<compile_context>
chip_gen: v7x
topology: tpu7x:2x2x1
jax: 0.10.0
libtpu: 0.0.40
codegen_flags: <defaults>
</compile_context>

<pallas_src>
import functools

import jax
import jax.numpy as jnp
from jax.experimental import pallas as pl
from jax.experimental.pallas import tpu as pltpu

KH = KW = 5  # nn.Conv2d(kernel_size=5)

# Flip to jnp.bfloat16 for ~2x MXU throughput / half the weight+cols DMA bytes
# (esp. v5e); accumulation and bias/ReLU epilogue stay f32. ~1e-2 rel. drift.
MATMUL_INPUT_DTYPE = jnp.float32


def _round_up(x, m):
    return (x + m - 1) // m * m


# --------------------- tiled matmul + bias (+ReLU) kernel -------------------

def _matmul_bias_act_kernel(x_ref, w_ref, b_ref, o_ref, acc_ref, *, apply_relu):
    k = pl.program_id(2)

    @pl.when(k == 0)
    def _():
        acc_ref[...] = jnp.zeros_like(acc_ref)

    acc_ref[...] += jnp.dot(x_ref[...], w_ref[...],
                            preferred_element_type=jnp.float32)

    @pl.when(k == pl.num_programs(2) - 1)
    def _():
        out = acc_ref[...] + b_ref[...]
        if apply_relu:
            out = jnp.maximum(out, 0.0)
        o_ref[...] = out.astype(o_ref.dtype)


def matmul_bias_act(x, w, b, *, n_out, apply_relu, tm, tk, tn):
    """act(x @ w + b)[:, :n_out].

    `w` (Kp, Np) and `b` (1, Np) are pre-padded to tile multiples at init time;
    only `x` is padded here (fuses with its producer under jit).
    """
    M, K = x.shape
    Kp, Np = w.shape
    assert Kp % tk == 0 and Np % tn == 0 and K <= Kp
    Mp = _round_up(M, tm)
    xp = jnp.pad(x, ((0, Mp - M), (0, Kp - K))).astype(w.dtype)

    out = pl.pallas_call(
        functools.partial(_matmul_bias_act_kernel, apply_relu=apply_relu),
        out_shape=jax.ShapeDtypeStruct((Mp, Np), jnp.float32),
        grid_spec=pltpu.PrefetchScalarGridSpec(
            num_scalar_prefetch=0,
            grid=(Mp // tm, Np // tn, Kp // tk),
            in_specs=[
                pl.BlockSpec((tm, tk), lambda i, j, k: (i, k)),
                pl.BlockSpec((tk, tn), lambda i, j, k: (k, j)),
                pl.BlockSpec((1, tn), lambda i, j, k: (0, j)),
            ],
            out_specs=pl.BlockSpec((tm, tn), lambda i, j, k: (i, j)),
            scratch_shapes=[pltpu.VMEM((tm, tn), jnp.float32)],
        ),
        compiler_params=pltpu.CompilerParams(
            dimension_semantics=("parallel", "parallel", "arbitrary")),
    )(xp, w, b)
    return out[:M, :n_out]


# ---------------- tiny matmul: whole problem in one block (FC2) --------------

def _fc_small_kernel(x_ref, w_ref, b_ref, o_ref, *, apply_relu):
    out = jnp.dot(x_ref[...], w_ref[...],
                  preferred_element_type=jnp.float32) + b_ref[...]
    if apply_relu:
        out = jnp.maximum(out, 0.0)
    o_ref[...] = out.astype(o_ref.dtype)


def matmul_bias_act_small(x, w, b, *, n_out, apply_relu):
    """Single gridless block: for matmuls smaller than one tile (M<=8)."""
    M, K = x.shape
    Kp, Np = w.shape
    Mp = _round_up(M, 8)
    xp = jnp.pad(x, ((0, Mp - M), (0, Kp - K))).astype(w.dtype)
    out = pl.pallas_call(
        functools.partial(_fc_small_kernel, apply_relu=apply_relu),
        out_shape=jax.ShapeDtypeStruct((Mp, Np), jnp.float32),
    )(xp, w, b)
    return out[:M, :n_out]


# ----------------------------- 2x2 max-pool ---------------------------------

def _max4_kernel(a_ref, b_ref, c_ref, d_ref, o_ref):
    o_ref[...] = jnp.maximum(jnp.maximum(a_ref[...], b_ref[...]),
                             jnp.maximum(c_ref[...], d_ref[...]))


def maxpool2x2(x_nhwc):
    """2x2 max-pool, stride 2, no padding (matches nn.MaxPool2d(2)).

    The four strided views are reshaped to lane-dense (B, Ho, Wo*C) 3D slabs
    and the max runs in a Pallas kernel gridded over batch (parallel), giving
    wide unmasked stores and bounded, pipelined VMEM use.
    """
    B, H, W, C = x_nhwc.shape
    Ho, Wo = H // 2, W // 2
    x = x_nhwc[:, : 2 * Ho, : 2 * Wo, :]
    a = x[:, 0::2, 0::2, :].reshape(B, Ho, Wo * C)
    b = x[:, 0::2, 1::2, :].reshape(B, Ho, Wo * C)
    c = x[:, 1::2, 0::2, :].reshape(B, Ho, Wo * C)
    d = x[:, 1::2, 1::2, :].reshape(B, Ho, Wo * C)

    spec = pl.BlockSpec((1, Ho, Wo * C), lambda i: (i, 0, 0))
    out = pl.pallas_call(
        _max4_kernel,
        out_shape=jax.ShapeDtypeStruct((B, Ho, Wo * C), x.dtype),
        grid=(B,),
        in_specs=[spec, spec, spec, spec],
        out_specs=spec,
        compiler_params=pltpu.CompilerParams(dimension_semantics=("parallel",)),
    )(a, b, c, d)
    return out.reshape(B, Ho, Wo, C)


# ------------------------------ conv via im2col ----------------------------

def _im2col(x_nhwc, kh, kw):
    B, H, W, C = x_nhwc.shape
    Ho, Wo = H - kh + 1, W - kw + 1
    cols = []
    for i in range(kh):
        for j in range(kw):
            cols.append(x_nhwc[:, i:i + Ho, j:j + Wo, :])
    patches = jnp.stack(cols, axis=3)                 # (B, Ho, Wo, kh*kw, C)
    return patches.reshape(B * Ho * Wo, kh * kw * C), (B, Ho, Wo)


def conv2d_bias_relu(x_nhwc, w2d, b2d, n_out, *, tm, tk):
    """'valid' conv, stride 1 (matches nn.Conv2d(in, out, kernel_size=5)).

    w2d is the pre-reshaped/padded (kh*kw*I -> Kp, O -> Np) weight.
    """
    # TODO(synk): fold the 25 im2col taps into the matmul K grid (per-tap HBM
    # window via index_map) to avoid materializing the cols matrix in HBM.
    cols, (B, Ho, Wo) = _im2col(x_nhwc, KH, KW)
    out = matmul_bias_act(cols, w2d, b2d, n_out=n_out, apply_relu=True,
                          tm=tm, tk=tk, tn=128)
    return out.reshape(B, Ho, Wo, n_out)


# ------------------------------- parameters --------------------------------

def init_params(key):
    """PyTorch-layout parameters (same shapes as the nn.Module)."""
    ks = jax.random.split(key, 8)
    return {
        "conv1_w": 0.05 * jax.random.normal(ks[0], (32, 3, 5, 5), jnp.float32),
        "conv1_b": 0.05 * jax.random.normal(ks[1], (32,), jnp.float32),
        "conv2_w": 0.05 * jax.random.normal(ks[2], (64, 32, 5, 5), jnp.float32),
        "conv2_b": 0.05 * jax.random.normal(ks[3], (64,), jnp.float32),
        "fc1_w": 0.01 * jax.random.normal(ks[4], (256, 64 * 21 * 21), jnp.float32),
        "fc1_b": 0.01 * jax.random.normal(ks[5], (256,), jnp.float32),
        "fc2_w": 0.05 * jax.random.normal(ks[6], (128, 256), jnp.float32),
        "fc2_b": 0.05 * jax.random.normal(ks[7], (128,), jnp.float32),
    }


def _prep_conv_w(w_oihw, kpad, npad, dtype):
    O, I, kh, kw = w_oihw.shape
    # Torch weight (O, I, kh, kw) -> (kh, kw, I, O) to match im2col patch layout.
    w2d = jnp.transpose(w_oihw, (2, 3, 1, 0)).reshape(kh * kw * I, O)
    return jnp.pad(w2d, ((0, kpad - kh * kw * I), (0, npad - O))).astype(dtype)


def _prep_bias(b, npad):
    return jnp.pad(b, ((0, npad - b.shape[0]),)).reshape(1, npad).astype(jnp.float32)


def prepare_params(params, dtype=MATMUL_INPUT_DTYPE):
    """One-time layout prep: (K, N) weights, padded to tile multiples."""
    fc1_w = jnp.transpose(params["fc1_w"])                       # (28224, 256)
    fc1_w = jnp.pad(fc1_w, ((0, 28672 - 28224), (0, 0))).astype(dtype)  # Kp=7*4096
    fc2_w = jnp.transpose(params["fc2_w"]).astype(dtype)          # (256, 128)
    return {
        "conv1_w2d": _prep_conv_w(params["conv1_w"], 128, 128, dtype),   # K=75 ->128
        "conv1_b2d": _prep_bias(params["conv1_b"], 128),
        "conv2_w2d": _prep_conv_w(params["conv2_w"], 896, 128, dtype),   # K=800->896
        "conv2_b2d": _prep_bias(params["conv2_b"], 128),
        "fc1_w2d": fc1_w,
        "fc1_b2d": _prep_bias(params["fc1_b"], 256),
        "fc2_w2d": fc2_w,
        "fc2_b2d": _prep_bias(params["fc2_b"], 128),
    }


# ------------------------------- model --------------------------------------

def forward_once(p, x_nchw):
    x = jnp.transpose(x_nchw, (0, 2, 3, 1))                             # NCHW -> NHWC
    x = conv2d_bias_relu(x, p["conv1_w2d"], p["conv1_b2d"], 32,
                         tm=1024, tk=128)                               # (B,92,92,32)
    x = maxpool2x2(x)                                                   # (B,46,46,32)
    x = conv2d_bias_relu(x, p["conv2_w2d"], p["conv2_b2d"], 64,
                         tm=512, tk=896)                                # (B,42,42,64)
    x = maxpool2x2(x)                                                   # (B,21,21,64)
    # PyTorch's x.view(B, -1) flattens NCHW (channel-major): transpose back.
    x = jnp.transpose(x, (0, 3, 1, 2)).reshape(x.shape[0], -1)          # (B, 28224)
    x = matmul_bias_act(x, p["fc1_w2d"], p["fc1_b2d"], n_out=256,
                        apply_relu=True, tm=8, tk=4096, tn=128)         # (B, 256)
    x = matmul_bias_act_small(x, p["fc2_w2d"], p["fc2_b2d"], n_out=128,
                              apply_relu=False)                         # (B, 128)
    return x


@jax.jit
def siamese_forward(prepared_params, input1_nchw, input2_nchw):
    # Batch both branches through a single forward pass (halves launches,
    # doubles M for the FC matmuls), then split.
    B = input1_nchw.shape[0]
    x = jnp.concatenate([input1_nchw, input2_nchw], axis=0)
    out = forward_once(prepared_params, x)
    return out[:B], out[B:]


if __name__ == "__main__":
    key = jax.random.PRNGKey(0)
    kp, k1, k2 = jax.random.split(key, 3)
    params = init_params(kp)
    prepared = prepare_params(params)          # one-time weight layout prep

    B = 2
    # 96x96 spatial size is required by the fc input dim 64*21*21.
    x1 = jax.random.normal(k1, (B, 3, 96, 96), jnp.float32)
    x2 = jax.random.normal(k2, (B, 3, 96, 96), jnp.float32)

    out1, out2 = siamese_forward(prepared, x1, x2)
    jax.block_until_ready((out1, out2))
    assert out1.shape == (B, 128) and out2.shape == (B, 128)
    assert out1.dtype == jnp.float32 and out2.dtype == jnp.float32
    print("KERNEL_OK")
</pallas_src>

<mosaic_0001>
module attributes {stable_mosaic.version = 11 : i64} {
  func.func @_matmul_bias_act_kernel(%arg0: i32, %arg1: i32, %arg2: i32, %arg3: memref<1024x128xf32, #tpu.memory_space<vmem>>, %arg4: memref<128x128xf32, #tpu.memory_space<vmem>>, %arg5: memref<1x128xf32, #tpu.memory_space<vmem>>, %arg6: memref<1024x128xf32, #tpu.memory_space<vmem>>, %arg7: memref<1024x128xf32, #tpu.memory_space<vmem>>) attributes {dimension_semantics = [#tpu.dimension_semantics<parallel>, #tpu.dimension_semantics<parallel>, #tpu.dimension_semantics<arbitrary>], iteration_bounds = array<i64: 34, 1, 1>, scalar_prefetch = 0 : i64, scratch_operands = 1 : i64, tpu.core_type = #tpu.core_type<tc>, window_params = [{transform_indices = @transform_0, window_bounds = array<i64: 1024, 128>}, {transform_indices = @transform_1, window_bounds = array<i64: 128, 128>}, {transform_indices = @transform_2, window_bounds = array<i64: 1, 128>}, {transform_indices = @transform_3, window_bounds = array<i64: 1024, 128>}]} {
    %c0_i32 = arith.constant 0 : i32
    %0 = arith.cmpi eq, %arg2, %c0_i32 : i32
    %1 = arith.extui %0 : i1 to i32
    %c0_i32_0 = arith.constant 0 : i32
    %2 = arith.cmpi ne, %1, %c0_i32_0 : i32
    scf.if %2 {
      %cst_10 = arith.constant 0.000000e+00 : f32
      %12 = vector.broadcast %cst_10 : f32 to vector<1024x128xf32>
      %c0_11 = arith.constant 0 : index
      %c0_12 = arith.constant 0 : index
      %13 = vector.load %arg7[%c0_11, %c0_12] : memref<1024x128xf32, #tpu.memory_space<vmem>>, vector<1024x128xf32>
      tpu.vector_store %arg7[%c0_11, %c0_12], %12 {strides = array<i32>} : memref<1024x128xf32, #tpu.memory_space<vmem>>, vector<1024x128xf32>,
    } else {
    }
    %c0 = arith.constant 0 : index
    %c0_1 = arith.constant 0 : index
    %3 = vector.load %arg7[%c0, %c0_1] : memref<1024x128xf32, #tpu.memory_space<vmem>>, vector<1024x128xf32>
    %c0_2 = arith.constant 0 : index
    %c0_3 = arith.constant 0 : index
    %4 = vector.load %arg3[%c0_2, %c0_3] : memref<1024x128xf32, #tpu.memory_space<vmem>>, vector<1024x128xf32>
    %c0_4 = arith.constant 0 : index
    %c0_5 = arith.constant 0 : index
    %5 = vector.load %arg4[%c0_4, %c0_5] : memref<128x128xf32, #tpu.memory_space<vmem>>, vector<128x128xf32>
    %cst = arith.constant dense<0.000000e+00> : vector<1024x128xf32>
    %6 = tpu.matmul %4, %5, %cst {dimension_numbers = #tpu.dot_dimension_numbers<[1], [0], [0], [1], [0, 0, 1, 1], [], []>} : vector<1024x128xf32>, vector<128x128xf32>, vector<1024x128xf32> -> vector<1024x128xf32>
    %7 = arith.addf %3, %6 : vector<1024x128xf32>
    %c0_6 = arith.constant 0 : index
    %c0_7 = arith.constant 0 : index
    %8 = vector.load %arg7[%c0_6, %c0_7] : memref<1024x128xf32, #tpu.memory_space<vmem>>, vector<1024x128xf32>
    tpu.vector_store %arg7[%c0_6, %c0_7], %7 {strides = array<i32>} : memref<1024x128xf32, #tpu.memory_space<vmem>>, vector<1024x128xf32>,
    %c0_i32_8 = arith.constant 0 : i32
    %9 = arith.cmpi eq, %arg2, %c0_i32_8 : i32
    %10 = arith.extui %9 : i1 to i32
    %c0_i32_9 = arith.constant 0 : i32
    %11 = arith.cmpi ne, %10, %c0_i32_9 : i32
    scf.if %11 {
      %c0_10 = arith.constant 0 : index
      %c0_11 = arith.constant 0 : index
      %12 = vector.load %arg7[%c0_10, %c0_11] : memref<1024x128xf32, #tpu.memory_space<vmem>>, vector<1024x128xf32>
      %c0_12 = arith.constant 0 : index
      %c0_13 = arith.constant 0 : index
      %13 = vector.load %arg5[%c0_12, %c0_13] : memref<1x128xf32, #tpu.memory_space<vmem>>, vector<1x128xf32>
      %14 = vector.broadcast %13 : vector<1x128xf32> to vector<1024x128xf32>
      %15 = arith.addf %12, %14 : vector<1024x128xf32>
      %cst_14 = arith.constant 0.000000e+00 : f32
      %16 = vector.broadcast %cst_14 : f32 to vector<1024x128xf32>
      %17 = arith.maximumf %15, %16 : vector<1024x128xf32>
      %c0_15 = arith.constant 0 : index
      %c0_16 = arith.constant 0 : index
      %18 = vector.load %arg6[%c0_15, %c0_16] : memref<1024x128xf32, #tpu.memory_space<vmem>>, vector<1024x128xf32>
      tpu.vector_store %arg6[%c0_15, %c0_16], %17 {strides = array<i32>} : memref<1024x128xf32, #tpu.memory_space<vmem>>, vector<1024x128xf32>,
    } else {
    }
    return
  }
  func.func @transform_0(%arg0: i32, %arg1: i32, %arg2: i32) -> (i32, i32) {
    %c0_i32 = arith.constant 0 : i32
    return %arg0, %arg2 : i32, i32
  }
  func.func @transform_1(%arg0: i32, %arg1: i32, %arg2: i32) -> (i32, i32) {
    %c0_i32 = arith.constant 0 : i32
    return %arg2, %arg1 : i32, i32
  }
  func.func @transform_2(%arg0: i32, %arg1: i32, %arg2: i32) -> (i32, i32) {
    %c0_i32 = arith.constant 0 : i32
    %c0_i32_0 = arith.constant 0 : i32
    return %c0_i32, %arg1 : i32, i32
  }
  func.func @transform_3(%arg0: i32, %arg1: i32, %arg2: i32) -> (i32, i32) {
    %c0_i32 = arith.constant 0 : i32
    return %arg0, %arg1 : i32, i32
  }
}

module attributes {stable_mosaic.version = 11 : i64} {
  func.func @_max4_kernel(%arg0: i32, %arg1: memref<1x46x1472xf32, #tpu.memory_space<vmem>>, %arg2: memref<1x46x1472xf32, #tpu.memory_space<vmem>>, %arg3: memref<1x46x1472xf32, #tpu.memory_space<vmem>>, %arg4: memref<1x46x1472xf32, #tpu.memory_space<vmem>>, %arg5: memref<1x46x1472xf32, #tpu.memory_space<vmem>>) attributes {dimension_semantics = [#tpu.dimension_semantics<parallel>], iteration_bounds = array<i64: 4>, scalar_prefetch = 0 : i64, scratch_operands = 0 : i64, tpu.core_type = #tpu.core_type<tc>, window_params = [{transform_indices = @transform_0, window_bounds = array<i64: 1, 46, 1472>}, {transform_indices = @transform_1, window_bounds = array<i64: 1, 46, 1472>}, {transform_indices = @transform_2, window_bounds = array<i64: 1, 46, 1472>}, {transform_indices = @transform_3, window_bounds = array<i64: 1, 46, 1472>}, {transform_indices = @transform_4, window_bounds = array<i64: 1, 46, 1472>}]} {
    %c0 = arith.constant 0 : index
    %c0_0 = arith.constant 0 : index
    %c0_1 = arith.constant 0 : index
    %0 = vector.load %arg1[%c0, %c0_0, %c0_1] : memref<1x46x1472xf32, #tpu.memory_space<vmem>>, vector<1x46x1472xf32>
    %c0_2 = arith.constant 0 : index
    %c0_3 = arith.constant 0 : index
    %c0_4 = arith.constant 0 : index
    %1 = vector.load %arg2[%c0_2, %c0_3, %c0_4] : memref<1x46x1472xf32, #tpu.memory_space<vmem>>, vector<1x46x1472xf32>
    %2 = arith.maximumf %0, %1 : vector<1x46x1472xf32>
    %c0_5 = arith.constant 0 : index
    %c0_6 = arith.constant 0 : index
    %c0_7 = arith.constant 0 : index
    %3 = vector.load %arg3[%c0_5, %c0_6, %c0_7] : memref<1x46x1472xf32, #tpu.memory_space<vmem>>, vector<1x46x1472xf32>
    %c0_8 = arith.constant 0 : index
    %c0_9 = arith.constant 0 : index
    %c0_10 = arith.constant 0 : index
    %4 = vector.load %arg4[%c0_8, %c0_9, %c0_10] : memref<1x46x1472xf32, #tpu.memory_space<vmem>>, vector<1x46x1472xf32>
    %5 = arith.maximumf %3, %4 : vector<1x46x1472xf32>
    %6 = arith.maximumf %2, %5 : vector<1x46x1472xf32>
    %c0_11 = arith.constant 0 : index
    %c0_12 = arith.constant 0 : index
    %c0_13 = arith.constant 0 : index
    %7 = vector.load %arg5[%c0_11, %c0_12, %c0_13] : memref<1x46x1472xf32, #tpu.memory_space<vmem>>, vector<1x46x1472xf32>
    tpu.vector_store %arg5[%c0_11, %c0_12, %c0_13], %6 {strides = array<i32>} : memref<1x46x1472xf32, #tpu.memory_space<vmem>>, vector<1x46x1472xf32>,
    return
  }
  func.func @transform_0(%arg0: i32) -> (i32, i32, i32) {
    %c0_i32 = arith.constant 0 : i32
    %c0_i32_0 = arith.constant 0 : i32
    %c0_i32_1 = arith.constant 0 : i32
    return %arg0, %c0_i32, %c0_i32_0 : i32, i32, i32
  }
  func.func @transform_1(%arg0: i32) -> (i32, i32, i32) {
    %c0_i32 = arith.constant 0 : i32
    %c0_i32_0 = arith.constant 0 : i32
    %c0_i32_1 = arith.constant 0 : i32
    return %arg0, %c0_i32, %c0_i32_0 : i32, i32, i32
  }
  func.func @transform_2(%arg0: i32) -> (i32, i32, i32) {
    %c0_i32 = arith.constant 0 : i32
    %c0_i32_0 = arith.constant 0 : i32
    %c0_i32_1 = arith.constant 0 : i32
    return %arg0, %c0_i32, %c0_i32_0 : i32, i32, i32
  }
  func.func @transform_3(%arg0: i32) -> (i32, i32, i32) {
    %c0_i32 = arith.constant 0 : i32
    %c0_i32_0 = arith.constant 0 : i32
    %c0_i32_1 = arith.constant 0 : i32
    return %arg0, %c0_i32, %c0_i32_0 : i32, i32, i32
  }
  func.func @transform_4(%arg0: i32) -> (i32, i32, i32) {
    %c0_i32 = arith.constant 0 : i32
    %c0_i32_0 = arith.constant 0 : i32
    %c0_i32_1 = arith.constant 0 : i32
    return %arg0, %c0_i32, %c0_i32_0 : i32, i32, i32
  }
}

module attributes {stable_mosaic.version = 11 : i64} {
  func.func @_matmul_bias_act_kernel(%arg0: i32, %arg1: i32, %arg2: i32, %arg3: memref<512x896xf32, #tpu.memory_space<vmem>>, %arg4: memref<896x128xf32, #tpu.memory_space<vmem>>, %arg5: memref<1x128xf32, #tpu.memory_space<vmem>>, %arg6: memref<512x128xf32, #tpu.memory_space<vmem>>, %arg7: memref<512x128xf32, #tpu.memory_space<vmem>>) attributes {dimension_semantics = [#tpu.dimension_semantics<parallel>, #tpu.dimension_semantics<parallel>, #tpu.dimension_semantics<arbitrary>], iteration_bounds = array<i64: 14, 1, 1>, scalar_prefetch = 0 : i64, scratch_operands = 1 : i64, tpu.core_type = #tpu.core_type<tc>, window_params = [{transform_indices = @transform_0, window_bounds = array<i64: 512, 896>}, {transform_indices = @transform_1, window_bounds = array<i64: 896, 128>}, {transform_indices = @transform_2, window_bounds = array<i64: 1, 128>}, {transform_indices = @transform_3, window_bounds = array<i64: 512, 128>}]} {
    %c0_i32 = arith.constant 0 : i32
    %0 = arith.cmpi eq, %arg2, %c0_i32 : i32
    %1 = arith.extui %0 : i1 to i32
    %c0_i32_0 = arith.constant 0 : i32
    %2 = arith.cmpi ne, %1, %c0_i32_0 : i32
    scf.if %2 {
      %cst_10 = arith.constant 0.000000e+00 : f32
      %12 = vector.broadcast %cst_10 : f32 to vector<512x128xf32>
      %c0_11 = arith.constant 0 : index
      %c0_12 = arith.constant 0 : index
      %13 = vector.load %arg7[%c0_11, %c0_12] : memref<512x128xf32, #tpu.memory_space<vmem>>, vector<512x128xf32>
      tpu.vector_store %arg7[%c0_11, %c0_12], %12 {strides = array<i32>} : memref<512x128xf32, #tpu.memory_space<vmem>>, vector<512x128xf32>,
    } else {
    }
    %c0 = arith.constant 0 : index
    %c0_1 = arith.constant 0 : index
    %3 = vector.load %arg7[%c0, %c0_1] : memref<512x128xf32, #tpu.memory_space<vmem>>, vector<512x128xf32>
    %c0_2 = arith.constant 0 : index
    %c0_3 = arith.constant 0 : index
    %4 = vector.load %arg3[%c0_2, %c0_3] : memref<512x896xf32, #tpu.memory_space<vmem>>, vector<512x896xf32>
    %c0_4 = arith.constant 0 : index
    %c0_5 = arith.constant 0 : index
    %5 = vector.load %arg4[%c0_4, %c0_5] : memref<896x128xf32, #tpu.memory_space<vmem>>, vector<896x128xf32>
    %cst = arith.constant dense<0.000000e+00> : vector<512x128xf32>
    %6 = tpu.matmul %4, %5, %cst {dimension_numbers = #tpu.dot_dimension_numbers<[1], [0], [0], [1], [0, 0, 1, 1], [], []>} : vector<512x896xf32>, vector<896x128xf32>, vector<512x128xf32> -> vector<512x128xf32>
    %7 = arith.addf %3, %6 : vector<512x128xf32>
    %c0_6 = arith.constant 0 : index
    %c0_7 = arith.constant 0 : index
    %8 = vector.load %arg7[%c0_6, %c0_7] : memref<512x128xf32, #tpu.memory_space<vmem>>, vector<512x128xf32>
    tpu.vector_store %arg7[%c0_6, %c0_7], %7 {strides = array<i32>} : memref<512x128xf32, #tpu.memory_space<vmem>>, vector<512x128xf32>,
    %c0_i32_8 = arith.constant 0 : i32
    %9 = arith.cmpi eq, %arg2, %c0_i32_8 : i32
    %10 = arith.extui %9 : i1 to i32
    %c0_i32_9 = arith.constant 0 : i32
    %11 = arith.cmpi ne, %10, %c0_i32_9 : i32
    scf.if %11 {
      %c0_10 = arith.constant 0 : index
      %c0_11 = arith.constant 0 : index
      %12 = vector.load %arg7[%c0_10, %c0_11] : memref<512x128xf32, #tpu.memory_space<vmem>>, vector<512x128xf32>
      %c0_12 = arith.constant 0 : index
      %c0_13 = arith.constant 0 : index
      %13 = vector.load %arg5[%c0_12, %c0_13] : memref<1x128xf32, #tpu.memory_space<vmem>>, vector<1x128xf32>
      %14 = vector.broadcast %13 : vector<1x128xf32> to vector<512x128xf32>
      %15 = arith.addf %12, %14 : vector<512x128xf32>
      %cst_14 = arith.constant 0.000000e+00 : f32
      %16 = vector.broadcast %cst_14 : f32 to vector<512x128xf32>
      %17 = arith.maximumf %15, %16 : vector<512x128xf32>
      %c0_15 = arith.constant 0 : index
      %c0_16 = arith.constant 0 : index
      %18 = vector.load %arg6[%c0_15, %c0_16] : memref<512x128xf32, #tpu.memory_space<vmem>>, vector<512x128xf32>
      tpu.vector_store %arg6[%c0_15, %c0_16], %17 {strides = array<i32>} : memref<512x128xf32, #tpu.memory_space<vmem>>, vector<512x128xf32>,
    } else {
    }
    return
  }
  func.func @transform_0(%arg0: i32, %arg1: i32, %arg2: i32) -> (i32, i32) {
    %c0_i32 = arith.constant 0 : i32
    return %arg0, %arg2 : i32, i32
  }
  func.func @transform_1(%arg0: i32, %arg1: i32, %arg2: i32) -> (i32, i32) {
    %c0_i32 = arith.constant 0 : i32
    return %arg2, %arg1 : i32, i32
  }
  func.func @transform_2(%arg0: i32, %arg1: i32, %arg2: i32) -> (i32, i32) {
    %c0_i32 = arith.constant 0 : i32
    %c0_i32_0 = arith.constant 0 : i32
    return %c0_i32, %arg1 : i32, i32
  }
  func.func @transform_3(%arg0: i32, %arg1: i32, %arg2: i32) -> (i32, i32) {
    %c0_i32 = arith.constant 0 : i32
    return %arg0, %arg1 : i32, i32
  }
}

module attributes {stable_mosaic.version = 11 : i64} {
  func.func @_max4_kernel(%arg0: i32, %arg1: memref<1x21x1344xf32, #tpu.memory_space<vmem>>, %arg2: memref<1x21x1344xf32, #tpu.memory_space<vmem>>, %arg3: memref<1x21x1344xf32, #tpu.memory_space<vmem>>, %arg4: memref<1x21x1344xf32, #tpu.memory_space<vmem>>, %arg5: memref<1x21x1344xf32, #tpu.memory_space<vmem>>) attributes {dimension_semantics = [#tpu.dimension_semantics<parallel>], iteration_bounds = array<i64: 4>, scalar_prefetch = 0 : i64, scratch_operands = 0 : i64, tpu.core_type = #tpu.core_type<tc>, window_params = [{transform_indices = @transform_0, window_bounds = array<i64: 1, 21, 1344>}, {transform_indices = @transform_1, window_bounds = array<i64: 1, 21, 1344>}, {transform_indices = @transform_2, window_bounds = array<i64: 1, 21, 1344>}, {transform_indices = @transform_3, window_bounds = array<i64: 1, 21, 1344>}, {transform_indices = @transform_4, window_bounds = array<i64: 1, 21, 1344>}]} {
    %c0 = arith.constant 0 : index
    %c0_0 = arith.constant 0 : index
    %c0_1 = arith.constant 0 : index
    %0 = vector.load %arg1[%c0, %c0_0, %c0_1] : memref<1x21x1344xf32, #tpu.memory_space<vmem>>, vector<1x21x1344xf32>
    %c0_2 = arith.constant 0 : index
    %c0_3 = arith.constant 0 : index
    %c0_4 = arith.constant 0 : index
    %1 = vector.load %arg2[%c0_2, %c0_3, %c0_4] : memref<1x21x1344xf32, #tpu.memory_space<vmem>>, vector<1x21x1344xf32>
    %2 = arith.maximumf %0, %1 : vector<1x21x1344xf32>
    %c0_5 = arith.constant 0 : index
    %c0_6 = arith.constant 0 : index
    %c0_7 = arith.constant 0 : index
    %3 = vector.load %arg3[%c0_5, %c0_6, %c0_7] : memref<1x21x1344xf32, #tpu.memory_space<vmem>>, vector<1x21x1344xf32>
    %c0_8 = arith.constant 0 : index
    %c0_9 = arith.constant 0 : index
    %c0_10 = arith.constant 0 : index
    %4 = vector.load %arg4[%c0_8, %c0_9, %c0_10] : memref<1x21x1344xf32, #tpu.memory_space<vmem>>, vector<1x21x1344xf32>
    %5 = arith.maximumf %3, %4 : vector<1x21x1344xf32>
    %6 = arith.maximumf %2, %5 : vector<1x21x1344xf32>
    %c0_11 = arith.constant 0 : index
    %c0_12 = arith.constant 0 : index
    %c0_13 = arith.constant 0 : index
    %7 = vector.load %arg5[%c0_11, %c0_12, %c0_13] : memref<1x21x1344xf32, #tpu.memory_space<vmem>>, vector<1x21x1344xf32>
    tpu.vector_store %arg5[%c0_11, %c0_12, %c0_13], %6 {strides = array<i32>} : memref<1x21x1344xf32, #tpu.memory_space<vmem>>, vector<1x21x1344xf32>,
    return
  }
  func.func @transform_0(%arg0: i32) -> (i32, i32, i32) {
    %c0_i32 = arith.constant 0 : i32
    %c0_i32_0 = arith.constant 0 : i32
    %c0_i32_1 = arith.constant 0 : i32
    return %arg0, %c0_i32, %c0_i32_0 : i32, i32, i32
  }
  func.func @transform_1(%arg0: i32) -> (i32, i32, i32) {
    %c0_i32 = arith.constant 0 : i32
    %c0_i32_0 = arith.constant 0 : i32
    %c0_i32_1 = arith.constant 0 : i32
    return %arg0, %c0_i32, %c0_i32_0 : i32, i32, i32
  }
  func.func @transform_2(%arg0: i32) -> (i32, i32, i32) {
    %c0_i32 = arith.constant 0 : i32
    %c0_i32_0 = arith.constant 0 : i32
    %c0_i32_1 = arith.constant 0 : i32
    return %arg0, %c0_i32, %c0_i32_0 : i32, i32, i32
  }
  func.func @transform_3(%arg0: i32) -> (i32, i32, i32) {
    %c0_i32 = arith.constant 0 : i32
    %c0_i32_0 = arith.constant 0 : i32
    %c0_i32_1 = arith.constant 0 : i32
    return %arg0, %c0_i32, %c0_i32_0 : i32, i32, i32
  }
  func.func @transform_4(%arg0: i32) -> (i32, i32, i32) {
    %c0_i32 = arith.constant 0 : i32
    %c0_i32_0 = arith.constant 0 : i32
    %c0_i32_1 = arith.constant 0 : i32
    return %arg0, %c0_i32, %c0_i32_0 : i32, i32, i32
  }
}

module attributes {stable_mosaic.version = 11 : i64} {
  func.func @_matmul_bias_act_kernel(%arg0: i32, %arg1: i32, %arg2: i32, %arg3: memref<8x4096xf32, #tpu.memory_space<vmem>>, %arg4: memref<4096x128xf32, #tpu.memory_space<vmem>>, %arg5: memref<1x128xf32, #tpu.memory_space<vmem>>, %arg6: memref<8x128xf32, #tpu.memory_space<vmem>>, %arg7: memref<8x128xf32, #tpu.memory_space<vmem>>) attributes {dimension_semantics = [#tpu.dimension_semantics<parallel>, #tpu.dimension_semantics<parallel>, #tpu.dimension_semantics<arbitrary>], iteration_bounds = array<i64: 1, 2, 7>, scalar_prefetch = 0 : i64, scratch_operands = 1 : i64, tpu.core_type = #tpu.core_type<tc>, window_params = [{transform_indices = @transform_0, window_bounds = array<i64: 8, 4096>}, {transform_indices = @transform_1, window_bounds = array<i64: 4096, 128>}, {transform_indices = @transform_2, window_bounds = array<i64: 1, 128>}, {transform_indices = @transform_3, window_bounds = array<i64: 8, 128>}]} {
    %c0_i32 = arith.constant 0 : i32
    %0 = arith.cmpi eq, %arg2, %c0_i32 : i32
    %1 = arith.extui %0 : i1 to i32
    %c0_i32_0 = arith.constant 0 : i32
    %2 = arith.cmpi ne, %1, %c0_i32_0 : i32
    scf.if %2 {
      %cst_9 = arith.constant 0.000000e+00 : f32
      %12 = vector.broadcast %cst_9 : f32 to vector<8x128xf32>
      %c0_10 = arith.constant 0 : index
      %c0_11 = arith.constant 0 : index
      %13 = vector.load %arg7[%c0_10, %c0_11] : memref<8x128xf32, #tpu.memory_space<vmem>>, vector<8x128xf32>
      tpu.vector_store %arg7[%c0_10, %c0_11], %12 {strides = array<i32>} : memref<8x128xf32, #tpu.memory_space<vmem>>, vector<8x128xf32>,
    } else {
    }
    %c0 = arith.constant 0 : index
    %c0_1 = arith.constant 0 : index
    %3 = vector.load %arg7[%c0, %c0_1] : memref<8x128xf32, #tpu.memory_space<vmem>>, vector<8x128xf32>
    %c0_2 = arith.constant 0 : index
    %c0_3 = arith.constant 0 : index
    %4 = vector.load %arg3[%c0_2, %c0_3] : memref<8x4096xf32, #tpu.memory_space<vmem>>, vector<8x4096xf32>
    %c0_4 = arith.constant 0 : index
    %c0_5 = arith.constant 0 : index
    %5 = vector.load %arg4[%c0_4, %c0_5] : memref<4096x128xf32, #tpu.memory_space<vmem>>, vector<4096x128xf32>
    %cst = arith.constant dense<0.000000e+00> : vector<8x128xf32>
    %6 = tpu.matmul %4, %5, %cst {dimension_numbers = #tpu.dot_dimension_numbers<[1], [0], [0], [1], [0, 0, 1, 1], [], []>} : vector<8x4096xf32>, vector<4096x128xf32>, vector<8x128xf32> -> vector<8x128xf32>
    %7 = arith.addf %3, %6 : vector<8x128xf32>
    %c0_6 = arith.constant 0 : index
    %c0_7 = arith.constant 0 : index
    %8 = vector.load %arg7[%c0_6, %c0_7] : memref<8x128xf32, #tpu.memory_space<vmem>>, vector<8x128xf32>
    tpu.vector_store %arg7[%c0_6, %c0_7], %7 {strides = array<i32>} : memref<8x128xf32, #tpu.memory_space<vmem>>, vector<8x128xf32>,
    %c6_i32 = arith.constant 6 : i32
    %9 = arith.cmpi eq, %arg2, %c6_i32 : i32
    %10 = arith.extui %9 : i1 to i32
    %c0_i32_8 = arith.constant 0 : i32
    %11 = arith.cmpi ne, %10, %c0_i32_8 : i32
    scf.if %11 {
      %c0_9 = arith.constant 0 : index
      %c0_10 = arith.constant 0 : index
      %12 = vector.load %arg7[%c0_9, %c0_10] : memref<8x128xf32, #tpu.memory_space<vmem>>, vector<8x128xf32>
      %c0_11 = arith.constant 0 : index
      %c0_12 = arith.constant 0 : index
      %13 = vector.load %arg5[%c0_11, %c0_12] : memref<1x128xf32, #tpu.memory_space<vmem>>, vector<1x128xf32>
      %14 = vector.broadcast %13 : vector<1x128xf32> to vector<8x128xf32>
      %15 = arith.addf %12, %14 : vector<8x128xf32>
      %cst_13 = arith.constant 0.000000e+00 : f32
      %16 = vector.broadcast %cst_13 : f32 to vector<8x128xf32>
      %17 = arith.maximumf %15, %16 : vector<8x128xf32>
      %c0_14 = arith.constant 0 : index
      %c0_15 = arith.constant 0 : index
      %18 = vector.load %arg6[%c0_14, %c0_15] : memref<8x128xf32, #tpu.memory_space<vmem>>, vector<8x128xf32>
      tpu.vector_store %arg6[%c0_14, %c0_15], %17 {strides = array<i32>} : memref<8x128xf32, #tpu.memory_space<vmem>>, vector<8x128xf32>,
    } else {
    }
    return
  }
  func.func @transform_0(%arg0: i32, %arg1: i32, %arg2: i32) -> (i32, i32) {
    %c0_i32 = arith.constant 0 : i32
    return %arg0, %arg2 : i32, i32
  }
  func.func @transform_1(%arg0: i32, %arg1: i32, %arg2: i32) -> (i32, i32) {
    %c0_i32 = arith.constant 0 : i32
    return %arg2, %arg1 : i32, i32
  }
  func.func @transform_2(%arg0: i32, %arg1: i32, %arg2: i32) -> (i32, i32) {
    %c0_i32 = arith.constant 0 : i32
    %c0_i32_0 = arith.constant 0 : i32
    return %c0_i32, %arg1 : i32, i32
  }
  func.func @transform_3(%arg0: i32, %arg1: i32, %arg2: i32) -> (i32, i32) {
    %c0_i32 = arith.constant 0 : i32
    return %arg0, %arg1 : i32, i32
  }
}

module attributes {stable_mosaic.version = 11 : i64} {
  func.func @_fc_small_kernel(%arg0: memref<8x256xf32, #tpu.memory_space<vmem>>, %arg1: memref<256x128xf32, #tpu.memory_space<vmem>>, %arg2: memref<1x128xf32, #tpu.memory_space<vmem>>, %arg3: memref<8x128xf32, #tpu.memory_space<vmem>>) attributes {dimension_semantics = [], scalar_prefetch = 0 : i64, scratch_operands = 0 : i64, tpu.core_type = #tpu.core_type<tc>} {
    %c0 = arith.constant 0 : index
    %c0_0 = arith.constant 0 : index
    %0 = vector.load %arg0[%c0, %c0_0] : memref<8x256xf32, #tpu.memory_space<vmem>>, vector<8x256xf32>
    %c0_1 = arith.constant 0 : index
    %c0_2 = arith.constant 0 : index
    %1 = vector.load %arg1[%c0_1, %c0_2] : memref<256x128xf32, #tpu.memory_space<vmem>>, vector<256x128xf32>
    %cst = arith.constant dense<0.000000e+00> : vector<8x128xf32>
    %2 = tpu.matmul %0, %1, %cst {dimension_numbers = #tpu.dot_dimension_numbers<[1], [0], [0], [1], [0, 0, 1, 1], [], []>} : vector<8x256xf32>, vector<256x128xf32>, vector<8x128xf32> -> vector<8x128xf32>
    %c0_3 = arith.constant 0 : index
    %c0_4 = arith.constant 0 : index
    %3 = vector.load %arg2[%c0_3, %c0_4] : memref<1x128xf32, #tpu.memory_space<vmem>>, vector<1x128xf32>
    %4 = vector.broadcast %3 : vector<1x128xf32> to vector<8x128xf32>
    %5 = arith.addf %2, %4 : vector<8x128xf32>
    %c0_5 = arith.constant 0 : index
    %c0_6 = arith.constant 0 : index
    %6 = vector.load %arg3[%c0_5, %c0_6] : memref<8x128xf32, #tpu.memory_space<vmem>>, vector<8x128xf32>
    tpu.vector_store %arg3[%c0_5, %c0_6], %5 {strides = array<i32>} : memref<8x128xf32, #tpu.memory_space<vmem>>, vector<8x128xf32>,
    return
  }
}

</mosaic_0001>

<bundles_post_ra>
// kernel: siamese_forward.6
= control target key start
LH: loop header
LB: loop body
LE: loop exit
PB: predicated region body
PF: predicated region fallthrough
CT: control target
= control target key end

     0   :  { %8 = vsyncpa [#allocation4], 0  ;;  %s3414_s0 = inlined_call_operand.vmem [shape: f32[34816,128], index: 0, kind: input, shape index: {}]   ;;  %s3415_s1 = inlined_call_operand.vmem [shape: f32[128,128], index: 1, kind: input, shape index: {}]   ;;  %s3416_s2 = inlined_call_operand.vmem [shape: f32[1,128], index: 2, kind: input, shape index: {}]   ;;  %s3417_s3 = inlined_call_operand.hbm [shape: f32[34816,128], index: 3, kind: output, shape index: {}]  }
   0x1   :  { %10 = vsyncpa [#allocation4 + $0x1], 0  ;;  %s2854_s12 = smov 0   ;;  %s2856_s13 = smov 0  }
   0x2   :  { %s2858_s14 = smov 0   ;;  %s2860_s15 = smov 0  }
   0x3   :  { %s2862_s16 = smov 0   ;;  %s2864_s17 = smov 0  }
   0x4 LB: > { %s2261_s18 = sadd.s32 4294967295, %s2829_s17   ;;  %s2262_s19 = sadd.s32 4294967294, %s2829_s17   ;;  %s2829_s17 = sphi %s2864_s17, %s16_s17   ;;  %s2825_s16 = sphi %s2862_s16, %s3424_s16   ;;  %s2821_s15 = sphi %s2860_s15, %s3423_s15   ;;  %s2817_s14 = sphi %s2858_s14, %s3422_s14   ;;  %s2813_s13 = sphi %s2856_s13, %s3421_s13   ;;  %s2809_s12 = sphi %s2854_s12, %s3420_s12  }
   0x5   : > { %s35_s20 = sadd.s32 1, %s2825_s16  ;;  %s126_s21 = sadd.s32 1, %s2817_s14 }
   0x6   : > { %p37_p0 = scmp.ge.s32.totalorder %s35_s20, 34  ;;  %p136_p1 = scmp.ne.s32.totalorder %s2817_s14, %s2813_s13 }
   0x7   : > { %p137_p2 = scmp.eq.s32.totalorder %s2261_s18, 33  ;;  %p142_p3 = scmp.ne.s32.totalorder %s2813_s13, %s2809_s12 }
   0x8   : > { %s3426_s20 = smov (%p37_p0, %s35_s20), 0  ;;  %p143_p5 = scmp.eq.s32.totalorder %s2262_s19, 33 }
   0x9   : > { %p2894_p4 = por %p137_p2, %p136_p1  ;;  %s121_s23 = ssub.s32 %s2825_s16, %s3426_s20 }
   0xa   : > { %p2267_p6 = scmp.ge.s32.totalorder %s2829_s17, 1  ;;  %p124_p7 = scmp.eq.s32.totalorder %s121_s23, 0 }
   0xb   : > { %p2901_p8 = por %p143_p5, %p142_p3  ;;  %p191_p9 = scmp.lt.s32.totalorder %s2829_s17, 35 }
   0xc   : > { %s2907_s25 = scalar_select %p124_p7, %s2817_s14, %s126_s21  }
   0xd   : > { %p192_p10 = pnand %p2267_p6, %p191_p9 }
   0xe   : > { %v639_v0 = vld [vmem:[%s3415_s1] sm:$0xff] (!%p192_p10)  ;;  %v640_v1 = vld [vmem:[%s3415_s1 + $0x8] sm:$0xff] (!%p192_p10)  ;;  %v641_v2 = vld [vmem:[%s3415_s1 + $0x10] sm:$0xff] (!%p192_p10)  ;;  %s2269_s5 = sshll.u32 (!%p192_p10), %s2821_s15, 7  ;;  %s226_s30 = sand.u32 (!%p192_p10), 1, %s2813_s13  }
   0xf   : > { %195 = sbr.rel (%p192_p10) target bundleno = 406 (0x196), region = 32  ;;  %v2646_v3 = vpack.c.bf16 (!%p192_p10), %v640_v1, %v639_v0  ;;  %v642_v4 = vld [vmem:[%s3415_s1 + $0x18] sm:$0xff] (!%p192_p10)  ;;  %p230_p11 = scmp.lt.s32.totalorder (!%p192_p10), %s2269_s5, 4351  ;;  %v643_v6 = vld [vmem:[%s3415_s1 + $0x20] sm:$0xff] (!%p192_p10)  ;;  %v644_v7 = vld [vmem:[%s3415_s1 + $0x28] sm:$0xff] (!%p192_p10) }
  0x10   : > { %v2650_v5 = vpack.c.bf16 (!%p192_p10), %v642_v4, %v641_v2  ;;  %v2654_v8 = vpack.c.bf16 (!%p192_p10), %v644_v7, %v643_v6  ;;  %v645_v9 = vld [vmem:[%s3415_s1 + $0x30] sm:$0xff] (!%p192_p10)  ;;  %v646_v10 = vld [vmem:[%s3415_s1 + $0x38] sm:$0xff] (!%p192_p10)  ;;  %v647_v14 = vld [vmem:[%s3415_s1 + $0x40] sm:$0xff] (!%p192_p10)  ;;  %s2268_s6 = sshll.u32 (!%p192_p10), %s226_s30, 10  ;;  %s2277_s7 = sshll.u32 (!%p192_p10), %s2821_s15, 14 }
  0x11   : > { %2647 = vmatprep.subr.bf16.mxu0 (!%p192_p10), %v2646_v3  ;;  %2678 = vmatprep.subr.bf16.mxu1 (!%p192_p10), %v2646_v3  ;;  %v2658_v13 = vpack.c.bf16 (!%p192_p10), %v646_v10, %v645_v9  ;;  %v648_v15 = vld [vmem:[%s3415_s1 + $0x48] sm:$0xff] (!%p192_p10)  ;;  %v649_v17 = vld [vmem:[%s3415_s1 + $0x50] sm:$0xff] (!%p192_p10)  ;;  %v650_v18 = vld [vmem:[%s3415_s1 + $0x58] sm:$0xff] (!%p192_p10)  ;;  %s3358_s10 = scalar_lea.hbm (!%p192_p10), %s3417_s3, %s2277_s7  ;;  %s3368_s11 = scalar_lea.sflag (!%p192_p10), [#allocation4], %s226_s30 }
  0x12   : > { %2649 = vmatpush3.bf16.msra.mxu0 (!%p192_p10), %v2646_v3  ;;  %2686 = vmatpush3.bf16.msra.mxu1 (!%p192_p10), %v2646_v3  ;;  %v2662_v16 = vpack.c.bf16 (!%p192_p10), %v648_v15, %v647_v14  ;;  %v2666_v19 = vpack.c.bf16 (!%p192_p10), %v650_v18, %v649_v17  ;;  %v651_v20 = vld [vmem:[%s3415_s1 + $0x60] sm:$0xff] (!%p192_p10)  ;;  %v652_v21 = vld [vmem:[%s3415_s1 + $0x68] sm:$0xff] (!%p192_p10)  ;;  %v653_v23 = vld [vmem:[%s3415_s1 + $0x70] sm:$0xff] (!%p192_p10)  ;;  %s2831_s19 = smov (!%p192_p10), [#allocation3]  }
  0x13   : > { %2651 = vmatprep.subr.bf16.mxu0 (!%p192_p10), %v2650_v5  ;;  %2679 = vmatprep.subr.bf16.mxu1 (!%p192_p10), %v2650_v5  ;;  %v2670_v22 = vpack.c.bf16 (!%p192_p10), %v652_v21, %v651_v20  ;;  %v654_v24 = vld [vmem:[%s3415_s1 + $0x78] sm:$0xff] (!%p192_p10)  ;;  %s2755_s21 = sshll.u32 (!%p192_p10), %s2831_s19, 4  ;;  %s2756_s21 = int_to_ptr.vmem [resolvable:$false] %s2755_s21 }
  0x14   : > { %v2674_v25 = vpack.c.bf16 (!%p192_p10), %v654_v24, %v653_v23  ;;  %s2757_s23 = scalar_lea.vmem (!%p192_p10), %s2756_s21, 32768 }
  0x16   : > { %s3428_s5 = smov (!%p230_p11, %s2269_s5), 4351  ;;  %2653 = vmatpush3.bf16.msra.mxu0 %v2650_v5  ;;  %2687 = vmatpush3.bf16.msra.mxu1 %v2650_v5 }
  0x17   : > { %s2270_s18 = sshll.u32 %s3428_s5, 3  ;;  %2655 = vmatprep.subr.bf16.mxu0 %v2654_v8  ;;  %2680 = vmatprep.subr.bf16.mxu1 %v2654_v8 }
  0x18   : > { %s2937_s29 = scalar_lea.vmem %s3414_s0, %s2270_s18 }
  0x19   : > { %v511_v11 = vld [vmem:[%s2937_s29] sm:$0xff]  ;;  %v512_v26 = vld [vmem:[%s2937_s29 + $0x8] sm:$0xff]  ;;  %v513_v28 = vld [vmem:[%s2937_s29 + $0x10] sm:$0xff] }
  0x1a   : > { %v575_v12 = vld [vmem:[%s2937_s29 + $0x200] sm:$0xff]  ;;  %2454 = vmatprep.mubr.f32.mxu0 %v511_v11  ;;  %2657 = vmatpush3.bf16.msra.mxu0 %v2654_v8  ;;  %v576_v27 = vld [vmem:[%s2937_s29 + $0x208] sm:$0xff]  ;;  %v577_v29 = vld [vmem:[%s2937_s29 + $0x210] sm:$0xff] }
  0x1b   : > { %2550 = vmatprep.mubr.f32.mxu1 %v575_v12  ;;  %2688 = vmatpush3.bf16.msra.mxu1 %v2654_v8  ;;  %v514_v30 = vld [vmem:[%s2937_s29 + $0x18] sm:$0xff]  ;;  %v515_v32 = vld [vmem:[%s2937_s29 + $0x20] sm:$0xff]  ;;  %v516_v34 = vld [vmem:[%s2937_s29 + $0x28] sm:$0xff] }
  0x1c   : > { %2659 = vmatprep.subr.bf16.mxu0 %v2658_v13  ;;  %2681 = vmatprep.subr.bf16.mxu1 %v2658_v13  ;;  %v578_v31 = vld [vmem:[%s2937_s29 + $0x218] sm:$0xff]  ;;  %v579_v33 = vld [vmem:[%s2937_s29 + $0x220] sm:$0xff]  ;;  %v580_v35 = vld [vmem:[%s2937_s29 + $0x228] sm:$0xff] }
  0x1d   : > { %v517_v36 = vld [vmem:[%s2937_s29 + $0x30] sm:$0xff]  ;;  %v518_v38 = vld [vmem:[%s2937_s29 + $0x38] sm:$0xff]  ;;  %v519_v40 = vld [vmem:[%s2937_s29 + $0x40] sm:$0xff] }
  0x1e   : > { %2661 = vmatpush3.bf16.msra.mxu0 %v2658_v13  ;;  %v581_v37 = vld [vmem:[%s2937_s29 + $0x230] sm:$0xff]  ;;  %v582_v39 = vld [vmem:[%s2937_s29 + $0x238] sm:$0xff]  ;;  %v583_v41 = vld [vmem:[%s2937_s29 + $0x240] sm:$0xff] }
  0x1f   : > { %2689 = vmatpush3.bf16.msra.mxu1 %v2658_v13  ;;  %2663 = vmatprep.subr.bf16.mxu0 %v2662_v16  ;;  %v520_v42 = vld [vmem:[%s2937_s29 + $0x48] sm:$0xff]  ;;  %v521_v44 = vld [vmem:[%s2937_s29 + $0x50] sm:$0xff]  ;;  %v522_v46 = vld [vmem:[%s2937_s29 + $0x58] sm:$0xff] }
  0x20   : > { %2682 = vmatprep.subr.bf16.mxu1 %v2662_v16  ;;  %v584_v43 = vld [vmem:[%s2937_s29 + $0x248] sm:$0xff]  ;;  %v585_v45 = vld [vmem:[%s2937_s29 + $0x250] sm:$0xff]  ;;  %v586_v47 = vld [vmem:[%s2937_s29 + $0x258] sm:$0xff] }
  0x21   : > { %v523_v48 = vld [vmem:[%s2937_s29 + $0x60] sm:$0xff]  ;;  %v524_v50 = vld [vmem:[%s2937_s29 + $0x68] sm:$0xff]  ;;  %v525_v52 = vld [vmem:[%s2937_s29 + $0x70] sm:$0xff] }
  0x22   : > { %2665 = vmatpush3.bf16.msra.mxu0 %v2662_v16  ;;  %v587_v49 = vld [vmem:[%s2937_s29 + $0x260] sm:$0xff]  ;;  %v588_v51 = vld [vmem:[%s2937_s29 + $0x268] sm:$0xff]  ;;  %v589_v53 = vld [vmem:[%s2937_s29 + $0x270] sm:$0xff] }
  0x23   : > { %2690 = vmatpush3.bf16.msra.mxu1 %v2662_v16  ;;  %2667 = vmatprep.subr.bf16.mxu0 %v2666_v19  ;;  %v526_v54 = vld [vmem:[%s2937_s29 + $0x78] sm:$0xff]  ;;  %v527_v56 = vld [vmem:[%s2937_s29 + $0x80] sm:$0xff]  ;;  %v528_v58 = vld [vmem:[%s2937_s29 + $0x88] sm:$0xff] }
  0x24   : > { %2683 = vmatprep.subr.bf16.mxu1 %v2666_v19  ;;  %v590_v55 = vld [vmem:[%s2937_s29 + $0x278] sm:$0xff]  ;;  %v591_v57 = vld [vmem:[%s2937_s29 + $0x280] sm:$0xff]  ;;  %v592_v59 = vld [vmem:[%s2937_s29 + $0x288] sm:$0xff] }
  0x25   : > { %v529_v60 = vld [vmem:[%s2937_s29 + $0x90] sm:$0xff]  ;;  %v530_v62 = vld [vmem:[%s2937_s29 + $0x98] sm:$0xff]  ;;  %v531_v0 = vld [vmem:[%s2937_s29 + $0xa0] sm:$0xff] }
  0x26   : > { %2669 = vmatpush3.bf16.msra.mxu0 %v2666_v19  ;;  %v593_v61 = vld [vmem:[%s2937_s29 + $0x290] sm:$0xff]  ;;  %v594_v63 = vld [vmem:[%s2937_s29 + $0x298] sm:$0xff]  ;;  %v595_v1 = vld [vmem:[%s2937_s29 + $0x2a0] sm:$0xff] }
  0x27   : > { %2691 = vmatpush3.bf16.msra.mxu1 %v2666_v19  ;;  %2671 = vmatprep.subr.bf16.mxu0 %v2670_v22  ;;  %v532_v2 = vld [vmem:[%s2937_s29 + $0xa8] sm:$0xff]  ;;  %v533_v4 = vld [vmem:[%s2937_s29 + $0xb0] sm:$0xff]  ;;  %v534_v6 = vld [vmem:[%s2937_s29 + $0xb8] sm:$0xff] }
  0x28   : > { %2684 = vmatprep.subr.bf16.mxu1 %v2670_v22  ;;  %v596_v3 = vld [vmem:[%s2937_s29 + $0x2a8] sm:$0xff]  ;;  %v597_v5 = vld [vmem:[%s2937_s29 + $0x2b0] sm:$0xff]  ;;  %v598_v7 = vld [vmem:[%s2937_s29 + $0x2b8] sm:$0xff] }
  0x29   : > { %v535_v8 = vld [vmem:[%s2937_s29 + $0xc0] sm:$0xff]  ;;  %v536_v10 = vld [vmem:[%s2937_s29 + $0xc8] sm:$0xff]  ;;  %v537_v12 = vld [vmem:[%s2937_s29 + $0xd0] sm:$0xff] }
  0x2a   : > { %2673 = vmatpush3.bf16.msra.mxu0 %v2670_v22  ;;  %v599_v9 = vld [vmem:[%s2937_s29 + $0x2c0] sm:$0xff]  ;;  %v600_v11 = vld [vmem:[%s2937_s29 + $0x2c8] sm:$0xff]  ;;  %v601_v13 = vld [vmem:[%s2937_s29 + $0x2d0] sm:$0xff] }
  0x2b   : > { %2692 = vmatpush3.bf16.msra.mxu1 %v2670_v22  ;;  %2675 = vmatprep.subr.bf16.mxu0 %v2674_v25  ;;  %v538_v14 = vld [vmem:[%s2937_s29 + $0xd8] sm:$0xff]  ;;  %v539_v16 = vld [vmem:[%s2937_s29 + $0xe0] sm:$0xff]  ;;  %v540_v18 = vld [vmem:[%s2937_s29 + $0xe8] sm:$0xff] }
  0x2c   : > { %2685 = vmatprep.subr.bf16.mxu1 %v2674_v25  ;;  %v602_v15 = vld [vmem:[%s2937_s29 + $0x2d8] sm:$0xff]  ;;  %v603_v17 = vld [vmem:[%s2937_s29 + $0x2e0] sm:$0xff]  ;;  %v604_v19 = vld [vmem:[%s2937_s29 + $0x2e8] sm:$0xff] }
  0x2d   : > { %v541_v20 = vld [vmem:[%s2937_s29 + $0xf0] sm:$0xff]  ;;  %v542_v22 = vld [vmem:[%s2937_s29 + $0xf8] sm:$0xff]  ;;  %v543_v24 = vld [vmem:[%s2937_s29 + $0x100] sm:$0xff] }
  0x2e   : > { %2677 = vmatpush3.bf16.msra.mxu0 %v2674_v25  ;;  %v605_v21 = vld [vmem:[%s2937_s29 + $0x2f0] sm:$0xff]  ;;  %v606_v23 = vld [vmem:[%s2937_s29 + $0x2f8] sm:$0xff] }
  0x2f   : > { %2693 = vmatpush3.bf16.msra.mxu1 %v2674_v25  ;;  %v607_v25 = vld [vmem:[%s2937_s29 + $0x300] sm:$0xff] }
  0x31   : > { %2455 = vmatmul.mubr.f32.vlgmr.msra.gmra.mrb[0].mxu0 %v512_v26  ;;  %v544_v26 = vld [vmem:[%s2937_s29 + $0x108] sm:$0xff] }
  0x32   : > { %2551 = vmatmul.mubr.f32.vlgmr.msra.gmra.mrb[0].mxu1 %v576_v27  ;;  %2457 = vmatprep.mubr.f32.mxu0 %v513_v28  ;;  %v608_v27 = vld [vmem:[%s2937_s29 + $0x308] sm:$0xff]  ;;  %v545_v28 = vld [vmem:[%s2937_s29 + $0x110] sm:$0xff] }
  0x33   : > { %2553 = vmatprep.mubr.f32.mxu1 %v577_v29  ;;  %v609_v29 = vld [vmem:[%s2937_s29 + $0x310] sm:$0xff] }
  0x35   : > { %2458 = vmatmul.mubr.f32.gmra.mrb[2].mxu0 %v514_v30  ;;  %v546_v30 = vld [vmem:[%s2937_s29 + $0x118] sm:$0xff] }
  0x36   : > { %2554 = vmatmul.mubr.f32.gmra.mrb[2].mxu1 %v578_v31  ;;  %2460 = vmatprep.mubr.f32.mxu0 %v515_v32  ;;  %v610_v31 = vld [vmem:[%s2937_s29 + $0x318] sm:$0xff]  ;;  %v547_v32 = vld [vmem:[%s2937_s29 + $0x120] sm:$0xff] }
  0x37   : > { %2556 = vmatprep.mubr.f32.mxu1 %v579_v33  ;;  %v611_v33 = vld [vmem:[%s2937_s29 + $0x320] sm:$0xff] }
  0x39   : > { %2461 = vmatmul.mubr.f32.gmra.mrb[4].mxu0 %v516_v34  ;;  %v548_v34 = vld [vmem:[%s2937_s29 + $0x128] sm:$0xff] }
  0x3a   : > { %2557 = vmatmul.mubr.f32.gmra.mrb[4].mxu1 %v580_v35  ;;  %2463 = vmatprep.mubr.f32.mxu0 %v517_v36  ;;  %v612_v35 = vld [vmem:[%s2937_s29 + $0x328] sm:$0xff]  ;;  %v549_v36 = vld [vmem:[%s2937_s29 + $0x130] sm:$0xff] }
  0x3b   : > { %2559 = vmatprep.mubr.f32.mxu1 %v581_v37  ;;  %v613_v37 = vld [vmem:[%s2937_s29 + $0x330] sm:$0xff] }
  0x3d   : > { %2464 = vmatmul.mubr.f32.gmra.mrb[6].mxu0 %v518_v38  ;;  %v550_v38 = vld [vmem:[%s2937_s29 + $0x138] sm:$0xff] }
  0x3e   : > { %2560 = vmatmul.mubr.f32.gmra.mrb[6].mxu1 %v582_v39  ;;  %2466 = vmatprep.mubr.f32.mxu0 %v519_v40  ;;  %v614_v39 = vld [vmem:[%s2937_s29 + $0x338] sm:$0xff]  ;;  %v551_v40 = vld [vmem:[%s2937_s29 + $0x140] sm:$0xff] }
  0x3f   : > { %2562 = vmatprep.mubr.f32.mxu1 %v583_v41  ;;  %v615_v41 = vld [vmem:[%s2937_s29 + $0x340] sm:$0xff] }
  0x41   : > { %2467 = vmatmul.mubr.f32.gmra.mrb[8].mxu0 %v520_v42  ;;  %v552_v42 = vld [vmem:[%s2937_s29 + $0x148] sm:$0xff] }
  0x42   : > { %2563 = vmatmul.mubr.f32.gmra.mrb[8].mxu1 %v584_v43  ;;  %2469 = vmatprep.mubr.f32.mxu0 %v521_v44  ;;  %v616_v43 = vld [vmem:[%s2937_s29 + $0x348] sm:$0xff]  ;;  %v553_v44 = vld [vmem:[%s2937_s29 + $0x150] sm:$0xff] }
  0x43   : > { %2565 = vmatprep.mubr.f32.mxu1 %v585_v45  ;;  %v617_v45 = vld [vmem:[%s2937_s29 + $0x350] sm:$0xff] }
  0x45   : > { %2470 = vmatmul.mubr.f32.gmra.mrb[10].mxu0 %v522_v46  ;;  %v554_v46 = vld [vmem:[%s2937_s29 + $0x158] sm:$0xff] }
  0x46   : > { %2566 = vmatmul.mubr.f32.gmra.mrb[10].mxu1 %v586_v47  ;;  %2472 = vmatprep.mubr.f32.mxu0 %v523_v48  ;;  %v618_v47 = vld [vmem:[%s2937_s29 + $0x358] sm:$0xff]  ;;  %v555_v48 = vld [vmem:[%s2937_s29 + $0x160] sm:$0xff] }
  0x47   : > { %2568 = vmatprep.mubr.f32.mxu1 %v587_v49  ;;  %v619_v49 = vld [vmem:[%s2937_s29 + $0x360] sm:$0xff] }
  0x49   : > { %2473 = vmatmul.mubr.f32.gmra.mrb[12].mxu0 %v524_v50  ;;  %v556_v50 = vld [vmem:[%s2937_s29 + $0x168] sm:$0xff] }
  0x4a   : > { %2569 = vmatmul.mubr.f32.gmra.mrb[12].mxu1 %v588_v51  ;;  %2475 = vmatprep.mubr.f32.mxu0 %v525_v52  ;;  %v620_v51 = vld [vmem:[%s2937_s29 + $0x368] sm:$0xff]  ;;  %v557_v52 = vld [vmem:[%s2937_s29 + $0x170] sm:$0xff] }
  0x4b   : > { %2571 = vmatprep.mubr.f32.mxu1 %v589_v53  ;;  %v621_v53 = vld [vmem:[%s2937_s29 + $0x370] sm:$0xff] }
  0x4d   : > { %2476 = vmatmul.mubr.f32.gmra.mrb[14].mxu0 %v526_v54  ;;  %v558_v54 = vld [vmem:[%s2937_s29 + $0x178] sm:$0xff] }
  0x4e   : > { %2572 = vmatmul.mubr.f32.gmra.mrb[14].mxu1 %v590_v55  ;;  %2478 = vmatprep.mubr.f32.mxu0 %v527_v56  ;;  %v622_v55 = vld [vmem:[%s2937_s29 + $0x378] sm:$0xff]  ;;  %v559_v56 = vld [vmem:[%s2937_s29 + $0x180] sm:$0xff] }
  0x4f   : > { %2574 = vmatprep.mubr.f32.mxu1 %v591_v57  ;;  %v623_v57 = vld [vmem:[%s2937_s29 + $0x380] sm:$0xff] }
  0x51   : > { %2479 = vmatmul.mubr.f32.gmra.mrb[16].mxu0 %v528_v58  ;;  %v560_v58 = vld [vmem:[%s2937_s29 + $0x188] sm:$0xff] }
  0x52   : > { %2575 = vmatmul.mubr.f32.gmra.mrb[16].mxu1 %v592_v59  ;;  %2481 = vmatprep.mubr.f32.mxu0 %v529_v60  ;;  %v624_v59 = vld [vmem:[%s2937_s29 + $0x388] sm:$0xff]  ;;  %v561_v60 = vld [vmem:[%s2937_s29 + $0x190] sm:$0xff] }
  0x53   : > { %2577 = vmatprep.mubr.f32.mxu1 %v593_v61  ;;  %v625_v61 = vld [vmem:[%s2937_s29 + $0x390] sm:$0xff] }
  0x55   : > { %2482 = vmatmul.mubr.f32.gmra.mrb[18].mxu0 %v530_v62  ;;  %v562_v62 = vld [vmem:[%s2937_s29 + $0x198] sm:$0xff] }
  0x56   : > { %2578 = vmatmul.mubr.f32.gmra.mrb[18].mxu1 %v594_v63  ;;  %2484 = vmatprep.mubr.f32.mxu0 %v531_v0  ;;  %v626_v63 = vld [vmem:[%s2937_s29 + $0x398] sm:$0xff]  ;;  %v563_v0 = vld [vmem:[%s2937_s29 + $0x1a0] sm:$0xff] }
  0x57   : > { %2580 = vmatprep.mubr.f32.mxu1 %v595_v1  ;;  %v627_v1 = vld [vmem:[%s2937_s29 + $0x3a0] sm:$0xff] }
  0x59   : > { %2485 = vmatmul.mubr.f32.gmra.mrb[20].mxu0 %v532_v2  ;;  %v564_v2 = vld [vmem:[%s2937_s29 + $0x1a8] sm:$0xff] }
  0x5a   : > { %2581 = vmatmul.mubr.f32.gmra.mrb[20].mxu1 %v596_v3  ;;  %2487 = vmatprep.mubr.f32.mxu0 %v533_v4  ;;  %v628_v3 = vld [vmem:[%s2937_s29 + $0x3a8] sm:$0xff]  ;;  %v565_v4 = vld [vmem:[%s2937_s29 + $0x1b0] sm:$0xff] }
  0x5b   : > { %2583 = vmatprep.mubr.f32.mxu1 %v597_v5  ;;  %v629_v5 = vld [vmem:[%s2937_s29 + $0x3b0] sm:$0xff] }
  0x5d   : > { %2488 = vmatmul.mubr.f32.gmra.mrb[22].mxu0 %v534_v6  ;;  %v566_v6 = vld [vmem:[%s2937_s29 + $0x1b8] sm:$0xff] }
  0x5e   : > { %2584 = vmatmul.mubr.f32.gmra.mrb[22].mxu1 %v598_v7  ;;  %2490 = vmatprep.mubr.f32.mxu0 %v535_v8  ;;  %v630_v7 = vld [vmem:[%s2937_s29 + $0x3b8] sm:$0xff]  ;;  %v567_v8 = vld [vmem:[%s2937_s29 + $0x1c0] sm:$0xff] }
  0x5f   : > { %2586 = vmatprep.mubr.f32.mxu1 %v599_v9  ;;  %v631_v9 = vld [vmem:[%s2937_s29 + $0x3c0] sm:$0xff] }
  0x61   : > { %2491 = vmatmul.mubr.f32.gmra.mrb[24].mxu0 %v536_v10  ;;  %v568_v10 = vld [vmem:[%s2937_s29 + $0x1c8] sm:$0xff] }
  0x62   : > { %2587 = vmatmul.mubr.f32.gmra.mrb[24].mxu1 %v600_v11  ;;  %2493 = vmatprep.mubr.f32.mxu0 %v537_v12  ;;  %v632_v11 = vld [vmem:[%s2937_s29 + $0x3c8] sm:$0xff]  ;;  %v569_v12 = vld [vmem:[%s2937_s29 + $0x1d0] sm:$0xff] }
  0x63   : > { %2589 = vmatprep.mubr.f32.mxu1 %v601_v13  ;;  %v633_v13 = vld [vmem:[%s2937_s29 + $0x3d0] sm:$0xff] }
  0x65   : > { %2494 = vmatmul.mubr.f32.gmra.mrb[26].mxu0 %v538_v14  ;;  %v570_v14 = vld [vmem:[%s2937_s29 + $0x1d8] sm:$0xff] }
  0x66   : > { %2590 = vmatmul.mubr.f32.gmra.mrb[26].mxu1 %v602_v15  ;;  %2496 = vmatprep.mubr.f32.mxu0 %v539_v16  ;;  %v634_v15 = vld [vmem:[%s2937_s29 + $0x3d8] sm:$0xff]  ;;  %v571_v16 = vld [vmem:[%s2937_s29 + $0x1e0] sm:$0xff] }
  0x67   : > { %2592 = vmatprep.mubr.f32.mxu1 %v603_v17  ;;  %v635_v17 = vld [vmem:[%s2937_s29 + $0x3e0] sm:$0xff] }
  0x69   : > { %2497 = vmatmul.mubr.f32.gmra.mrb[28].mxu0 %v540_v18  ;;  %v572_v18 = vld [vmem:[%s2937_s29 + $0x1e8] sm:$0xff] }
  0x6a   : > { %2593 = vmatmul.mubr.f32.gmra.mrb[28].mxu1 %v604_v19  ;;  %2499 = vmatprep.mubr.f32.mxu0 %v541_v20  ;;  %v636_v19 = vld [vmem:[%s2937_s29 + $0x3e8] sm:$0xff]  ;;  %v573_v20 = vld [vmem:[%s2937_s29 + $0x1f0] sm:$0xff] }
  0x6b   : > { %2595 = vmatprep.mubr.f32.mxu1 %v605_v21  ;;  %v637_v21 = vld [vmem:[%s2937_s29 + $0x3f0] sm:$0xff] }
  0x6d   : > { %2500 = vmatmul.mubr.f32.gmra.mrb[30].mxu0 %v542_v22  ;;  %v574_v22 = vld [vmem:[%s2937_s29 + $0x1f8] sm:$0xff] }
  0x6e   : > { %2596 = vmatmul.mubr.f32.gmra.mrb[30].mxu1 %v606_v23  ;;  %2502 = vmatprep.mubr.f32.mxu0 %v543_v24  ;;  %v638_v23 = vld [vmem:[%s2937_s29 + $0x3f8] sm:$0xff]  ;;  %v3095_v24 = vld [vmem:[%s3416_s2] ss:$0 sm:$0xff]  ;;  %s3103_s29 = scalar_lea.vmem [#allocation3], %s2268_s6 }
  0x6f   : > { %2598 = vmatprep.mubr.f32.mxu1 %v607_v25  ;;  %s2153_s8 = sshll.u32 %s3103_s29, 4  ;;  %s3360_s8 = int_to_ptr.vmem [resolvable:$true] %s2153_s8 }
  0x70   : > { %s2751_s18 = scalar_lea.vmem %s3360_s8, 16384  ;;  %p2758_p1 = scmp.lt.s32.totalorder %s3360_s8, %s2756_s21 }
  0x71   : > { %2503 = vmatmul.mubr.f32.gmra.mrb[32].mxu0 %v544_v26  ;;  %p2752_p12 = scmp.ne.s32.totalorder %s3360_s8, %s2751_s18  ;;  %p2759_p2 = scmp.lt.s32.totalorder %s2757_s23, %s2751_s18 }
  0x72   : > { %2599 = vmatmul.mubr.f32.gmra.mrb[32].mxu1 %v608_v27  ;;  %2505 = vmatprep.mubr.f32.mxu0 %v545_v28 }
  0x73   : > { %2601 = vmatprep.mubr.f32.mxu1 %v609_v29  ;;  %p2753_p13 = pnand %p2752_p12, %p2894_p4  ;;  %p2760_p3 = por %p2759_p2, %p2758_p1 }
  0x75   : > { %2506 = vmatmul.mubr.f32.gmra.mrb[34].mxu0 %v546_v30  ;;  %p2754_p0 = pneg %p2753_p13 }
  0x76   : > { %2602 = vmatmul.mubr.f32.gmra.mrb[34].mxu1 %v610_v31  ;;  %2508 = vmatprep.mubr.f32.mxu0 %v547_v32 }
  0x77   : > { %2604 = vmatprep.mubr.f32.mxu1 %v611_v33  ;;  %p2761_p5 = pnand %p2760_p3, %p2754_p0 }
  0x79   : > { %2509 = vmatmul.mubr.f32.gmra.mrb[36].mxu0 %v548_v34 }
  0x7a   : > { %2605 = vmatmul.mubr.f32.gmra.mrb[36].mxu1 %v612_v35  ;;  %2511 = vmatprep.mubr.f32.mxu0 %v549_v36 }
  0x7b   : > { %2607 = vmatprep.mubr.f32.mxu1 %v613_v37 }
  0x7d   : > { %2512 = vmatmul.mubr.f32.gmra.mrb[38].mxu0 %v550_v38 }
  0x7e   : > { %2608 = vmatmul.mubr.f32.gmra.mrb[38].mxu1 %v614_v39  ;;  %2514 = vmatprep.mubr.f32.mxu0 %v551_v40 }
  0x7f   : > { %2610 = vmatprep.mubr.f32.mxu1 %v615_v41 }
  0x81   : > { %2515 = vmatmul.mubr.f32.gmra.mrb[40].mxu0 %v552_v42 }
  0x82   : > { %2611 = vmatmul.mubr.f32.gmra.mrb[40].mxu1 %v616_v43  ;;  %2517 = vmatprep.mubr.f32.mxu0 %v553_v44 }
  0x83   : > { %2613 = vmatprep.mubr.f32.mxu1 %v617_v45 }
  0x85   : > { %2518 = vmatmul.mubr.f32.gmra.mrb[42].mxu0 %v554_v46 }
  0x86   : > { %2614 = vmatmul.mubr.f32.gmra.mrb[42].mxu1 %v618_v47  ;;  %2520 = vmatprep.mubr.f32.mxu0 %v555_v48 }
  0x87   : > { %2616 = vmatprep.mubr.f32.mxu1 %v619_v49 }
  0x89   : > { %2521 = vmatmul.mubr.f32.gmra.mrb[44].mxu0 %v556_v50 }
  0x8a   : > { %2617 = vmatmul.mubr.f32.gmra.mrb[44].mxu1 %v620_v51  ;;  %2523 = vmatprep.mubr.f32.mxu0 %v557_v52 }
  0x8b   : > { %2619 = vmatprep.mubr.f32.mxu1 %v621_v53 }
  0x8d   : > { %2524 = vmatmul.mubr.f32.gmra.mrb[46].mxu0 %v558_v54 }
  0x8e   : > { %2620 = vmatmul.mubr.f32.gmra.mrb[46].mxu1 %v622_v55  ;;  %2526 = vmatprep.mubr.f32.mxu0 %v559_v56 }
  0x8f   : > { %2622 = vmatprep.mubr.f32.mxu1 %v623_v57 }
  0x91   : > { %2527 = vmatmul.mubr.f32.gmra.mrb[48].mxu0 %v560_v58 }
  0x92   : > { %2623 = vmatmul.mubr.f32.gmra.mrb[48].mxu1 %v624_v59  ;;  %2529 = vmatprep.mubr.f32.mxu0 %v561_v60 }
  0x93   : > { %2625 = vmatprep.mubr.f32.mxu1 %v625_v61 }
  0x95   : > { %2530 = vmatmul.mubr.f32.gmra.mrb[50].mxu0 %v562_v62 }
  0x96   : > { %2626 = vmatmul.mubr.f32.gmra.mrb[50].mxu1 %v626_v63  ;;  %2532 = vmatprep.mubr.f32.mxu0 %v563_v0 }
  0x97   : > { %2628 = vmatprep.mubr.f32.mxu1 %v627_v1 }
  0x99   : > { %2533 = vmatmul.mubr.f32.gmra.mrb[52].mxu0 %v564_v2 }
  0x9a   : > { %2629 = vmatmul.mubr.f32.gmra.mrb[52].mxu1 %v628_v3  ;;  %2535 = vmatprep.mubr.f32.mxu0 %v565_v4 }
  0x9b   : > { %2631 = vmatprep.mubr.f32.mxu1 %v629_v5 }
  0x9d   : > { %2536 = vmatmul.mubr.f32.gmra.mrb[54].mxu0 %v566_v6 }
  0x9e   : > { %2632 = vmatmul.mubr.f32.gmra.mrb[54].mxu1 %v630_v7  ;;  %2538 = vmatprep.mubr.f32.mxu0 %v567_v8 }
  0x9f   : > { %2634 = vmatprep.mubr.f32.mxu1 %v631_v9 }
  0xa1   : > { %2539 = vmatmul.mubr.f32.gmra.mrb[56].mxu0 %v568_v10 }
  0xa2   : > { %2635 = vmatmul.mubr.f32.gmra.mrb[56].mxu1 %v632_v11  ;;  %2541 = vmatprep.mubr.f32.mxu0 %v569_v12 }
  0xa3   : > { %2637 = vmatprep.mubr.f32.mxu1 %v633_v13 }
  0xa5   : > { %2542 = vmatmul.mubr.f32.gmra.mrb[58].mxu0 %v570_v14 }
  0xa6   : > { %2638 = vmatmul.mubr.f32.gmra.mrb[58].mxu1 %v634_v15  ;;  %2544 = vmatprep.mubr.f32.mxu0 %v571_v16 }
  0xa7   : > { %2640 = vmatprep.mubr.f32.mxu1 %v635_v17 }
  0xa9   : > { %2545 = vmatmul.mubr.f32.gmra.mrb[60].mxu0 %v572_v18 }
  0xaa   : > { %2641 = vmatmul.mubr.f32.gmra.mrb[60].mxu1 %v636_v19  ;;  %2547 = vmatprep.mubr.f32.mxu0 %v573_v20 }
  0xab   : > { %2643 = vmatprep.mubr.f32.mxu1 %v637_v21 }
  0xad   : > { %2548 = vmatmul.mubr.f32.gmra.mrb[62].mxu0 %v574_v22 }
  0xae   : > { %2644 = vmatmul.mubr.f32.gmra.mrb[62].mxu1 %v638_v23 }
 0x104   : > { %v2456_v25 = vpop.f32.mrb[0].mxu0 }
 0x105   : > { %v2552_v26 = vpop.f32.mrb[0].mxu1  ;;  %v1755_v27 = vadd.f32 %v2456_v25, %v3095_v24  ;;  %v721_v29 = vpop.f32.mrb[1].mxu0 }
 0x106   : > { %v1819_v28 = vadd.f32 %v2552_v26, %v3095_v24  ;;  %v1041_v30 = vpop.f32.mrb[1].mxu1  ;;  %v1754_v31 = vadd.f32 %v3095_v24, %v721_v29 }
 0x107   : > { %v1818_v32 = vadd.f32 %v3095_v24, %v1041_v30  ;;  %v1883_v33 = vmax.f32 %v1755_v27, 0.0 }
 0x108   : > { %v1947_v34 = vmax.f32 %v1819_v28, 0.0  ;;  %v1882_v35 = vmax.f32 %v1754_v31, 0.0  ;;  %v2459_v37 = vpop.f32.mrb[2].mxu0 }
 0x109   : > { %v1946_v36 = vmax.f32 %v1818_v32, 0.0  ;;  %v2555_v38 = vpop.f32.mrb[2].mxu1  ;;  %2011 = vst [vmem:[%s3103_s29 + $0x8] sm:$0xff] %v1883_v33  ;;  %v1757_v39 = vadd.f32 %v2459_v37, %v3095_v24  ;;  %v731_v41 = vpop.f32.mrb[3].mxu0 }
 0x10a   : > { %2075 = vst [vmem:[%s3103_s29 + $0x208] sm:$0xff] %v1947_v34  ;;  %v1821_v40 = vadd.f32 %v2555_v38, %v3095_v24  ;;  %v1051_v42 = vpop.f32.mrb[3].mxu1  ;;  %2010 = vst [vmem:[%s3103_s29] sm:$0xff] %v1882_v35  ;;  %v1756_v43 = vadd.f32 %v3095_v24, %v731_v41 }
 0x10b   : > { %2074 = vst [vmem:[%s3103_s29 + $0x200] sm:$0xff] %v1946_v36  ;;  %v1820_v44 = vadd.f32 %v3095_v24, %v1051_v42  ;;  %v1885_v45 = vmax.f32 %v1757_v39, 0.0 }
 0x10c   : > { %v1949_v46 = vmax.f32 %v1821_v40, 0.0  ;;  %v1884_v47 = vmax.f32 %v1756_v43, 0.0  ;;  %v2462_v49 = vpop.f32.mrb[4].mxu0 }
 0x10d   : > { %v1948_v48 = vmax.f32 %v1820_v44, 0.0  ;;  %v2558_v50 = vpop.f32.mrb[4].mxu1  ;;  %2013 = vst [vmem:[%s3103_s29 + $0x18] sm:$0xff] %v1885_v45  ;;  %v1759_v51 = vadd.f32 %v2462_v49, %v3095_v24  ;;  %v741_v53 = vpop.f32.mrb[5].mxu0 }
 0x10e   : > { %2077 = vst [vmem:[%s3103_s29 + $0x218] sm:$0xff] %v1949_v46  ;;  %v1823_v52 = vadd.f32 %v2558_v50, %v3095_v24  ;;  %v1061_v54 = vpop.f32.mrb[5].mxu1  ;;  %2012 = vst [vmem:[%s3103_s29 + $0x10] sm:$0xff] %v1884_v47  ;;  %v1758_v55 = vadd.f32 %v3095_v24, %v741_v53 }
 0x10f   : > { %2076 = vst [vmem:[%s3103_s29 + $0x210] sm:$0xff] %v1948_v48  ;;  %v1822_v56 = vadd.f32 %v3095_v24, %v1061_v54  ;;  %v1887_v57 = vmax.f32 %v1759_v51, 0.0 }
 0x110   : > { %v1951_v58 = vmax.f32 %v1823_v52, 0.0  ;;  %v1886_v59 = vmax.f32 %v1758_v55, 0.0  ;;  %v2465_v61 = vpop.f32.mrb[6].mxu0 }
 0x111   : > { %v1950_v60 = vmax.f32 %v1822_v56, 0.0  ;;  %v2561_v62 = vpop.f32.mrb[6].mxu1  ;;  %2015 = vst [vmem:[%s3103_s29 + $0x28] sm:$0xff] %v1887_v57  ;;  %v1761_v63 = vadd.f32 %v2465_v61, %v3095_v24  ;;  %v751_v1 = vpop.f32.mrb[7].mxu0 }
 0x112   : > { %2079 = vst [vmem:[%s3103_s29 + $0x228] sm:$0xff] %v1951_v58  ;;  %v1825_v0 = vadd.f32 %v2561_v62, %v3095_v24  ;;  %v1071_v2 = vpop.f32.mrb[7].mxu1  ;;  %2014 = vst [vmem:[%s3103_s29 + $0x20] sm:$0xff] %v1886_v59  ;;  %v1760_v3 = vadd.f32 %v3095_v24, %v751_v1 }
 0x113   : > { %2078 = vst [vmem:[%s3103_s29 + $0x220] sm:$0xff] %v1950_v60  ;;  %v1824_v4 = vadd.f32 %v3095_v24, %v1071_v2  ;;  %v1889_v5 = vmax.f32 %v1761_v63, 0.0 }
 0x114   : > { %v1953_v6 = vmax.f32 %v1825_v0, 0.0  ;;  %v1888_v7 = vmax.f32 %v1760_v3, 0.0  ;;  %v2468_v9 = vpop.f32.mrb[8].mxu0 }
 0x115   : > { %v1952_v8 = vmax.f32 %v1824_v4, 0.0  ;;  %v2564_v10 = vpop.f32.mrb[8].mxu1  ;;  %2017 = vst [vmem:[%s3103_s29 + $0x38] sm:$0xff] %v1889_v5  ;;  %v1763_v11 = vadd.f32 %v2468_v9, %v3095_v24  ;;  %v761_v13 = vpop.f32.mrb[9].mxu0 }
 0x116   : > { %2081 = vst [vmem:[%s3103_s29 + $0x238] sm:$0xff] %v1953_v6  ;;  %v1827_v12 = vadd.f32 %v2564_v10, %v3095_v24  ;;  %v1081_v14 = vpop.f32.mrb[9].mxu1  ;;  %2016 = vst [vmem:[%s3103_s29 + $0x30] sm:$0xff] %v1888_v7  ;;  %v1762_v15 = vadd.f32 %v3095_v24, %v761_v13 }
 0x117   : > { %2080 = vst [vmem:[%s3103_s29 + $0x230] sm:$0xff] %v1952_v8  ;;  %v1826_v16 = vadd.f32 %v3095_v24, %v1081_v14  ;;  %v1891_v17 = vmax.f32 %v1763_v11, 0.0 }
 0x118   : > { %v1955_v18 = vmax.f32 %v1827_v12, 0.0  ;;  %v1890_v19 = vmax.f32 %v1762_v15, 0.0  ;;  %v2471_v21 = vpop.f32.mrb[10].mxu0 }
 0x119   : > { %v1954_v20 = vmax.f32 %v1826_v16, 0.0  ;;  %v2567_v22 = vpop.f32.mrb[10].mxu1  ;;  %2019 = vst [vmem:[%s3103_s29 + $0x48] sm:$0xff] %v1891_v17  ;;  %v1765_v23 = vadd.f32 %v2471_v21, %v3095_v24  ;;  %v771_v26 = vpop.f32.mrb[11].mxu0 }
 0x11a   : > { %2083 = vst [vmem:[%s3103_s29 + $0x248] sm:$0xff] %v1955_v18  ;;  %v1829_v25 = vadd.f32 %v2567_v22, %v3095_v24  ;;  %v1091_v27 = vpop.f32.mrb[11].mxu1  ;;  %2018 = vst [vmem:[%s3103_s29 + $0x40] sm:$0xff] %v1890_v19  ;;  %v1764_v28 = vadd.f32 %v3095_v24, %v771_v26 }
 0x11b   : > { %2082 = vst [vmem:[%s3103_s29 + $0x240] sm:$0xff] %v1954_v20  ;;  %v1828_v29 = vadd.f32 %v3095_v24, %v1091_v27  ;;  %v1893_v30 = vmax.f32 %v1765_v23, 0.0 }
 0x11c   : > { %v1957_v31 = vmax.f32 %v1829_v25, 0.0  ;;  %v1892_v32 = vmax.f32 %v1764_v28, 0.0  ;;  %v2474_v34 = vpop.f32.mrb[12].mxu0 }
 0x11d   : > { %v1956_v33 = vmax.f32 %v1828_v29, 0.0  ;;  %v2570_v35 = vpop.f32.mrb[12].mxu1  ;;  %2021 = vst [vmem:[%s3103_s29 + $0x58] sm:$0xff] %v1893_v30  ;;  %v1767_v36 = vadd.f32 %v2474_v34, %v3095_v24  ;;  %v781_v38 = vpop.f32.mrb[13].mxu0 }
 0x11e   : > { %2085 = vst [vmem:[%s3103_s29 + $0x258] sm:$0xff] %v1957_v31  ;;  %v1831_v37 = vadd.f32 %v2570_v35, %v3095_v24  ;;  %v1101_v39 = vpop.f32.mrb[13].mxu1  ;;  %2020 = vst [vmem:[%s3103_s29 + $0x50] sm:$0xff] %v1892_v32  ;;  %v1766_v40 = vadd.f32 %v3095_v24, %v781_v38 }
 0x11f   : > { %2084 = vst [vmem:[%s3103_s29 + $0x250] sm:$0xff] %v1956_v33  ;;  %v1830_v41 = vadd.f32 %v3095_v24, %v1101_v39  ;;  %v1895_v42 = vmax.f32 %v1767_v36, 0.0 }
 0x120   : > { %v1959_v43 = vmax.f32 %v1831_v37, 0.0  ;;  %v1894_v44 = vmax.f32 %v1766_v40, 0.0  ;;  %v2477_v46 = vpop.f32.mrb[14].mxu0 }
 0x121   : > { %v1958_v45 = vmax.f32 %v1830_v41, 0.0  ;;  %v2573_v47 = vpop.f32.mrb[14].mxu1  ;;  %2023 = vst [vmem:[%s3103_s29 + $0x68] sm:$0xff] %v1895_v42  ;;  %v1769_v48 = vadd.f32 %v2477_v46, %v3095_v24  ;;  %v791_v50 = vpop.f32.mrb[15].mxu0 }
 0x122   : > { %2087 = vst [vmem:[%s3103_s29 + $0x268] sm:$0xff] %v1959_v43  ;;  %v1833_v49 = vadd.f32 %v2573_v47, %v3095_v24  ;;  %v1111_v51 = vpop.f32.mrb[15].mxu1  ;;  %2022 = vst [vmem:[%s3103_s29 + $0x60] sm:$0xff] %v1894_v44  ;;  %v1768_v52 = vadd.f32 %v3095_v24, %v791_v50 }
 0x123   : > { %2086 = vst [vmem:[%s3103_s29 + $0x260] sm:$0xff] %v1958_v45  ;;  %v1832_v53 = vadd.f32 %v3095_v24, %v1111_v51  ;;  %v1897_v54 = vmax.f32 %v1769_v48, 0.0 }
 0x124   : > { %v1961_v55 = vmax.f32 %v1833_v49, 0.0  ;;  %v1896_v56 = vmax.f32 %v1768_v52, 0.0  ;;  %v2480_v58 = vpop.f32.mrb[16].mxu0 }
 0x125   : > { %v1960_v57 = vmax.f32 %v1832_v53, 0.0  ;;  %v2576_v59 = vpop.f32.mrb[16].mxu1  ;;  %2025 = vst [vmem:[%s3103_s29 + $0x78] sm:$0xff] %v1897_v54  ;;  %v1771_v60 = vadd.f32 %v2480_v58, %v3095_v24  ;;  %v801_v62 = vpop.f32.mrb[17].mxu0 }
 0x126   : > { %2089 = vst [vmem:[%s3103_s29 + $0x278] sm:$0xff] %v1961_v55  ;;  %v1835_v61 = vadd.f32 %v2576_v59, %v3095_v24  ;;  %v1121_v63 = vpop.f32.mrb[17].mxu1  ;;  %2024 = vst [vmem:[%s3103_s29 + $0x70] sm:$0xff] %v1896_v56  ;;  %v1770_v0 = vadd.f32 %v3095_v24, %v801_v62 }
 0x127   : > { %2088 = vst [vmem:[%s3103_s29 + $0x270] sm:$0xff] %v1960_v57  ;;  %v1834_v1 = vadd.f32 %v3095_v24, %v1121_v63  ;;  %v1899_v2 = vmax.f32 %v1771_v60, 0.0 }
 0x128   : > { %v1963_v3 = vmax.f32 %v1835_v61, 0.0  ;;  %v1898_v4 = vmax.f32 %v1770_v0, 0.0  ;;  %v2483_v6 = vpop.f32.mrb[18].mxu0 }
 0x129   : > { %v1962_v5 = vmax.f32 %v1834_v1, 0.0  ;;  %v2579_v7 = vpop.f32.mrb[18].mxu1  ;;  %2027 = vst [vmem:[%s3103_s29 + $0x88] sm:$0xff] %v1899_v2  ;;  %v1773_v8 = vadd.f32 %v2483_v6, %v3095_v24  ;;  %v811_v10 = vpop.f32.mrb[19].mxu0 }
 0x12a   : > { %2091 = vst [vmem:[%s3103_s29 + $0x288] sm:$0xff] %v1963_v3  ;;  %v1837_v9 = vadd.f32 %v2579_v7, %v3095_v24  ;;  %v1131_v11 = vpop.f32.mrb[19].mxu1  ;;  %2026 = vst [vmem:[%s3103_s29 + $0x80] sm:$0xff] %v1898_v4  ;;  %v1772_v12 = vadd.f32 %v3095_v24, %v811_v10 }
 0x12b   : > { %2090 = vst [vmem:[%s3103_s29 + $0x280] sm:$0xff] %v1962_v5  ;;  %v1836_v13 = vadd.f32 %v3095_v24, %v1131_v11  ;;  %v1901_v14 = vmax.f32 %v1773_v8, 0.0 }
 0x12c   : > { %v1965_v15 = vmax.f32 %v1837_v9, 0.0  ;;  %v1900_v16 = vmax.f32 %v1772_v12, 0.0  ;;  %v2486_v18 = vpop.f32.mrb[20].mxu0 }
 0x12d   : > { %v1964_v17 = vmax.f32 %v1836_v13, 0.0  ;;  %v2582_v19 = vpop.f32.mrb[20].mxu1  ;;  %2029 = vst [vmem:[%s3103_s29 + $0x98] sm:$0xff] %v1901_v14  ;;  %v1775_v20 = vadd.f32 %v2486_v18, %v3095_v24  ;;  %v821_v22 = vpop.f32.mrb[21].mxu0 }
 0x12e   : > { %2093 = vst [vmem:[%s3103_s29 + $0x298] sm:$0xff] %v1965_v15  ;;  %v1839_v21 = vadd.f32 %v2582_v19, %v3095_v24  ;;  %v1141_v23 = vpop.f32.mrb[21].mxu1  ;;  %2028 = vst [vmem:[%s3103_s29 + $0x90] sm:$0xff] %v1900_v16  ;;  %v1774_v25 = vadd.f32 %v3095_v24, %v821_v22 }
 0x12f   : > { %2092 = vst [vmem:[%s3103_s29 + $0x290] sm:$0xff] %v1964_v17  ;;  %v1838_v26 = vadd.f32 %v3095_v24, %v1141_v23  ;;  %v1903_v27 = vmax.f32 %v1775_v20, 0.0 }
 0x130   : > { %v1967_v28 = vmax.f32 %v1839_v21, 0.0  ;;  %v1902_v29 = vmax.f32 %v1774_v25, 0.0  ;;  %v2489_v31 = vpop.f32.mrb[22].mxu0 }
 0x131   : > { %v1966_v30 = vmax.f32 %v1838_v26, 0.0  ;;  %v2585_v32 = vpop.f32.mrb[22].mxu1  ;;  %2031 = vst [vmem:[%s3103_s29 + $0xa8] sm:$0xff] %v1903_v27  ;;  %v1777_v33 = vadd.f32 %v2489_v31, %v3095_v24  ;;  %v831_v35 = vpop.f32.mrb[23].mxu0 }
 0x132   : > { %2095 = vst [vmem:[%s3103_s29 + $0x2a8] sm:$0xff] %v1967_v28  ;;  %v1841_v34 = vadd.f32 %v2585_v32, %v3095_v24  ;;  %v1151_v36 = vpop.f32.mrb[23].mxu1  ;;  %2030 = vst [vmem:[%s3103_s29 + $0xa0] sm:$0xff] %v1902_v29  ;;  %v1776_v37 = vadd.f32 %v3095_v24, %v831_v35 }
 0x133   : > { %2094 = vst [vmem:[%s3103_s29 + $0x2a0] sm:$0xff] %v1966_v30  ;;  %v1840_v38 = vadd.f32 %v3095_v24, %v1151_v36  ;;  %v1905_v39 = vmax.f32 %v1777_v33, 0.0 }
 0x134   : > { %v1969_v40 = vmax.f32 %v1841_v34, 0.0  ;;  %v1904_v41 = vmax.f32 %v1776_v37, 0.0  ;;  %v2492_v43 = vpop.f32.mrb[24].mxu0 }
 0x135   : > { %v1968_v42 = vmax.f32 %v1840_v38, 0.0  ;;  %v2588_v44 = vpop.f32.mrb[24].mxu1  ;;  %2033 = vst [vmem:[%s3103_s29 + $0xb8] sm:$0xff] %v1905_v39  ;;  %v1779_v45 = vadd.f32 %v2492_v43, %v3095_v24  ;;  %v841_v47 = vpop.f32.mrb[25].mxu0 }
 0x136   : > { %2097 = vst [vmem:[%s3103_s29 + $0x2b8] sm:$0xff] %v1969_v40  ;;  %v1843_v46 = vadd.f32 %v2588_v44, %v3095_v24  ;;  %v1161_v48 = vpop.f32.mrb[25].mxu1  ;;  %2032 = vst [vmem:[%s3103_s29 + $0xb0] sm:$0xff] %v1904_v41  ;;  %v1778_v49 = vadd.f32 %v3095_v24, %v841_v47 }
 0x137   : > { %2096 = vst [vmem:[%s3103_s29 + $0x2b0] sm:$0xff] %v1968_v42  ;;  %v1842_v50 = vadd.f32 %v3095_v24, %v1161_v48  ;;  %v1907_v51 = vmax.f32 %v1779_v45, 0.0 }
 0x138   : > { %v1971_v52 = vmax.f32 %v1843_v46, 0.0  ;;  %v1906_v53 = vmax.f32 %v1778_v49, 0.0  ;;  %v2495_v55 = vpop.f32.mrb[26].mxu0 }
 0x139   : > { %v1970_v54 = vmax.f32 %v1842_v50, 0.0  ;;  %v2591_v56 = vpop.f32.mrb[26].mxu1  ;;  %2035 = vst [vmem:[%s3103_s29 + $0xc8] sm:$0xff] %v1907_v51  ;;  %v1781_v57 = vadd.f32 %v2495_v55, %v3095_v24  ;;  %v851_v59 = vpop.f32.mrb[27].mxu0 }
 0x13a   : > { %2099 = vst [vmem:[%s3103_s29 + $0x2c8] sm:$0xff] %v1971_v52  ;;  %v1845_v58 = vadd.f32 %v2591_v56, %v3095_v24  ;;  %v1171_v60 = vpop.f32.mrb[27].mxu1  ;;  %2034 = vst [vmem:[%s3103_s29 + $0xc0] sm:$0xff] %v1906_v53  ;;  %v1780_v61 = vadd.f32 %v3095_v24, %v851_v59 }
 0x13b   : > { %2098 = vst [vmem:[%s3103_s29 + $0x2c0] sm:$0xff] %v1970_v54  ;;  %v1844_v62 = vadd.f32 %v3095_v24, %v1171_v60  ;;  %v1909_v63 = vmax.f32 %v1781_v57, 0.0 }
 0x13c   : > { %v1973_v0 = vmax.f32 %v1845_v58, 0.0  ;;  %v1908_v1 = vmax.f32 %v1780_v61, 0.0  ;;  %v2498_v3 = vpop.f32.mrb[28].mxu0 }
 0x13d   : > { %v1972_v2 = vmax.f32 %v1844_v62, 0.0  ;;  %v2594_v4 = vpop.f32.mrb[28].mxu1  ;;  %2037 = vst [vmem:[%s3103_s29 + $0xd8] sm:$0xff] %v1909_v63  ;;  %v1783_v5 = vadd.f32 %v2498_v3, %v3095_v24  ;;  %v861_v7 = vpop.f32.mrb[29].mxu0 }
 0x13e   : > { %2101 = vst [vmem:[%s3103_s29 + $0x2d8] sm:$0xff] %v1973_v0  ;;  %v1847_v6 = vadd.f32 %v2594_v4, %v3095_v24  ;;  %v1181_v8 = vpop.f32.mrb[29].mxu1  ;;  %2036 = vst [vmem:[%s3103_s29 + $0xd0] sm:$0xff] %v1908_v1  ;;  %v1782_v9 = vadd.f32 %v3095_v24, %v861_v7 }
 0x13f   : > { %2100 = vst [vmem:[%s3103_s29 + $0x2d0] sm:$0xff] %v1972_v2  ;;  %v1846_v10 = vadd.f32 %v3095_v24, %v1181_v8  ;;  %v1911_v11 = vmax.f32 %v1783_v5, 0.0 }
 0x140   : > { %v1975_v12 = vmax.f32 %v1847_v6, 0.0  ;;  %v1910_v13 = vmax.f32 %v1782_v9, 0.0  ;;  %v2501_v15 = vpop.f32.mrb[30].mxu0 }
 0x141   : > { %v1974_v14 = vmax.f32 %v1846_v10, 0.0  ;;  %v2597_v16 = vpop.f32.mrb[30].mxu1  ;;  %2039 = vst [vmem:[%s3103_s29 + $0xe8] sm:$0xff] %v1911_v11  ;;  %v1785_v17 = vadd.f32 %v2501_v15, %v3095_v24  ;;  %v871_v19 = vpop.f32.mrb[31].mxu0 }
 0x142   : > { %2103 = vst [vmem:[%s3103_s29 + $0x2e8] sm:$0xff] %v1975_v12  ;;  %v1849_v18 = vadd.f32 %v2597_v16, %v3095_v24  ;;  %v1191_v20 = vpop.f32.mrb[31].mxu1  ;;  %2038 = vst [vmem:[%s3103_s29 + $0xe0] sm:$0xff] %v1910_v13  ;;  %v1784_v21 = vadd.f32 %v3095_v24, %v871_v19 }
 0x143   : > { %2102 = vst [vmem:[%s3103_s29 + $0x2e0] sm:$0xff] %v1974_v14  ;;  %v1848_v22 = vadd.f32 %v3095_v24, %v1191_v20  ;;  %v1913_v23 = vmax.f32 %v1785_v17, 0.0 }
 0x144   : > { %v1977_v25 = vmax.f32 %v1849_v18, 0.0  ;;  %v1912_v26 = vmax.f32 %v1784_v21, 0.0  ;;  %v2504_v28 = vpop.f32.mrb[32].mxu0 }
 0x145   : > { %v1976_v27 = vmax.f32 %v1848_v22, 0.0  ;;  %v2600_v29 = vpop.f32.mrb[32].mxu1  ;;  %2041 = vst [vmem:[%s3103_s29 + $0xf8] sm:$0xff] %v1913_v23  ;;  %v1787_v30 = vadd.f32 %v2504_v28, %v3095_v24  ;;  %v881_v32 = vpop.f32.mrb[33].mxu0 }
 0x146   : > { %2105 = vst [vmem:[%s3103_s29 + $0x2f8] sm:$0xff] %v1977_v25  ;;  %v1851_v31 = vadd.f32 %v2600_v29, %v3095_v24  ;;  %v1201_v33 = vpop.f32.mrb[33].mxu1  ;;  %2040 = vst [vmem:[%s3103_s29 + $0xf0] sm:$0xff] %v1912_v26  ;;  %v1786_v34 = vadd.f32 %v3095_v24, %v881_v32 }
 0x147   : > { %2104 = vst [vmem:[%s3103_s29 + $0x2f0] sm:$0xff] %v1976_v27  ;;  %v1850_v35 = vadd.f32 %v3095_v24, %v1201_v33  ;;  %v1915_v36 = vmax.f32 %v1787_v30, 0.0 }
 0x148   : > { %v1979_v37 = vmax.f32 %v1851_v31, 0.0  ;;  %v1914_v38 = vmax.f32 %v1786_v34, 0.0  ;;  %v2507_v40 = vpop.f32.mrb[34].mxu0 }
 0x149   : > { %v1978_v39 = vmax.f32 %v1850_v35, 0.0  ;;  %v2603_v41 = vpop.f32.mrb[34].mxu1  ;;  %2043 = vst [vmem:[%s3103_s29 + $0x108] sm:$0xff] %v1915_v36  ;;  %v1789_v42 = vadd.f32 %v2507_v40, %v3095_v24  ;;  %v891_v44 = vpop.f32.mrb[35].mxu0 }
 0x14a   : > { %2107 = vst [vmem:[%s3103_s29 + $0x308] sm:$0xff] %v1979_v37  ;;  %v1853_v43 = vadd.f32 %v2603_v41, %v3095_v24  ;;  %v1211_v45 = vpop.f32.mrb[35].mxu1  ;;  %2042 = vst [vmem:[%s3103_s29 + $0x100] sm:$0xff] %v1914_v38  ;;  %v1788_v46 = vadd.f32 %v3095_v24, %v891_v44 }
 0x14b   : > { %2106 = vst [vmem:[%s3103_s29 + $0x300] sm:$0xff] %v1978_v39  ;;  %v1852_v47 = vadd.f32 %v3095_v24, %v1211_v45  ;;  %v1917_v48 = vmax.f32 %v1789_v42, 0.0 }
 0x14c   : > { %v1981_v49 = vmax.f32 %v1853_v43, 0.0  ;;  %v1916_v50 = vmax.f32 %v1788_v46, 0.0  ;;  %v2510_v52 = vpop.f32.mrb[36].mxu0 }
 0x14d   : > { %v1980_v51 = vmax.f32 %v1852_v47, 0.0  ;;  %v2606_v53 = vpop.f32.mrb[36].mxu1  ;;  %2045 = vst [vmem:[%s3103_s29 + $0x118] sm:$0xff] %v1917_v48  ;;  %v1791_v54 = vadd.f32 %v2510_v52, %v3095_v24  ;;  %v901_v56 = vpop.f32.mrb[37].mxu0 }
 0x14e   : > { %2109 = vst [vmem:[%s3103_s29 + $0x318] sm:$0xff] %v1981_v49  ;;  %v1855_v55 = vadd.f32 %v2606_v53, %v3095_v24  ;;  %v1221_v57 = vpop.f32.mrb[37].mxu1  ;;  %2044 = vst [vmem:[%s3103_s29 + $0x110] sm:$0xff] %v1916_v50  ;;  %v1790_v58 = vadd.f32 %v3095_v24, %v901_v56 }
 0x14f   : > { %2108 = vst [vmem:[%s3103_s29 + $0x310] sm:$0xff] %v1980_v51  ;;  %v1854_v59 = vadd.f32 %v3095_v24, %v1221_v57  ;;  %v1919_v60 = vmax.f32 %v1791_v54, 0.0 }
 0x150   : > { %v1983_v61 = vmax.f32 %v1855_v55, 0.0  ;;  %v1918_v62 = vmax.f32 %v1790_v58, 0.0  ;;  %v2513_v0 = vpop.f32.mrb[38].mxu0 }
 0x151   : > { %v1982_v63 = vmax.f32 %v1854_v59, 0.0  ;;  %v2609_v1 = vpop.f32.mrb[38].mxu1  ;;  %2047 = vst [vmem:[%s3103_s29 + $0x128] sm:$0xff] %v1919_v60  ;;  %v1793_v2 = vadd.f32 %v2513_v0, %v3095_v24  ;;  %v911_v4 = vpop.f32.mrb[39].mxu0 }
 0x152   : > { %2111 = vst [vmem:[%s3103_s29 + $0x328] sm:$0xff] %v1983_v61  ;;  %v1857_v3 = vadd.f32 %v2609_v1, %v3095_v24  ;;  %v1231_v5 = vpop.f32.mrb[39].mxu1  ;;  %2046 = vst [vmem:[%s3103_s29 + $0x120] sm:$0xff] %v1918_v62  ;;  %v1792_v6 = vadd.f32 %v3095_v24, %v911_v4 }
 0x153   : > { %2110 = vst [vmem:[%s3103_s29 + $0x320] sm:$0xff] %v1982_v63  ;;  %v1856_v7 = vadd.f32 %v3095_v24, %v1231_v5  ;;  %v1921_v8 = vmax.f32 %v1793_v2, 0.0 }
 0x154   : > { %v1985_v9 = vmax.f32 %v1857_v3, 0.0  ;;  %v1920_v10 = vmax.f32 %v1792_v6, 0.0  ;;  %v2516_v12 = vpop.f32.mrb[40].mxu0 }
 0x155   : > { %v1984_v11 = vmax.f32 %v1856_v7, 0.0  ;;  %v2612_v13 = vpop.f32.mrb[40].mxu1  ;;  %2049 = vst [vmem:[%s3103_s29 + $0x138] sm:$0xff] %v1921_v8  ;;  %v1795_v14 = vadd.f32 %v2516_v12, %v3095_v24  ;;  %v921_v16 = vpop.f32.mrb[41].mxu0 }
 0x156   : > { %2113 = vst [vmem:[%s3103_s29 + $0x338] sm:$0xff] %v1985_v9  ;;  %v1859_v15 = vadd.f32 %v2612_v13, %v3095_v24  ;;  %v1241_v17 = vpop.f32.mrb[41].mxu1  ;;  %2048 = vst [vmem:[%s3103_s29 + $0x130] sm:$0xff] %v1920_v10  ;;  %v1794_v18 = vadd.f32 %v3095_v24, %v921_v16 }
 0x157   : > { %2112 = vst [vmem:[%s3103_s29 + $0x330] sm:$0xff] %v1984_v11  ;;  %v1858_v19 = vadd.f32 %v3095_v24, %v1241_v17  ;;  %v1923_v20 = vmax.f32 %v1795_v14, 0.0 }
 0x158   : > { %v1987_v21 = vmax.f32 %v1859_v15, 0.0  ;;  %v1922_v22 = vmax.f32 %v1794_v18, 0.0  ;;  %v2519_v25 = vpop.f32.mrb[42].mxu0 }
 0x159   : > { %v1986_v23 = vmax.f32 %v1858_v19, 0.0  ;;  %v2615_v26 = vpop.f32.mrb[42].mxu1  ;;  %2051 = vst [vmem:[%s3103_s29 + $0x148] sm:$0xff] %v1923_v20  ;;  %v1797_v27 = vadd.f32 %v2519_v25, %v3095_v24  ;;  %v931_v29 = vpop.f32.mrb[43].mxu0 }
 0x15a   : > { %2115 = vst [vmem:[%s3103_s29 + $0x348] sm:$0xff] %v1987_v21  ;;  %v1861_v28 = vadd.f32 %v2615_v26, %v3095_v24  ;;  %v1251_v30 = vpop.f32.mrb[43].mxu1  ;;  %2050 = vst [vmem:[%s3103_s29 + $0x140] sm:$0xff] %v1922_v22  ;;  %v1796_v31 = vadd.f32 %v3095_v24, %v931_v29 }
 0x15b   : > { %2114 = vst [vmem:[%s3103_s29 + $0x340] sm:$0xff] %v1986_v23  ;;  %v1860_v32 = vadd.f32 %v3095_v24, %v1251_v30  ;;  %v1925_v33 = vmax.f32 %v1797_v27, 0.0 }
 0x15c   : > { %v1989_v34 = vmax.f32 %v1861_v28, 0.0  ;;  %v1924_v35 = vmax.f32 %v1796_v31, 0.0  ;;  %v2522_v37 = vpop.f32.mrb[44].mxu0 }
 0x15d   : > { %v1988_v36 = vmax.f32 %v1860_v32, 0.0  ;;  %v2618_v38 = vpop.f32.mrb[44].mxu1  ;;  %2053 = vst [vmem:[%s3103_s29 + $0x158] sm:$0xff] %v1925_v33  ;;  %v1799_v39 = vadd.f32 %v2522_v37, %v3095_v24  ;;  %v941_v41 = vpop.f32.mrb[45].mxu0 }
 0x15e   : > { %2117 = vst [vmem:[%s3103_s29 + $0x358] sm:$0xff] %v1989_v34  ;;  %v1863_v40 = vadd.f32 %v2618_v38, %v3095_v24  ;;  %v1261_v42 = vpop.f32.mrb[45].mxu1  ;;  %2052 = vst [vmem:[%s3103_s29 + $0x150] sm:$0xff] %v1924_v35  ;;  %v1798_v43 = vadd.f32 %v3095_v24, %v941_v41 }
 0x15f   : > { %2116 = vst [vmem:[%s3103_s29 + $0x350] sm:$0xff] %v1988_v36  ;;  %v1862_v44 = vadd.f32 %v3095_v24, %v1261_v42  ;;  %v1927_v45 = vmax.f32 %v1799_v39, 0.0 }
 0x160   : > { %v1991_v46 = vmax.f32 %v1863_v40, 0.0  ;;  %v1926_v47 = vmax.f32 %v1798_v43, 0.0  ;;  %v2525_v49 = vpop.f32.mrb[46].mxu0 }
 0x161   : > { %v1990_v48 = vmax.f32 %v1862_v44, 0.0  ;;  %v2621_v50 = vpop.f32.mrb[46].mxu1  ;;  %2055 = vst [vmem:[%s3103_s29 + $0x168] sm:$0xff] %v1927_v45  ;;  %v1801_v51 = vadd.f32 %v2525_v49, %v3095_v24  ;;  %v951_v53 = vpop.f32.mrb[47].mxu0 }
 0x162   : > { %2119 = vst [vmem:[%s3103_s29 + $0x368] sm:$0xff] %v1991_v46  ;;  %v1865_v52 = vadd.f32 %v2621_v50, %v3095_v24  ;;  %v1271_v54 = vpop.f32.mrb[47].mxu1  ;;  %2054 = vst [vmem:[%s3103_s29 + $0x160] sm:$0xff] %v1926_v47  ;;  %v1800_v55 = vadd.f32 %v3095_v24, %v951_v53 }
 0x163   : > { %2118 = vst [vmem:[%s3103_s29 + $0x360] sm:$0xff] %v1990_v48  ;;  %v1864_v56 = vadd.f32 %v3095_v24, %v1271_v54  ;;  %v1929_v57 = vmax.f32 %v1801_v51, 0.0 }
 0x164   : > { %v1993_v58 = vmax.f32 %v1865_v52, 0.0  ;;  %v1928_v59 = vmax.f32 %v1800_v55, 0.0  ;;  %v2528_v61 = vpop.f32.mrb[48].mxu0 }
 0x165   : > { %v1992_v60 = vmax.f32 %v1864_v56, 0.0  ;;  %v2624_v62 = vpop.f32.mrb[48].mxu1  ;;  %2057 = vst [vmem:[%s3103_s29 + $0x178] sm:$0xff] %v1929_v57  ;;  %v1803_v63 = vadd.f32 %v2528_v61, %v3095_v24  ;;  %v961_v1 = vpop.f32.mrb[49].mxu0 }
 0x166   : > { %2121 = vst [vmem:[%s3103_s29 + $0x378] sm:$0xff] %v1993_v58  ;;  %v1867_v0 = vadd.f32 %v2624_v62, %v3095_v24  ;;  %v1281_v2 = vpop.f32.mrb[49].mxu1  ;;  %2056 = vst [vmem:[%s3103_s29 + $0x170] sm:$0xff] %v1928_v59  ;;  %v1802_v3 = vadd.f32 %v3095_v24, %v961_v1 }
 0x167   : > { %2120 = vst [vmem:[%s3103_s29 + $0x370] sm:$0xff] %v1992_v60  ;;  %v1866_v4 = vadd.f32 %v3095_v24, %v1281_v2  ;;  %v1931_v5 = vmax.f32 %v1803_v63, 0.0 }
 0x168   : > { %v1995_v6 = vmax.f32 %v1867_v0, 0.0  ;;  %v1930_v7 = vmax.f32 %v1802_v3, 0.0  ;;  %v2531_v9 = vpop.f32.mrb[50].mxu0 }
 0x169   : > { %v1994_v8 = vmax.f32 %v1866_v4, 0.0  ;;  %v2627_v10 = vpop.f32.mrb[50].mxu1  ;;  %2059 = vst [vmem:[%s3103_s29 + $0x188] sm:$0xff] %v1931_v5  ;;  %v1805_v11 = vadd.f32 %v2531_v9, %v3095_v24  ;;  %v971_v13 = vpop.f32.mrb[51].mxu0 }
 0x16a   : > { %2123 = vst [vmem:[%s3103_s29 + $0x388] sm:$0xff] %v1995_v6  ;;  %v1869_v12 = vadd.f32 %v2627_v10, %v3095_v24  ;;  %v1291_v14 = vpop.f32.mrb[51].mxu1  ;;  %2058 = vst [vmem:[%s3103_s29 + $0x180] sm:$0xff] %v1930_v7  ;;  %v1804_v15 = vadd.f32 %v3095_v24, %v971_v13 }
 0x16b   : > { %2122 = vst [vmem:[%s3103_s29 + $0x380] sm:$0xff] %v1994_v8  ;;  %v1868_v16 = vadd.f32 %v3095_v24, %v1291_v14  ;;  %v1933_v17 = vmax.f32 %v1805_v11, 0.0 }
 0x16c   : > { %v1997_v18 = vmax.f32 %v1869_v12, 0.0  ;;  %v1932_v19 = vmax.f32 %v1804_v15, 0.0  ;;  %v2534_v21 = vpop.f32.mrb[52].mxu0 }
 0x16d   : > { %v1996_v20 = vmax.f32 %v1868_v16, 0.0  ;;  %v2630_v22 = vpop.f32.mrb[52].mxu1  ;;  %2061 = vst [vmem:[%s3103_s29 + $0x198] sm:$0xff] %v1933_v17  ;;  %v1807_v23 = vadd.f32 %v2534_v21, %v3095_v24  ;;  %v981_v26 = vpop.f32.mrb[53].mxu0 }
 0x16e   : > { %2125 = vst [vmem:[%s3103_s29 + $0x398] sm:$0xff] %v1997_v18  ;;  %v1871_v25 = vadd.f32 %v2630_v22, %v3095_v24  ;;  %v1301_v27 = vpop.f32.mrb[53].mxu1  ;;  %2060 = vst [vmem:[%s3103_s29 + $0x190] sm:$0xff] %v1932_v19  ;;  %v1806_v28 = vadd.f32 %v3095_v24, %v981_v26 }
 0x16f   : > { %2124 = vst [vmem:[%s3103_s29 + $0x390] sm:$0xff] %v1996_v20  ;;  %v1870_v29 = vadd.f32 %v3095_v24, %v1301_v27  ;;  %v1935_v30 = vmax.f32 %v1807_v23, 0.0 }
 0x170   : > { %v1999_v31 = vmax.f32 %v1871_v25, 0.0  ;;  %v1934_v32 = vmax.f32 %v1806_v28, 0.0  ;;  %v2537_v34 = vpop.f32.mrb[54].mxu0 }
 0x171   : > { %v1998_v33 = vmax.f32 %v1870_v29, 0.0  ;;  %v2633_v35 = vpop.f32.mrb[54].mxu1  ;;  %2063 = vst [vmem:[%s3103_s29 + $0x1a8] sm:$0xff] %v1935_v30  ;;  %v1809_v36 = vadd.f32 %v2537_v34, %v3095_v24  ;;  %v991_v38 = vpop.f32.mrb[55].mxu0 }
 0x172   : > { %2127 = vst [vmem:[%s3103_s29 + $0x3a8] sm:$0xff] %v1999_v31  ;;  %v1873_v37 = vadd.f32 %v2633_v35, %v3095_v24  ;;  %v1311_v39 = vpop.f32.mrb[55].mxu1  ;;  %2062 = vst [vmem:[%s3103_s29 + $0x1a0] sm:$0xff] %v1934_v32  ;;  %v1808_v40 = vadd.f32 %v3095_v24, %v991_v38 }
 0x173   : > { %2126 = vst [vmem:[%s3103_s29 + $0x3a0] sm:$0xff] %v1998_v33  ;;  %v1872_v41 = vadd.f32 %v3095_v24, %v1311_v39  ;;  %v1937_v42 = vmax.f32 %v1809_v36, 0.0 }
 0x174   : > { %v2001_v43 = vmax.f32 %v1873_v37, 0.0  ;;  %v1936_v44 = vmax.f32 %v1808_v40, 0.0  ;;  %v2540_v46 = vpop.f32.mrb[56].mxu0 }
 0x175   : > { %v2000_v45 = vmax.f32 %v1872_v41, 0.0  ;;  %v2636_v47 = vpop.f32.mrb[56].mxu1  ;;  %2065 = vst [vmem:[%s3103_s29 + $0x1b8] sm:$0xff] %v1937_v42  ;;  %v1811_v48 = vadd.f32 %v2540_v46, %v3095_v24  ;;  %v1001_v50 = vpop.f32.mrb[57].mxu0 }
 0x176   : > { %2129 = vst [vmem:[%s3103_s29 + $0x3b8] sm:$0xff] %v2001_v43  ;;  %v1875_v49 = vadd.f32 %v2636_v47, %v3095_v24  ;;  %v1321_v51 = vpop.f32.mrb[57].mxu1  ;;  %2064 = vst [vmem:[%s3103_s29 + $0x1b0] sm:$0xff] %v1936_v44  ;;  %v1810_v52 = vadd.f32 %v3095_v24, %v1001_v50 }
 0x177   : > { %2128 = vst [vmem:[%s3103_s29 + $0x3b0] sm:$0xff] %v2000_v45  ;;  %v1874_v53 = vadd.f32 %v3095_v24, %v1321_v51  ;;  %v1939_v54 = vmax.f32 %v1811_v48, 0.0 }
 0x178   : > { %v2003_v55 = vmax.f32 %v1875_v49, 0.0  ;;  %v1938_v56 = vmax.f32 %v1810_v52, 0.0  ;;  %v2543_v58 = vpop.f32.mrb[58].mxu0 }
 0x179   : > { %v2002_v57 = vmax.f32 %v1874_v53, 0.0  ;;  %v2639_v59 = vpop.f32.mrb[58].mxu1  ;;  %2067 = vst [vmem:[%s3103_s29 + $0x1c8] sm:$0xff] %v1939_v54  ;;  %v1813_v60 = vadd.f32 %v2543_v58, %v3095_v24  ;;  %v1011_v62 = vpop.f32.mrb[59].mxu0 }
 0x17a   : > { %2131 = vst [vmem:[%s3103_s29 + $0x3c8] sm:$0xff] %v2003_v55  ;;  %v1877_v61 = vadd.f32 %v2639_v59, %v3095_v24  ;;  %v1331_v63 = vpop.f32.mrb[59].mxu1  ;;  %2066 = vst [vmem:[%s3103_s29 + $0x1c0] sm:$0xff] %v1938_v56  ;;  %v1812_v0 = vadd.f32 %v3095_v24, %v1011_v62 }
 0x17b   : > { %2130 = vst [vmem:[%s3103_s29 + $0x3c0] sm:$0xff] %v2002_v57  ;;  %v1876_v1 = vadd.f32 %v3095_v24, %v1331_v63  ;;  %v1941_v2 = vmax.f32 %v1813_v60, 0.0 }
 0x17c   : > { %v2005_v3 = vmax.f32 %v1877_v61, 0.0  ;;  %v1940_v4 = vmax.f32 %v1812_v0, 0.0  ;;  %v2546_v6 = vpop.f32.mrb[60].mxu0 }
 0x17d   : > { %v2004_v5 = vmax.f32 %v1876_v1, 0.0  ;;  %v2642_v7 = vpop.f32.mrb[60].mxu1  ;;  %2069 = vst [vmem:[%s3103_s29 + $0x1d8] sm:$0xff] %v1941_v2  ;;  %v1815_v8 = vadd.f32 %v2546_v6, %v3095_v24  ;;  %v1021_v10 = vpop.f32.mrb[61].mxu0 }
 0x17e   : > { %2133 = vst [vmem:[%s3103_s29 + $0x3d8] sm:$0xff] %v2005_v3  ;;  %v1879_v9 = vadd.f32 %v2642_v7, %v3095_v24  ;;  %v1341_v11 = vpop.f32.mrb[61].mxu1  ;;  %2068 = vst [vmem:[%s3103_s29 + $0x1d0] sm:$0xff] %v1940_v4  ;;  %v1814_v12 = vadd.f32 %v3095_v24, %v1021_v10 }
 0x17f   : > { %2132 = vst [vmem:[%s3103_s29 + $0x3d0] sm:$0xff] %v2004_v5  ;;  %v1878_v13 = vadd.f32 %v3095_v24, %v1341_v11  ;;  %v1943_v14 = vmax.f32 %v1815_v8, 0.0 }
 0x180   : > { %v2007_v15 = vmax.f32 %v1879_v9, 0.0  ;;  %v1942_v16 = vmax.f32 %v1814_v12, 0.0  ;;  %v2549_v18 = vpop.f32.mrb[62].mxu0 }
 0x181   : > { %v2006_v17 = vmax.f32 %v1878_v13, 0.0  ;;  %v2645_v19 = vpop.f32.mrb[62].mxu1  ;;  %2071 = vst [vmem:[%s3103_s29 + $0x1e8] sm:$0xff] %v1943_v14  ;;  %v1817_v20 = vadd.f32 %v2549_v18, %v3095_v24  ;;  %v1031_v22 = vpop.f32.mrb[63].mxu0 }
 0x182   : > { %2135 = vst [vmem:[%s3103_s29 + $0x3e8] sm:$0xff] %v2007_v15  ;;  %v1881_v21 = vadd.f32 %v2645_v19, %v3095_v24  ;;  %v1351_v23 = vpop.f32.mrb[63].mxu1  ;;  %2070 = vst [vmem:[%s3103_s29 + $0x1e0] sm:$0xff] %v1942_v16  ;;  %v1816_v25 = vadd.f32 %v3095_v24, %v1031_v22 }
 0x183   : > { %2134 = vst [vmem:[%s3103_s29 + $0x3e0] sm:$0xff] %v2006_v17  ;;  %v1880_v26 = vadd.f32 %v3095_v24, %v1351_v23  ;;  %v1945_v27 = vmax.f32 %v1817_v20, 0.0 }
 0x184   : > { %v2009_v28 = vmax.f32 %v1881_v21, 0.0  ;;  %v1944_v29 = vmax.f32 %v1816_v25, 0.0 }
 0x185   : > { %v2008_v30 = vmax.f32 %v1880_v26, 0.0  ;;  %2073 = vst [vmem:[%s3103_s29 + $0x1f8] sm:$0xff] %v1945_v27 }
 0x186   : > { %2137 = vst [vmem:[%s3103_s29 + $0x3f8] sm:$0xff] %v2009_v28  ;;  %2072 = vst [vmem:[%s3103_s29 + $0x1f0] sm:$0xff] %v1944_v29 }
 0x187   : > { %2136 = vst [vmem:[%s3103_s29 + $0x3f0] sm:$0xff] %v2008_v30 }
 0x188   : > { %2764 = shalt.err (!%p2761_p5)
}
 0x189   : > { %s2765_s26 = scalar_lea.hbm %s3358_s10, 16384  ;;  %s2769_s30 = scalar_lea.hbm %s3417_s3, 557056 }
 0x18a   : > { %p2766_p6 = scmp.ne.s32.totalorder %s3358_s10, %s2765_s26  ;;  %p2770_p10 = scmp.lt.u32.totalorder %s3358_s10, %s3417_s3 }
 0x18b   : > { %p2771_p11 = scmp.lt.u32.totalorder %s2769_s30, %s2765_s26  ;;  %p2773_p13 = scmp.lt.u32.totalorder %s2765_s26, %s3358_s10 }
 0x18c   : > { %p2767_p7 = pnand %p2766_p6, %p2894_p4 }
 0x18d   : > { %p2772_p12 = por %p2771_p11, %p2770_p10 }
 0x18e   : > { %p2768_p9 = pneg %p2767_p7 }
 0x18f   : > { %p2774_p0 = por %p2773_p13, %p2772_p12 }
 0x191   : > { %p2775_p1 = pnand %p2774_p0, %p2768_p9 }
 0x193   : > { %2778 = shalt.err (!%p2775_p1)
}
 0x194   : > { %s2832_s6 = smov 128   ;;  %s2833_s29 = smov 8  }
 0x195   : > { %2694 = dma.vmem_to_hbm [thread:$0]  (%p2894_p4), %s3360_s8, 16384, %s3358_s10, %s3368_s11, %s2832_s6, %s2832_s6, %s2833_s29  }
 0x196 PF: > { %p2700_p2 = scmp.ge.s32.totalorder %s2829_s17, 2  ;;  %s2168_s7 = sand.u32 1, %s2809_s12  }
 0x197   : > { %s2169_s15 = scalar_lea.sflag [#allocation4], %s2168_s7 }
 0x198   : > { %p2697_p3 = pnand %p2700_p2, %p2901_p8 }
 0x19a   : > { %2804 = dma.done.wait (!%p2697_p3), %s2169_s15, 16384  }
 0x19b   : > { %2806 = vsyncadd (!%p2697_p3), %s2169_s15, 4294950912  ;;  %s16_s17 = sadd.s32 1, %s2829_s17   ;;  %s3420_s12 = smov %s2813_s13 }
 0x19c   : > { %p13_p5 = scmp.ge.s32.totalorder %s16_s17, 36   ;;  %s3421_s13 = smov %s2817_s14 }
 0x19d   : > { %s3422_s14 = smov %s2907_s25  ;;  %s3423_s15 = smov %s2825_s16 }
 0x19e   : > { %s3424_s16 = smov %s3426_s20  ;;  %15 = sbr.rel (!%p13_p5) target bundleno = 4 (0x4), region = 81 }
 0x1a5   :  { %2174 = vsyncpa [#allocation4], 1 }
 0x1a6   :  { %2176 = vsyncpa [#allocation4 + $0x1], 1 }

// kernel: siamese_forward.7
= control target key start
LH: loop header
LB: loop body
LE: loop exit
PB: predicated region body
PF: predicated region fallthrough
CT: control target
= control target key end

     0   :  { %s981_s15 = smov 0   ;;  %s1382_s0 = inlined_call_operand.vmem [shape: f32[4,46,1472], index: 0, kind: input, shape index: {}]   ;;  %s1383_s1 = inlined_call_operand.vmem [shape: f32[4,46,1472], index: 1, kind: input, shape index: {}]   ;;  %s1384_s2 = inlined_call_operand.vmem [shape: f32[4,46,1472], index: 2, kind: input, shape index: {}]   ;;  %s1385_s3 = inlined_call_operand.vmem [shape: f32[4,46,1472], index: 3, kind: input, shape index: {}]   ;;  %s1386_s4 = inlined_call_operand.vmem [shape: f32[4,46,1472], index: 4, kind: output, shape index: {}]  }
   0x1 LB: > { %s927_s16 = sadd.s32 4294967295, %s954_s15   ;;  %p931_p0 = scmp.ge.s32.totalorder %s954_s15, 1  ;;  %s954_s15 = sphi %s981_s15, %s14_s15  }
   0x2   : > { %p192_p1 = scmp.lt.s32.totalorder %s954_s15, 5 }
   0x4   : > { %p193_p2 = pnand %p931_p0, %p192_p1 }
   0x5   : > { %p233_p3 = scmp.lt.s32.totalorder (!%p193_p2), %s927_s16, 3  ;;  %vm773_vm0 = vcmask (!%p193_p2), 523264   ;;  %vm834_vm1 = vcmask (!%p193_p2), 521216  }
   0x6   : > { %196 = sbr.rel (%p193_p2) target bundleno = 129 (0x81), region = 36 }
   0xd   : > { %s1388_s16 = smov (!%p233_p3, %s927_s16), 3 }
   0xe   : > { %s939_s17 = smul.u32 576, %s1388_s16 }
  0x10   : > { %s992_s20 = scalar_lea.vmem %s1382_s0, %s939_s17  ;;  %s997_s23 = scalar_lea.vmem %s1383_s1, %s939_s17 }
  0x11   : > { %s1002_s26 = scalar_lea.vmem %s1384_s2, %s939_s17  ;;  %s1007_s29 = scalar_lea.vmem %s1385_s3, %s939_s17  ;;  %v258_v0 = vld [vmem:[%s992_s20] sm:$0xff]  ;;  %v259_v2 = vld [vmem:[%s992_s20 + $0x8] sm:$0xff]  ;;  %v260_v11 = vld [vmem:[%s992_s20 + $0x10] sm:$0xff] }
  0x12   : > { %v330_v1 = vld [vmem:[%s997_s23] sm:$0xff]  ;;  %v331_v6 = vld [vmem:[%s997_s23 + $0x8] sm:$0xff]  ;;  %s1021_s6 = scalar_lea.vmem %s1386_s4, %s939_s17  ;;  %v332_v13 = vld [vmem:[%s997_s23 + $0x10] sm:$0xff] }
  0x13   : > { %v402_v3 = vmax.f32 %v258_v0, %v330_v1  ;;  %v474_v4 = vld [vmem:[%s1002_s26] sm:$0xff]  ;;  %v403_v8 = vmax.f32 %v259_v2, %v331_v6  ;;  %v475_v9 = vld [vmem:[%s1002_s26 + $0x8] sm:$0xff]  ;;  %v476_v14 = vld [vmem:[%s1002_s26 + $0x10] sm:$0xff]  ;;  %v404_v17 = vmax.f32 %v260_v11, %v332_v13 }
  0x14   : > { %v546_v5 = vld [vmem:[%s1007_s29] sm:$0xff]  ;;  %v547_v10 = vld [vmem:[%s1007_s29 + $0x8] sm:$0xff]  ;;  %v548_v15 = vld [vmem:[%s1007_s29 + $0x10] sm:$0xff] }
  0x15   : > { %v618_v7 = vmax.f32 %v474_v4, %v546_v5  ;;  %v619_v12 = vmax.f32 %v475_v9, %v547_v10  ;;  %v620_v18 = vmax.f32 %v476_v14, %v548_v15  ;;  %v261_v19 = vld [vmem:[%s992_s20 + $0x18] sm:$0xff]  ;;  %v262_v25 = vld [vmem:[%s992_s20 + $0x20] sm:$0xff]  ;;  %v263_v32 = vld [vmem:[%s992_s20 + $0x28] sm:$0xff] }
  0x16   : > { %v333_v20 = vld [vmem:[%s997_s23 + $0x18] sm:$0xff]  ;;  %v334_v26 = vld [vmem:[%s997_s23 + $0x20] sm:$0xff]  ;;  %v335_v34 = vld [vmem:[%s997_s23 + $0x28] sm:$0xff] }
  0x17   : > { %v690_v16 = vmax.f32 %v402_v3, %v618_v7  ;;  %v477_v21 = vld [vmem:[%s1002_s26 + $0x18] sm:$0xff]  ;;  %v691_v22 = vmax.f32 %v403_v8, %v619_v12  ;;  %v405_v23 = vmax.f32 %v261_v19, %v333_v20  ;;  %v692_v27 = vmax.f32 %v404_v17, %v620_v18  ;;  %v478_v30 = vld [vmem:[%s1002_s26 + $0x20] sm:$0xff]  ;;  %v479_v35 = vld [vmem:[%s1002_s26 + $0x28] sm:$0xff] }
  0x18   : > { %v549_v24 = vld [vmem:[%s1007_s29 + $0x18] sm:$0xff]  ;;  %v406_v29 = vmax.f32 %v262_v25, %v334_v26  ;;  %v550_v31 = vld [vmem:[%s1007_s29 + $0x20] sm:$0xff]  ;;  %v551_v36 = vld [vmem:[%s1007_s29 + $0x28] sm:$0xff]  ;;  %v407_v38 = vmax.f32 %v263_v32, %v335_v34 }
  0x19   : > { %762 = vst [vmem:[%s1021_s6] sm:$0xff] %v690_v16  ;;  %v621_v28 = vmax.f32 %v477_v21, %v549_v24  ;;  %763 = vst [vmem:[%s1021_s6 + $0x8] sm:$0xff] %v691_v22  ;;  %v622_v33 = vmax.f32 %v478_v30, %v550_v31  ;;  %v623_v39 = vmax.f32 %v479_v35, %v551_v36  ;;  %v264_v40 = vld [vmem:[%s992_s20 + $0x30] sm:$0xff]  ;;  %v265_v46 = vld [vmem:[%s992_s20 + $0x38] sm:$0xff] }
  0x1a   : > { %764 = vst [vmem:[%s1021_s6 + $0x10] sm:$0xff] %v692_v27  ;;  %v336_v41 = vld [vmem:[%s997_s23 + $0x30] sm:$0xff]  ;;  %v337_v47 = vld [vmem:[%s997_s23 + $0x38] sm:$0xff]  ;;  %v266_v53 = vld [vmem:[%s992_s20 + $0x40] sm:$0xff] }
  0x1b   : > { %v693_v37 = vmax.f32 %v405_v23, %v621_v28  ;;  %v480_v42 = vld [vmem:[%s1002_s26 + $0x30] sm:$0xff]  ;;  %v694_v43 = vmax.f32 %v406_v29, %v622_v33  ;;  %v408_v44 = vmax.f32 %v264_v40, %v336_v41  ;;  %v695_v48 = vmax.f32 %v407_v38, %v623_v39  ;;  %v481_v51 = vld [vmem:[%s1002_s26 + $0x38] sm:$0xff]  ;;  %v338_v55 = vld [vmem:[%s997_s23 + $0x40] sm:$0xff] }
  0x1c   : > { %v552_v45 = vld [vmem:[%s1007_s29 + $0x30] sm:$0xff]  ;;  %v409_v50 = vmax.f32 %v265_v46, %v337_v47  ;;  %v553_v52 = vld [vmem:[%s1007_s29 + $0x38] sm:$0xff]  ;;  %v482_v56 = vld [vmem:[%s1002_s26 + $0x40] sm:$0xff]  ;;  %v410_v59 = vmax.f32 %v266_v53, %v338_v55 }
  0x1d   : > { %765 = vst [vmem:[%s1021_s6 + $0x18] sm:$0xff] %v693_v37  ;;  %v624_v49 = vmax.f32 %v480_v42, %v552_v45  ;;  %766 = vst [vmem:[%s1021_s6 + $0x20] sm:$0xff] %v694_v43  ;;  %v625_v54 = vmax.f32 %v481_v51, %v553_v52  ;;  %v554_v57 = vld [vmem:[%s1007_s29 + $0x40] sm:$0xff]  ;;  %v267_v61 = vld [vmem:[%s992_s20 + $0x48] sm:$0xff] }
  0x1e   : > { %767 = vst [vmem:[%s1021_s6 + $0x28] sm:$0xff] %v695_v48  ;;  %v626_v60 = vmax.f32 %v482_v56, %v554_v57  ;;  %v339_v62 = vld [vmem:[%s997_s23 + $0x48] sm:$0xff]  ;;  %v268_v3 = vld [vmem:[%s992_s20 + $0x50] sm:$0xff]  ;;  %v269_v10 = vld [vmem:[%s992_s20 + $0x58] sm:$0xff] }
  0x1f   : > { %v696_v58 = vmax.f32 %v408_v44, %v624_v49  ;;  %v483_v63 = vld [vmem:[%s1002_s26 + $0x48] sm:$0xff]  ;;  %v697_v0 = vmax.f32 %v409_v50, %v625_v54  ;;  %v411_v1 = vmax.f32 %v267_v61, %v339_v62  ;;  %v340_v4 = vld [vmem:[%s997_s23 + $0x50] sm:$0xff]  ;;  %v341_v12 = vld [vmem:[%s997_s23 + $0x58] sm:$0xff] }
  0x20   : > { %v555_v2 = vld [vmem:[%s1007_s29 + $0x48] sm:$0xff]  ;;  %v698_v5 = vmax.f32 %v410_v59, %v626_v60  ;;  %v412_v7 = vmax.f32 %v268_v3, %v340_v4  ;;  %v484_v8 = vld [vmem:[%s1002_s26 + $0x50] sm:$0xff]  ;;  %v485_v13 = vld [vmem:[%s1002_s26 + $0x58] sm:$0xff]  ;;  %v413_v16 = vmax.f32 %v269_v10, %v341_v12 }
  0x21   : > { %768 = vst [vmem:[%s1021_s6 + $0x30] sm:$0xff] %v696_v58  ;;  %v627_v6 = vmax.f32 %v483_v63, %v555_v2  ;;  %v556_v9 = vld [vmem:[%s1007_s29 + $0x50] sm:$0xff]  ;;  %769 = vst [vmem:[%s1021_s6 + $0x38] sm:$0xff] %v697_v0  ;;  %v557_v14 = vld [vmem:[%s1007_s29 + $0x58] sm:$0xff] }
  0x22   : > { %v628_v11 = vmax.f32 %v484_v8, %v556_v9  ;;  %770 = vst [vmem:[%s1021_s6 + $0x40] sm:$0xff] %v698_v5  ;;  %v629_v17 = vmax.f32 %v485_v13, %v557_v14  ;;  %v270_v18 = vld [vmem:[%s992_s20 + $0x60] sm:$0xff]  ;;  %v271_v24 = vld [vmem:[%s992_s20 + $0x68] sm:$0xff]  ;;  %v272_v31 = vld [vmem:[%s992_s20 + $0x70] sm:$0xff] }
  0x23   : > { %v699_v15 = vmax.f32 %v411_v1, %v627_v6  ;;  %v342_v19 = vld [vmem:[%s997_s23 + $0x60] sm:$0xff]  ;;  %v343_v25 = vld [vmem:[%s997_s23 + $0x68] sm:$0xff]  ;;  %v344_v33 = vld [vmem:[%s997_s23 + $0x70] sm:$0xff] }
  0x24   : > { %v486_v20 = vld [vmem:[%s1002_s26 + $0x60] sm:$0xff]  ;;  %v700_v21 = vmax.f32 %v412_v7, %v628_v11  ;;  %v414_v22 = vmax.f32 %v270_v18, %v342_v19  ;;  %v701_v26 = vmax.f32 %v413_v16, %v629_v17  ;;  %v415_v28 = vmax.f32 %v271_v24, %v343_v25  ;;  %v487_v29 = vld [vmem:[%s1002_s26 + $0x68] sm:$0xff]  ;;  %v488_v34 = vld [vmem:[%s1002_s26 + $0x70] sm:$0xff] }
  0x25   : > { %v558_v23 = vld [vmem:[%s1007_s29 + $0x60] sm:$0xff]  ;;  %771 = vst [vmem:[%s1021_s6 + $0x48] sm:$0xff] %v699_v15  ;;  %v559_v30 = vld [vmem:[%s1007_s29 + $0x68] sm:$0xff]  ;;  %v560_v35 = vld [vmem:[%s1007_s29 + $0x70] sm:$0xff]  ;;  %v416_v37 = vmax.f32 %v272_v31, %v344_v33 }
  0x26   : > { %v630_v27 = vmax.f32 %v486_v20, %v558_v23  ;;  %772 = vst [vmem:[%s1021_s6 + $0x50] sm:$0xff] %v700_v21  ;;  %v631_v32 = vmax.f32 %v487_v29, %v559_v30  ;;  %774 = vst.msk [vmem:[%s1021_s6 + $0x58] sm:$0xff] %vm773_vm0, %v701_v26  ;;  %v632_v38 = vmax.f32 %v488_v34, %v560_v35  ;;  %v273_v39 = vld [vmem:[%s992_s20 + $0x78] sm:$0xff]  ;;  %v274_v45 = vld [vmem:[%s992_s20 + $0x80] sm:$0xff] }
  0x27   : > { %v345_v40 = vld [vmem:[%s997_s23 + $0x78] sm:$0xff]  ;;  %v346_v46 = vld [vmem:[%s997_s23 + $0x80] sm:$0xff]  ;;  %v275_v52 = vld [vmem:[%s992_s20 + $0x88] sm:$0xff] }
  0x28   : > { %v702_v36 = vmax.f32 %v414_v22, %v630_v27  ;;  %v489_v41 = vld [vmem:[%s1002_s26 + $0x78] sm:$0xff]  ;;  %v703_v42 = vmax.f32 %v415_v28, %v631_v32  ;;  %v417_v43 = vmax.f32 %v273_v39, %v345_v40  ;;  %v704_v47 = vmax.f32 %v416_v37, %v632_v38  ;;  %v490_v50 = vld [vmem:[%s1002_s26 + $0x80] sm:$0xff]  ;;  %v347_v54 = vld [vmem:[%s997_s23 + $0x88] sm:$0xff] }
  0x29   : > { %v561_v44 = vld [vmem:[%s1007_s29 + $0x78] sm:$0xff]  ;;  %v418_v49 = vmax.f32 %v274_v45, %v346_v46  ;;  %v562_v51 = vld [vmem:[%s1007_s29 + $0x80] sm:$0xff]  ;;  %v491_v55 = vld [vmem:[%s1002_s26 + $0x88] sm:$0xff]  ;;  %v419_v58 = vmax.f32 %v275_v52, %v347_v54 }
  0x2a   : > { %775 = vst [vmem:[%s1021_s6 + $0x60] sm:$0xff] %v702_v36  ;;  %v633_v48 = vmax.f32 %v489_v41, %v561_v44  ;;  %776 = vst [vmem:[%s1021_s6 + $0x68] sm:$0xff] %v703_v42  ;;  %v634_v53 = vmax.f32 %v490_v50, %v562_v51  ;;  %v563_v56 = vld [vmem:[%s1007_s29 + $0x88] sm:$0xff]  ;;  %v276_v60 = vld [vmem:[%s992_s20 + $0x90] sm:$0xff] }
  0x2b   : > { %777 = vst [vmem:[%s1021_s6 + $0x70] sm:$0xff] %v704_v47  ;;  %v635_v59 = vmax.f32 %v491_v55, %v563_v56  ;;  %v348_v61 = vld [vmem:[%s997_s23 + $0x90] sm:$0xff]  ;;  %v277_v2 = vld [vmem:[%s992_s20 + $0x98] sm:$0xff]  ;;  %v278_v9 = vld [vmem:[%s992_s20 + $0xa0] sm:$0xff] }
  0x2c   : > { %v705_v57 = vmax.f32 %v417_v43, %v633_v48  ;;  %v492_v62 = vld [vmem:[%s1002_s26 + $0x90] sm:$0xff]  ;;  %v706_v63 = vmax.f32 %v418_v49, %v634_v53  ;;  %v420_v0 = vmax.f32 %v276_v60, %v348_v61  ;;  %v349_v3 = vld [vmem:[%s997_s23 + $0x98] sm:$0xff]  ;;  %v350_v11 = vld [vmem:[%s997_s23 + $0xa0] sm:$0xff] }
  0x2d   : > { %v564_v1 = vld [vmem:[%s1007_s29 + $0x90] sm:$0xff]  ;;  %v707_v4 = vmax.f32 %v419_v58, %v635_v59  ;;  %v421_v6 = vmax.f32 %v277_v2, %v349_v3  ;;  %v493_v7 = vld [vmem:[%s1002_s26 + $0x98] sm:$0xff]  ;;  %v494_v12 = vld [vmem:[%s1002_s26 + $0xa0] sm:$0xff]  ;;  %v422_v15 = vmax.f32 %v278_v9, %v350_v11 }
  0x2e   : > { %778 = vst [vmem:[%s1021_s6 + $0x78] sm:$0xff] %v705_v57  ;;  %v636_v5 = vmax.f32 %v492_v62, %v564_v1  ;;  %v565_v8 = vld [vmem:[%s1007_s29 + $0x98] sm:$0xff]  ;;  %779 = vst [vmem:[%s1021_s6 + $0x80] sm:$0xff] %v706_v63  ;;  %v566_v13 = vld [vmem:[%s1007_s29 + $0xa0] sm:$0xff] }
  0x2f   : > { %v637_v10 = vmax.f32 %v493_v7, %v565_v8  ;;  %780 = vst [vmem:[%s1021_s6 + $0x88] sm:$0xff] %v707_v4  ;;  %v638_v16 = vmax.f32 %v494_v12, %v566_v13  ;;  %v279_v17 = vld [vmem:[%s992_s20 + $0xa8] sm:$0xff]  ;;  %v280_v23 = vld [vmem:[%s992_s20 + $0xb0] sm:$0xff]  ;;  %v281_v30 = vld [vmem:[%s992_s20 + $0xb8] sm:$0xff] }
  0x30   : > { %v708_v14 = vmax.f32 %v420_v0, %v636_v5  ;;  %v351_v18 = vld [vmem:[%s997_s23 + $0xa8] sm:$0xff]  ;;  %v352_v24 = vld [vmem:[%s997_s23 + $0xb0] sm:$0xff]  ;;  %v353_v32 = vld [vmem:[%s997_s23 + $0xb8] sm:$0xff] }
  0x31   : > { %v495_v19 = vld [vmem:[%s1002_s26 + $0xa8] sm:$0xff]  ;;  %v709_v20 = vmax.f32 %v421_v6, %v637_v10  ;;  %v423_v21 = vmax.f32 %v279_v17, %v351_v18  ;;  %v710_v25 = vmax.f32 %v422_v15, %v638_v16  ;;  %v424_v27 = vmax.f32 %v280_v23, %v352_v24  ;;  %v496_v28 = vld [vmem:[%s1002_s26 + $0xb0] sm:$0xff]  ;;  %v497_v33 = vld [vmem:[%s1002_s26 + $0xb8] sm:$0xff] }
  0x32   : > { %v567_v22 = vld [vmem:[%s1007_s29 + $0xa8] sm:$0xff]  ;;  %781 = vst [vmem:[%s1021_s6 + $0x90] sm:$0xff] %v708_v14  ;;  %v568_v29 = vld [vmem:[%s1007_s29 + $0xb0] sm:$0xff]  ;;  %v569_v34 = vld [vmem:[%s1007_s29 + $0xb8] sm:$0xff]  ;;  %v425_v36 = vmax.f32 %v281_v30, %v353_v32 }
  0x33   : > { %v639_v26 = vmax.f32 %v495_v19, %v567_v22  ;;  %782 = vst [vmem:[%s1021_s6 + $0x98] sm:$0xff] %v709_v20  ;;  %v640_v31 = vmax.f32 %v496_v28, %v568_v29  ;;  %783 = vst [vmem:[%s1021_s6 + $0xa0] sm:$0xff] %v710_v25  ;;  %v641_v37 = vmax.f32 %v497_v33, %v569_v34  ;;  %v282_v38 = vld [vmem:[%s992_s20 + $0xc0] sm:$0xff]  ;;  %v283_v44 = vld [vmem:[%s992_s20 + $0xc8] sm:$0xff] }
  0x34   : > { %v354_v39 = vld [vmem:[%s997_s23 + $0xc0] sm:$0xff]  ;;  %v355_v45 = vld [vmem:[%s997_s23 + $0xc8] sm:$0xff]  ;;  %v284_v51 = vld [vmem:[%s992_s20 + $0xd0] sm:$0xff] }
  0x35   : > { %v711_v35 = vmax.f32 %v423_v21, %v639_v26  ;;  %v498_v40 = vld [vmem:[%s1002_s26 + $0xc0] sm:$0xff]  ;;  %v712_v41 = vmax.f32 %v424_v27, %v640_v31  ;;  %v426_v42 = vmax.f32 %v282_v38, %v354_v39  ;;  %v713_v46 = vmax.f32 %v425_v36, %v641_v37  ;;  %v499_v49 = vld [vmem:[%s1002_s26 + $0xc8] sm:$0xff]  ;;  %v356_v53 = vld [vmem:[%s997_s23 + $0xd0] sm:$0xff] }
  0x36   : > { %v570_v43 = vld [vmem:[%s1007_s29 + $0xc0] sm:$0xff]  ;;  %v427_v48 = vmax.f32 %v283_v44, %v355_v45  ;;  %v571_v50 = vld [vmem:[%s1007_s29 + $0xc8] sm:$0xff]  ;;  %v500_v54 = vld [vmem:[%s1002_s26 + $0xd0] sm:$0xff]  ;;  %v428_v57 = vmax.f32 %v284_v51, %v356_v53 }
  0x37   : > { %784 = vst [vmem:[%s1021_s6 + $0xa8] sm:$0xff] %v711_v35  ;;  %v642_v47 = vmax.f32 %v498_v40, %v570_v43  ;;  %785 = vst [vmem:[%s1021_s6 + $0xb0] sm:$0xff] %v712_v41  ;;  %v643_v52 = vmax.f32 %v499_v49, %v571_v50  ;;  %v572_v55 = vld [vmem:[%s1007_s29 + $0xd0] sm:$0xff]  ;;  %v285_v59 = vld [vmem:[%s992_s20 + $0xd8] sm:$0xff] }
  0x38   : > { %786 = vst.msk [vmem:[%s1021_s6 + $0xb8] sm:$0xff] %vm773_vm0, %v713_v46  ;;  %v644_v58 = vmax.f32 %v500_v54, %v572_v55  ;;  %v357_v60 = vld [vmem:[%s997_s23 + $0xd8] sm:$0xff]  ;;  %v286_v1 = vld [vmem:[%s992_s20 + $0xe0] sm:$0xff]  ;;  %v287_v8 = vld [vmem:[%s992_s20 + $0xe8] sm:$0xff] }
  0x39   : > { %v714_v56 = vmax.f32 %v426_v42, %v642_v47  ;;  %v501_v61 = vld [vmem:[%s1002_s26 + $0xd8] sm:$0xff]  ;;  %v715_v62 = vmax.f32 %v427_v48, %v643_v52  ;;  %v429_v63 = vmax.f32 %v285_v59, %v357_v60  ;;  %v358_v2 = vld [vmem:[%s997_s23 + $0xe0] sm:$0xff]  ;;  %v359_v10 = vld [vmem:[%s997_s23 + $0xe8] sm:$0xff] }
  0x3a   : > { %v573_v0 = vld [vmem:[%s1007_s29 + $0xd8] sm:$0xff]  ;;  %v716_v3 = vmax.f32 %v428_v57, %v644_v58  ;;  %v430_v5 = vmax.f32 %v286_v1, %v358_v2  ;;  %v502_v6 = vld [vmem:[%s1002_s26 + $0xe0] sm:$0xff]  ;;  %v503_v11 = vld [vmem:[%s1002_s26 + $0xe8] sm:$0xff]  ;;  %v431_v14 = vmax.f32 %v287_v8, %v359_v10 }
  0x3b   : > { %787 = vst [vmem:[%s1021_s6 + $0xc0] sm:$0xff] %v714_v56  ;;  %v645_v4 = vmax.f32 %v501_v61, %v573_v0  ;;  %v574_v7 = vld [vmem:[%s1007_s29 + $0xe0] sm:$0xff]  ;;  %788 = vst [vmem:[%s1021_s6 + $0xc8] sm:$0xff] %v715_v62  ;;  %v575_v12 = vld [vmem:[%s1007_s29 + $0xe8] sm:$0xff] }
  0x3c   : > { %v646_v9 = vmax.f32 %v502_v6, %v574_v7  ;;  %789 = vst [vmem:[%s1021_s6 + $0xd0] sm:$0xff] %v716_v3  ;;  %v647_v15 = vmax.f32 %v503_v11, %v575_v12  ;;  %v288_v16 = vld [vmem:[%s992_s20 + $0xf0] sm:$0xff]  ;;  %v289_v22 = vld [vmem:[%s992_s20 + $0xf8] sm:$0xff]  ;;  %v290_v29 = vld [vmem:[%s992_s20 + $0x100] sm:$0xff] }
  0x3d   : > { %v717_v13 = vmax.f32 %v429_v63, %v645_v4  ;;  %v360_v17 = vld [vmem:[%s997_s23 + $0xf0] sm:$0xff]  ;;  %v361_v23 = vld [vmem:[%s997_s23 + $0xf8] sm:$0xff]  ;;  %v362_v31 = vld [vmem:[%s997_s23 + $0x100] sm:$0xff] }
  0x3e   : > { %v504_v18 = vld [vmem:[%s1002_s26 + $0xf0] sm:$0xff]  ;;  %v718_v19 = vmax.f32 %v430_v5, %v646_v9  ;;  %v432_v20 = vmax.f32 %v288_v16, %v360_v17  ;;  %v719_v24 = vmax.f32 %v431_v14, %v647_v15  ;;  %v433_v26 = vmax.f32 %v289_v22, %v361_v23  ;;  %v505_v27 = vld [vmem:[%s1002_s26 + $0xf8] sm:$0xff]  ;;  %v506_v32 = vld [vmem:[%s1002_s26 + $0x100] sm:$0xff] }
  0x3f   : > { %v576_v21 = vld [vmem:[%s1007_s29 + $0xf0] sm:$0xff]  ;;  %790 = vst [vmem:[%s1021_s6 + $0xd8] sm:$0xff] %v717_v13  ;;  %v577_v28 = vld [vmem:[%s1007_s29 + $0xf8] sm:$0xff]  ;;  %v578_v33 = vld [vmem:[%s1007_s29 + $0x100] sm:$0xff]  ;;  %v434_v35 = vmax.f32 %v290_v29, %v362_v31 }
  0x40   : > { %v648_v25 = vmax.f32 %v504_v18, %v576_v21  ;;  %791 = vst [vmem:[%s1021_s6 + $0xe0] sm:$0xff] %v718_v19  ;;  %v649_v30 = vmax.f32 %v505_v27, %v577_v28  ;;  %792 = vst [vmem:[%s1021_s6 + $0xe8] sm:$0xff] %v719_v24  ;;  %v650_v36 = vmax.f32 %v506_v32, %v578_v33  ;;  %v291_v37 = vld [vmem:[%s992_s20 + $0x108] sm:$0xff]  ;;  %v292_v43 = vld [vmem:[%s992_s20 + $0x110] sm:$0xff] }
  0x41   : > { %v363_v38 = vld [vmem:[%s997_s23 + $0x108] sm:$0xff]  ;;  %v364_v44 = vld [vmem:[%s997_s23 + $0x110] sm:$0xff]  ;;  %v293_v50 = vld [vmem:[%s992_s20 + $0x118] sm:$0xff] }
  0x42   : > { %v720_v34 = vmax.f32 %v432_v20, %v648_v25  ;;  %v507_v39 = vld [vmem:[%s1002_s26 + $0x108] sm:$0xff]  ;;  %v721_v40 = vmax.f32 %v433_v26, %v649_v30  ;;  %v435_v41 = vmax.f32 %v291_v37, %v363_v38  ;;  %v722_v45 = vmax.f32 %v434_v35, %v650_v36  ;;  %v508_v48 = vld [vmem:[%s1002_s26 + $0x110] sm:$0xff]  ;;  %v365_v52 = vld [vmem:[%s997_s23 + $0x118] sm:$0xff] }
  0x43   : > { %v579_v42 = vld [vmem:[%s1007_s29 + $0x108] sm:$0xff]  ;;  %v436_v47 = vmax.f32 %v292_v43, %v364_v44  ;;  %v580_v49 = vld [vmem:[%s1007_s29 + $0x110] sm:$0xff]  ;;  %v509_v53 = vld [vmem:[%s1002_s26 + $0x118] sm:$0xff]  ;;  %v437_v56 = vmax.f32 %v293_v50, %v365_v52 }
  0x44   : > { %793 = vst [vmem:[%s1021_s6 + $0xf0] sm:$0xff] %v720_v34  ;;  %v651_v46 = vmax.f32 %v507_v39, %v579_v42  ;;  %794 = vst [vmem:[%s1021_s6 + $0xf8] sm:$0xff] %v721_v40  ;;  %v652_v51 = vmax.f32 %v508_v48, %v580_v49  ;;  %v581_v54 = vld [vmem:[%s1007_s29 + $0x118] sm:$0xff]  ;;  %v294_v58 = vld [vmem:[%s992_s20 + $0x120] sm:$0xff] }
  0x45   : > { %795 = vst [vmem:[%s1021_s6 + $0x100] sm:$0xff] %v722_v45  ;;  %v653_v57 = vmax.f32 %v509_v53, %v581_v54  ;;  %v366_v59 = vld [vmem:[%s997_s23 + $0x120] sm:$0xff]  ;;  %v295_v0 = vld [vmem:[%s992_s20 + $0x128] sm:$0xff]  ;;  %v296_v7 = vld [vmem:[%s992_s20 + $0x130] sm:$0xff] }
  0x46   : > { %v723_v55 = vmax.f32 %v435_v41, %v651_v46  ;;  %v510_v60 = vld [vmem:[%s1002_s26 + $0x120] sm:$0xff]  ;;  %v724_v61 = vmax.f32 %v436_v47, %v652_v51  ;;  %v438_v62 = vmax.f32 %v294_v58, %v366_v59  ;;  %v367_v1 = vld [vmem:[%s997_s23 + $0x128] sm:$0xff]  ;;  %v368_v9 = vld [vmem:[%s997_s23 + $0x130] sm:$0xff] }
  0x47   : > { %v582_v63 = vld [vmem:[%s1007_s29 + $0x120] sm:$0xff]  ;;  %v725_v2 = vmax.f32 %v437_v56, %v653_v57  ;;  %v439_v4 = vmax.f32 %v295_v0, %v367_v1  ;;  %v511_v5 = vld [vmem:[%s1002_s26 + $0x128] sm:$0xff]  ;;  %v512_v10 = vld [vmem:[%s1002_s26 + $0x130] sm:$0xff]  ;;  %v440_v13 = vmax.f32 %v296_v7, %v368_v9 }
  0x48   : > { %796 = vst [vmem:[%s1021_s6 + $0x108] sm:$0xff] %v723_v55  ;;  %v654_v3 = vmax.f32 %v510_v60, %v582_v63  ;;  %v583_v6 = vld [vmem:[%s1007_s29 + $0x128] sm:$0xff]  ;;  %797 = vst [vmem:[%s1021_s6 + $0x110] sm:$0xff] %v724_v61  ;;  %v584_v11 = vld [vmem:[%s1007_s29 + $0x130] sm:$0xff] }
  0x49   : > { %v655_v8 = vmax.f32 %v511_v5, %v583_v6  ;;  %798 = vst.msk [vmem:[%s1021_s6 + $0x118] sm:$0xff] %vm773_vm0, %v725_v2  ;;  %v656_v14 = vmax.f32 %v512_v10, %v584_v11  ;;  %v297_v15 = vld [vmem:[%s992_s20 + $0x138] sm:$0xff]  ;;  %v298_v21 = vld [vmem:[%s992_s20 + $0x140] sm:$0xff]  ;;  %v299_v28 = vld [vmem:[%s992_s20 + $0x148] sm:$0xff] }
  0x4a   : > { %v726_v12 = vmax.f32 %v438_v62, %v654_v3  ;;  %v369_v16 = vld [vmem:[%s997_s23 + $0x138] sm:$0xff]  ;;  %v370_v22 = vld [vmem:[%s997_s23 + $0x140] sm:$0xff]  ;;  %v371_v30 = vld [vmem:[%s997_s23 + $0x148] sm:$0xff] }
  0x4b   : > { %v513_v17 = vld [vmem:[%s1002_s26 + $0x138] sm:$0xff]  ;;  %v727_v18 = vmax.f32 %v439_v4, %v655_v8  ;;  %v441_v19 = vmax.f32 %v297_v15, %v369_v16  ;;  %v728_v23 = vmax.f32 %v440_v13, %v656_v14  ;;  %v442_v25 = vmax.f32 %v298_v21, %v370_v22  ;;  %v514_v26 = vld [vmem:[%s1002_s26 + $0x140] sm:$0xff]  ;;  %v515_v31 = vld [vmem:[%s1002_s26 + $0x148] sm:$0xff] }
  0x4c   : > { %v585_v20 = vld [vmem:[%s1007_s29 + $0x138] sm:$0xff]  ;;  %799 = vst [vmem:[%s1021_s6 + $0x120] sm:$0xff] %v726_v12  ;;  %v586_v27 = vld [vmem:[%s1007_s29 + $0x140] sm:$0xff]  ;;  %v587_v32 = vld [vmem:[%s1007_s29 + $0x148] sm:$0xff]  ;;  %v443_v34 = vmax.f32 %v299_v28, %v371_v30 }
  0x4d   : > { %v657_v24 = vmax.f32 %v513_v17, %v585_v20  ;;  %800 = vst [vmem:[%s1021_s6 + $0x128] sm:$0xff] %v727_v18  ;;  %v658_v29 = vmax.f32 %v514_v26, %v586_v27  ;;  %801 = vst [vmem:[%s1021_s6 + $0x130] sm:$0xff] %v728_v23  ;;  %v659_v35 = vmax.f32 %v515_v31, %v587_v32  ;;  %v300_v36 = vld [vmem:[%s992_s20 + $0x150] sm:$0xff]  ;;  %v301_v42 = vld [vmem:[%s992_s20 + $0x158] sm:$0xff] }
  0x4e   : > { %v372_v37 = vld [vmem:[%s997_s23 + $0x150] sm:$0xff]  ;;  %v373_v43 = vld [vmem:[%s997_s23 + $0x158] sm:$0xff]  ;;  %v302_v49 = vld [vmem:[%s992_s20 + $0x160] sm:$0xff] }
  0x4f   : > { %v729_v33 = vmax.f32 %v441_v19, %v657_v24  ;;  %v516_v38 = vld [vmem:[%s1002_s26 + $0x150] sm:$0xff]  ;;  %v730_v39 = vmax.f32 %v442_v25, %v658_v29  ;;  %v444_v40 = vmax.f32 %v300_v36, %v372_v37  ;;  %v731_v44 = vmax.f32 %v443_v34, %v659_v35  ;;  %v517_v47 = vld [vmem:[%s1002_s26 + $0x158] sm:$0xff]  ;;  %v374_v51 = vld [vmem:[%s997_s23 + $0x160] sm:$0xff] }
  0x50   : > { %v588_v41 = vld [vmem:[%s1007_s29 + $0x150] sm:$0xff]  ;;  %v445_v46 = vmax.f32 %v301_v42, %v373_v43  ;;  %v589_v48 = vld [vmem:[%s1007_s29 + $0x158] sm:$0xff]  ;;  %v518_v52 = vld [vmem:[%s1002_s26 + $0x160] sm:$0xff]  ;;  %v446_v55 = vmax.f32 %v302_v49, %v374_v51 }
  0x51   : > { %802 = vst [vmem:[%s1021_s6 + $0x138] sm:$0xff] %v729_v33  ;;  %v660_v45 = vmax.f32 %v516_v38, %v588_v41  ;;  %803 = vst [vmem:[%s1021_s6 + $0x140] sm:$0xff] %v730_v39  ;;  %v661_v50 = vmax.f32 %v517_v47, %v589_v48  ;;  %v590_v53 = vld [vmem:[%s1007_s29 + $0x160] sm:$0xff]  ;;  %v303_v57 = vld [vmem:[%s992_s20 + $0x168] sm:$0xff] }
  0x52   : > { %804 = vst [vmem:[%s1021_s6 + $0x148] sm:$0xff] %v731_v44  ;;  %v662_v56 = vmax.f32 %v518_v52, %v590_v53  ;;  %v375_v58 = vld [vmem:[%s997_s23 + $0x168] sm:$0xff]  ;;  %v304_v63 = vld [vmem:[%s992_s20 + $0x170] sm:$0xff]  ;;  %v305_v6 = vld [vmem:[%s992_s20 + $0x178] sm:$0xff] }
  0x53   : > { %v732_v54 = vmax.f32 %v444_v40, %v660_v45  ;;  %v519_v59 = vld [vmem:[%s1002_s26 + $0x168] sm:$0xff]  ;;  %v733_v60 = vmax.f32 %v445_v46, %v661_v50  ;;  %v447_v61 = vmax.f32 %v303_v57, %v375_v58  ;;  %v376_v0 = vld [vmem:[%s997_s23 + $0x170] sm:$0xff]  ;;  %v377_v8 = vld [vmem:[%s997_s23 + $0x178] sm:$0xff] }
  0x54   : > { %v591_v62 = vld [vmem:[%s1007_s29 + $0x168] sm:$0xff]  ;;  %v734_v1 = vmax.f32 %v446_v55, %v662_v56  ;;  %v448_v3 = vmax.f32 %v304_v63, %v376_v0  ;;  %v520_v4 = vld [vmem:[%s1002_s26 + $0x170] sm:$0xff]  ;;  %v521_v9 = vld [vmem:[%s1002_s26 + $0x178] sm:$0xff]  ;;  %v449_v12 = vmax.f32 %v305_v6, %v377_v8 }
  0x55   : > { %805 = vst [vmem:[%s1021_s6 + $0x150] sm:$0xff] %v732_v54  ;;  %v663_v2 = vmax.f32 %v519_v59, %v591_v62  ;;  %v592_v5 = vld [vmem:[%s1007_s29 + $0x170] sm:$0xff]  ;;  %806 = vst [vmem:[%s1021_s6 + $0x158] sm:$0xff] %v733_v60  ;;  %v593_v10 = vld [vmem:[%s1007_s29 + $0x178] sm:$0xff] }
  0x56   : > { %v664_v7 = vmax.f32 %v520_v4, %v592_v5  ;;  %807 = vst [vmem:[%s1021_s6 + $0x160] sm:$0xff] %v734_v1  ;;  %v665_v13 = vmax.f32 %v521_v9, %v593_v10  ;;  %v306_v14 = vld [vmem:[%s992_s20 + $0x180] sm:$0xff]  ;;  %v307_v20 = vld [vmem:[%s992_s20 + $0x188] sm:$0xff]  ;;  %v308_v27 = vld [vmem:[%s992_s20 + $0x190] sm:$0xff] }
  0x57   : > { %v735_v11 = vmax.f32 %v447_v61, %v663_v2  ;;  %v378_v15 = vld [vmem:[%s997_s23 + $0x180] sm:$0xff]  ;;  %v379_v21 = vld [vmem:[%s997_s23 + $0x188] sm:$0xff]  ;;  %v380_v29 = vld [vmem:[%s997_s23 + $0x190] sm:$0xff] }
  0x58   : > { %v522_v16 = vld [vmem:[%s1002_s26 + $0x180] sm:$0xff]  ;;  %v736_v17 = vmax.f32 %v448_v3, %v664_v7  ;;  %v450_v18 = vmax.f32 %v306_v14, %v378_v15  ;;  %v737_v22 = vmax.f32 %v449_v12, %v665_v13  ;;  %v451_v24 = vmax.f32 %v307_v20, %v379_v21  ;;  %v523_v25 = vld [vmem:[%s1002_s26 + $0x188] sm:$0xff]  ;;  %v524_v30 = vld [vmem:[%s1002_s26 + $0x190] sm:$0xff] }
  0x59   : > { %v594_v19 = vld [vmem:[%s1007_s29 + $0x180] sm:$0xff]  ;;  %808 = vst [vmem:[%s1021_s6 + $0x168] sm:$0xff] %v735_v11  ;;  %v595_v26 = vld [vmem:[%s1007_s29 + $0x188] sm:$0xff]  ;;  %v596_v31 = vld [vmem:[%s1007_s29 + $0x190] sm:$0xff]  ;;  %v452_v33 = vmax.f32 %v308_v27, %v380_v29 }
  0x5a   : > { %v666_v23 = vmax.f32 %v522_v16, %v594_v19  ;;  %809 = vst [vmem:[%s1021_s6 + $0x170] sm:$0xff] %v736_v17  ;;  %v667_v28 = vmax.f32 %v523_v25, %v595_v26  ;;  %810 = vst.msk [vmem:[%s1021_s6 + $0x178] sm:$0xff] %vm773_vm0, %v737_v22  ;;  %v668_v34 = vmax.f32 %v524_v30, %v596_v31  ;;  %v309_v35 = vld [vmem:[%s992_s20 + $0x198] sm:$0xff]  ;;  %v310_v41 = vld [vmem:[%s992_s20 + $0x1a0] sm:$0xff] }
  0x5b   : > { %v381_v36 = vld [vmem:[%s997_s23 + $0x198] sm:$0xff]  ;;  %v382_v42 = vld [vmem:[%s997_s23 + $0x1a0] sm:$0xff]  ;;  %v311_v48 = vld [vmem:[%s992_s20 + $0x1a8] sm:$0xff] }
  0x5c   : > { %v738_v32 = vmax.f32 %v450_v18, %v666_v23  ;;  %v525_v37 = vld [vmem:[%s1002_s26 + $0x198] sm:$0xff]  ;;  %v739_v38 = vmax.f32 %v451_v24, %v667_v28  ;;  %v453_v39 = vmax.f32 %v309_v35, %v381_v36  ;;  %v740_v43 = vmax.f32 %v452_v33, %v668_v34  ;;  %v526_v46 = vld [vmem:[%s1002_s26 + $0x1a0] sm:$0xff]  ;;  %v383_v50 = vld [vmem:[%s997_s23 + $0x1a8] sm:$0xff] }
  0x5d   : > { %v597_v40 = vld [vmem:[%s1007_s29 + $0x198] sm:$0xff]  ;;  %v454_v45 = vmax.f32 %v310_v41, %v382_v42  ;;  %v598_v47 = vld [vmem:[%s1007_s29 + $0x1a0] sm:$0xff]  ;;  %v527_v51 = vld [vmem:[%s1002_s26 + $0x1a8] sm:$0xff]  ;;  %v455_v54 = vmax.f32 %v311_v48, %v383_v50 }
  0x5e   : > { %811 = vst [vmem:[%s1021_s6 + $0x180] sm:$0xff] %v738_v32  ;;  %v669_v44 = vmax.f32 %v525_v37, %v597_v40  ;;  %812 = vst [vmem:[%s1021_s6 + $0x188] sm:$0xff] %v739_v38  ;;  %v670_v49 = vmax.f32 %v526_v46, %v598_v47  ;;  %v599_v52 = vld [vmem:[%s1007_s29 + $0x1a8] sm:$0xff]  ;;  %v312_v56 = vld [vmem:[%s992_s20 + $0x1b0] sm:$0xff] }
  0x5f   : > { %813 = vst [vmem:[%s1021_s6 + $0x190] sm:$0xff] %v740_v43  ;;  %v671_v55 = vmax.f32 %v527_v51, %v599_v52  ;;  %v384_v57 = vld [vmem:[%s997_s23 + $0x1b0] sm:$0xff]  ;;  %v313_v62 = vld [vmem:[%s992_s20 + $0x1b8] sm:$0xff]  ;;  %v314_v5 = vld [vmem:[%s992_s20 + $0x1c0] sm:$0xff] }
  0x60   : > { %v741_v53 = vmax.f32 %v453_v39, %v669_v44  ;;  %v528_v58 = vld [vmem:[%s1002_s26 + $0x1b0] sm:$0xff]  ;;  %v742_v59 = vmax.f32 %v454_v45, %v670_v49  ;;  %v456_v60 = vmax.f32 %v312_v56, %v384_v57  ;;  %v385_v63 = vld [vmem:[%s997_s23 + $0x1b8] sm:$0xff]  ;;  %v386_v7 = vld [vmem:[%s997_s23 + $0x1c0] sm:$0xff] }
  0x61   : > { %v600_v61 = vld [vmem:[%s1007_s29 + $0x1b0] sm:$0xff]  ;;  %v743_v0 = vmax.f32 %v455_v54, %v671_v55  ;;  %v457_v2 = vmax.f32 %v313_v62, %v385_v63  ;;  %v529_v3 = vld [vmem:[%s1002_s26 + $0x1b8] sm:$0xff]  ;;  %v530_v8 = vld [vmem:[%s1002_s26 + $0x1c0] sm:$0xff]  ;;  %v458_v11 = vmax.f32 %v314_v5, %v386_v7 }
  0x62   : > { %814 = vst [vmem:[%s1021_s6 + $0x198] sm:$0xff] %v741_v53  ;;  %v672_v1 = vmax.f32 %v528_v58, %v600_v61  ;;  %v601_v4 = vld [vmem:[%s1007_s29 + $0x1b8] sm:$0xff]  ;;  %815 = vst [vmem:[%s1021_s6 + $0x1a0] sm:$0xff] %v742_v59  ;;  %v602_v9 = vld [vmem:[%s1007_s29 + $0x1c0] sm:$0xff] }
  0x63   : > { %v673_v6 = vmax.f32 %v529_v3, %v601_v4  ;;  %816 = vst [vmem:[%s1021_s6 + $0x1a8] sm:$0xff] %v743_v0  ;;  %v674_v12 = vmax.f32 %v530_v8, %v602_v9  ;;  %v315_v13 = vld [vmem:[%s992_s20 + $0x1c8] sm:$0xff]  ;;  %v316_v19 = vld [vmem:[%s992_s20 + $0x1d0] sm:$0xff]  ;;  %v317_v26 = vld [vmem:[%s992_s20 + $0x1d8] sm:$0xff] }
  0x64   : > { %v744_v10 = vmax.f32 %v456_v60, %v672_v1  ;;  %v387_v14 = vld [vmem:[%s997_s23 + $0x1c8] sm:$0xff]  ;;  %v388_v20 = vld [vmem:[%s997_s23 + $0x1d0] sm:$0xff]  ;;  %v389_v28 = vld [vmem:[%s997_s23 + $0x1d8] sm:$0xff] }
  0x65   : > { %v531_v15 = vld [vmem:[%s1002_s26 + $0x1c8] sm:$0xff]  ;;  %v745_v16 = vmax.f32 %v457_v2, %v673_v6  ;;  %v459_v17 = vmax.f32 %v315_v13, %v387_v14  ;;  %v746_v21 = vmax.f32 %v458_v11, %v674_v12  ;;  %v460_v23 = vmax.f32 %v316_v19, %v388_v20  ;;  %v532_v24 = vld [vmem:[%s1002_s26 + $0x1d0] sm:$0xff]  ;;  %v533_v29 = vld [vmem:[%s1002_s26 + $0x1d8] sm:$0xff] }
  0x66   : > { %v603_v18 = vld [vmem:[%s1007_s29 + $0x1c8] sm:$0xff]  ;;  %817 = vst [vmem:[%s1021_s6 + $0x1b0] sm:$0xff] %v744_v10  ;;  %v604_v25 = vld [vmem:[%s1007_s29 + $0x1d0] sm:$0xff]  ;;  %v605_v30 = vld [vmem:[%s1007_s29 + $0x1d8] sm:$0xff]  ;;  %v461_v32 = vmax.f32 %v317_v26, %v389_v28 }
  0x67   : > { %v675_v22 = vmax.f32 %v531_v15, %v603_v18  ;;  %818 = vst [vmem:[%s1021_s6 + $0x1b8] sm:$0xff] %v745_v16  ;;  %v676_v27 = vmax.f32 %v532_v24, %v604_v25  ;;  %819 = vst [vmem:[%s1021_s6 + $0x1c0] sm:$0xff] %v746_v21  ;;  %v677_v33 = vmax.f32 %v533_v29, %v605_v30  ;;  %v318_v34 = vld [vmem:[%s992_s20 + $0x1e0] sm:$0x3f]  ;;  %v319_v40 = vld [vmem:[%s992_s20 + $0x1e8] sm:$0x3f] }
  0x68   : > { %v390_v35 = vld [vmem:[%s997_s23 + $0x1e0] sm:$0x3f]  ;;  %v391_v41 = vld [vmem:[%s997_s23 + $0x1e8] sm:$0x3f]  ;;  %v320_v47 = vld [vmem:[%s992_s20 + $0x1f0] sm:$0x3f] }
  0x69   : > { %v747_v31 = vmax.f32 %v459_v17, %v675_v22  ;;  %v534_v36 = vld [vmem:[%s1002_s26 + $0x1e0] sm:$0x3f]  ;;  %v748_v37 = vmax.f32 %v460_v23, %v676_v27  ;;  %v462_v38 = vmax.f32 %v318_v34, %v390_v35  ;;  %v749_v42 = vmax.f32 %v461_v32, %v677_v33  ;;  %v535_v45 = vld [vmem:[%s1002_s26 + $0x1e8] sm:$0x3f]  ;;  %v392_v49 = vld [vmem:[%s997_s23 + $0x1f0] sm:$0x3f] }
  0x6a   : > { %v606_v39 = vld [vmem:[%s1007_s29 + $0x1e0] sm:$0x3f]  ;;  %v463_v44 = vmax.f32 %v319_v40, %v391_v41  ;;  %v607_v46 = vld [vmem:[%s1007_s29 + $0x1e8] sm:$0x3f]  ;;  %v536_v50 = vld [vmem:[%s1002_s26 + $0x1f0] sm:$0x3f]  ;;  %v464_v53 = vmax.f32 %v320_v47, %v392_v49 }
  0x6b   : > { %820 = vst [vmem:[%s1021_s6 + $0x1c8] sm:$0xff] %v747_v31  ;;  %v678_v43 = vmax.f32 %v534_v36, %v606_v39  ;;  %821 = vst [vmem:[%s1021_s6 + $0x1d0] sm:$0xff] %v748_v37  ;;  %v679_v48 = vmax.f32 %v535_v45, %v607_v46  ;;  %v608_v51 = vld [vmem:[%s1007_s29 + $0x1f0] sm:$0x3f]  ;;  %v321_v55 = vld [vmem:[%s992_s20 + $0x1f8] sm:$0x3f] }
  0x6c   : > { %822 = vst.msk [vmem:[%s1021_s6 + $0x1d8] sm:$0xff] %vm773_vm0, %v749_v42  ;;  %v680_v54 = vmax.f32 %v536_v50, %v608_v51  ;;  %v393_v56 = vld [vmem:[%s997_s23 + $0x1f8] sm:$0x3f]  ;;  %v322_v61 = vld [vmem:[%s992_s20 + $0x200] sm:$0x3f] }
  0x6d   : > { %v750_v52 = vmax.f32 %v462_v38, %v678_v43  ;;  %v537_v57 = vld [vmem:[%s1002_s26 + $0x1f8] sm:$0x3f]  ;;  %v751_v58 = vmax.f32 %v463_v44, %v679_v48  ;;  %v465_v59 = vmax.f32 %v321_v55, %v393_v56  ;;  %v394_v62 = vld [vmem:[%s997_s23 + $0x200] sm:$0x3f]  ;;  %v323_v4 = vld [vmem:[%s992_s20 + $0x208] sm:$0x3f] }
  0x6e   : > { %v609_v60 = vld [vmem:[%s1007_s29 + $0x1f8] sm:$0x3f]  ;;  %v752_v63 = vmax.f32 %v464_v53, %v680_v54  ;;  %v466_v1 = vmax.f32 %v322_v61, %v394_v62  ;;  %v538_v2 = vld [vmem:[%s1002_s26 + $0x200] sm:$0x3f]  ;;  %v395_v6 = vld [vmem:[%s997_s23 + $0x208] sm:$0x3f] }
  0x6f   : > { %823 = vst [vmem:[%s1021_s6 + $0x1e0] sm:$0x3f] %v750_v52  ;;  %v681_v0 = vmax.f32 %v537_v57, %v609_v60  ;;  %v610_v3 = vld [vmem:[%s1007_s29 + $0x200] sm:$0x3f]  ;;  %824 = vst [vmem:[%s1021_s6 + $0x1e8] sm:$0x3f] %v751_v58  ;;  %v467_v10 = vmax.f32 %v323_v4, %v395_v6 }
  0x70   : > { %v682_v5 = vmax.f32 %v538_v2, %v610_v3  ;;  %v539_v7 = vld [vmem:[%s1002_s26 + $0x208] sm:$0x3f]  ;;  %825 = vst [vmem:[%s1021_s6 + $0x1f0] sm:$0x3f] %v752_v63  ;;  %v324_v12 = vld [vmem:[%s992_s20 + $0x210] sm:$0x3f] }
  0x71   : > { %v611_v8 = vld [vmem:[%s1007_s29 + $0x208] sm:$0x3f]  ;;  %v753_v9 = vmax.f32 %v465_v59, %v681_v0  ;;  %v396_v13 = vld [vmem:[%s997_s23 + $0x210] sm:$0x3f]  ;;  %v325_v18 = vld [vmem:[%s992_s20 + $0x218] sm:$0x3f] }
  0x72   : > { %v683_v11 = vmax.f32 %v539_v7, %v611_v8  ;;  %v540_v14 = vld [vmem:[%s1002_s26 + $0x210] sm:$0x3f]  ;;  %v754_v15 = vmax.f32 %v466_v1, %v682_v5  ;;  %v468_v16 = vmax.f32 %v324_v12, %v396_v13  ;;  %v397_v19 = vld [vmem:[%s997_s23 + $0x218] sm:$0x3f]  ;;  %v326_v25 = vld [vmem:[%s992_s20 + $0x220] sm:$0x3f] }
  0x73   : > { %v612_v17 = vld [vmem:[%s1007_s29 + $0x210] sm:$0x3f]  ;;  %826 = vst [vmem:[%s1021_s6 + $0x1f8] sm:$0x3f] %v753_v9  ;;  %v469_v22 = vmax.f32 %v325_v18, %v397_v19  ;;  %v541_v23 = vld [vmem:[%s1002_s26 + $0x218] sm:$0x3f] }
  0x74   : > { %v755_v20 = vmax.f32 %v467_v10, %v683_v11  ;;  %v684_v21 = vmax.f32 %v540_v14, %v612_v17  ;;  %v613_v24 = vld [vmem:[%s1007_s29 + $0x218] sm:$0x3f]  ;;  %827 = vst [vmem:[%s1021_s6 + $0x200] sm:$0x3f] %v754_v15  ;;  %v398_v27 = vld [vmem:[%s997_s23 + $0x220] sm:$0x3f] }
  0x75   : > { %v685_v26 = vmax.f32 %v541_v23, %v613_v24  ;;  %v542_v28 = vld [vmem:[%s1002_s26 + $0x220] sm:$0x3f]  ;;  %v470_v31 = vmax.f32 %v326_v25, %v398_v27  ;;  %v327_v33 = vld [vmem:[%s992_s20 + $0x228] sm:$0x3f]  ;;  %v328_v39 = vld [vmem:[%s992_s20 + $0x230] sm:$0x3f] }
  0x76   : > { %v614_v29 = vld [vmem:[%s1007_s29 + $0x220] sm:$0x3f]  ;;  %828 = vst [vmem:[%s1021_s6 + $0x208] sm:$0x3f] %v755_v20  ;;  %v756_v30 = vmax.f32 %v468_v16, %v684_v21  ;;  %v399_v34 = vld [vmem:[%s997_s23 + $0x228] sm:$0x3f] }
  0x77   : > { %v686_v32 = vmax.f32 %v542_v28, %v614_v29  ;;  %v543_v35 = vld [vmem:[%s1002_s26 + $0x228] sm:$0x3f]  ;;  %v757_v36 = vmax.f32 %v469_v22, %v685_v26  ;;  %v471_v37 = vmax.f32 %v327_v33, %v399_v34  ;;  %v400_v40 = vld [vmem:[%s997_s23 + $0x230] sm:$0x3f]  ;;  %v329_v46 = vld [vmem:[%s992_s20 + $0x238] sm:$0x3f] }
  0x78   : > { %v615_v38 = vld [vmem:[%s1007_s29 + $0x228] sm:$0x3f]  ;;  %829 = vst [vmem:[%s1021_s6 + $0x210] sm:$0x3f] %v756_v30  ;;  %v472_v43 = vmax.f32 %v328_v39, %v400_v40  ;;  %v544_v44 = vld [vmem:[%s1002_s26 + $0x230] sm:$0x3f] }
  0x79   : > { %v758_v41 = vmax.f32 %v470_v31, %v686_v32  ;;  %v687_v42 = vmax.f32 %v543_v35, %v615_v38  ;;  %v616_v45 = vld [vmem:[%s1007_s29 + $0x230] sm:$0x3f]  ;;  %830 = vst [vmem:[%s1021_s6 + $0x218] sm:$0x3f] %v757_v36  ;;  %v401_v48 = vld [vmem:[%s997_s23 + $0x238] sm:$0x3f] }
  0x7a   : > { %v688_v47 = vmax.f32 %v544_v44, %v616_v45  ;;  %v545_v49 = vld [vmem:[%s1002_s26 + $0x238] sm:$0x3f]  ;;  %v473_v52 = vmax.f32 %v329_v46, %v401_v48 }
  0x7b   : > { %v617_v50 = vld [vmem:[%s1007_s29 + $0x238] sm:$0x3f]  ;;  %831 = vst [vmem:[%s1021_s6 + $0x220] sm:$0x3f] %v758_v41  ;;  %v759_v51 = vmax.f32 %v471_v37, %v687_v42 }
  0x7c   : > { %v689_v53 = vmax.f32 %v545_v49, %v617_v50  ;;  %v760_v54 = vmax.f32 %v472_v43, %v688_v47 }
  0x7d   : > { %832 = vst [vmem:[%s1021_s6 + $0x228] sm:$0x3f] %v759_v51 }
  0x7e   : > { %v761_v55 = vmax.f32 %v473_v52, %v689_v53  ;;  %833 = vst [vmem:[%s1021_s6 + $0x230] sm:$0x3f] %v760_v54 }
  0x80   : > { %835 = vst.msk [vmem:[%s1021_s6 + $0x238] sm:$0x3f] %vm834_vm1, %v761_v55 }
  0x81 PF: > { %s14_s15 = sadd.s32 1, %s954_s15  }
  0x82   : > { %p11_p4 = scmp.ge.s32.totalorder %s14_s15, 6  }
  0x84   :  { %13 = sbr.rel (!%p11_p4) target bundleno = 1 (0x1), region = 75 }

// kernel: siamese_forward.8
= control target key start
LH: loop header
LB: loop body
LE: loop exit
PB: predicated region body
PF: predicated region fallthrough
CT: control target
= control target key end

     0   :  { %s3700_s12 = smov 0   ;;  %s3702_s13 = smov 0   ;;  %s5147_s0 = inlined_call_operand.vmem [shape: f32[7168,896], index: 0, kind: input, shape index: {}]   ;;  %s5148_s1 = inlined_call_operand.vmem [shape: f32[896,128], index: 1, kind: input, shape index: {}]   ;;  %s5149_s2 = inlined_call_operand.vmem [shape: f32[1,128], index: 2, kind: input, shape index: {}]   ;;  %s5150_s3 = inlined_call_operand.vmem [shape: f32[7168,128], index: 3, kind: output, shape index: {}]  }
   0x1   :  { %s3704_s14 = smov 0  }
   0x2 LB: > { %s32_s15 = sadd.s32 1, %s3673_s13  ;;  %p3013_p0 = scmp.ge.s32.totalorder %s3677_s14, 1  ;;  %s3677_s14 = sphi %s3704_s14, %s13_s14   ;;  %s3673_s13 = sphi %s3702_s13, %s5180_s13   ;;  %s3669_s12 = sphi %s3700_s12, %s5179_s12  }
   0x3   : > { %p34_p1 = scmp.ge.s32.totalorder %s32_s15, 14  ;;  %p191_p2 = scmp.lt.s32.totalorder %s3677_s14, 15 }
   0x5   : > { %s5182_s15 = smov (%p34_p1, %s32_s15), 0  ;;  %p192_p3 = pnand %p3013_p0, %p191_p2 }
   0x7   : > { %195 = sbr.rel (%p192_p3) target bundleno = 746 (0x2ea), region = 32 }
   0xe   : > { %v847_v0 = vld [vmem:[%s5148_s1] sm:$0xff]  ;;  %v848_v1 = vld [vmem:[%s5148_s1 + $0x8] sm:$0xff]  ;;  %v3679_v3 = vmov 0.0|0.0   ;;  %v849_v6 = vld [vmem:[%s5148_s1 + $0x10] sm:$0xff]  ;;  %s3014_s5 = sshll.u32 %s3669_s12, 6 }
   0xf   : > { %v879_v2 = vld [vmem:[%s5148_s1 + $0x100] sm:$0xff]  ;;  %3229 = vmatprep.subr.bf16.mxu1 %v3679_v3  ;;  %3277 = vmatprep.subr.bf16.mxu0 %v3679_v3  ;;  %v3230_v4 = vpack.c.bf16 %v848_v1, %v847_v0  ;;  %v880_v5 = vld [vmem:[%s5148_s1 + $0x108] sm:$0xff]  ;;  %v850_v7 = vld [vmem:[%s5148_s1 + $0x18] sm:$0xff]  ;;  %p236_p4 = scmp.lt.s32.totalorder %s3014_s5, 895 }
  0x10   : > { %v3740_v8 = vpack.c.bf16 %v880_v5, %v879_v2  ;;  %v881_v9 = vld [vmem:[%s5148_s1 + $0x110] sm:$0xff]  ;;  %v882_v10 = vld [vmem:[%s5148_s1 + $0x118] sm:$0xff]  ;;  %v3233_v11 = vpack.c.bf16 %v850_v7, %v849_v6  ;;  %v851_v13 = vld [vmem:[%s5148_s1 + $0x20] sm:$0xff] }
  0x11   : > { %3231 = vmatpush1.bf16.msra.mxu1 %v3230_v4  ;;  %v3751_v12 = vpack.c.bf16 %v882_v10, %v881_v9  ;;  %v852_v14 = vld [vmem:[%s5148_s1 + $0x28] sm:$0xff]  ;;  %v883_v15 = vld [vmem:[%s5148_s1 + $0x120] sm:$0xff]  ;;  %v853_v19 = vld [vmem:[%s5148_s1 + $0x30] sm:$0xff]  ;;  %s5184_s5 = smov (!%p236_p4, %s3014_s5), 895 }
  0x12   : > { %3279 = vmatpush1.bf16.msra.mxu0 %v3740_v8  ;;  %3232 = vmatprep.subr.bf16.mxu1 %v3679_v3  ;;  %v884_v16 = vld [vmem:[%s5148_s1 + $0x128] sm:$0xff]  ;;  %v3236_v17 = vpack.c.bf16 %v852_v14, %v851_v13  ;;  %v854_v20 = vld [vmem:[%s5148_s1 + $0x38] sm:$0xff]  ;;  %v885_v21 = vld [vmem:[%s5148_s1 + $0x130] sm:$0xff]  ;;  %s3629_s7 = smul.u32 56, %s5184_s5  ;;  %s3017_s23 = sshll.u32 %s5184_s5, 3 }
  0x13   : > { %3280 = vmatprep.subr.bf16.mxu0 %v3679_v3  ;;  %v3768_v18 = vpack.c.bf16 %v884_v16, %v883_v15  ;;  %v886_v22 = vld [vmem:[%s5148_s1 + $0x138] sm:$0xff]  ;;  %v3239_v23 = vpack.c.bf16 %v854_v20, %v853_v19  ;;  %v855_v25 = vld [vmem:[%s5148_s1 + $0x40] sm:$0xff]  ;;  %v856_v26 = vld [vmem:[%s5148_s1 + $0x48] sm:$0xff]  ;;  %s4884_s26 = scalar_lea.vmem %s5150_s3, %s3017_s23 }
  0x14   : > { %v3787_v24 = vpack.c.bf16 %v886_v22, %v885_v21  ;;  %v887_v27 = vld [vmem:[%s5148_s1 + $0x140] sm:$0xff]  ;;  %v888_v28 = vld [vmem:[%s5148_s1 + $0x148] sm:$0xff]  ;;  %v3242_v29 = vpack.c.bf16 %v856_v26, %v855_v25  ;;  %v857_v31 = vld [vmem:[%s5148_s1 + $0x50] sm:$0xff]  ;;  %s3823_s21 = scalar_lea.vmem %s5147_s0, %s3629_s7 }
  0x15   : > { %3234 = vmatpush1.bf16.msra.mxu1 %v3233_v11  ;;  %v3805_v30 = vpack.c.bf16 %v888_v28, %v887_v27  ;;  %v858_v32 = vld [vmem:[%s5148_s1 + $0x58] sm:$0xff]  ;;  %v889_v33 = vld [vmem:[%s5148_s1 + $0x150] sm:$0xff]  ;;  %v859_v37 = vld [vmem:[%s5148_s1 + $0x60] sm:$0xff] }
  0x16   : > { %3282 = vmatpush1.bf16.msra.mxu0 %v3751_v12  ;;  %3235 = vmatprep.subr.bf16.mxu1 %v3679_v3  ;;  %v890_v34 = vld [vmem:[%s5148_s1 + $0x158] sm:$0xff]  ;;  %v3245_v35 = vpack.c.bf16 %v858_v32, %v857_v31  ;;  %v860_v38 = vld [vmem:[%s5148_s1 + $0x68] sm:$0xff]  ;;  %v891_v39 = vld [vmem:[%s5148_s1 + $0x160] sm:$0xff] }
  0x17   : > { %3283 = vmatprep.subr.bf16.mxu0 %v3679_v3  ;;  %v3827_v36 = vpack.c.bf16 %v890_v34, %v889_v33  ;;  %v892_v40 = vld [vmem:[%s5148_s1 + $0x168] sm:$0xff]  ;;  %v402_v42 = vld [vmem:[%s3823_s21 + $0x18] sm:$0xff]  ;;  %v3248_v43 = vpack.c.bf16 %v860_v38, %v859_v37  ;;  %v861_v45 = vld [vmem:[%s5148_s1 + $0x70] sm:$0xff] }
  0x18   : > { %v400_v41 = vld [vmem:[%s3823_s21 + $0x8] sm:$0xff]  ;;  %1408 = vmatprep.mubr.f32.mxu0 %v402_v42  ;;  %v3846_v44 = vpack.c.bf16 %v892_v40, %v891_v39  ;;  %v862_v46 = vld [vmem:[%s5148_s1 + $0x78] sm:$0xff]  ;;  %v893_v47 = vld [vmem:[%s5148_s1 + $0x170] sm:$0xff] }
  0x19   : > { %3237 = vmatpush1.bf16.msra.mxu1 %v3236_v17  ;;  %1023 = vmatprep.mubr.f32.mxu1 %v400_v41  ;;  %v894_v48 = vld [vmem:[%s5148_s1 + $0x178] sm:$0xff]  ;;  %v3251_v49 = vpack.c.bf16 %v862_v46, %v861_v45  ;;  %v863_v51 = vld [vmem:[%s5148_s1 + $0x80] sm:$0xff]  ;;  %v864_v52 = vld [vmem:[%s5148_s1 + $0x88] sm:$0xff] }
  0x1a   : > { %3285 = vmatpush1.bf16.msra.mxu0 %v3768_v18  ;;  %3238 = vmatprep.subr.bf16.mxu1 %v3679_v3  ;;  %v3863_v50 = vpack.c.bf16 %v894_v48, %v893_v47  ;;  %v895_v53 = vld [vmem:[%s5148_s1 + $0x180] sm:$0xff]  ;;  %v896_v54 = vld [vmem:[%s5148_s1 + $0x188] sm:$0xff]  ;;  %v3254_v55 = vpack.c.bf16 %v864_v52, %v863_v51  ;;  %v865_v57 = vld [vmem:[%s5148_s1 + $0x90] sm:$0xff] }
  0x1b   : > { %3286 = vmatprep.subr.bf16.mxu0 %v3679_v3  ;;  %v3880_v56 = vpack.c.bf16 %v896_v54, %v895_v53  ;;  %v866_v58 = vld [vmem:[%s5148_s1 + $0x98] sm:$0xff]  ;;  %v897_v59 = vld [vmem:[%s5148_s1 + $0x190] sm:$0xff]  ;;  %v867_v63 = vld [vmem:[%s5148_s1 + $0xa0] sm:$0xff] }
  0x1c   : > { %v898_v60 = vld [vmem:[%s5148_s1 + $0x198] sm:$0xff]  ;;  %v3257_v61 = vpack.c.bf16 %v866_v58, %v865_v57  ;;  %v868_v0 = vld [vmem:[%s5148_s1 + $0xa8] sm:$0xff]  ;;  %v899_v1 = vld [vmem:[%s5148_s1 + $0x1a0] sm:$0xff] }
  0x1d   : > { %3240 = vmatpush1.bf16.msra.mxu1 %v3239_v23  ;;  %v3897_v62 = vpack.c.bf16 %v898_v60, %v897_v59  ;;  %v900_v2 = vld [vmem:[%s5148_s1 + $0x1a8] sm:$0xff]  ;;  %v3260_v4 = vpack.c.bf16 %v868_v0, %v867_v63  ;;  %v869_v6 = vld [vmem:[%s5148_s1 + $0xb0] sm:$0xff]  ;;  %v870_v7 = vld [vmem:[%s5148_s1 + $0xb8] sm:$0xff] }
  0x1e   : > { %3288 = vmatpush1.bf16.msra.mxu0 %v3787_v24  ;;  %3241 = vmatprep.subr.bf16.mxu1 %v3679_v3  ;;  %v3914_v5 = vpack.c.bf16 %v900_v2, %v899_v1  ;;  %v901_v9 = vld [vmem:[%s5148_s1 + $0x1b0] sm:$0xff]  ;;  %v902_v10 = vld [vmem:[%s5148_s1 + $0x1b8] sm:$0xff]  ;;  %v3263_v11 = vpack.c.bf16 %v870_v7, %v869_v6  ;;  %v871_v14 = vld [vmem:[%s5148_s1 + $0xc0] sm:$0xff] }
  0x1f   : > { %3289 = vmatprep.subr.bf16.mxu0 %v3679_v3  ;;  %v3931_v13 = vpack.c.bf16 %v902_v10, %v901_v9  ;;  %v872_v15 = vld [vmem:[%s5148_s1 + $0xc8] sm:$0xff]  ;;  %v903_v16 = vld [vmem:[%s5148_s1 + $0x1c0] sm:$0xff]  ;;  %v873_v21 = vld [vmem:[%s5148_s1 + $0xd0] sm:$0xff] }
  0x20   : > { %v904_v17 = vld [vmem:[%s5148_s1 + $0x1c8] sm:$0xff]  ;;  %v3266_v19 = vpack.c.bf16 %v872_v15, %v871_v14  ;;  %v874_v22 = vld [vmem:[%s5148_s1 + $0xd8] sm:$0xff]  ;;  %v905_v23 = vld [vmem:[%s5148_s1 + $0x1d0] sm:$0xff] }
  0x21   : > { %3243 = vmatpush1.bf16.msra.mxu1 %v3242_v29  ;;  %v3948_v20 = vpack.c.bf16 %v904_v17, %v903_v16  ;;  %v906_v25 = vld [vmem:[%s5148_s1 + $0x1d8] sm:$0xff]  ;;  %v3269_v26 = vpack.c.bf16 %v874_v22, %v873_v21  ;;  %v875_v28 = vld [vmem:[%s5148_s1 + $0xe0] sm:$0xff]  ;;  %v876_v29 = vld [vmem:[%s5148_s1 + $0xe8] sm:$0xff] }
  0x22   : > { %3291 = vmatpush1.bf16.msra.mxu0 %v3805_v30  ;;  %3244 = vmatprep.subr.bf16.mxu1 %v3679_v3  ;;  %v3965_v27 = vpack.c.bf16 %v906_v25, %v905_v23  ;;  %v907_v31 = vld [vmem:[%s5148_s1 + $0x1e0] sm:$0xff]  ;;  %v908_v32 = vld [vmem:[%s5148_s1 + $0x1e8] sm:$0xff]  ;;  %v3272_v33 = vpack.c.bf16 %v876_v29, %v875_v28  ;;  %v878_v37 = vld [vmem:[%s5148_s1 + $0xf8] sm:$0xff] }
  0x23   : > { %3292 = vmatprep.subr.bf16.mxu0 %v3679_v3  ;;  %v3982_v34 = vpack.c.bf16 %v908_v32, %v907_v31  ;;  %v909_v38 = vld [vmem:[%s5148_s1 + $0x1f0] sm:$0xff]  ;;  %v910_v39 = vld [vmem:[%s5148_s1 + $0x1f8] sm:$0xff]  ;;  %v911_v42 = vld [vmem:[%s5148_s1 + $0x200] sm:$0xff] }
  0x24   : > { %v3999_v41 = vpack.c.bf16 %v910_v39, %v909_v38  ;;  %v399_v45 = vld [vmem:[%s3823_s21] sm:$0xff]  ;;  %v401_v46 = vld [vmem:[%s3823_s21 + $0x10] sm:$0xff]  ;;  %v914_v51 = vld [vmem:[%s5148_s1 + $0x218] sm:$0xff] }
  0x25   : > { %3246 = vmatpush1.bf16.msra.mxu1 %v3245_v35  ;;  %v877_v35 = vld [vmem:[%s5148_s1 + $0xf0] sm:$0xff]  ;;  %v407_v48 = vld [vmem:[%s3823_s21 + $0x40] sm:$0xff]  ;;  %v406_v53 = vld [vmem:[%s3823_s21 + $0x38] sm:$0xff] }
  0x26   : > { %3294 = vmatpush1.bf16.msra.mxu0 %v3827_v36  ;;  %3247 = vmatprep.subr.bf16.mxu1 %v3679_v3  ;;  %v3275_v40 = vpack.c.bf16 %v878_v37, %v877_v35  ;;  %v409_v52 = vld [vmem:[%s3823_s21 + $0x50] sm:$0xff]  ;;  %v408_v54 = vld [vmem:[%s3823_s21 + $0x48] sm:$0xff]  ;;  %v915_v59 = vld [vmem:[%s5148_s1 + $0x220] sm:$0xff] }
  0x27   : > { %3295 = vmatprep.subr.bf16.mxu0 %v3679_v3  ;;  %v416_v58 = vld [vmem:[%s3823_s21 + $0x88] sm:$0xff]  ;;  %v413_v60 = vld [vmem:[%s3823_s21 + $0x70] sm:$0xff]  ;;  %v423_v1 = vld [vmem:[%s3823_s21 + $0xc0] sm:$0xff] }
  0x28   : > { %v421_v63 = vld [vmem:[%s3823_s21 + $0xb0] sm:$0xff]  ;;  %v420_v6 = vld [vmem:[%s3823_s21 + $0xa8] sm:$0xff]  ;;  %v430_v10 = vld [vmem:[%s3823_s21 + $0xf8] sm:$0xff] }
  0x29   : > { %3249 = vmatpush1.bf16.msra.mxu1 %v3248_v43  ;;  %v912_v43 = vld [vmem:[%s5148_s1 + $0x208] sm:$0xff]  ;;  %v917_v2 = vld [vmem:[%s5148_s1 + $0x230] sm:$0xff]  ;;  %v427_v15 = vld [vmem:[%s3823_s21 + $0xe0] sm:$0xff] }
  0x2a   : > { %3297 = vmatpush1.bf16.msra.mxu0 %v3846_v44  ;;  %3250 = vmatprep.subr.bf16.mxu1 %v3679_v3  ;;  %v3326_v47 = vpack.c.bf16 %v912_v43, %v911_v42  ;;  %v428_v7 = vld [vmem:[%s3823_s21 + $0xe8] sm:$0xff]  ;;  %v435_v16 = vld [vmem:[%s3823_s21 + $0x120] sm:$0xff]  ;;  %v921_v21 = vld [vmem:[%s5148_s1 + $0x250] sm:$0xff] }
  0x2b   : > { %3298 = vmatprep.subr.bf16.mxu0 %v3679_v3  ;;  %v920_v14 = vld [vmem:[%s5148_s1 + $0x248] sm:$0xff]  ;;  %v922_v22 = vld [vmem:[%s5148_s1 + $0x258] sm:$0xff]  ;;  %v923_v29 = vld [vmem:[%s5148_s1 + $0x260] sm:$0xff] }
  0x2c   : > { %v434_v23 = vld [vmem:[%s3823_s21 + $0x118] sm:$0xff]  ;;  %v436_v25 = vld [vmem:[%s3823_s21 + $0x128] sm:$0xff]  ;;  %v441_v32 = vld [vmem:[%s3823_s21 + $0x150] sm:$0xff] }
  0x2d   : > { %3252 = vmatpush1.bf16.msra.mxu1 %v3251_v49  ;;  %v913_v49 = vld [vmem:[%s5148_s1 + $0x210] sm:$0xff]  ;;  %v444_v28 = vld [vmem:[%s3823_s21 + $0x168] sm:$0xff]  ;;  %v451_v37 = vld [vmem:[%s3823_s21 + $0x1a0] sm:$0xff] }
  0x2e   : > { %3300 = vmatpush1.bf16.msra.mxu0 %v3863_v50  ;;  %3253 = vmatprep.subr.bf16.mxu1 %v3679_v3  ;;  %v3329_v57 = vpack.c.bf16 %v914_v51, %v913_v49  ;;  %v924_v31 = vld [vmem:[%s5148_s1 + $0x268] sm:$0xff]  ;;  %v925_v38 = vld [vmem:[%s5148_s1 + $0x270] sm:$0xff]  ;;  %v926_v39 = vld [vmem:[%s5148_s1 + $0x278] sm:$0xff] }
  0x2f   : > { %3301 = vmatprep.subr.bf16.mxu0 %v3679_v3  ;;  %v3344_v35 = vpack.c.bf16 %v924_v31, %v923_v29  ;;  %v450_v42 = vld [vmem:[%s3823_s21 + $0x198] sm:$0xff]  ;;  %v3347_v43 = vpack.c.bf16 %v926_v39, %v925_v38  ;;  %v457_v49 = vld [vmem:[%s3823_s21 + $0x1d0] sm:$0xff]  ;;  %v463_v51 = vld [vmem:[%s3823_s21 + $0x200] sm:$0xff] }
  0x30   : > { %v499_v29 = vld [vmem:[%s3823_s21 + $0x320] sm:$0xff]  ;;  %v505_v31 = vld [vmem:[%s3823_s21 + $0x350] sm:$0xff]  ;;  %v512_v38 = vld [vmem:[%s3823_s21 + $0x388] sm:$0xff] }
  0x31   : > { %3255 = vmatpush1.bf16.msra.mxu1 %v3254_v55  ;;  %v414_v55 = vld [vmem:[%s3823_s21 + $0x78] sm:$0xff] }
  0x32   : > { %3303 = vmatpush1.bf16.msra.mxu0 %v3880_v56  ;;  %3256 = vmatprep.subr.bf16.mxu1 %v3679_v3 }
  0x33   : > { %3304 = vmatprep.subr.bf16.mxu0 %v3679_v3 }
  0x35   : > { %3258 = vmatpush1.bf16.msra.mxu1 %v3257_v61  ;;  %v415_v61 = vld [vmem:[%s3823_s21 + $0x80] sm:$0xff] }
  0x36   : > { %3306 = vmatpush1.bf16.msra.mxu0 %v3897_v62  ;;  %3259 = vmatprep.subr.bf16.mxu1 %v3679_v3 }
  0x37   : > { %3307 = vmatprep.subr.bf16.mxu0 %v3679_v3 }
  0x39   : > { %3261 = vmatpush1.bf16.msra.mxu1 %v3260_v4  ;;  %v918_v4 = vld [vmem:[%s5148_s1 + $0x238] sm:$0xff] }
  0x3a   : > { %3309 = vmatpush1.bf16.msra.mxu0 %v3914_v5  ;;  %3262 = vmatprep.subr.bf16.mxu1 %v3679_v3  ;;  %v3335_v9 = vpack.c.bf16 %v918_v4, %v917_v2  ;;  %v479_v2 = vld [vmem:[%s3823_s21 + $0x280] sm:$0xff]  ;;  %v934_v4 = vld [vmem:[%s5148_s1 + $0x2b8] sm:$0xff] }
  0x3b   : > { %3310 = vmatprep.subr.bf16.mxu0 %v3679_v3 }
  0x3d   : > { %3264 = vmatpush1.bf16.msra.mxu1 %v3263_v11  ;;  %v919_v11 = vld [vmem:[%s5148_s1 + $0x240] sm:$0xff] }
  0x3e   : > { %3312 = vmatpush1.bf16.msra.mxu0 %v3931_v13  ;;  %3265 = vmatprep.subr.bf16.mxu1 %v3679_v3  ;;  %v3338_v17 = vpack.c.bf16 %v920_v14, %v919_v11  ;;  %v936_v11 = vld [vmem:[%s5148_s1 + $0x2c8] sm:$0xff]  ;;  %v483_v14 = vld [vmem:[%s3823_s21 + $0x2a0] sm:$0xff] }
  0x3f   : > { %3313 = vmatprep.subr.bf16.mxu0 %v3679_v3 }
  0x41   : > { %3267 = vmatpush1.bf16.msra.mxu1 %v3266_v19  ;;  %v437_v19 = vld [vmem:[%s3823_s21 + $0x130] sm:$0xff] }
  0x42   : > { %3315 = vmatpush1.bf16.msra.mxu0 %v3948_v20  ;;  %3268 = vmatprep.subr.bf16.mxu1 %v3679_v3 }
  0x43   : > { %3316 = vmatprep.subr.bf16.mxu0 %v3679_v3 }
  0x45   : > { %3270 = vmatpush1.bf16.msra.mxu1 %v3269_v26  ;;  %v3341_v26 = vpack.c.bf16 %v922_v22, %v921_v21  ;;  %v490_v21 = vld [vmem:[%s3823_s21 + $0x2d8] sm:$0xff]  ;;  %v492_v22 = vld [vmem:[%s3823_s21 + $0x2e8] sm:$0xff] }
  0x46   : > { %3318 = vmatpush1.bf16.msra.mxu0 %v3965_v27  ;;  %3271 = vmatprep.subr.bf16.mxu1 %v3679_v3 }
  0x47   : > { %3319 = vmatprep.subr.bf16.mxu0 %v3679_v3 }
  0x49   : > { %3273 = vmatpush1.bf16.msra.mxu1 %v3272_v33  ;;  %v443_v33 = vld [vmem:[%s3823_s21 + $0x160] sm:$0xff] }
  0x4a   : > { %3321 = vmatpush1.bf16.msra.mxu0 %v3982_v34  ;;  %3274 = vmatprep.subr.bf16.mxu1 %v3679_v3 }
  0x4b   : > { %3322 = vmatprep.subr.bf16.mxu0 %v3679_v3 }
  0x4d   : > { %3276 = vmatpush1.bf16.msra.mxu1 %v3275_v40  ;;  %v448_v40 = vld [vmem:[%s3823_s21 + $0x188] sm:$0xff] }
  0x4e   : > { %3324 = vmatpush1.bf16.msra.mxu0 %v3999_v41  ;;  %3405 = vmatprep.subr.bf16.mxu1 %v3679_v3 }
  0x4f   : > { %3325 = vmatprep.subr.bf16.mxu0 %v3679_v3 }
  0x50   : > { %1024 = vmatmul.mubr.f32.vlgmr.msra.gmra.mrb[0].mxu1 %v399_v45  ;;  %v458_v45 = vld [vmem:[%s3823_s21 + $0x1d8] sm:$0xff] }
  0x51   : > { %1409 = vmatmul.mubr.f32.vlgmr.msra.gmra.mrb[0].mxu0 %v401_v46  ;;  %3421 = vmatpush1.bf16.msra.mxu1 %v3740_v8  ;;  %v916_v8 = vld [vmem:[%s5148_s1 + $0x228] sm:$0xff]  ;;  %v927_v46 = vld [vmem:[%s5148_s1 + $0x280] sm:$0xff] }
  0x52   : > { %3327 = vmatpush1.bf16.msra.mxu0 %v3326_v47  ;;  %1028 = vmatprep.mubr.f32.mxu1 %v407_v48  ;;  %v3332_v0 = vpack.c.bf16 %v916_v8, %v915_v59  ;;  %v928_v47 = vld [vmem:[%s5148_s1 + $0x288] sm:$0xff]  ;;  %v455_v48 = vld [vmem:[%s3823_s21 + $0x1c0] sm:$0xff] }
  0x53   : > { %1413 = vmatprep.mubr.f32.mxu0 %v409_v52  ;;  %3328 = vmatprep.subr.bf16.mxu0 %v3679_v3  ;;  %v3350_v52 = vpack.c.bf16 %v928_v47, %v927_v46  ;;  %v472_v8 = vld [vmem:[%s3823_s21 + $0x248] sm:$0xff]  ;;  %v525_v47 = vld [vmem:[%s3823_s21 + $0x3f0] sm:$0xff] }
  0x54   : > { %1029 = vmatmul.mubr.f32.gmra.mrb[2].mxu1 %v406_v53  ;;  %3406 = vmatprep.subr.bf16.mxu1 %v3679_v3  ;;  %v465_v53 = vld [vmem:[%s3823_s21 + $0x210] sm:$0xff]  ;;  %v528_v46 = vld [vmem:[%s3823_s21 + $0x408] sm:$0xff] }
  0x55   : > { %1414 = vmatmul.mubr.f32.gmra.mrb[2].mxu0 %v408_v54  ;;  %1033 = vmatprep.mubr.f32.mxu1 %v414_v55  ;;  %v930_v54 = vld [vmem:[%s5148_s1 + $0x298] sm:$0xff] }
  0x56   : > { %1418 = vmatprep.mubr.f32.mxu0 %v416_v58  ;;  %3330 = vmatpush1.bf16.msra.mxu0 %v3329_v57  ;;  %v462_v55 = vld [vmem:[%s3823_s21 + $0x1f8] sm:$0xff]  ;;  %v464_v57 = vld [vmem:[%s3823_s21 + $0x208] sm:$0xff] }
  0x57   : > { %3422 = vmatpush1.bf16.msra.mxu1 %v3751_v12  ;;  %3331 = vmatprep.subr.bf16.mxu0 %v3679_v3  ;;  %v422_v12 = vld [vmem:[%s3823_s21 + $0xb8] sm:$0xff] }
  0x58   : > { %1034 = vmatmul.mubr.f32.gmra.mrb[4].mxu1 %v413_v60  ;;  %3407 = vmatprep.subr.bf16.mxu1 %v3679_v3  ;;  %v470_v58 = vld [vmem:[%s3823_s21 + $0x238] sm:$0xff]  ;;  %v932_v60 = vld [vmem:[%s5148_s1 + $0x2a8] sm:$0xff] }
  0x59   : > { %1419 = vmatmul.mubr.f32.gmra.mrb[4].mxu0 %v415_v61  ;;  %1038 = vmatprep.mubr.f32.mxu1 %v421_v63  ;;  %v469_v61 = vld [vmem:[%s3823_s21 + $0x230] sm:$0xff]  ;;  %v471_v63 = vld [vmem:[%s3823_s21 + $0x240] sm:$0xff] }
  0x5a   : > { %1423 = vmatprep.mubr.f32.mxu0 %v423_v1  ;;  %3333 = vmatpush1.bf16.msra.mxu0 %v3332_v0  ;;  %v477_v0 = vld [vmem:[%s3823_s21 + $0x270] sm:$0xff] }
  0x5b   : > { %3423 = vmatpush1.bf16.msra.mxu1 %v3768_v18  ;;  %3334 = vmatprep.subr.bf16.mxu0 %v3679_v3  ;;  %v429_v18 = vld [vmem:[%s3823_s21 + $0xf0] sm:$0xff] }
  0x5c   : > { %1039 = vmatmul.mubr.f32.gmra.mrb[6].mxu1 %v420_v6  ;;  %3408 = vmatprep.subr.bf16.mxu1 %v3679_v3  ;;  %v476_v6 = vld [vmem:[%s3823_s21 + $0x268] sm:$0xff] }
  0x5d   : > { %1424 = vmatmul.mubr.f32.gmra.mrb[6].mxu0 %v422_v12  ;;  %1043 = vmatprep.mubr.f32.mxu1 %v428_v7  ;;  %v478_v12 = vld [vmem:[%s3823_s21 + $0x278] sm:$0xff]  ;;  %v484_v7 = vld [vmem:[%s3823_s21 + $0x2a8] sm:$0xff] }
  0x5e   : > { %1428 = vmatprep.mubr.f32.mxu0 %v430_v10  ;;  %3336 = vmatpush1.bf16.msra.mxu0 %v3335_v9  ;;  %v486_v10 = vld [vmem:[%s3823_s21 + $0x2b8] sm:$0xff] }
  0x5f   : > { %3337 = vmatprep.subr.bf16.mxu0 %v3679_v3  ;;  %3424 = vmatpush1.bf16.msra.mxu1 %v3787_v24  ;;  %v442_v24 = vld [vmem:[%s3823_s21 + $0x158] sm:$0xff] }
  0x60   : > { %1044 = vmatmul.mubr.f32.gmra.mrb[8].mxu1 %v427_v15  ;;  %3409 = vmatprep.subr.bf16.mxu1 %v3679_v3  ;;  %v485_v15 = vld [vmem:[%s3823_s21 + $0x2b0] sm:$0xff] }
  0x61   : > { %1429 = vmatmul.mubr.f32.gmra.mrb[8].mxu0 %v429_v18  ;;  %1048 = vmatprep.mubr.f32.mxu1 %v435_v16  ;;  %v491_v18 = vld [vmem:[%s3823_s21 + $0x2e0] sm:$0xff] }
  0x62   : > { %1433 = vmatprep.mubr.f32.mxu0 %v437_v19  ;;  %3339 = vmatpush1.bf16.msra.mxu0 %v3338_v17  ;;  %v493_v17 = vld [vmem:[%s3823_s21 + $0x2f0] sm:$0xff]  ;;  %v938_v19 = vld [vmem:[%s5148_s1 + $0x2d8] sm:$0xff] }
  0x63   : > { %3340 = vmatprep.subr.bf16.mxu0 %v3679_v3  ;;  %3425 = vmatpush1.bf16.msra.mxu1 %v3805_v30  ;;  %v449_v30 = vld [vmem:[%s3823_s21 + $0x190] sm:$0xff] }
  0x64   : > { %1049 = vmatmul.mubr.f32.gmra.mrb[10].mxu1 %v434_v23  ;;  %3410 = vmatprep.subr.bf16.mxu1 %v3679_v3  ;;  %v498_v23 = vld [vmem:[%s3823_s21 + $0x318] sm:$0xff] }
  0x65   : > { %1434 = vmatmul.mubr.f32.gmra.mrb[10].mxu0 %v436_v25  ;;  %1053 = vmatprep.mubr.f32.mxu1 %v442_v24  ;;  %v500_v24 = vld [vmem:[%s3823_s21 + $0x328] sm:$0xff] }
  0x66   : > { %1438 = vmatprep.mubr.f32.mxu0 %v444_v28  ;;  %3342 = vmatpush1.bf16.msra.mxu0 %v3341_v26  ;;  %v940_v26 = vld [vmem:[%s5148_s1 + $0x2e8] sm:$0xff]  ;;  %v497_v28 = vld [vmem:[%s3823_s21 + $0x310] sm:$0xff] }
  0x67   : > { %3343 = vmatprep.subr.bf16.mxu0 %v3679_v3  ;;  %3426 = vmatpush1.bf16.msra.mxu1 %v3827_v36  ;;  %v456_v36 = vld [vmem:[%s3823_s21 + $0x1c8] sm:$0xff] }
  0x68   : > { %1054 = vmatmul.mubr.f32.gmra.mrb[12].mxu1 %v441_v32  ;;  %3411 = vmatprep.subr.bf16.mxu1 %v3679_v3 }
  0x69   : > { %1439 = vmatmul.mubr.f32.gmra.mrb[12].mxu0 %v443_v33  ;;  %1058 = vmatprep.mubr.f32.mxu1 %v449_v30  ;;  %v507_v33 = vld [vmem:[%s3823_s21 + $0x360] sm:$0xff]  ;;  %v942_v30 = vld [vmem:[%s5148_s1 + $0x2f8] sm:$0xff] }
  0x6a   : > { %1443 = vmatprep.mubr.f32.mxu0 %v451_v37  ;;  %3345 = vmatpush1.bf16.msra.mxu0 %v3344_v35  ;;  %v504_v35 = vld [vmem:[%s3823_s21 + $0x348] sm:$0xff]  ;;  %v506_v37 = vld [vmem:[%s3823_s21 + $0x358] sm:$0xff] }
  0x6b   : > { %3346 = vmatprep.subr.bf16.mxu0 %v3679_v3  ;;  %3427 = vmatpush1.bf16.msra.mxu1 %v3846_v44  ;;  %v929_v44 = vld [vmem:[%s5148_s1 + $0x290] sm:$0xff] }
  0x6c   : > { %1059 = vmatmul.mubr.f32.gmra.mrb[14].mxu1 %v448_v40  ;;  %3412 = vmatprep.subr.bf16.mxu1 %v3679_v3  ;;  %v3353_v59 = vpack.c.bf16 %v930_v54, %v929_v44  ;;  %v514_v40 = vld [vmem:[%s3823_s21 + $0x398] sm:$0xff]  ;;  %v539_v54 = vld [vmem:[%s3823_s21 + $0x460] sm:$0xff] }
  0x6d   : > { %1444 = vmatmul.mubr.f32.gmra.mrb[14].mxu0 %v450_v42  ;;  %1063 = vmatprep.mubr.f32.mxu1 %v456_v36  ;;  %v513_v42 = vld [vmem:[%s3823_s21 + $0x390] sm:$0xff]  ;;  %v519_v36 = vld [vmem:[%s3823_s21 + $0x3c0] sm:$0xff]  ;;  %v542_v44 = vld [vmem:[%s3823_s21 + $0x478] sm:$0xff] }
  0x6e   : > { %1448 = vmatprep.mubr.f32.mxu0 %v458_v45  ;;  %3348 = vmatpush1.bf16.msra.mxu0 %v3347_v43  ;;  %v521_v43 = vld [vmem:[%s3823_s21 + $0x3d0] sm:$0xff]  ;;  %v526_v45 = vld [vmem:[%s3823_s21 + $0x3f8] sm:$0xff] }
  0x6f   : > { %3349 = vmatprep.subr.bf16.mxu0 %v3679_v3  ;;  %3428 = vmatpush1.bf16.msra.mxu1 %v3863_v50  ;;  %v931_v50 = vld [vmem:[%s5148_s1 + $0x2a0] sm:$0xff] }
  0x70   : > { %1064 = vmatmul.mubr.f32.gmra.mrb[16].mxu1 %v455_v48  ;;  %3413 = vmatprep.subr.bf16.mxu1 %v3679_v3  ;;  %v3356_v1 = vpack.c.bf16 %v932_v60, %v931_v50  ;;  %v533_v48 = vld [vmem:[%s3823_s21 + $0x430] sm:$0xff]  ;;  %v554_v50 = vld [vmem:[%s3823_s21 + $0x4d8] sm:$0xff]  ;;  %v556_v60 = vld [vmem:[%s3823_s21 + $0x4e8] sm:$0xff] }
  0x71   : > { %1449 = vmatmul.mubr.f32.gmra.mrb[16].mxu0 %v457_v49  ;;  %1068 = vmatprep.mubr.f32.mxu1 %v463_v51  ;;  %v535_v49 = vld [vmem:[%s3823_s21 + $0x440] sm:$0xff]  ;;  %v532_v51 = vld [vmem:[%s3823_s21 + $0x428] sm:$0xff] }
  0x72   : > { %1453 = vmatprep.mubr.f32.mxu0 %v465_v53  ;;  %3351 = vmatpush1.bf16.msra.mxu0 %v3350_v52  ;;  %v534_v52 = vld [vmem:[%s3823_s21 + $0x438] sm:$0xff]  ;;  %v540_v53 = vld [vmem:[%s3823_s21 + $0x468] sm:$0xff] }
  0x73   : > { %3352 = vmatprep.subr.bf16.mxu0 %v3679_v3  ;;  %3429 = vmatpush1.bf16.msra.mxu1 %v3880_v56  ;;  %v933_v56 = vld [vmem:[%s5148_s1 + $0x2b0] sm:$0xff] }
  0x74   : > { %1069 = vmatmul.mubr.f32.gmra.mrb[18].mxu1 %v462_v55  ;;  %3414 = vmatprep.subr.bf16.mxu1 %v3679_v3  ;;  %v3359_v9 = vpack.c.bf16 %v934_v4, %v933_v56  ;;  %v541_v55 = vld [vmem:[%s3823_s21 + $0x470] sm:$0xff]  ;;  %v562_v56 = vld [vmem:[%s3823_s21 + $0x518] sm:$0xff]  ;;  %v568_v4 = vld [vmem:[%s3823_s21 + $0x548] sm:$0xff] }
  0x75   : > { %1454 = vmatmul.mubr.f32.gmra.mrb[18].mxu0 %v464_v57  ;;  %1073 = vmatprep.mubr.f32.mxu1 %v470_v58  ;;  %v547_v57 = vld [vmem:[%s3823_s21 + $0x4a0] sm:$0xff]  ;;  %v549_v58 = vld [vmem:[%s3823_s21 + $0x4b0] sm:$0xff] }
  0x76   : > { %1458 = vmatprep.mubr.f32.mxu0 %v472_v8  ;;  %3354 = vmatpush1.bf16.msra.mxu0 %v3353_v59  ;;  %v546_v59 = vld [vmem:[%s3823_s21 + $0x498] sm:$0xff]  ;;  %v548_v8 = vld [vmem:[%s3823_s21 + $0x4a8] sm:$0xff] }
  0x77   : > { %3355 = vmatprep.subr.bf16.mxu0 %v3679_v3  ;;  %3430 = vmatpush1.bf16.msra.mxu1 %v3897_v62  ;;  %v935_v62 = vld [vmem:[%s5148_s1 + $0x2c0] sm:$0xff] }
  0x78   : > { %1074 = vmatmul.mubr.f32.gmra.mrb[20].mxu1 %v469_v61  ;;  %3415 = vmatprep.subr.bf16.mxu1 %v3679_v3  ;;  %v3362_v16 = vpack.c.bf16 %v936_v11, %v935_v62  ;;  %v553_v61 = vld [vmem:[%s3823_s21 + $0x4d0] sm:$0xff]  ;;  %v574_v62 = vld [vmem:[%s3823_s21 + $0x578] sm:$0xff]  ;;  %v576_v11 = vld [vmem:[%s3823_s21 + $0x588] sm:$0xff] }
  0x79   : > { %1459 = vmatmul.mubr.f32.gmra.mrb[20].mxu0 %v471_v63  ;;  %1078 = vmatprep.mubr.f32.mxu1 %v477_v0  ;;  %v555_v63 = vld [vmem:[%s3823_s21 + $0x4e0] sm:$0xff]  ;;  %v561_v0 = vld [vmem:[%s3823_s21 + $0x510] sm:$0xff] }
  0x7a   : > { %1463 = vmatprep.mubr.f32.mxu0 %v479_v2  ;;  %3357 = vmatpush1.bf16.msra.mxu0 %v3356_v1  ;;  %v563_v1 = vld [vmem:[%s3823_s21 + $0x520] sm:$0xff]  ;;  %v560_v2 = vld [vmem:[%s3823_s21 + $0x508] sm:$0xff] }
  0x7b   : > { %3358 = vmatprep.subr.bf16.mxu0 %v3679_v3  ;;  %3431 = vmatpush1.bf16.msra.mxu1 %v3914_v5  ;;  %v937_v5 = vld [vmem:[%s5148_s1 + $0x2d0] sm:$0xff] }
  0x7c   : > { %1079 = vmatmul.mubr.f32.gmra.mrb[22].mxu1 %v476_v6  ;;  %3416 = vmatprep.subr.bf16.mxu1 %v3679_v3  ;;  %v3365_v25 = vpack.c.bf16 %v938_v19, %v937_v5  ;;  %v570_v6 = vld [vmem:[%s3823_s21 + $0x558] sm:$0xff]  ;;  %v591_v5 = vld [vmem:[%s3823_s21 + $0x600] sm:$0xff]  ;;  %v588_v19 = vld [vmem:[%s3823_s21 + $0x5e8] sm:$0xff] }
  0x7d   : > { %1464 = vmatmul.mubr.f32.gmra.mrb[22].mxu0 %v478_v12  ;;  %1083 = vmatprep.mubr.f32.mxu1 %v484_v7  ;;  %v567_v12 = vld [vmem:[%s3823_s21 + $0x540] sm:$0xff]  ;;  %v569_v7 = vld [vmem:[%s3823_s21 + $0x550] sm:$0xff] }
  0x7e   : > { %1468 = vmatprep.mubr.f32.mxu0 %v486_v10  ;;  %3360 = vmatpush1.bf16.msra.mxu0 %v3359_v9  ;;  %v575_v9 = vld [vmem:[%s3823_s21 + $0x580] sm:$0xff]  ;;  %v577_v10 = vld [vmem:[%s3823_s21 + $0x590] sm:$0xff] }
  0x7f   : > { %3361 = vmatprep.subr.bf16.mxu0 %v3679_v3  ;;  %3432 = vmatpush1.bf16.msra.mxu1 %v3931_v13  ;;  %v939_v13 = vld [vmem:[%s5148_s1 + $0x2e0] sm:$0xff] }
  0x80   : > { %1084 = vmatmul.mubr.f32.gmra.mrb[24].mxu1 %v483_v14  ;;  %3417 = vmatprep.subr.bf16.mxu1 %v3679_v3  ;;  %v3368_v32 = vpack.c.bf16 %v940_v26, %v939_v13  ;;  %v582_v14 = vld [vmem:[%s3823_s21 + $0x5b8] sm:$0xff]  ;;  %v603_v13 = vld [vmem:[%s3823_s21 + $0x660] sm:$0xff]  ;;  %v605_v26 = vld [vmem:[%s3823_s21 + $0x670] sm:$0xff] }
  0x81   : > { %1469 = vmatmul.mubr.f32.gmra.mrb[24].mxu0 %v485_v15  ;;  %1088 = vmatprep.mubr.f32.mxu1 %v491_v18  ;;  %v584_v15 = vld [vmem:[%s3823_s21 + $0x5c8] sm:$0xff]  ;;  %v581_v18 = vld [vmem:[%s3823_s21 + $0x5b0] sm:$0xff] }
  0x82   : > { %1473 = vmatprep.mubr.f32.mxu0 %v493_v17  ;;  %3363 = vmatpush1.bf16.msra.mxu0 %v3362_v16  ;;  %v583_v16 = vld [vmem:[%s3823_s21 + $0x5c0] sm:$0xff]  ;;  %v589_v17 = vld [vmem:[%s3823_s21 + $0x5f0] sm:$0xff] }
  0x83   : > { %3364 = vmatprep.subr.bf16.mxu0 %v3679_v3  ;;  %3433 = vmatpush1.bf16.msra.mxu1 %v3948_v20  ;;  %v941_v20 = vld [vmem:[%s5148_s1 + $0x2f0] sm:$0xff] }
  0x84   : > { %1089 = vmatmul.mubr.f32.gmra.mrb[26].mxu1 %v490_v21  ;;  %3418 = vmatprep.subr.bf16.mxu1 %v3679_v3  ;;  %v3371_v39 = vpack.c.bf16 %v942_v30, %v941_v20  ;;  %v590_v21 = vld [vmem:[%s3823_s21 + $0x5f8] sm:$0xff]  ;;  %v611_v20 = vld [vmem:[%s3823_s21 + $0x6a0] sm:$0xff]  ;;  %v617_v30 = vld [vmem:[%s3823_s21 + $0x6d0] sm:$0xff] }
  0x85   : > { %1474 = vmatmul.mubr.f32.gmra.mrb[26].mxu0 %v492_v22  ;;  %1093 = vmatprep.mubr.f32.mxu1 %v498_v23  ;;  %v596_v22 = vld [vmem:[%s3823_s21 + $0x628] sm:$0xff]  ;;  %v598_v23 = vld [vmem:[%s3823_s21 + $0x638] sm:$0xff] }
  0x86   : > { %1478 = vmatprep.mubr.f32.mxu0 %v500_v24  ;;  %3366 = vmatpush1.bf16.msra.mxu0 %v3365_v25  ;;  %v595_v25 = vld [vmem:[%s3823_s21 + $0x620] sm:$0xff]  ;;  %v597_v24 = vld [vmem:[%s3823_s21 + $0x630] sm:$0xff] }
  0x87   : > { %3367 = vmatprep.subr.bf16.mxu0 %v3679_v3  ;;  %3434 = vmatpush1.bf16.msra.mxu1 %v3965_v27  ;;  %v511_v27 = vld [vmem:[%s3823_s21 + $0x380] sm:$0xff] }
  0x88   : > { %1094 = vmatmul.mubr.f32.gmra.mrb[28].mxu1 %v497_v28  ;;  %3419 = vmatprep.subr.bf16.mxu1 %v3679_v3  ;;  %v602_v28 = vld [vmem:[%s3823_s21 + $0x658] sm:$0xff] }
  0x89   : > { %1479 = vmatmul.mubr.f32.gmra.mrb[28].mxu0 %v499_v29  ;;  %1098 = vmatprep.mubr.f32.mxu1 %v505_v31  ;;  %v604_v29 = vld [vmem:[%s3823_s21 + $0x668] sm:$0xff]  ;;  %v610_v31 = vld [vmem:[%s3823_s21 + $0x698] sm:$0xff] }
  0x8a   : > { %1483 = vmatprep.mubr.f32.mxu0 %v507_v33  ;;  %3369 = vmatpush1.bf16.msra.mxu0 %v3368_v32  ;;  %v612_v32 = vld [vmem:[%s3823_s21 + $0x6a8] sm:$0xff]  ;;  %v609_v33 = vld [vmem:[%s3823_s21 + $0x690] sm:$0xff] }
  0x8b   : > { %3370 = vmatprep.subr.bf16.mxu0 %v3679_v3  ;;  %3435 = vmatpush1.bf16.msra.mxu1 %v3982_v34  ;;  %v520_v34 = vld [vmem:[%s3823_s21 + $0x3c8] sm:$0xff] }
  0x8c   : > { %1099 = vmatmul.mubr.f32.gmra.mrb[30].mxu1 %v504_v35  ;;  %3420 = vmatprep.subr.bf16.mxu1 %v3679_v3  ;;  %v518_v3 = vld [vmem:[%s3823_s21 + $0x3b8] sm:$0xff]  ;;  %v619_v35 = vld [vmem:[%s3823_s21 + $0x6e0] sm:$0xff] }
  0x8d   : > { %1484 = vmatmul.mubr.f32.gmra.mrb[30].mxu0 %v506_v37  ;;  %1103 = vmatprep.mubr.f32.mxu1 %v512_v38  ;;  %v616_v37 = vld [vmem:[%s3823_s21 + $0x6c8] sm:$0xff]  ;;  %v618_v38 = vld [vmem:[%s3823_s21 + $0x6d8] sm:$0xff] }
  0x8e   : > { %1488 = vmatprep.mubr.f32.mxu0 %v514_v40  ;;  %3372 = vmatpush1.bf16.msra.mxu0 %v3371_v39  ;;  %v624_v39 = vld [vmem:[%s3823_s21 + $0x708] sm:$0xff]  ;;  %v626_v40 = vld [vmem:[%s3823_s21 + $0x718] sm:$0xff] }
  0x8f   : > { %3436 = vmatpush1.bf16.msra.mxu1 %v3999_v41  ;;  %v527_v41 = vld [vmem:[%s3823_s21 + $0x400] sm:$0xff] }
  0x90   : > { %1104 = vmatmul.mubr.f32.gmra.mrb[32].mxu1 %v511_v27  ;;  %v623_v27 = vld [vmem:[%s3823_s21 + $0x700] sm:$0xff] }
  0x91   : > { %1489 = vmatmul.mubr.f32.gmra.mrb[32].mxu0 %v513_v42  ;;  %1108 = vmatprep.mubr.f32.mxu1 %v519_v36  ;;  %v625_v42 = vld [vmem:[%s3823_s21 + $0x710] sm:$0xff]  ;;  %v631_v36 = vld [vmem:[%s3823_s21 + $0x740] sm:$0xff] }
  0x92   : > { %1493 = vmatprep.mubr.f32.mxu0 %v521_v43  ;;  %v633_v43 = vld [vmem:[%s3823_s21 + $0x750] sm:$0xff] }
  0x94   : > { %1109 = vmatmul.mubr.f32.gmra.mrb[34].mxu1 %v518_v3  ;;  %v630_v3 = vld [vmem:[%s3823_s21 + $0x738] sm:$0xff] }
  0x95   : > { %1494 = vmatmul.mubr.f32.gmra.mrb[34].mxu0 %v520_v34  ;;  %1113 = vmatprep.mubr.f32.mxu1 %v526_v45  ;;  %v943_v34 = vld [vmem:[%s5148_s1 + $0x300] sm:$0xff]  ;;  %v944_v45 = vld [vmem:[%s5148_s1 + $0x308] sm:$0xff] }
  0x96   : > { %1498 = vmatprep.mubr.f32.mxu0 %v528_v46  ;;  %v632_v46 = vld [vmem:[%s3823_s21 + $0x748] sm:$0xff] }
  0x98   : > { %1114 = vmatmul.mubr.f32.gmra.mrb[36].mxu1 %v525_v47  ;;  %v638_v47 = vld [vmem:[%s3823_s21 + $0x778] sm:$0xff] }
  0x99   : > { %1499 = vmatmul.mubr.f32.gmra.mrb[36].mxu0 %v527_v41  ;;  %1118 = vmatprep.mubr.f32.mxu1 %v533_v48  ;;  %v4288_v41 = vpack.c.bf16 %v944_v45, %v943_v34  ;;  %v640_v48 = vld [vmem:[%s3823_s21 + $0x788] sm:$0xff]  ;;  %v743_v34 = vld [vmem:[%s3823_s21 + $0xac0] sm:$0xff] }
  0x9a   : > { %1503 = vmatprep.mubr.f32.mxu0 %v535_v49  ;;  %v637_v49 = vld [vmem:[%s3823_s21 + $0x770] sm:$0xff]  ;;  %v411_v45 = vld [vmem:[%s3823_s21 + $0x60] sm:$0xff] }
  0x9b   : > { %3374 = vmatprep.subr.bf16.mxu1 %v4288_v41 }
  0x9c   : > { %1119 = vmatmul.mubr.f32.gmra.mrb[38].mxu1 %v532_v51  ;;  %v639_v51 = vld [vmem:[%s3823_s21 + $0x780] sm:$0xff] }
  0x9d   : > { %1504 = vmatmul.mubr.f32.gmra.mrb[38].mxu0 %v534_v52  ;;  %1123 = vmatprep.mubr.f32.mxu1 %v540_v53  ;;  %v645_v52 = vld [vmem:[%s3823_s21 + $0x7b0] sm:$0xff]  ;;  %v647_v53 = vld [vmem:[%s3823_s21 + $0x7c0] sm:$0xff] }
  0x9e   : > { %1508 = vmatprep.mubr.f32.mxu0 %v542_v44  ;;  %v644_v44 = vld [vmem:[%s3823_s21 + $0x7a8] sm:$0xff] }
  0xa0   : > { %1124 = vmatmul.mubr.f32.gmra.mrb[40].mxu1 %v539_v54  ;;  %v646_v54 = vld [vmem:[%s3823_s21 + $0x7b8] sm:$0xff] }
  0xa1   : > { %1509 = vmatmul.mubr.f32.gmra.mrb[40].mxu0 %v541_v55  ;;  %1128 = vmatprep.mubr.f32.mxu1 %v547_v57  ;;  %v652_v55 = vld [vmem:[%s3823_s21 + $0x7e8] sm:$0xff]  ;;  %v654_v57 = vld [vmem:[%s3823_s21 + $0x7f8] sm:$0xff] }
  0xa2   : > { %1513 = vmatprep.mubr.f32.mxu0 %v549_v58  ;;  %v651_v58 = vld [vmem:[%s3823_s21 + $0x7e0] sm:$0xff] }
  0xa4   : > { %1129 = vmatmul.mubr.f32.gmra.mrb[42].mxu1 %v546_v59  ;;  %v653_v59 = vld [vmem:[%s3823_s21 + $0x7f0] sm:$0xff] }
  0xa5   : > { %1514 = vmatmul.mubr.f32.gmra.mrb[42].mxu0 %v548_v8  ;;  %1133 = vmatprep.mubr.f32.mxu1 %v554_v50  ;;  %v659_v8 = vld [vmem:[%s3823_s21 + $0x820] sm:$0xff]  ;;  %v661_v50 = vld [vmem:[%s3823_s21 + $0x830] sm:$0xff] }
  0xa6   : > { %1518 = vmatprep.mubr.f32.mxu0 %v556_v60  ;;  %v658_v60 = vld [vmem:[%s3823_s21 + $0x818] sm:$0xff] }
  0xa8   : > { %1134 = vmatmul.mubr.f32.gmra.mrb[44].mxu1 %v553_v61  ;;  %v660_v61 = vld [vmem:[%s3823_s21 + $0x828] sm:$0xff] }
  0xa9   : > { %1519 = vmatmul.mubr.f32.gmra.mrb[44].mxu0 %v555_v63  ;;  %1138 = vmatprep.mubr.f32.mxu1 %v561_v0  ;;  %v666_v63 = vld [vmem:[%s3823_s21 + $0x858] sm:$0xff]  ;;  %v668_v0 = vld [vmem:[%s3823_s21 + $0x868] sm:$0xff] }
  0xaa   : > { %1523 = vmatprep.mubr.f32.mxu0 %v563_v1  ;;  %v665_v1 = vld [vmem:[%s3823_s21 + $0x850] sm:$0xff] }
  0xac   : > { %1139 = vmatmul.mubr.f32.gmra.mrb[46].mxu1 %v560_v2  ;;  %v667_v2 = vld [vmem:[%s3823_s21 + $0x860] sm:$0xff] }
  0xad   : > { %1524 = vmatmul.mubr.f32.gmra.mrb[46].mxu0 %v562_v56  ;;  %1143 = vmatprep.mubr.f32.mxu1 %v568_v4  ;;  %v673_v56 = vld [vmem:[%s3823_s21 + $0x890] sm:$0xff]  ;;  %v675_v4 = vld [vmem:[%s3823_s21 + $0x8a0] sm:$0xff] }
  0xae   : > { %1528 = vmatprep.mubr.f32.mxu0 %v570_v6  ;;  %v672_v6 = vld [vmem:[%s3823_s21 + $0x888] sm:$0xff] }
  0xb0   : > { %1144 = vmatmul.mubr.f32.gmra.mrb[48].mxu1 %v567_v12  ;;  %v674_v12 = vld [vmem:[%s3823_s21 + $0x898] sm:$0xff] }
  0xb1   : > { %1529 = vmatmul.mubr.f32.gmra.mrb[48].mxu0 %v569_v7  ;;  %1148 = vmatprep.mubr.f32.mxu1 %v575_v9  ;;  %v680_v7 = vld [vmem:[%s3823_s21 + $0x8c8] sm:$0xff]  ;;  %v682_v9 = vld [vmem:[%s3823_s21 + $0x8d8] sm:$0xff] }
  0xb2   : > { %1533 = vmatprep.mubr.f32.mxu0 %v577_v10  ;;  %v679_v10 = vld [vmem:[%s3823_s21 + $0x8c0] sm:$0xff] }
  0xb4   : > { %1149 = vmatmul.mubr.f32.gmra.mrb[50].mxu1 %v574_v62  ;;  %v681_v62 = vld [vmem:[%s3823_s21 + $0x8d0] sm:$0xff] }
  0xb5   : > { %1534 = vmatmul.mubr.f32.gmra.mrb[50].mxu0 %v576_v11  ;;  %1153 = vmatprep.mubr.f32.mxu1 %v582_v14  ;;  %v687_v11 = vld [vmem:[%s3823_s21 + $0x900] sm:$0xff]  ;;  %v689_v14 = vld [vmem:[%s3823_s21 + $0x910] sm:$0xff] }
  0xb6   : > { %1538 = vmatprep.mubr.f32.mxu0 %v584_v15  ;;  %v686_v15 = vld [vmem:[%s3823_s21 + $0x8f8] sm:$0xff] }
  0xb8   : > { %1154 = vmatmul.mubr.f32.gmra.mrb[52].mxu1 %v581_v18  ;;  %v688_v18 = vld [vmem:[%s3823_s21 + $0x908] sm:$0xff] }
  0xb9   : > { %1539 = vmatmul.mubr.f32.gmra.mrb[52].mxu0 %v583_v16  ;;  %1158 = vmatprep.mubr.f32.mxu1 %v589_v17  ;;  %v694_v16 = vld [vmem:[%s3823_s21 + $0x938] sm:$0xff]  ;;  %v696_v17 = vld [vmem:[%s3823_s21 + $0x948] sm:$0xff] }
  0xba   : > { %1543 = vmatprep.mubr.f32.mxu0 %v591_v5  ;;  %v693_v5 = vld [vmem:[%s3823_s21 + $0x930] sm:$0xff] }
  0xbc   : > { %1159 = vmatmul.mubr.f32.gmra.mrb[54].mxu1 %v588_v19  ;;  %v695_v19 = vld [vmem:[%s3823_s21 + $0x940] sm:$0xff] }
  0xbd   : > { %1544 = vmatmul.mubr.f32.gmra.mrb[54].mxu0 %v590_v21  ;;  %1163 = vmatprep.mubr.f32.mxu1 %v596_v22  ;;  %v701_v21 = vld [vmem:[%s3823_s21 + $0x970] sm:$0xff]  ;;  %v703_v22 = vld [vmem:[%s3823_s21 + $0x980] sm:$0xff] }
  0xbe   : > { %1548 = vmatprep.mubr.f32.mxu0 %v598_v23  ;;  %v700_v23 = vld [vmem:[%s3823_s21 + $0x968] sm:$0xff] }
  0xc0   : > { %1164 = vmatmul.mubr.f32.gmra.mrb[56].mxu1 %v595_v25  ;;  %v702_v25 = vld [vmem:[%s3823_s21 + $0x978] sm:$0xff] }
  0xc1   : > { %1549 = vmatmul.mubr.f32.gmra.mrb[56].mxu0 %v597_v24  ;;  %1168 = vmatprep.mubr.f32.mxu1 %v603_v13  ;;  %v708_v24 = vld [vmem:[%s3823_s21 + $0x9a8] sm:$0xff]  ;;  %v710_v13 = vld [vmem:[%s3823_s21 + $0x9b8] sm:$0xff] }
  0xc2   : > { %1553 = vmatprep.mubr.f32.mxu0 %v605_v26  ;;  %v707_v26 = vld [vmem:[%s3823_s21 + $0x9a0] sm:$0xff] }
  0xc4   : > { %1169 = vmatmul.mubr.f32.gmra.mrb[58].mxu1 %v602_v28  ;;  %v709_v28 = vld [vmem:[%s3823_s21 + $0x9b0] sm:$0xff] }
  0xc5   : > { %1554 = vmatmul.mubr.f32.gmra.mrb[58].mxu0 %v604_v29  ;;  %1173 = vmatprep.mubr.f32.mxu1 %v610_v31  ;;  %v715_v29 = vld [vmem:[%s3823_s21 + $0x9e0] sm:$0xff]  ;;  %v717_v31 = vld [vmem:[%s3823_s21 + $0x9f0] sm:$0xff] }
  0xc6   : > { %1558 = vmatprep.mubr.f32.mxu0 %v612_v32  ;;  %v714_v32 = vld [vmem:[%s3823_s21 + $0x9d8] sm:$0xff] }
  0xc8   : > { %1174 = vmatmul.mubr.f32.gmra.mrb[60].mxu1 %v609_v33  ;;  %v716_v33 = vld [vmem:[%s3823_s21 + $0x9e8] sm:$0xff] }
  0xc9   : > { %1559 = vmatmul.mubr.f32.gmra.mrb[60].mxu0 %v611_v20  ;;  %1178 = vmatprep.mubr.f32.mxu1 %v617_v30  ;;  %v722_v20 = vld [vmem:[%s3823_s21 + $0xa18] sm:$0xff]  ;;  %v724_v30 = vld [vmem:[%s3823_s21 + $0xa28] sm:$0xff] }
  0xca   : > { %1563 = vmatprep.mubr.f32.mxu0 %v619_v35  ;;  %v721_v35 = vld [vmem:[%s3823_s21 + $0xa10] sm:$0xff] }
  0xcc   : > { %1179 = vmatmul.mubr.f32.gmra.mrb[62].mxu1 %v616_v37  ;;  %v723_v37 = vld [vmem:[%s3823_s21 + $0xa20] sm:$0xff] }
  0xcd   : > { %1564 = vmatmul.mubr.f32.gmra.mrb[62].mxu0 %v618_v38  ;;  %1183 = vmatprep.mubr.f32.mxu1 %v624_v39  ;;  %v729_v38 = vld [vmem:[%s3823_s21 + $0xa50] sm:$0xff]  ;;  %v731_v39 = vld [vmem:[%s3823_s21 + $0xa60] sm:$0xff] }
  0xce   : > { %1568 = vmatprep.mubr.f32.mxu0 %v626_v40  ;;  %v728_v40 = vld [vmem:[%s3823_s21 + $0xa48] sm:$0xff] }
  0xd0   : > { %1184 = vmatmul.mubr.f32.gmra.mrb[64].mxu1 %v623_v27  ;;  %v730_v27 = vld [vmem:[%s3823_s21 + $0xa58] sm:$0xff] }
  0xd1   : > { %1569 = vmatmul.mubr.f32.gmra.mrb[64].mxu0 %v625_v42  ;;  %1188 = vmatprep.mubr.f32.mxu1 %v631_v36  ;;  %v736_v42 = vld [vmem:[%s3823_s21 + $0xa88] sm:$0xff] }
  0xd2   : > { %1573 = vmatprep.mubr.f32.mxu0 %v633_v43  ;;  %v404_v36 = vld [vmem:[%s3823_s21 + $0x28] sm:$0xff]  ;;  %v735_v43 = vld [vmem:[%s3823_s21 + $0xa80] sm:$0xff] }
  0xd4   : > { %1189 = vmatmul.mubr.f32.gmra.mrb[66].mxu1 %v630_v3  ;;  %v403_v3 = vld [vmem:[%s3823_s21 + $0x20] sm:$0xff] }
  0xd5   : > { %1574 = vmatmul.mubr.f32.gmra.mrb[66].mxu0 %v632_v46  ;;  %1193 = vmatprep.mubr.f32.mxu1 %v638_v47  ;;  %v742_v46 = vld [vmem:[%s3823_s21 + $0xab8] sm:$0xff] }
  0xd6   : > { %1578 = vmatprep.mubr.f32.mxu0 %v640_v48  ;;  %v410_v47 = vld [vmem:[%s3823_s21 + $0x58] sm:$0xff] }
  0xd7   : > { %v750_v48 = vld [vmem:[%s3823_s21 + $0xaf8] sm:$0xff] }
  0xd8   : > { %1194 = vmatmul.mubr.f32.gmra.mrb[68].mxu1 %v637_v49  ;;  %v418_v49 = vld [vmem:[%s3823_s21 + $0x98] sm:$0xff] }
  0xd9   : > { %1579 = vmatmul.mubr.f32.gmra.mrb[68].mxu0 %v639_v51  ;;  %1198 = vmatprep.mubr.f32.mxu1 %v645_v52  ;;  %v749_v51 = vld [vmem:[%s3823_s21 + $0xaf0] sm:$0xff] }
  0xda   : > { %1583 = vmatprep.mubr.f32.mxu0 %v647_v53  ;;  %v417_v52 = vld [vmem:[%s3823_s21 + $0x90] sm:$0xff] }
  0xdb   : > { %v757_v53 = vld [vmem:[%s3823_s21 + $0xb30] sm:$0xff] }
  0xdc   : > { %1199 = vmatmul.mubr.f32.gmra.mrb[70].mxu1 %v644_v44  ;;  %v425_v44 = vld [vmem:[%s3823_s21 + $0xd0] sm:$0xff] }
  0xdd   : > { %1584 = vmatmul.mubr.f32.gmra.mrb[70].mxu0 %v646_v54  ;;  %1203 = vmatprep.mubr.f32.mxu1 %v652_v55  ;;  %v756_v54 = vld [vmem:[%s3823_s21 + $0xb28] sm:$0xff] }
  0xde   : > { %1588 = vmatprep.mubr.f32.mxu0 %v654_v57  ;;  %v424_v55 = vld [vmem:[%s3823_s21 + $0xc8] sm:$0xff] }
  0xdf   : > { %v764_v57 = vld [vmem:[%s3823_s21 + $0xb68] sm:$0xff] }
  0xe0   : > { %1204 = vmatmul.mubr.f32.gmra.mrb[72].mxu1 %v651_v58  ;;  %v432_v58 = vld [vmem:[%s3823_s21 + $0x108] sm:$0xff] }
  0xe1   : > { %1589 = vmatmul.mubr.f32.gmra.mrb[72].mxu0 %v653_v59  ;;  %1208 = vmatprep.mubr.f32.mxu1 %v659_v8  ;;  %v763_v59 = vld [vmem:[%s3823_s21 + $0xb60] sm:$0xff] }
  0xe2   : > { %1593 = vmatprep.mubr.f32.mxu0 %v661_v50  ;;  %v431_v8 = vld [vmem:[%s3823_s21 + $0x100] sm:$0xff] }
  0xe3   : > { %v771_v50 = vld [vmem:[%s3823_s21 + $0xba0] sm:$0xff] }
  0xe4   : > { %1209 = vmatmul.mubr.f32.gmra.mrb[74].mxu1 %v658_v60  ;;  %v439_v60 = vld [vmem:[%s3823_s21 + $0x140] sm:$0xff] }
  0xe5   : > { %1594 = vmatmul.mubr.f32.gmra.mrb[74].mxu0 %v660_v61  ;;  %1213 = vmatprep.mubr.f32.mxu1 %v666_v63  ;;  %v770_v61 = vld [vmem:[%s3823_s21 + $0xb98] sm:$0xff] }
  0xe6   : > { %1598 = vmatprep.mubr.f32.mxu0 %v668_v0  ;;  %v438_v63 = vld [vmem:[%s3823_s21 + $0x138] sm:$0xff] }
  0xe7   : > { %v778_v0 = vld [vmem:[%s3823_s21 + $0xbd8] sm:$0xff] }
  0xe8   : > { %1214 = vmatmul.mubr.f32.gmra.mrb[76].mxu1 %v665_v1 }
  0xe9   : > { %1599 = vmatmul.mubr.f32.gmra.mrb[76].mxu0 %v667_v2  ;;  %1218 = vmatprep.mubr.f32.mxu1 %v673_v56  ;;  %v446_v2 = vld [vmem:[%s3823_s21 + $0x178] sm:$0xff] }
  0xea   : > { %1603 = vmatprep.mubr.f32.mxu0 %v675_v4  ;;  %v777_v4 = vld [vmem:[%s3823_s21 + $0xbd0] sm:$0xff] }
  0xec   : > { %1219 = vmatmul.mubr.f32.gmra.mrb[78].mxu1 %v672_v6  ;;  %v445_v6 = vld [vmem:[%s3823_s21 + $0x170] sm:$0xff] }
  0xed   : > { %1604 = vmatmul.mubr.f32.gmra.mrb[78].mxu0 %v674_v12  ;;  %1223 = vmatprep.mubr.f32.mxu1 %v680_v7  ;;  %v785_v12 = vld [vmem:[%s3823_s21 + $0xc10] sm:$0xff] }
  0xee   : > { %1608 = vmatprep.mubr.f32.mxu0 %v682_v9  ;;  %v453_v9 = vld [vmem:[%s3823_s21 + $0x1b0] sm:$0xff] }
  0xf0   : > { %1224 = vmatmul.mubr.f32.gmra.mrb[80].mxu1 %v679_v10 }
  0xf1   : > { %1609 = vmatmul.mubr.f32.gmra.mrb[80].mxu0 %v681_v62  ;;  %1228 = vmatprep.mubr.f32.mxu1 %v687_v11  ;;  %v784_v62 = vld [vmem:[%s3823_s21 + $0xc08] sm:$0xff] }
  0xf2   : > { %1613 = vmatprep.mubr.f32.mxu0 %v689_v14  ;;  %v452_v11 = vld [vmem:[%s3823_s21 + $0x1a8] sm:$0xff] }
  0xf3   : > { %v792_v14 = vld [vmem:[%s3823_s21 + $0xc48] sm:$0xff] }
  0xf4   : > { %1229 = vmatmul.mubr.f32.gmra.mrb[82].mxu1 %v686_v15 }
  0xf5   : > { %1614 = vmatmul.mubr.f32.gmra.mrb[82].mxu0 %v688_v18  ;;  %1233 = vmatprep.mubr.f32.mxu1 %v694_v16  ;;  %v460_v18 = vld [vmem:[%s3823_s21 + $0x1e8] sm:$0xff] }
  0xf6   : > { %1618 = vmatprep.mubr.f32.mxu0 %v696_v17  ;;  %v791_v17 = vld [vmem:[%s3823_s21 + $0xc40] sm:$0xff] }
  0xf8   : > { %1234 = vmatmul.mubr.f32.gmra.mrb[84].mxu1 %v693_v5  ;;  %v459_v5 = vld [vmem:[%s3823_s21 + $0x1e0] sm:$0xff] }
  0xf9   : > { %1619 = vmatmul.mubr.f32.gmra.mrb[84].mxu0 %v695_v19  ;;  %1238 = vmatprep.mubr.f32.mxu1 %v701_v21  ;;  %v799_v19 = vld [vmem:[%s3823_s21 + $0xc80] sm:$0xff] }
  0xfa   : > { %1623 = vmatprep.mubr.f32.mxu0 %v703_v22  ;;  %v467_v22 = vld [vmem:[%s3823_s21 + $0x220] sm:$0xff] }
  0xfc   : > { %1239 = vmatmul.mubr.f32.gmra.mrb[86].mxu1 %v700_v23 }
  0xfd   : > { %1624 = vmatmul.mubr.f32.gmra.mrb[86].mxu0 %v702_v25  ;;  %1243 = vmatprep.mubr.f32.mxu1 %v708_v24  ;;  %v798_v25 = vld [vmem:[%s3823_s21 + $0xc78] sm:$0xff] }
  0xfe   : > { %1628 = vmatprep.mubr.f32.mxu0 %v710_v13  ;;  %v466_v24 = vld [vmem:[%s3823_s21 + $0x218] sm:$0xff] }
  0xff   : > { %v806_v13 = vld [vmem:[%s3823_s21 + $0xcb8] sm:$0xff] }
 0x100   : > { %1244 = vmatmul.mubr.f32.gmra.mrb[88].mxu1 %v707_v26 }
 0x101   : > { %1629 = vmatmul.mubr.f32.gmra.mrb[88].mxu0 %v709_v28  ;;  %1248 = vmatprep.mubr.f32.mxu1 %v715_v29  ;;  %v474_v28 = vld [vmem:[%s3823_s21 + $0x258] sm:$0xff] }
 0x102   : > { %1633 = vmatprep.mubr.f32.mxu0 %v717_v31  ;;  %v805_v31 = vld [vmem:[%s3823_s21 + $0xcb0] sm:$0xff] }
 0x104   : > { %1249 = vmatmul.mubr.f32.gmra.mrb[90].mxu1 %v714_v32  ;;  %v473_v32 = vld [vmem:[%s3823_s21 + $0x250] sm:$0xff] }
 0x105   : > { %1634 = vmatmul.mubr.f32.gmra.mrb[90].mxu0 %v716_v33  ;;  %1253 = vmatprep.mubr.f32.mxu1 %v722_v20  ;;  %v813_v33 = vld [vmem:[%s3823_s21 + $0xcf0] sm:$0xff] }
 0x106   : > { %1638 = vmatprep.mubr.f32.mxu0 %v724_v30  ;;  %v481_v30 = vld [vmem:[%s3823_s21 + $0x290] sm:$0xff] }
 0x108   : > { %1254 = vmatmul.mubr.f32.gmra.mrb[92].mxu1 %v721_v35 }
 0x109   : > { %1639 = vmatmul.mubr.f32.gmra.mrb[92].mxu0 %v723_v37  ;;  %1258 = vmatprep.mubr.f32.mxu1 %v729_v38  ;;  %v812_v37 = vld [vmem:[%s3823_s21 + $0xce8] sm:$0xff] }
 0x10a   : > { %1643 = vmatprep.mubr.f32.mxu0 %v731_v39  ;;  %v480_v38 = vld [vmem:[%s3823_s21 + $0x288] sm:$0xff] }
 0x10b   : > { %v820_v39 = vld [vmem:[%s3823_s21 + $0xd28] sm:$0xff] }
 0x10c   : > { %1259 = vmatmul.mubr.f32.gmra.mrb[94].mxu1 %v728_v40 }
 0x10d   : > { %1644 = vmatmul.mubr.f32.gmra.mrb[94].mxu0 %v730_v27  ;;  %1263 = vmatprep.mubr.f32.mxu1 %v736_v42  ;;  %v488_v27 = vld [vmem:[%s3823_s21 + $0x2c8] sm:$0xff] }
 0x10e   : > { %1793 = vmatprep.mubr.f32.mxu0 %v404_v36  ;;  %v819_v36 = vld [vmem:[%s3823_s21 + $0xd20] sm:$0xff] }
 0x110   : > { %1264 = vmatmul.mubr.f32.gmra.mrb[96].mxu1 %v735_v43  ;;  %v487_v43 = vld [vmem:[%s3823_s21 + $0x2c0] sm:$0xff] }
 0x111   : > { %1794 = vmatmul.mubr.f32.vlgmr.msra.gmra.mrb[0].mxu0 %v403_v3  ;;  %1268 = vmatprep.mubr.f32.mxu1 %v743_v34  ;;  %v827_v3 = vld [vmem:[%s3823_s21 + $0xd60] sm:$0xff] }
 0x112   : > { %1798 = vmatprep.mubr.f32.mxu0 %v411_v45  ;;  %v495_v45 = vld [vmem:[%s3823_s21 + $0x300] sm:$0xff] }
 0x114   : > { %1269 = vmatmul.mubr.f32.gmra.mrb[98].mxu1 %v742_v46 }
 0x115   : > { %1799 = vmatmul.mubr.f32.gmra.mrb[2].mxu0 %v410_v47  ;;  %1273 = vmatprep.mubr.f32.mxu1 %v750_v48  ;;  %v826_v47 = vld [vmem:[%s3823_s21 + $0xd58] sm:$0xff] }
 0x116   : > { %1803 = vmatprep.mubr.f32.mxu0 %v418_v49  ;;  %v494_v48 = vld [vmem:[%s3823_s21 + $0x2f8] sm:$0xff] }
 0x117   : > { %v834_v49 = vld [vmem:[%s3823_s21 + $0xd98] sm:$0xff] }
 0x118   : > { %1274 = vmatmul.mubr.f32.gmra.mrb[100].mxu1 %v749_v51 }
 0x119   : > { %1804 = vmatmul.mubr.f32.gmra.mrb[4].mxu0 %v417_v52  ;;  %1278 = vmatprep.mubr.f32.mxu1 %v757_v53  ;;  %v502_v52 = vld [vmem:[%s3823_s21 + $0x338] sm:$0xff] }
 0x11a   : > { %1808 = vmatprep.mubr.f32.mxu0 %v425_v44  ;;  %v833_v44 = vld [vmem:[%s3823_s21 + $0xd90] sm:$0xff] }
 0x11c   : > { %1279 = vmatmul.mubr.f32.gmra.mrb[102].mxu1 %v756_v54  ;;  %v501_v54 = vld [vmem:[%s3823_s21 + $0x330] sm:$0xff] }
 0x11d   : > { %1809 = vmatmul.mubr.f32.gmra.mrb[6].mxu0 %v424_v55  ;;  %1283 = vmatprep.mubr.f32.mxu1 %v764_v57  ;;  %v841_v55 = vld [vmem:[%s3823_s21 + $0xdd0] sm:$0xff] }
 0x11e   : > { %1813 = vmatprep.mubr.f32.mxu0 %v432_v58  ;;  %v509_v58 = vld [vmem:[%s3823_s21 + $0x370] sm:$0xff] }
 0x120   : > { %1284 = vmatmul.mubr.f32.gmra.mrb[104].mxu1 %v763_v59 }
 0x121   : > { %1814 = vmatmul.mubr.f32.gmra.mrb[8].mxu0 %v431_v8  ;;  %1288 = vmatprep.mubr.f32.mxu1 %v771_v50  ;;  %v840_v8 = vld [vmem:[%s3823_s21 + $0xdc8] sm:$0xff] }
 0x122   : > { %1818 = vmatprep.mubr.f32.mxu0 %v439_v60  ;;  %v508_v50 = vld [vmem:[%s3823_s21 + $0x368] sm:$0xff]  ;;  %v738_v60 = vld [vmem:[%s3823_s21 + $0xa98] sm:$0xff] }
 0x123   : > { %v4371_v1 = vpop.f32.mrb[0].mxu1 }
 0x124   : > { %1289 = vmatmul.mubr.f32.gmra.mrb[106].mxu1 %v770_v61  ;;  %v1027_v56 = vpop.f32.mrb[1].mxu1 }
 0x125   : > { %1819 = vmatmul.mubr.f32.gmra.mrb[10].mxu0 %v438_v63  ;;  %1293 = vmatprep.mubr.f32.mxu1 %v778_v0  ;;  %v516_v63 = vld [vmem:[%s3823_s21 + $0x3a8] sm:$0xff]  ;;  %v946_v56 = vld [vmem:[%s5148_s1 + $0x318] sm:$0xff] }
 0x126   : > { %1823 = vmatprep.mubr.f32.mxu0 %v446_v2  ;;  %v945_v2 = vld [vmem:[%s5148_s1 + $0x310] sm:$0xff] }
 0x127   : > { %v4377_v7 = vpop.f32.mrb[2].mxu1 }
 0x128   : > { %1294 = vmatmul.mubr.f32.gmra.mrb[108].mxu1 %v777_v4  ;;  %v1032_v10 = vpop.f32.mrb[3].mxu1  ;;  %v737_v4 = vld [vmem:[%s3823_s21 + $0xa90] sm:$0xff] }
 0x129   : > { %1824 = vmatmul.mubr.f32.gmra.mrb[12].mxu0 %v445_v6  ;;  %1298 = vmatprep.mubr.f32.mxu1 %v785_v12  ;;  %v515_v6 = vld [vmem:[%s3823_s21 + $0x3a0] sm:$0xff] }
 0x12a   : > { %1828 = vmatprep.mubr.f32.mxu0 %v453_v9  ;;  %v745_v9 = vld [vmem:[%s3823_s21 + $0xad0] sm:$0xff]  ;;  %v523_v10 = vld [vmem:[%s3823_s21 + $0x3e0] sm:$0xff] }
 0x12b   : > { %v4383_v15 = vpop.f32.mrb[4].mxu1 }
 0x12c   : > { %1299 = vmatmul.mubr.f32.gmra.mrb[110].mxu1 %v784_v62  ;;  %v1037_v16 = vpop.f32.mrb[5].mxu1  ;;  %v3377_v62 = vpack.c.bf16 %v946_v56, %v945_v2  ;;  %v957_v56 = vld [vmem:[%s5148_s1 + $0x370] sm:$0xff] }
 0x12d   : > { %1829 = vmatmul.mubr.f32.gmra.mrb[14].mxu0 %v452_v11  ;;  %1303 = vmatprep.mubr.f32.mxu1 %v792_v14  ;;  %v947_v14 = vld [vmem:[%s5148_s1 + $0x320] sm:$0xff]  ;;  %v744_v16 = vld [vmem:[%s3823_s21 + $0xac8] sm:$0xff] }
 0x12e   : > { %1833 = vmatprep.mubr.f32.mxu0 %v460_v18  ;;  %v948_v18 = vld [vmem:[%s5148_s1 + $0x328] sm:$0xff] }
 0x12f   : > { %v4389_v21 = vpop.f32.mrb[6].mxu1 }
 0x130   : > { %1304 = vmatmul.mubr.f32.gmra.mrb[112].mxu1 %v791_v17  ;;  %v1042_v23 = vpop.f32.mrb[7].mxu1  ;;  %v522_v17 = vld [vmem:[%s3823_s21 + $0x3d8] sm:$0xff] }
 0x131   : > { %1834 = vmatmul.mubr.f32.gmra.mrb[16].mxu0 %v459_v5  ;;  %1308 = vmatprep.mubr.f32.mxu1 %v799_v19  ;;  %v752_v5 = vld [vmem:[%s3823_s21 + $0xb08] sm:$0xff]  ;;  %v3381_v23 = vpack.c.bf16 %v948_v18, %v947_v14 }
 0x132   : > { %1838 = vmatprep.mubr.f32.mxu0 %v467_v22  ;;  %v530_v22 = vld [vmem:[%s3823_s21 + $0x418] sm:$0xff] }
 0x133   : > { %v4395_v26 = vpop.f32.mrb[8].mxu1 }
 0x134   : > { %1309 = vmatmul.mubr.f32.gmra.mrb[114].mxu1 %v798_v25  ;;  %v1047_v29 = vpop.f32.mrb[9].mxu1 }
 0x135   : > { %1839 = vmatmul.mubr.f32.gmra.mrb[18].mxu0 %v466_v24  ;;  %1313 = vmatprep.mubr.f32.mxu1 %v806_v13  ;;  %v950_v24 = vld [vmem:[%s5148_s1 + $0x338] sm:$0xff]  ;;  %v751_v13 = vld [vmem:[%s3823_s21 + $0xb00] sm:$0xff] }
 0x136   : > { %1843 = vmatprep.mubr.f32.mxu0 %v474_v28  ;;  %v529_v28 = vld [vmem:[%s3823_s21 + $0x410] sm:$0xff]  ;;  %v759_v29 = vld [vmem:[%s3823_s21 + $0xb40] sm:$0xff] }
 0x137   : > { %v4401_v20 = vpop.f32.mrb[10].mxu1 }
 0x138   : > { %1314 = vmatmul.mubr.f32.gmra.mrb[116].mxu1 %v805_v31  ;;  %v1052_v35 = vpop.f32.mrb[11].mxu1 }
 0x139   : > { %1844 = vmatmul.mubr.f32.gmra.mrb[20].mxu0 %v473_v32  ;;  %1318 = vmatprep.mubr.f32.mxu1 %v813_v33  ;;  %v537_v32 = vld [vmem:[%s3823_s21 + $0x450] sm:$0xff]  ;;  %v951_v35 = vld [vmem:[%s5148_s1 + $0x340] sm:$0xff] }
 0x13a   : > { %1848 = vmatprep.mubr.f32.mxu0 %v481_v30 }
 0x13b   : > { %v4407_v40 = vpop.f32.mrb[12].mxu1 }
 0x13c   : > { %1319 = vmatmul.mubr.f32.gmra.mrb[118].mxu1 %v812_v37  ;;  %v1057_v42 = vpop.f32.mrb[13].mxu1  ;;  %v952_v37 = vld [vmem:[%s5148_s1 + $0x348] sm:$0xff] }
 0x13d   : > { %1849 = vmatmul.mubr.f32.gmra.mrb[22].mxu0 %v480_v38  ;;  %1323 = vmatprep.mubr.f32.mxu1 %v820_v39  ;;  %v758_v38 = vld [vmem:[%s3823_s21 + $0xb38] sm:$0xff]  ;;  %v536_v39 = vld [vmem:[%s3823_s21 + $0x448] sm:$0xff] }
 0x13e   : > { %1853 = vmatprep.mubr.f32.mxu0 %v488_v27  ;;  %v766_v27 = vld [vmem:[%s3823_s21 + $0xb78] sm:$0xff] }
 0x13f   : > { %v4413_v34 = vpop.f32.mrb[14].mxu1 }
 0x140   : > { %1324 = vmatmul.mubr.f32.gmra.mrb[120].mxu1 %v819_v36  ;;  %v1062_v46 = vpop.f32.mrb[15].mxu1  ;;  %v544_v36 = vld [vmem:[%s3823_s21 + $0x488] sm:$0xff] }
 0x141   : > { %1854 = vmatmul.mubr.f32.gmra.mrb[24].mxu0 %v487_v43  ;;  %1328 = vmatprep.mubr.f32.mxu1 %v827_v3  ;;  %v3389_v43 = vpack.c.bf16 %v952_v37, %v951_v35  ;;  %v954_v46 = vld [vmem:[%s5148_s1 + $0x358] sm:$0xff]  ;;  %v808_v35 = vld [vmem:[%s3823_s21 + $0xcc8] sm:$0xff] }
 0x142   : > { %1858 = vmatprep.mubr.f32.mxu0 %v495_v45  ;;  %v953_v45 = vld [vmem:[%s5148_s1 + $0x350] sm:$0xff] }
 0x143   : > { %v4419_v51 = vpop.f32.mrb[16].mxu1 }
 0x144   : > { %1329 = vmatmul.mubr.f32.gmra.mrb[122].mxu1 %v826_v47  ;;  %v1067_v53 = vpop.f32.mrb[17].mxu1  ;;  %v765_v47 = vld [vmem:[%s3823_s21 + $0xb70] sm:$0xff] }
 0x145   : > { %1859 = vmatmul.mubr.f32.gmra.mrb[26].mxu0 %v494_v48  ;;  %1333 = vmatprep.mubr.f32.mxu1 %v834_v49  ;;  %v543_v48 = vld [vmem:[%s3823_s21 + $0x480] sm:$0xff]  ;;  %v773_v49 = vld [vmem:[%s3823_s21 + $0xbb0] sm:$0xff] }
 0x146   : > { %1863 = vmatprep.mubr.f32.mxu0 %v502_v52  ;;  %v551_v53 = vld [vmem:[%s3823_s21 + $0x4c0] sm:$0xff] }
 0x147   : > { %v4425_v57 = vpop.f32.mrb[18].mxu1 }
 0x148   : > { %1334 = vmatmul.mubr.f32.gmra.mrb[124].mxu1 %v833_v44  ;;  %v1072_v59 = vpop.f32.mrb[19].mxu1  ;;  %v3393_v44 = vpack.c.bf16 %v954_v46, %v953_v45  ;;  %v593_v45 = vld [vmem:[%s3823_s21 + $0x610] sm:$0xff] }
 0x149   : > { %1864 = vmatmul.mubr.f32.gmra.mrb[28].mxu0 %v501_v54  ;;  %1338 = vmatprep.mubr.f32.mxu1 %v841_v55  ;;  %v955_v55 = vld [vmem:[%s5148_s1 + $0x360] sm:$0xff]  ;;  %v772_v59 = vld [vmem:[%s3823_s21 + $0xba8] sm:$0xff] }
 0x14a   : > { %1868 = vmatprep.mubr.f32.mxu0 %v509_v58  ;;  %v956_v58 = vld [vmem:[%s5148_s1 + $0x368] sm:$0xff] }
 0x14b   : > { %v4431_v61 = vpop.f32.mrb[20].mxu1 }
 0x14c   : > { %1339 = vmatmul.mubr.f32.gmra.mrb[126].mxu1 %v840_v8  ;;  %v1077_v0 = vpop.f32.mrb[21].mxu1  ;;  %v550_v8 = vld [vmem:[%s3823_s21 + $0x4b8] sm:$0xff] }
 0x14d   : > { %1869 = vmatmul.mubr.f32.gmra.mrb[30].mxu0 %v508_v50  ;;  %1648 = vmatprep.mubr.f32.mxu1 %v738_v60  ;;  %v780_v50 = vld [vmem:[%s3823_s21 + $0xbe8] sm:$0xff]  ;;  %v3397_v0 = vpack.c.bf16 %v956_v58, %v955_v55  ;;  %v821_v55 = vld [vmem:[%s3823_s21 + $0xd30] sm:$0xff]  ;;  %v599_v58 = vld [vmem:[%s3823_s21 + $0x640] sm:$0xff] }
 0x14e   : > { %1873 = vmatprep.mubr.f32.mxu0 %v516_v63  ;;  %v558_v63 = vld [vmem:[%s3823_s21 + $0x4f8] sm:$0xff] }
 0x14f   : > { %v4442_v12 = vpop.f32.mrb[22].mxu1 }
 0x150   : > { %1649 = vmatmul.mubr.f32.vlgmr.msra.gmra.mrb[96].mxu1 %v737_v4  ;;  %v1082_v11 = vpop.f32.mrb[23].mxu1  ;;  %v958_v4 = vld [vmem:[%s5148_s1 + $0x378] sm:$0xff] }
 0x151   : > { %1874 = vmatmul.mubr.f32.gmra.mrb[32].mxu0 %v515_v6  ;;  %3376 = vmatpush3.bf16.msra.mxu1 %v4288_v41  ;;  %v949_v41 = vld [vmem:[%s5148_s1 + $0x330] sm:$0xff]  ;;  %v779_v6 = vld [vmem:[%s3823_s21 + $0xbe0] sm:$0xff]  ;;  %v3401_v14 = vpack.c.bf16 %v958_v4, %v957_v56  ;;  %v836_v56 = vld [vmem:[%s3823_s21 + $0xda8] sm:$0xff] }
 0x152   : > { %1653 = vmatprep.mubr.f32.mxu1 %v745_v9  ;;  %1878 = vmatprep.mubr.f32.mxu0 %v523_v10  ;;  %v3385_v33 = vpack.c.bf16 %v950_v24, %v949_v41  ;;  %v557_v9 = vld [vmem:[%s3823_s21 + $0x4f0] sm:$0xff]  ;;  %v787_v10 = vld [vmem:[%s3823_s21 + $0xc20] sm:$0xff] }
 0x153   : > { %v4456_v19 = vpop.f32.mrb[24].mxu1  ;;  %3378 = vmatprep.subr.bf16.mxu1 %v3377_v62  ;;  %v565_v11 = vld [vmem:[%s3823_s21 + $0x530] sm:$0xff]  ;;  %v571_v24 = vld [vmem:[%s3823_s21 + $0x560] sm:$0xff] }
 0x154   : > { %1654 = vmatmul.mubr.f32.gmra.mrb[98].mxu1 %v744_v16  ;;  %v1087_v25 = vpop.f32.mrb[25].mxu1  ;;  %v786_v16 = vld [vmem:[%s3823_s21 + $0xc18] sm:$0xff]  ;;  %v793_v41 = vld [vmem:[%s3823_s21 + $0xc50] sm:$0xff] }
 0x155   : > { %1879 = vmatmul.mubr.f32.gmra.mrb[34].mxu0 %v522_v17  ;;  %1658 = vmatprep.mubr.f32.mxu1 %v752_v5  ;;  %v564_v17 = vld [vmem:[%s3823_s21 + $0x528] sm:$0xff]  ;;  %v794_v5 = vld [vmem:[%s3823_s21 + $0xc58] sm:$0xff] }
 0x156   : > { %1883 = vmatprep.mubr.f32.mxu0 %v530_v22  ;;  %3380 = vmatpush3.bf16.msra.mxu1 %v3377_v62 }
 0x157   : > { %v4468_v31 = vpop.f32.mrb[26].mxu1  ;;  %3382 = vmatprep.subr.bf16.mxu1 %v3381_v23 }
 0x158   : > { %1659 = vmatmul.mubr.f32.gmra.mrb[100].mxu1 %v751_v13  ;;  %v1092_v30 = vpop.f32.mrb[27].mxu1  ;;  %v801_v13 = vld [vmem:[%s3823_s21 + $0xc90] sm:$0xff] }
 0x159   : > { %1884 = vmatmul.mubr.f32.gmra.mrb[36].mxu0 %v529_v28  ;;  %1663 = vmatprep.mubr.f32.mxu1 %v759_v29  ;;  %v579_v29 = vld [vmem:[%s3823_s21 + $0x5a0] sm:$0xff]  ;;  %v578_v30 = vld [vmem:[%s3823_s21 + $0x598] sm:$0xff] }
 0x15a   : > { %1888 = vmatprep.mubr.f32.mxu0 %v537_v32  ;;  %3384 = vmatpush3.bf16.msra.mxu1 %v3381_v23  ;;  %v572_v23 = vld [vmem:[%s3823_s21 + $0x568] sm:$0xff] }
 0x15b   : > { %v4480_v42 = vpop.f32.mrb[28].mxu1  ;;  %3386 = vmatprep.subr.bf16.mxu1 %v3385_v33 }
 0x15c   : > { %1664 = vmatmul.mubr.f32.gmra.mrb[102].mxu1 %v758_v38  ;;  %v1097_v3 = vpop.f32.mrb[29].mxu1  ;;  %v586_v38 = vld [vmem:[%s3823_s21 + $0x5d8] sm:$0xff] }
 0x15d   : > { %1889 = vmatmul.mubr.f32.gmra.mrb[38].mxu0 %v536_v39  ;;  %1668 = vmatprep.mubr.f32.mxu1 %v766_v27  ;;  %v807_v27 = vld [vmem:[%s3823_s21 + $0xcc0] sm:$0xff] }
 0x15e   : > { %1893 = vmatprep.mubr.f32.mxu0 %v544_v36  ;;  %3388 = vmatpush3.bf16.msra.mxu1 %v3385_v33  ;;  %v800_v33 = vld [vmem:[%s3823_s21 + $0xc88] sm:$0xff]  ;;  %v585_v36 = vld [vmem:[%s3823_s21 + $0x5d0] sm:$0xff] }
 0x15f   : > { %v4492_v52 = vpop.f32.mrb[30].mxu1  ;;  %3390 = vmatprep.subr.bf16.mxu1 %v3389_v43 }
 0x160   : > { %1669 = vmatmul.mubr.f32.gmra.mrb[104].mxu1 %v765_v47  ;;  %v1102_v54 = vpop.f32.mrb[31].mxu1  ;;  %v814_v47 = vld [vmem:[%s3823_s21 + $0xcf8] sm:$0xff] }
 0x161   : > { %1894 = vmatmul.mubr.f32.gmra.mrb[40].mxu0 %v543_v48  ;;  %1673 = vmatprep.mubr.f32.mxu1 %v773_v49  ;;  %v592_v48 = vld [vmem:[%s3823_s21 + $0x608] sm:$0xff]  ;;  %v822_v49 = vld [vmem:[%s3823_s21 + $0xd38] sm:$0xff] }
 0x162   : > { %1898 = vmatprep.mubr.f32.mxu0 %v551_v53  ;;  %3392 = vmatpush3.bf16.msra.mxu1 %v3389_v43  ;;  %v815_v43 = vld [vmem:[%s3823_s21 + $0xd00] sm:$0xff] }
 0x163   : > { %v4504_v60 = vpop.f32.mrb[32].mxu1  ;;  %3394 = vmatprep.subr.bf16.mxu1 %v3393_v44 }
 0x164   : > { %1674 = vmatmul.mubr.f32.gmra.mrb[106].mxu1 %v772_v59  ;;  %v1107_v2 = vpop.f32.mrb[33].mxu1  ;;  %v829_v59 = vld [vmem:[%s3823_s21 + $0xd70] sm:$0xff] }
 0x165   : > { %1899 = vmatmul.mubr.f32.gmra.mrb[42].mxu0 %v550_v8  ;;  %1678 = vmatprep.mubr.f32.mxu1 %v780_v50  ;;  %v607_v50 = vld [vmem:[%s3823_s21 + $0x680] sm:$0xff]  ;;  %v606_v2 = vld [vmem:[%s3823_s21 + $0x678] sm:$0xff] }
 0x166   : > { %1903 = vmatprep.mubr.f32.mxu0 %v558_v63  ;;  %3396 = vmatpush3.bf16.msra.mxu1 %v3393_v44  ;;  %v600_v44 = vld [vmem:[%s3823_s21 + $0x648] sm:$0xff] }
 0x167   : > { %v4516_v62 = vpop.f32.mrb[34].mxu1  ;;  %3398 = vmatprep.subr.bf16.mxu1 %v3397_v0 }
 0x168   : > { %1679 = vmatmul.mubr.f32.gmra.mrb[108].mxu1 %v779_v6  ;;  %v1112_v18 = vpop.f32.mrb[35].mxu1  ;;  %v614_v6 = vld [vmem:[%s3823_s21 + $0x6b8] sm:$0xff] }
 0x169   : > { %1904 = vmatmul.mubr.f32.gmra.mrb[44].mxu0 %v557_v9  ;;  %1683 = vmatprep.mubr.f32.mxu1 %v787_v10  ;;  %v835_v10 = vld [vmem:[%s3823_s21 + $0xda0] sm:$0xff] }
 0x16a   : > { %1908 = vmatprep.mubr.f32.mxu0 %v565_v11  ;;  %3400 = vmatpush3.bf16.msra.mxu1 %v3397_v0  ;;  %v828_v0 = vld [vmem:[%s3823_s21 + $0xd68] sm:$0xff]  ;;  %v613_v11 = vld [vmem:[%s3823_s21 + $0x6b0] sm:$0xff] }
 0x16b   : > { %v4522_v22 = vpop.f32.mrb[36].mxu1  ;;  %3402 = vmatprep.subr.bf16.mxu1 %v3401_v14 }
 0x16c   : > { %1684 = vmatmul.mubr.f32.gmra.mrb[110].mxu1 %v786_v16  ;;  %v1117_v25 = vpop.f32.mrb[37].mxu1  ;;  %v621_v16 = vld [vmem:[%s3823_s21 + $0x6f0] sm:$0xff] }
 0x16d   : > { %1909 = vmatmul.mubr.f32.gmra.mrb[46].mxu0 %v564_v17  ;;  %1688 = vmatprep.mubr.f32.mxu1 %v794_v5  ;;  %v842_v5 = vld [vmem:[%s3823_s21 + $0xdd8] sm:$0xff]  ;;  %v405_v25 = vld [vmem:[%s3823_s21 + $0x30] sm:$0xff] }
 0x16e   : > { %1913 = vmatprep.mubr.f32.mxu0 %v572_v23  ;;  %3404 = vmatpush3.bf16.msra.mxu1 %v3401_v14  ;;  %v843_v14 = vld [vmem:[%s3823_s21 + $0xde0] sm:$0xff]  ;;  %v620_v23 = vld [vmem:[%s3823_s21 + $0x6e8] sm:$0xff] }
 0x16f   : > { %v4528_v28 = vpop.f32.mrb[38].mxu1 }
 0x170   : > { %1689 = vmatmul.mubr.f32.gmra.mrb[112].mxu1 %v793_v41  ;;  %v1122_v32 = vpop.f32.mrb[39].mxu1 }
 0x171   : > { %1914 = vmatmul.mubr.f32.gmra.mrb[48].mxu0 %v571_v24  ;;  %1693 = vmatprep.mubr.f32.mxu1 %v801_v13  ;;  %v628_v24 = vld [vmem:[%s3823_s21 + $0x728] sm:$0xff]  ;;  %v627_v32 = vld [vmem:[%s3823_s21 + $0x720] sm:$0xff] }
 0x172   : > { %1918 = vmatprep.mubr.f32.mxu0 %v579_v29  ;;  %v412_v29 = vld [vmem:[%s3823_s21 + $0x68] sm:$0xff] }
 0x173   : > { %v4534_v37 = vpop.f32.mrb[40].mxu1 }
 0x174   : > { %1694 = vmatmul.mubr.f32.gmra.mrb[114].mxu1 %v800_v33  ;;  %v1127_v39 = vpop.f32.mrb[41].mxu1  ;;  %v419_v33 = vld [vmem:[%s3823_s21 + $0xa0] sm:$0xff] }
 0x175   : > { %1919 = vmatmul.mubr.f32.gmra.mrb[50].mxu0 %v578_v30  ;;  %1698 = vmatprep.mubr.f32.mxu1 %v808_v35  ;;  %v635_v35 = vld [vmem:[%s3823_s21 + $0x760] sm:$0xff]  ;;  %v426_v39 = vld [vmem:[%s3823_s21 + $0xd8] sm:$0xff] }
 0x176   : > { %1923 = vmatprep.mubr.f32.mxu0 %v586_v38 }
 0x177   : > { %v4540_v3 = vpop.f32.mrb[42].mxu1 }
 0x178   : > { %1699 = vmatmul.mubr.f32.gmra.mrb[116].mxu1 %v807_v27  ;;  %v1132_v46 = vpop.f32.mrb[43].mxu1  ;;  %v634_v27 = vld [vmem:[%s3823_s21 + $0x758] sm:$0xff] }
 0x179   : > { %1924 = vmatmul.mubr.f32.gmra.mrb[52].mxu0 %v585_v36  ;;  %1703 = vmatprep.mubr.f32.mxu1 %v815_v43  ;;  %v433_v36 = vld [vmem:[%s3823_s21 + $0x110] sm:$0xff] }
 0x17a   : > { %1928 = vmatprep.mubr.f32.mxu0 %v593_v45  ;;  %v642_v45 = vld [vmem:[%s3823_s21 + $0x798] sm:$0xff] }
 0x17b   : > { %v4546_v53 = vpop.f32.mrb[44].mxu1 }
 0x17c   : > { %1704 = vmatmul.mubr.f32.gmra.mrb[118].mxu1 %v814_v47  ;;  %v1137_v54 = vpop.f32.mrb[45].mxu1  ;;  %v440_v47 = vld [vmem:[%s3823_s21 + $0x148] sm:$0xff] }
 0x17d   : > { %1929 = vmatmul.mubr.f32.gmra.mrb[54].mxu0 %v592_v48  ;;  %1708 = vmatprep.mubr.f32.mxu1 %v822_v49  ;;  %v641_v48 = vld [vmem:[%s3823_s21 + $0x790] sm:$0xff]  ;;  %v447_v49 = vld [vmem:[%s3823_s21 + $0x180] sm:$0xff] }
 0x17e   : > { %1933 = vmatprep.mubr.f32.mxu0 %v600_v44  ;;  %v649_v54 = vld [vmem:[%s3823_s21 + $0x7d0] sm:$0xff] }
 0x17f   : > { %v4552_v8 = vpop.f32.mrb[46].mxu1 }
 0x180   : > { %1709 = vmatmul.mubr.f32.gmra.mrb[120].mxu1 %v821_v55  ;;  %v1142_v63 = vpop.f32.mrb[47].mxu1 }
 0x181   : > { %1934 = vmatmul.mubr.f32.gmra.mrb[56].mxu0 %v599_v58  ;;  %1713 = vmatprep.mubr.f32.mxu1 %v829_v59  ;;  %v454_v58 = vld [vmem:[%s3823_s21 + $0x1b8] sm:$0xff]  ;;  %v648_v59 = vld [vmem:[%s3823_s21 + $0x7c8] sm:$0xff] }
 0x182   : > { %1938 = vmatprep.mubr.f32.mxu0 %v607_v50  ;;  %v461_v50 = vld [vmem:[%s3823_s21 + $0x1f0] sm:$0xff] }
 0x183   : > { %v4558_v4 = vpop.f32.mrb[48].mxu1 }
 0x184   : > { %1714 = vmatmul.mubr.f32.gmra.mrb[122].mxu1 %v828_v0  ;;  %v1147_v9 = vpop.f32.mrb[49].mxu1  ;;  %v656_v0 = vld [vmem:[%s3823_s21 + $0x808] sm:$0xff] }
 0x185   : > { %1939 = vmatmul.mubr.f32.gmra.mrb[58].mxu0 %v606_v2  ;;  %1718 = vmatprep.mubr.f32.mxu1 %v836_v56  ;;  %v468_v56 = vld [vmem:[%s3823_s21 + $0x228] sm:$0xff]  ;;  %v475_v9 = vld [vmem:[%s3823_s21 + $0x260] sm:$0xff] }
 0x186   : > { %1943 = vmatprep.mubr.f32.mxu0 %v614_v6  ;;  %v655_v6 = vld [vmem:[%s3823_s21 + $0x800] sm:$0xff] }
 0x187   : > { %v4564_v18 = vpop.f32.mrb[50].mxu1 }
 0x188   : > { %1719 = vmatmul.mubr.f32.gmra.mrb[124].mxu1 %v835_v10  ;;  %v1152_v17 = vpop.f32.mrb[51].mxu1 }
 0x189   : > { %1944 = vmatmul.mubr.f32.gmra.mrb[60].mxu0 %v613_v11  ;;  %1723 = vmatprep.mubr.f32.mxu1 %v843_v14  ;;  %v663_v11 = vld [vmem:[%s3823_s21 + $0x840] sm:$0xff]  ;;  %v662_v17 = vld [vmem:[%s3823_s21 + $0x838] sm:$0xff] }
 0x18a   : > { %1948 = vmatprep.mubr.f32.mxu0 %v621_v16  ;;  %v482_v16 = vld [vmem:[%s3823_s21 + $0x298] sm:$0xff] }
 0x18b   : > { %v4570_v41 = vpop.f32.mrb[52].mxu1 }
 0x18c   : > { %1724 = vmatmul.mubr.f32.gmra.mrb[126].mxu1 %v842_v5  ;;  %v1157_v13 = vpop.f32.mrb[53].mxu1  ;;  %v489_v5 = vld [vmem:[%s3823_s21 + $0x2d0] sm:$0xff] }
 0x18d   : > { %1949 = vmatmul.mubr.f32.gmra.mrb[62].mxu0 %v620_v23  ;;  %3133 = vmatprep.mubr.f32.mxu1 %v405_v25  ;;  %v670_v25 = vld [vmem:[%s3823_s21 + $0x878] sm:$0xff]  ;;  %v496_v13 = vld [vmem:[%s3823_s21 + $0x308] sm:$0xff] }
 0x18e   : > { %1953 = vmatprep.mubr.f32.mxu0 %v628_v24 }
 0x18f   : > { %v4576_v30 = vpop.f32.mrb[54].mxu1 }
 0x190   : > { %3134 = vmatmul.mubr.f32.vlgmr.msra.gmra.mrb[128].mxu1 %v412_v29  ;;  %v1162_v38 = vpop.f32.mrb[55].mxu1  ;;  %v669_v29 = vld [vmem:[%s3823_s21 + $0x870] sm:$0xff] }
 0x191   : > { %1954 = vmatmul.mubr.f32.gmra.mrb[64].mxu0 %v627_v32  ;;  %3136 = vmatprep.mubr.f32.mxu1 %v419_v33  ;;  %v503_v32 = vld [vmem:[%s3823_s21 + $0x340] sm:$0xff] }
 0x192   : > { %1958 = vmatprep.mubr.f32.mxu0 %v635_v35  ;;  %v677_v35 = vld [vmem:[%s3823_s21 + $0x8b0] sm:$0xff] }
 0x193   : > { %v4582_v43 = vpop.f32.mrb[56].mxu1 }
 0x194   : > { %3137 = vmatmul.mubr.f32.gmra.mrb[130].mxu1 %v426_v39  ;;  %v1167_v46 = vpop.f32.mrb[57].mxu1  ;;  %v510_v39 = vld [vmem:[%s3823_s21 + $0x378] sm:$0xff] }
 0x195   : > { %1959 = vmatmul.mubr.f32.gmra.mrb[66].mxu0 %v634_v27  ;;  %3139 = vmatprep.mubr.f32.mxu1 %v433_v36  ;;  %v676_v27 = vld [vmem:[%s3823_s21 + $0x8a8] sm:$0xff]  ;;  %v517_v36 = vld [vmem:[%s3823_s21 + $0x3b0] sm:$0xff] }
 0x196   : > { %1963 = vmatprep.mubr.f32.mxu0 %v642_v45  ;;  %v684_v46 = vld [vmem:[%s3823_s21 + $0x8e8] sm:$0xff] }
 0x197   : > { %v4588_v44 = vpop.f32.mrb[58].mxu1 }
 0x198   : > { %3140 = vmatmul.mubr.f32.gmra.mrb[132].mxu1 %v440_v47  ;;  %v1172_v55 = vpop.f32.mrb[59].mxu1 }
 0x199   : > { %1964 = vmatmul.mubr.f32.gmra.mrb[68].mxu0 %v641_v48  ;;  %3142 = vmatprep.mubr.f32.mxu1 %v447_v49  ;;  %v524_v48 = vld [vmem:[%s3823_s21 + $0x3e8] sm:$0xff]  ;;  %v683_v49 = vld [vmem:[%s3823_s21 + $0x8e0] sm:$0xff] }
 0x19a   : > { %1968 = vmatprep.mubr.f32.mxu0 %v649_v54  ;;  %v531_v54 = vld [vmem:[%s3823_s21 + $0x420] sm:$0xff] }
 0x19b   : > { %v4594_v63 = vpop.f32.mrb[60].mxu1 }
 0x19c   : > { %3143 = vmatmul.mubr.f32.gmra.mrb[134].mxu1 %v454_v58  ;;  %v1177_v2 = vpop.f32.mrb[61].mxu1  ;;  %v691_v58 = vld [vmem:[%s3823_s21 + $0x920] sm:$0xff] }
 0x19d   : > { %1969 = vmatmul.mubr.f32.gmra.mrb[70].mxu0 %v648_v59  ;;  %3145 = vmatprep.mubr.f32.mxu1 %v461_v50  ;;  %v538_v50 = vld [vmem:[%s3823_s21 + $0x458] sm:$0xff]  ;;  %v545_v2 = vld [vmem:[%s3823_s21 + $0x490] sm:$0xff] }
 0x19e   : > { %1973 = vmatprep.mubr.f32.mxu0 %v656_v0  ;;  %v690_v0 = vld [vmem:[%s3823_s21 + $0x918] sm:$0xff] }
 0x19f   : > { %v4600_v10 = vpop.f32.mrb[62].mxu1 }
 0x1a0   : > { %3146 = vmatmul.mubr.f32.gmra.mrb[136].mxu1 %v468_v56  ;;  %v1182_v14 = vpop.f32.mrb[63].mxu1 }
 0x1a1   : > { %1974 = vmatmul.mubr.f32.gmra.mrb[72].mxu0 %v655_v6  ;;  %3148 = vmatprep.mubr.f32.mxu1 %v475_v9  ;;  %v698_v6 = vld [vmem:[%s3823_s21 + $0x958] sm:$0xff]  ;;  %v697_v14 = vld [vmem:[%s3823_s21 + $0x950] sm:$0xff] }
 0x1a2   : > { %1978 = vmatprep.mubr.f32.mxu0 %v663_v11  ;;  %v552_v11 = vld [vmem:[%s3823_s21 + $0x4c8] sm:$0xff] }
 0x1a3   : > { %v4606_v23 = vpop.f32.mrb[64].mxu1 }
 0x1a4   : > { %3149 = vmatmul.mubr.f32.gmra.mrb[138].mxu1 %v482_v16  ;;  %v1187_v24 = vpop.f32.mrb[65].mxu1  ;;  %v559_v16 = vld [vmem:[%s3823_s21 + $0x500] sm:$0xff] }
 0x1a5   : > { %1979 = vmatmul.mubr.f32.gmra.mrb[74].mxu0 %v662_v17  ;;  %3151 = vmatprep.mubr.f32.mxu1 %v489_v5  ;;  %v705_v5 = vld [vmem:[%s3823_s21 + $0x990] sm:$0xff]  ;;  %v566_v24 = vld [vmem:[%s3823_s21 + $0x538] sm:$0xff] }
 0x1a6   : > { %1983 = vmatprep.mubr.f32.mxu0 %v670_v25 }
 0x1a7   : > { %v4612_v33 = vpop.f32.mrb[66].mxu1 }
 0x1a8   : > { %3152 = vmatmul.mubr.f32.gmra.mrb[140].mxu1 %v496_v13  ;;  %v1192_v38 = vpop.f32.mrb[67].mxu1  ;;  %v704_v13 = vld [vmem:[%s3823_s21 + $0x988] sm:$0xff] }
 0x1a9   : > { %1984 = vmatmul.mubr.f32.gmra.mrb[76].mxu0 %v669_v29  ;;  %3154 = vmatprep.mubr.f32.mxu1 %v503_v32  ;;  %v573_v29 = vld [vmem:[%s3823_s21 + $0x570] sm:$0xff] }
 0x1aa   : > { %1988 = vmatprep.mubr.f32.mxu0 %v677_v35  ;;  %v712_v35 = vld [vmem:[%s3823_s21 + $0x9c8] sm:$0xff] }
 0x1ab   : > { %v4618_v45 = vpop.f32.mrb[68].mxu1 }
 0x1ac   : > { %3155 = vmatmul.mubr.f32.gmra.mrb[142].mxu1 %v510_v39  ;;  %v1197_v47 = vpop.f32.mrb[69].mxu1  ;;  %v580_v39 = vld [vmem:[%s3823_s21 + $0x5a8] sm:$0xff] }
 0x1ad   : > { %1989 = vmatmul.mubr.f32.gmra.mrb[78].mxu0 %v676_v27  ;;  %3157 = vmatprep.mubr.f32.mxu1 %v517_v36  ;;  %v711_v27 = vld [vmem:[%s3823_s21 + $0x9c0] sm:$0xff] }
 0x1ae   : > { %1993 = vmatprep.mubr.f32.mxu0 %v684_v46  ;;  %v587_v36 = vld [vmem:[%s3823_s21 + $0x5e0] sm:$0xff] }
 0x1af   : > { %v4624_v55 = vpop.f32.mrb[70].mxu1  ;;  %v719_v47 = vld [vmem:[%s3823_s21 + $0xa00] sm:$0xff] }
 0x1b0   : > { %3158 = vmatmul.mubr.f32.gmra.mrb[144].mxu1 %v524_v48  ;;  %v1202_v59 = vpop.f32.mrb[71].mxu1 }
 0x1b1   : > { %1994 = vmatmul.mubr.f32.gmra.mrb[80].mxu0 %v683_v49  ;;  %3160 = vmatprep.mubr.f32.mxu1 %v531_v54  ;;  %v594_v49 = vld [vmem:[%s3823_s21 + $0x618] sm:$0xff] }
 0x1b2   : > { %1998 = vmatprep.mubr.f32.mxu0 %v691_v58  ;;  %v718_v54 = vld [vmem:[%s3823_s21 + $0x9f8] sm:$0xff]  ;;  %v601_v58 = vld [vmem:[%s3823_s21 + $0x650] sm:$0xff] }
 0x1b3   : > { %v4630_v56 = vpop.f32.mrb[72].mxu1 }
 0x1b4   : > { %3161 = vmatmul.mubr.f32.gmra.mrb[146].mxu1 %v538_v50  ;;  %v1207_v9 = vpop.f32.mrb[73].mxu1  ;;  %v726_v50 = vld [vmem:[%s3823_s21 + $0xa38] sm:$0xff] }
 0x1b5   : > { %1999 = vmatmul.mubr.f32.gmra.mrb[82].mxu0 %v690_v0  ;;  %3163 = vmatprep.mubr.f32.mxu1 %v545_v2  ;;  %v608_v2 = vld [vmem:[%s3823_s21 + $0x688] sm:$0xff]  ;;  %v615_v9 = vld [vmem:[%s3823_s21 + $0x6c0] sm:$0xff] }
 0x1b6   : > { %2003 = vmatprep.mubr.f32.mxu0 %v698_v6  ;;  %v725_v6 = vld [vmem:[%s3823_s21 + $0xa30] sm:$0xff] }
 0x1b7   : > { %v4636_v17 = vpop.f32.mrb[74].mxu1 }
 0x1b8   : > { %3164 = vmatmul.mubr.f32.gmra.mrb[148].mxu1 %v552_v11  ;;  %v1212_v25 = vpop.f32.mrb[75].mxu1 }
 0x1b9   : > { %2004 = vmatmul.mubr.f32.gmra.mrb[84].mxu0 %v697_v14  ;;  %3166 = vmatprep.mubr.f32.mxu1 %v559_v16  ;;  %v733_v14 = vld [vmem:[%s3823_s21 + $0xa70] sm:$0xff]  ;;  %v732_v25 = vld [vmem:[%s3823_s21 + $0xa68] sm:$0xff] }
 0x1ba   : > { %2008 = vmatprep.mubr.f32.mxu0 %v705_v5  ;;  %v622_v5 = vld [vmem:[%s3823_s21 + $0x6f8] sm:$0xff] }
 0x1bb   : > { %v4642_v32 = vpop.f32.mrb[76].mxu1 }
 0x1bc   : > { %3167 = vmatmul.mubr.f32.gmra.mrb[150].mxu1 %v566_v24  ;;  %v1217_v38 = vpop.f32.mrb[77].mxu1  ;;  %v629_v24 = vld [vmem:[%s3823_s21 + $0x730] sm:$0xff] }
 0x1bd   : > { %2009 = vmatmul.mubr.f32.gmra.mrb[86].mxu0 %v704_v13  ;;  %3169 = vmatprep.mubr.f32.mxu1 %v573_v29  ;;  %v740_v29 = vld [vmem:[%s3823_s21 + $0xaa8] sm:$0xff] }
 0x1be   : > { %2013 = vmatprep.mubr.f32.mxu0 %v712_v35  ;;  %v636_v38 = vld [vmem:[%s3823_s21 + $0x768] sm:$0xff] }
 0x1bf   : > { %v4648_v46 = vpop.f32.mrb[78].mxu1 }
 0x1c0   : > { %3170 = vmatmul.mubr.f32.gmra.mrb[152].mxu1 %v580_v39  ;;  %v1222_v48 = vpop.f32.mrb[79].mxu1  ;;  %v739_v39 = vld [vmem:[%s3823_s21 + $0xaa0] sm:$0xff] }
 0x1c1   : > { %2014 = vmatmul.mubr.f32.gmra.mrb[88].mxu0 %v711_v27  ;;  %3172 = vmatprep.mubr.f32.mxu1 %v587_v36  ;;  %v643_v27 = vld [vmem:[%s3823_s21 + $0x7a0] sm:$0xff] }
 0x1c2   : > { %2018 = vmatprep.mubr.f32.mxu0 %v719_v47  ;;  %v747_v47 = vld [vmem:[%s3823_s21 + $0xae0] sm:$0xff] }
 0x1c3   : > { %v4654_v59 = vpop.f32.mrb[80].mxu1 }
 0x1c4   : > { %3173 = vmatmul.mubr.f32.gmra.mrb[154].mxu1 %v594_v49  ;;  %v1227_v0 = vpop.f32.mrb[81].mxu1  ;;  %v650_v49 = vld [vmem:[%s3823_s21 + $0x7d8] sm:$0xff] }
 0x1c5   : > { %2019 = vmatmul.mubr.f32.gmra.mrb[90].mxu0 %v718_v54  ;;  %3175 = vmatprep.mubr.f32.mxu1 %v601_v58  ;;  %v746_v54 = vld [vmem:[%s3823_s21 + $0xad8] sm:$0xff]  ;;  %v657_v58 = vld [vmem:[%s3823_s21 + $0x810] sm:$0xff] }
 0x1c6   : > { %2023 = vmatprep.mubr.f32.mxu0 %v726_v50  ;;  %v754_v0 = vld [vmem:[%s3823_s21 + $0xb18] sm:$0xff] }
 0x1c7   : > { %v4660_v11 = vpop.f32.mrb[82].mxu1 }
 0x1c8   : > { %3176 = vmatmul.mubr.f32.gmra.mrb[156].mxu1 %v608_v2  ;;  %v1232_v16 = vpop.f32.mrb[83].mxu1 }
 0x1c9   : > { %2024 = vmatmul.mubr.f32.gmra.mrb[92].mxu0 %v725_v6  ;;  %3178 = vmatprep.mubr.f32.mxu1 %v615_v9  ;;  %v664_v6 = vld [vmem:[%s3823_s21 + $0x848] sm:$0xff]  ;;  %v753_v9 = vld [vmem:[%s3823_s21 + $0xb10] sm:$0xff] }
 0x1ca   : > { %2028 = vmatprep.mubr.f32.mxu0 %v733_v14  ;;  %v671_v14 = vld [vmem:[%s3823_s21 + $0x880] sm:$0xff] }
 0x1cb   : > { %v4666_v13 = vpop.f32.mrb[84].mxu1 }
 0x1cc   : > { %3179 = vmatmul.mubr.f32.gmra.mrb[158].mxu1 %v622_v5  ;;  %v1237_v35 = vpop.f32.mrb[85].mxu1  ;;  %v761_v5 = vld [vmem:[%s3823_s21 + $0xb50] sm:$0xff] }
 0x1cd   : > { %2029 = vmatmul.mubr.f32.gmra.mrb[94].mxu0 %v732_v25  ;;  %3181 = vmatprep.mubr.f32.mxu1 %v629_v24  ;;  %v678_v24 = vld [vmem:[%s3823_s21 + $0x8b8] sm:$0xff]  ;;  %v685_v35 = vld [vmem:[%s3823_s21 + $0x8f0] sm:$0xff] }
 0x1ce   : > { %2033 = vmatprep.mubr.f32.mxu0 %v740_v29  ;;  %v760_v29 = vld [vmem:[%s3823_s21 + $0xb48] sm:$0xff] }
 0x1cf   : > { %v4672_v36 = vpop.f32.mrb[86].mxu1 }
 0x1d0   : > { %3182 = vmatmul.mubr.f32.gmra.mrb[160].mxu1 %v636_v38  ;;  %v1242_v48 = vpop.f32.mrb[87].mxu1 }
 0x1d1   : > { %2034 = vmatmul.mubr.f32.gmra.mrb[96].mxu0 %v739_v39  ;;  %3184 = vmatprep.mubr.f32.mxu1 %v643_v27  ;;  %v768_v39 = vld [vmem:[%s3823_s21 + $0xb88] sm:$0xff]  ;;  %v767_v48 = vld [vmem:[%s3823_s21 + $0xb80] sm:$0xff] }
 0x1d2   : > { %2038 = vmatprep.mubr.f32.mxu0 %v747_v47  ;;  %v692_v47 = vld [vmem:[%s3823_s21 + $0x928] sm:$0xff] }
 0x1d3   : > { %v4678_v50 = vpop.f32.mrb[88].mxu1 }
 0x1d4   : > { %3185 = vmatmul.mubr.f32.gmra.mrb[162].mxu1 %v650_v49  ;;  %v1247_v2 = vpop.f32.mrb[89].mxu1  ;;  %v699_v49 = vld [vmem:[%s3823_s21 + $0x960] sm:$0xff] }
 0x1d5   : > { %2039 = vmatmul.mubr.f32.gmra.mrb[98].mxu0 %v746_v54  ;;  %3187 = vmatprep.mubr.f32.mxu1 %v657_v58  ;;  %v775_v58 = vld [vmem:[%s3823_s21 + $0xbc0] sm:$0xff]  ;;  %v706_v2 = vld [vmem:[%s3823_s21 + $0x998] sm:$0xff] }
 0x1d6   : > { %2043 = vmatprep.mubr.f32.mxu0 %v754_v0 }
 0x1d7   : > { %v4684_v16 = vpop.f32.mrb[90].mxu1 }
 0x1d8   : > { %3188 = vmatmul.mubr.f32.gmra.mrb[164].mxu1 %v664_v6  ;;  %v1252_v25 = vpop.f32.mrb[91].mxu1  ;;  %v774_v6 = vld [vmem:[%s3823_s21 + $0xbb8] sm:$0xff] }
 0x1d9   : > { %2044 = vmatmul.mubr.f32.gmra.mrb[100].mxu0 %v753_v9  ;;  %3190 = vmatprep.mubr.f32.mxu1 %v671_v14  ;;  %v713_v9 = vld [vmem:[%s3823_s21 + $0x9d0] sm:$0xff]  ;;  %v782_v14 = vld [vmem:[%s3823_s21 + $0xbf8] sm:$0xff] }
 0x1da   : > { %2048 = vmatprep.mubr.f32.mxu0 %v761_v5 }
 0x1db   : > { %v4690_v38 = vpop.f32.mrb[92].mxu1 }
 0x1dc   : > { %3191 = vmatmul.mubr.f32.gmra.mrb[166].mxu1 %v678_v24  ;;  %v1257_v27 = vpop.f32.mrb[93].mxu1 }
 0x1dd   : > { %2049 = vmatmul.mubr.f32.gmra.mrb[102].mxu0 %v760_v29  ;;  %3193 = vmatprep.mubr.f32.mxu1 %v685_v35  ;;  %v720_v29 = vld [vmem:[%s3823_s21 + $0xa08] sm:$0xff]  ;;  %v781_v35 = vld [vmem:[%s3823_s21 + $0xbf0] sm:$0xff] }
 0x1de   : > { %2053 = vmatprep.mubr.f32.mxu0 %v768_v39  ;;  %v727_v39 = vld [vmem:[%s3823_s21 + $0xa40] sm:$0xff]  ;;  %v789_v27 = vld [vmem:[%s3823_s21 + $0xc30] sm:$0xff] }
 0x1df   : > { %v4696_v54 = vpop.f32.mrb[94].mxu1 }
 0x1e0   : > { %3194 = vmatmul.mubr.f32.gmra.mrb[168].mxu1 %v692_v47  ;;  %v1262_v0 = vpop.f32.mrb[95].mxu1 }
 0x1e1   : > { %2054 = vmatmul.mubr.f32.gmra.mrb[104].mxu0 %v767_v48  ;;  %3196 = vmatprep.mubr.f32.mxu1 %v699_v49  ;;  %v741_v0 = vld [vmem:[%s3823_s21 + $0xab0] sm:$0xff] }
 0x1e2   : > { %2058 = vmatprep.mubr.f32.mxu0 %v775_v58  ;;  %v788_v58 = vld [vmem:[%s3823_s21 + $0xc28] sm:$0xff] }
 0x1e4   : > { %v1795_v5 = vpop.f32.mrb[0].mxu0  ;;  %3197 = vmatmul.mubr.f32.gmra.mrb[170].mxu1 %v706_v2  ;;  %v796_v2 = vld [vmem:[%s3823_s21 + $0xc68] sm:$0xff] }
 0x1e5   : > { %v4704_v25 = vadd.f32 %v1795_v5, %v4371_v1  ;;  %v1797_v24 = vpop.f32.mrb[1].mxu0  ;;  %2059 = vmatmul.mubr.f32.gmra.mrb[106].mxu0 %v774_v6  ;;  %3199 = vmatprep.mubr.f32.mxu1 %v713_v9  ;;  %v734_v1 = vld [vmem:[%s3823_s21 + $0xa78] sm:$0xff]  ;;  %v795_v5 = vld [vmem:[%s3823_s21 + $0xc60] sm:$0xff] }
 0x1e6   : > { %2063 = vmatprep.mubr.f32.mxu0 %v782_v14  ;;  %v755_v24 = vld [vmem:[%s3823_s21 + $0xb20] sm:$0xff] }
 0x1e8   : > { %v1800_v47 = vpop.f32.mrb[2].mxu0  ;;  %3200 = vmatmul.mubr.f32.gmra.mrb[172].mxu1 %v720_v29  ;;  %v803_v29 = vld [vmem:[%s3823_s21 + $0xca0] sm:$0xff] }
 0x1e9   : > { %v4711_v48 = vadd.f32 %v1800_v47, %v4377_v7  ;;  %v1802_v49 = vpop.f32.mrb[3].mxu0  ;;  %2064 = vmatmul.mubr.f32.gmra.mrb[108].mxu0 %v781_v35  ;;  %3202 = vmatprep.mubr.f32.mxu1 %v727_v39  ;;  %v748_v7 = vld [vmem:[%s3823_s21 + $0xae8] sm:$0xff]  ;;  %v802_v47 = vld [vmem:[%s3823_s21 + $0xc98] sm:$0xff] }
 0x1ea   : > { %2068 = vmatprep.mubr.f32.mxu0 %v789_v27  ;;  %v769_v49 = vld [vmem:[%s3823_s21 + $0xb90] sm:$0xff] }
 0x1ec   : > { %v1805_v6 = vpop.f32.mrb[4].mxu0  ;;  %3203 = vmatmul.mubr.f32.gmra.mrb[174].mxu1 %v734_v1  ;;  %v810_v1 = vld [vmem:[%s3823_s21 + $0xcd8] sm:$0xff] }
 0x1ed   : > { %v4718_v9 = vadd.f32 %v1805_v6, %v4383_v15  ;;  %v1807_v14 = vpop.f32.mrb[5].mxu0  ;;  %2069 = vmatmul.mubr.f32.gmra.mrb[110].mxu0 %v788_v58  ;;  %3205 = vmatprep.mubr.f32.mxu1 %v741_v0  ;;  %v762_v15 = vld [vmem:[%s3823_s21 + $0xb58] sm:$0xff]  ;;  %v809_v6 = vld [vmem:[%s3823_s21 + $0xcd0] sm:$0xff] }
 0x1ee   : > { %2073 = vmatprep.mubr.f32.mxu0 %v796_v2  ;;  %v783_v14 = vld [vmem:[%s3823_s21 + $0xc00] sm:$0xff] }
 0x1f0   : > { %v1810_v35 = vpop.f32.mrb[6].mxu0  ;;  %3206 = vmatmul.mubr.f32.gmra.mrb[176].mxu1 %v748_v7  ;;  %v817_v7 = vld [vmem:[%s3823_s21 + $0xd10] sm:$0xff] }
 0x1f1   : > { %v4725_v39 = vadd.f32 %v1810_v35, %v4389_v21  ;;  %v1812_v27 = vpop.f32.mrb[7].mxu0  ;;  %2074 = vmatmul.mubr.f32.gmra.mrb[112].mxu0 %v795_v5  ;;  %3208 = vmatprep.mubr.f32.mxu1 %v755_v24  ;;  %v776_v21 = vld [vmem:[%s3823_s21 + $0xbc8] sm:$0xff] }
 0x1f2   : > { %2078 = vmatprep.mubr.f32.mxu0 %v803_v29  ;;  %v816_v35 = vld [vmem:[%s3823_s21 + $0xd08] sm:$0xff]  ;;  %v797_v27 = vld [vmem:[%s3823_s21 + $0xc70] sm:$0xff] }
 0x1f4   : > { %v1815_v58 = vpop.f32.mrb[8].mxu0  ;;  %3209 = vmatmul.mubr.f32.gmra.mrb[178].mxu1 %v762_v15  ;;  %v824_v15 = vld [vmem:[%s3823_s21 + $0xd48] sm:$0xff] }
 0x1f5   : > { %v4732_v0 = vadd.f32 %v1815_v58, %v4395_v26  ;;  %v1817_v2 = vpop.f32.mrb[9].mxu0  ;;  %2079 = vmatmul.mubr.f32.gmra.mrb[114].mxu0 %v802_v47  ;;  %3211 = vmatprep.mubr.f32.mxu1 %v769_v49  ;;  %v790_v26 = vld [vmem:[%s3823_s21 + $0xc38] sm:$0xff]  ;;  %v823_v58 = vld [vmem:[%s3823_s21 + $0xd40] sm:$0xff] }
 0x1f6   : > { %2083 = vmatprep.mubr.f32.mxu0 %v810_v1  ;;  %v811_v2 = vld [vmem:[%s3823_s21 + $0xce0] sm:$0xff] }
 0x1f8   : > { %v1820_v5 = vpop.f32.mrb[10].mxu0  ;;  %3212 = vmatmul.mubr.f32.gmra.mrb[180].mxu1 %v776_v21  ;;  %v831_v21 = vld [vmem:[%s3823_s21 + $0xd80] sm:$0xff] }
 0x1f9   : > { %v4739_v24 = vadd.f32 %v1820_v5, %v4401_v20  ;;  %v1822_v29 = vpop.f32.mrb[11].mxu0  ;;  %2084 = vmatmul.mubr.f32.gmra.mrb[116].mxu0 %v809_v6  ;;  %3214 = vmatprep.mubr.f32.mxu1 %v783_v14  ;;  %v804_v20 = vld [vmem:[%s3823_s21 + $0xca8] sm:$0xff]  ;;  %v830_v5 = vld [vmem:[%s3823_s21 + $0xd78] sm:$0xff] }
 0x1fa   : > { %2088 = vmatprep.mubr.f32.mxu0 %v817_v7  ;;  %v825_v29 = vld [vmem:[%s3823_s21 + $0xd50] sm:$0xff] }
 0x1fc   : > { %v1825_v47 = vpop.f32.mrb[12].mxu0  ;;  %3215 = vmatmul.mubr.f32.gmra.mrb[182].mxu1 %v790_v26  ;;  %v838_v26 = vld [vmem:[%s3823_s21 + $0xdb8] sm:$0xff] }
 0x1fd   : > { %v4746_v49 = vadd.f32 %v1825_v47, %v4407_v40  ;;  %v1827_v1 = vpop.f32.mrb[13].mxu0  ;;  %2089 = vmatmul.mubr.f32.gmra.mrb[118].mxu0 %v816_v35  ;;  %3217 = vmatprep.mubr.f32.mxu1 %v797_v27  ;;  %v818_v40 = vld [vmem:[%s3823_s21 + $0xd18] sm:$0xff]  ;;  %v837_v47 = vld [vmem:[%s3823_s21 + $0xdb0] sm:$0xff] }
 0x1fe   : > { %2093 = vmatprep.mubr.f32.mxu0 %v824_v15  ;;  %v839_v1 = vld [vmem:[%s3823_s21 + $0xdc0] sm:$0xff] }
 0x200   : > { %v1830_v6 = vpop.f32.mrb[14].mxu0  ;;  %3218 = vmatmul.mubr.f32.gmra.mrb[184].mxu1 %v804_v20  ;;  %v845_v20 = vld [vmem:[%s3823_s21 + $0xdf0] sm:$0xff] }
 0x201   : > { %v4753_v14 = vadd.f32 %v1830_v6, %v4413_v34  ;;  %v1832_v7 = vpop.f32.mrb[15].mxu0  ;;  %2094 = vmatmul.mubr.f32.gmra.mrb[120].mxu0 %v823_v58  ;;  %3220 = vmatprep.mubr.f32.mxu1 %v811_v2  ;;  %v832_v34 = vld [vmem:[%s3823_s21 + $0xd88] sm:$0xff]  ;;  %v846_v6 = vld [vmem:[%s3823_s21 + $0xdf8] sm:$0xff] }
 0x202   : > { %2098 = vmatprep.mubr.f32.mxu0 %v831_v21 }
 0x204   : > { %v1835_v35 = vpop.f32.mrb[16].mxu0  ;;  %3221 = vmatmul.mubr.f32.gmra.mrb[186].mxu1 %v818_v40 }
 0x205   : > { %v4760_v27 = vadd.f32 %v1835_v35, %v4419_v51  ;;  %v1837_v15 = vpop.f32.mrb[17].mxu0  ;;  %2099 = vmatmul.mubr.f32.gmra.mrb[122].mxu0 %v830_v5  ;;  %3223 = vmatprep.mubr.f32.mxu1 %v825_v29  ;;  %v844_v51 = vld [vmem:[%s3823_s21 + $0xde8] sm:$0xff] }
 0x206   : > { %2103 = vmatprep.mubr.f32.mxu0 %v838_v26 }
 0x208   : > { %v1840_v58 = vpop.f32.mrb[18].mxu0  ;;  %3224 = vmatmul.mubr.f32.gmra.mrb[188].mxu1 %v832_v34 }
 0x209   : > { %v4767_v2 = vadd.f32 %v1840_v58, %v4425_v57  ;;  %v1842_v21 = vpop.f32.mrb[19].mxu0  ;;  %2104 = vmatmul.mubr.f32.gmra.mrb[124].mxu0 %v837_v47  ;;  %3226 = vmatprep.mubr.f32.mxu1 %v839_v1 }
 0x20a   : > { %2108 = vmatprep.mubr.f32.mxu0 %v845_v20 }
 0x20c   : > { %v1845_v7 = vpop.f32.mrb[20].mxu0  ;;  %3227 = vmatmul.mubr.f32.gmra.mrb[190].mxu1 %v846_v6 }
 0x20d   : > { %v4772_v40 = vadd.f32 %v1845_v7, %v4431_v61  ;;  %v1847_v5 = vpop.f32.mrb[21].mxu0  ;;  %2109 = vmatmul.mubr.f32.gmra.mrb[126].mxu0 %v844_v51 }
 0x210   : > { %v1850_v29 = vpop.f32.mrb[22].mxu0 }
 0x211   : > { %v4775_v26 = vadd.f32 %v1850_v29, %v4442_v12  ;;  %v1852_v35 = vpop.f32.mrb[23].mxu0 }
 0x214   : > { %v1855_v57 = vpop.f32.mrb[24].mxu0 }
 0x215   : > { %v4778_v15 = vadd.f32 %v1855_v57, %v4456_v19  ;;  %v1857_v34 = vpop.f32.mrb[25].mxu0 }
 0x218   : > { %v1860_v47 = vpop.f32.mrb[26].mxu0 }
 0x219   : > { %v4781_v1 = vadd.f32 %v1860_v47, %v4468_v31  ;;  %v1862_v20 = vpop.f32.mrb[27].mxu0 }
 0x21c   : > { %v1865_v58 = vpop.f32.mrb[28].mxu0 }
 0x21d   : > { %v4784_v61 = vadd.f32 %v1865_v58, %v4480_v42  ;;  %v1867_v21 = vpop.f32.mrb[29].mxu0 }
 0x220   : > { %v1870_v6 = vpop.f32.mrb[30].mxu0 }
 0x221   : > { %v4787_v12 = vadd.f32 %v1870_v6, %v4492_v52  ;;  %v1872_v51 = vpop.f32.mrb[31].mxu0 }
 0x223   : > { %v4789_v7 = vpop.f32.mrb[96].mxu1 }
 0x224   : > { %v1875_v19 = vpop.f32.mrb[32].mxu0  ;;  %v1652_v5 = vpop.f32.mrb[97].mxu1 }
 0x225   : > { %v4792_v29 = vadd.f32 %v1875_v19, %v4504_v60  ;;  %v1877_v31 = vpop.f32.mrb[33].mxu0 }
 0x227   : > { %v4794_v35 = vpop.f32.mrb[98].mxu1 }
 0x228   : > { %v1880_v57 = vpop.f32.mrb[34].mxu0  ;;  %v1657_v34 = vpop.f32.mrb[99].mxu1 }
 0x229   : > { %v4797_v42 = vadd.f32 %v1880_v57, %v4516_v62  ;;  %v1882_v47 = vpop.f32.mrb[35].mxu0 }
 0x22b   : > { %v4799_v20 = vpop.f32.mrb[100].mxu1 }
 0x22c   : > { %5151 = vst [vmem:[#allocation3_spill] sm:$0xff] %v4799_v20  ;;  %v1885_v52 = vpop.f32.mrb[36].mxu0  ;;  %v1662_v58 = vpop.f32.mrb[101].mxu1 }
 0x22d   : > { %v4802_v21 = vadd.f32 %v1885_v52, %v4522_v22  ;;  %v1887_v6 = vpop.f32.mrb[37].mxu0 }
 0x22f   : > { %v4804_v51 = vpop.f32.mrb[102].mxu1 }
 0x230   : > { %5152 = vst [vmem:[#allocation4_spill] sm:$0xff] %v4804_v51  ;;  %v1890_v60 = vpop.f32.mrb[38].mxu0  ;;  %v1667_v19 = vpop.f32.mrb[103].mxu1 }
 0x231   : > { %v4807_v5 = vadd.f32 %v1890_v60, %v4528_v28  ;;  %v1892_v31 = vpop.f32.mrb[39].mxu0 }
 0x233   : > { %v4809_v34 = vpop.f32.mrb[104].mxu1 }
 0x234   : > { %5153 = vst [vmem:[#allocation5_spill] sm:$0xff] %v4809_v34  ;;  %v1895_v62 = vpop.f32.mrb[40].mxu0  ;;  %v1672_v57 = vpop.f32.mrb[105].mxu1 }
 0x235   : > { %v4812_v47 = vadd.f32 %v1895_v62, %v4534_v37  ;;  %v1897_v58 = vpop.f32.mrb[41].mxu0 }
 0x237   : > { %v4814_v20 = vpop.f32.mrb[106].mxu1 }
 0x238   : > { %5154 = vst [vmem:[#allocation6_spill] sm:$0xff] %v4814_v20  ;;  %v1900_v22 = vpop.f32.mrb[42].mxu0  ;;  %v1677_v52 = vpop.f32.mrb[107].mxu1 }
 0x239   : > { %v4817_v6 = vadd.f32 %v1900_v22, %v4540_v3  ;;  %v1902_v19 = vpop.f32.mrb[43].mxu0 }
 0x23b   : > { %v4819_v51 = vpop.f32.mrb[108].mxu1 }
 0x23c   : > { %5155 = vst [vmem:[#allocation7_spill] sm:$0xff] %v4819_v51  ;;  %v1905_v28 = vpop.f32.mrb[44].mxu0  ;;  %v1682_v60 = vpop.f32.mrb[109].mxu1 }
 0x23d   : > { %v4822_v31 = vadd.f32 %v1905_v28, %v4546_v53  ;;  %v1907_v57 = vpop.f32.mrb[45].mxu0 }
 0x23f   : > { %v4824_v34 = vpop.f32.mrb[110].mxu1 }
 0x240   : > { %5156 = vst [vmem:[#allocation8_spill] sm:$0xff] %v4824_v34  ;;  %v1910_v37 = vpop.f32.mrb[46].mxu0  ;;  %v1687_v62 = vpop.f32.mrb[111].mxu1 }
 0x241   : > { %v4827_v58 = vadd.f32 %v1910_v37, %v4552_v8  ;;  %v1912_v52 = vpop.f32.mrb[47].mxu0 }
 0x243   : > { %v4829_v20 = vpop.f32.mrb[112].mxu1 }
 0x244   : > { %5157 = vst [vmem:[#allocation9_spill] sm:$0xff] %v4829_v20  ;;  %v1915_v3 = vpop.f32.mrb[48].mxu0  ;;  %v1692_v22 = vpop.f32.mrb[113].mxu1 }
 0x245   : > { %v4832_v19 = vadd.f32 %v1915_v3, %v4558_v4  ;;  %v1917_v60 = vpop.f32.mrb[49].mxu0 }
 0x247   : > { %v4834_v51 = vpop.f32.mrb[114].mxu1 }
 0x248   : > { %5158 = vst [vmem:[#allocation10_spill] sm:$0xff] %v4834_v51  ;;  %v1920_v53 = vpop.f32.mrb[50].mxu0  ;;  %v1697_v28 = vpop.f32.mrb[115].mxu1 }
 0x249   : > { %v4837_v57 = vadd.f32 %v1920_v53, %v4564_v18  ;;  %v1922_v62 = vpop.f32.mrb[51].mxu0 }
 0x24b   : > { %v4839_v34 = vpop.f32.mrb[116].mxu1 }
 0x24c   : > { %5159 = vst [vmem:[#allocation11_spill] sm:$0xff] %v4839_v34  ;;  %v1925_v8 = vpop.f32.mrb[52].mxu0  ;;  %v1702_v37 = vpop.f32.mrb[117].mxu1 }
 0x24d   : > { %v4842_v52 = vadd.f32 %v1925_v8, %v4570_v41  ;;  %v1927_v22 = vpop.f32.mrb[53].mxu0 }
 0x24f   : > { %v4844_v20 = vpop.f32.mrb[118].mxu1 }
 0x250   : > { %5160 = vst [vmem:[#allocation12_spill] sm:$0xff] %v4844_v20  ;;  %v1930_v4 = vpop.f32.mrb[54].mxu0  ;;  %v1707_v3 = vpop.f32.mrb[119].mxu1 }
 0x251   : > { %v4847_v60 = vadd.f32 %v1930_v4, %v4576_v30  ;;  %v1932_v28 = vpop.f32.mrb[55].mxu0 }
 0x253   : > { %v4849_v51 = vpop.f32.mrb[120].mxu1 }
 0x254   : > { %5161 = vst [vmem:[#allocation13_spill] sm:$0xff] %v4849_v51  ;;  %v1935_v18 = vpop.f32.mrb[56].mxu0  ;;  %v1712_v53 = vpop.f32.mrb[121].mxu1 }
 0x255   : > { %v4852_v62 = vadd.f32 %v1935_v18, %v4582_v43  ;;  %v1937_v37 = vpop.f32.mrb[57].mxu0 }
 0x257   : > { %v4854_v34 = vpop.f32.mrb[122].mxu1 }
 0x258   : > { %5162 = vst [vmem:[#allocation14_spill] sm:$0xff] %v4854_v34  ;;  %v1940_v41 = vpop.f32.mrb[58].mxu0  ;;  %v1717_v8 = vpop.f32.mrb[123].mxu1 }
 0x259   : > { %v4857_v22 = vadd.f32 %v1940_v41, %v4588_v44  ;;  %v1942_v3 = vpop.f32.mrb[59].mxu0  ;;  %v4872_v44 = vld [vmem:[%s5149_s2] ss:$0 sm:$0xff] }
 0x25b   : > { %v4859_v30 = vpop.f32.mrb[124].mxu1 }
 0x25c   : > { %5163 = vst [vmem:[#allocation15_spill] sm:$0xff] %v4859_v30  ;;  %v1945_v4 = vpop.f32.mrb[60].mxu0  ;;  %v1722_v28 = vpop.f32.mrb[125].mxu1 }
 0x25d   : > { %v4862_v51 = vadd.f32 %v1945_v4, %v4594_v63  ;;  %v1947_v53 = vpop.f32.mrb[61].mxu0 }
 0x25f   : > { %v4864_v43 = vpop.f32.mrb[126].mxu1 }
 0x260   : > { %5164 = vst [vmem:[#allocation16_spill] sm:$0xff] %v4864_v43  ;;  %v1950_v18 = vpop.f32.mrb[62].mxu0  ;;  %v1727_v37 = vpop.f32.mrb[127].mxu1 }
 0x261   : > { %v4867_v34 = vadd.f32 %v1950_v18, %v4600_v10  ;;  %v1952_v8 = vpop.f32.mrb[63].mxu0 }
 0x263   : > { %v3135_v20 = vpop.f32.mrb[128].mxu1 }
 0x264   : > { %v1955_v41 = vpop.f32.mrb[64].mxu0  ;;  %v2186_v63 = vadd.f32 %v4711_v48, %v3135_v20  ;;  %v2180_v3 = vpop.f32.mrb[129].mxu1 }
 0x265   : > { %v4877_v4 = vadd.f32 %v1955_v41, %v4606_v23  ;;  %v1957_v28 = vpop.f32.mrb[65].mxu0  ;;  %v2181_v53 = vadd.f32 %v4704_v25, %v2180_v3 }
 0x266   : > { %v2702_v10 = vadd.f32 %v4872_v44, %v2186_v63 }
 0x267   : > { %v2701_v18 = vadd.f32 %v4872_v44, %v2181_v53  ;;  %v3138_v37 = vpop.f32.mrb[130].mxu1 }
 0x268   : > { %v2766_v48 = vmax.f32 %v2702_v10, 0.0  ;;  %v1960_v20 = vpop.f32.mrb[66].mxu0  ;;  %v2196_v23 = vadd.f32 %v4725_v39, %v3138_v37  ;;  %v2190_v8 = vpop.f32.mrb[131].mxu1 }
 0x269   : > { %v2765_v41 = vmax.f32 %v2701_v18, 0.0  ;;  %v4889_v25 = vadd.f32 %v1960_v20, %v4612_v33  ;;  %v1962_v63 = vpop.f32.mrb[67].mxu0  ;;  %v2191_v3 = vadd.f32 %v4718_v9, %v2190_v8 }
 0x26a   : > { %2830 = vst [vmem:[%s4884_s26 + $0x8] sm:$0xff] %v2766_v48  ;;  %v2704_v28 = vadd.f32 %v4872_v44, %v2196_v23 }
 0x26b   : > { %2829 = vst [vmem:[%s4884_s26] sm:$0xff] %v2765_v41  ;;  %v2703_v53 = vadd.f32 %v4872_v44, %v2191_v3  ;;  %v3141_v10 = vpop.f32.mrb[132].mxu1 }
 0x26c   : > { %v2768_v43 = vmax.f32 %v2704_v28, 0.0  ;;  %v1965_v30 = vpop.f32.mrb[68].mxu0  ;;  %v2206_v39 = vadd.f32 %v4739_v24, %v3141_v10  ;;  %v2200_v18 = vpop.f32.mrb[133].mxu1 }
 0x26d   : > { %v2767_v37 = vmax.f32 %v2703_v53, 0.0  ;;  %v4898_v33 = vadd.f32 %v1965_v30, %v4618_v45  ;;  %v1967_v20 = vpop.f32.mrb[69].mxu0  ;;  %v2201_v9 = vadd.f32 %v4732_v0, %v2200_v18 }
 0x26e   : > { %2832 = vst [vmem:[%s4884_s26 + $0x18] sm:$0xff] %v2768_v43  ;;  %v2706_v48 = vadd.f32 %v4872_v44, %v2206_v39 }
 0x26f   : > { %2831 = vst [vmem:[%s4884_s26 + $0x10] sm:$0xff] %v2767_v37  ;;  %v2705_v23 = vadd.f32 %v4872_v44, %v2201_v9  ;;  %v3144_v8 = vpop.f32.mrb[134].mxu1 }
 0x270   : > { %v2770_v41 = vmax.f32 %v2706_v48, 0.0  ;;  %v1970_v63 = vpop.f32.mrb[70].mxu0  ;;  %v2216_v24 = vadd.f32 %v4753_v14, %v3144_v8  ;;  %v2210_v3 = vpop.f32.mrb[135].mxu1 }
 0x271   : > { %v2769_v28 = vmax.f32 %v2705_v23, 0.0  ;;  %v4907_v45 = vadd.f32 %v1970_v63, %v4624_v55  ;;  %v1972_v30 = vpop.f32.mrb[71].mxu0  ;;  %v2211_v0 = vadd.f32 %v4746_v49, %v2210_v3 }
 0x272   : > { %2834 = vst [vmem:[%s4884_s26 + $0x28] sm:$0xff] %v2770_v41  ;;  %v2708_v43 = vadd.f32 %v4872_v44, %v2216_v24 }
 0x273   : > { %2833 = vst [vmem:[%s4884_s26 + $0x20] sm:$0xff] %v2769_v28  ;;  %v2707_v53 = vadd.f32 %v4872_v44, %v2211_v0  ;;  %v3147_v10 = vpop.f32.mrb[136].mxu1 }
 0x274   : > { %v2772_v39 = vmax.f32 %v2708_v43, 0.0  ;;  %v1975_v18 = vpop.f32.mrb[72].mxu0  ;;  %v2226_v14 = vadd.f32 %v4767_v2, %v3147_v10  ;;  %v2220_v37 = vpop.f32.mrb[137].mxu1 }
 0x275   : > { %v2771_v20 = vmax.f32 %v2707_v53, 0.0  ;;  %v4916_v55 = vadd.f32 %v1975_v18, %v4630_v56  ;;  %v1977_v9 = vpop.f32.mrb[73].mxu0  ;;  %v2221_v49 = vadd.f32 %v4760_v27, %v2220_v37 }
 0x276   : > { %2836 = vst [vmem:[%s4884_s26 + $0x38] sm:$0xff] %v2772_v39  ;;  %v2710_v48 = vadd.f32 %v4872_v44, %v2226_v14 }
 0x277   : > { %2835 = vst [vmem:[%s4884_s26 + $0x30] sm:$0xff] %v2771_v20  ;;  %v2709_v23 = vadd.f32 %v4872_v44, %v2221_v49  ;;  %v3150_v8 = vpop.f32.mrb[138].mxu1 }
 0x278   : > { %v2774_v41 = vmax.f32 %v2710_v48, 0.0  ;;  %v1980_v63 = vpop.f32.mrb[74].mxu0  ;;  %v2236_v2 = vadd.f32 %v4775_v26, %v3150_v8  ;;  %v2230_v24 = vpop.f32.mrb[139].mxu1 }
 0x279   : > { %v2773_v3 = vmax.f32 %v2709_v23, 0.0  ;;  %v4925_v56 = vadd.f32 %v1980_v63, %v4636_v17  ;;  %v1982_v28 = vpop.f32.mrb[75].mxu0  ;;  %v2231_v27 = vadd.f32 %v4772_v40, %v2230_v24 }
 0x27a   : > { %2838 = vst [vmem:[%s4884_s26 + $0x48] sm:$0xff] %v2774_v41  ;;  %v2712_v30 = vadd.f32 %v4872_v44, %v2236_v2 }
 0x27b   : > { %2837 = vst [vmem:[%s4884_s26 + $0x40] sm:$0xff] %v2773_v3  ;;  %v2711_v0 = vadd.f32 %v4872_v44, %v2231_v27  ;;  %v3153_v43 = vpop.f32.mrb[140].mxu1 }
 0x27c   : > { %v2776_v53 = vmax.f32 %v2712_v30, 0.0  ;;  %v1985_v10 = vpop.f32.mrb[76].mxu0  ;;  %v2246_v26 = vadd.f32 %v4781_v1, %v3153_v43  ;;  %v2240_v39 = vpop.f32.mrb[141].mxu1 }
 0x27d   : > { %v2775_v18 = vmax.f32 %v2711_v0, 0.0  ;;  %v4934_v17 = vadd.f32 %v1985_v10, %v4642_v32  ;;  %v1987_v14 = vpop.f32.mrb[77].mxu0  ;;  %v2241_v40 = vadd.f32 %v4778_v15, %v2240_v39 }
 0x27e   : > { %2840 = vst [vmem:[%s4884_s26 + $0x58] sm:$0xff] %v2776_v53  ;;  %v2714_v37 = vadd.f32 %v4872_v44, %v2246_v26 }
 0x27f   : > { %2839 = vst [vmem:[%s4884_s26 + $0x50] sm:$0xff] %v2775_v18  ;;  %v2713_v20 = vadd.f32 %v4872_v44, %v2241_v40  ;;  %v3156_v9 = vpop.f32.mrb[142].mxu1 }
 0x280   : > { %v2778_v49 = vmax.f32 %v2714_v37, 0.0  ;;  %v1990_v48 = vpop.f32.mrb[78].mxu0  ;;  %v2256_v1 = vadd.f32 %v4787_v12, %v3156_v9  ;;  %v2250_v23 = vpop.f32.mrb[143].mxu1 }
 0x281   : > { %v2777_v8 = vmax.f32 %v2713_v20, 0.0  ;;  %v4943_v32 = vadd.f32 %v1990_v48, %v4648_v46  ;;  %v1992_v41 = vpop.f32.mrb[79].mxu0  ;;  %v2251_v15 = vadd.f32 %v4784_v61, %v2250_v23 }
 0x282   : > { %2842 = vst [vmem:[%s4884_s26 + $0x68] sm:$0xff] %v2778_v49  ;;  %v2716_v63 = vadd.f32 %v4872_v44, %v2256_v1 }
 0x283   : > { %2841 = vst [vmem:[%s4884_s26 + $0x60] sm:$0xff] %v2777_v8  ;;  %v2715_v2 = vadd.f32 %v4872_v44, %v2251_v15  ;;  %v3159_v24 = vpop.f32.mrb[144].mxu1 }
 0x284   : > { %v2780_v3 = vmax.f32 %v2716_v63, 0.0  ;;  %v1995_v28 = vpop.f32.mrb[80].mxu0  ;;  %v2266_v12 = vadd.f32 %v4797_v42, %v3159_v24  ;;  %v2260_v27 = vpop.f32.mrb[145].mxu1 }
 0x285   : > { %v2779_v30 = vmax.f32 %v2715_v2, 0.0  ;;  %v4952_v46 = vadd.f32 %v1995_v28, %v4654_v59  ;;  %v1997_v0 = vpop.f32.mrb[81].mxu0  ;;  %v2261_v61 = vadd.f32 %v4792_v29, %v2260_v27 }
 0x286   : > { %2844 = vst [vmem:[%s4884_s26 + $0x78] sm:$0xff] %v2780_v3  ;;  %v2718_v43 = vadd.f32 %v4872_v44, %v2266_v12 }
 0x287   : > { %2843 = vst [vmem:[%s4884_s26 + $0x70] sm:$0xff] %v2779_v30  ;;  %v2717_v53 = vadd.f32 %v4872_v44, %v2261_v61  ;;  %v3162_v10 = vpop.f32.mrb[146].mxu1 }
 0x288   : > { %v2782_v26 = vmax.f32 %v2718_v43, 0.0  ;;  %v2000_v39 = vpop.f32.mrb[82].mxu0  ;;  %v2276_v42 = vadd.f32 %v4807_v5, %v3162_v10  ;;  %v2270_v18 = vpop.f32.mrb[147].mxu1 }
 0x289   : > { %v2781_v14 = vmax.f32 %v2717_v53, 0.0  ;;  %v4961_v59 = vadd.f32 %v2000_v39, %v4660_v11  ;;  %v2002_v40 = vpop.f32.mrb[83].mxu0  ;;  %v2271_v29 = vadd.f32 %v4802_v21, %v2270_v18 }
 0x28a   : > { %2846 = vst [vmem:[%s4884_s26 + $0x88] sm:$0xff] %v2782_v26  ;;  %v2720_v37 = vadd.f32 %v4872_v44, %v2276_v42 }
 0x28b   : > { %2845 = vst [vmem:[%s4884_s26 + $0x80] sm:$0xff] %v2781_v14  ;;  %v2719_v20 = vadd.f32 %v4872_v44, %v2271_v29  ;;  %v3165_v9 = vpop.f32.mrb[148].mxu1 }
 0x28c   : > { %v2784_v49 = vmax.f32 %v2720_v37, 0.0  ;;  %v2005_v48 = vpop.f32.mrb[84].mxu0  ;;  %v2286_v5 = vadd.f32 %v4817_v6, %v3165_v9  ;;  %v2280_v1 = vpop.f32.mrb[149].mxu1 }
 0x28d   : > { %v2783_v23 = vmax.f32 %v2719_v20, 0.0  ;;  %v4970_v11 = vadd.f32 %v2005_v48, %v4666_v13  ;;  %v2007_v8 = vpop.f32.mrb[85].mxu0  ;;  %v2281_v21 = vadd.f32 %v4812_v47, %v2280_v1 }
 0x28e   : > { %2848 = vst [vmem:[%s4884_s26 + $0x98] sm:$0xff] %v2784_v49  ;;  %v2722_v41 = vadd.f32 %v4872_v44, %v2286_v5 }
 0x28f   : > { %2847 = vst [vmem:[%s4884_s26 + $0x90] sm:$0xff] %v2783_v23  ;;  %v2721_v15 = vadd.f32 %v4872_v44, %v2281_v21  ;;  %v3168_v63 = vpop.f32.mrb[150].mxu1 }
 0x290   : > { %v2786_v2 = vmax.f32 %v2722_v41, 0.0  ;;  %v2010_v24 = vpop.f32.mrb[86].mxu0  ;;  %v2296_v6 = vadd.f32 %v4827_v58, %v3168_v63  ;;  %v2290_v3 = vpop.f32.mrb[151].mxu1 }
 0x291   : > { %v2785_v28 = vmax.f32 %v2721_v15, 0.0  ;;  %v4979_v13 = vadd.f32 %v2010_v24, %v4672_v36  ;;  %v2012_v12 = vpop.f32.mrb[87].mxu0  ;;  %v2291_v47 = vadd.f32 %v4822_v31, %v2290_v3 }
 0x292   : > { %2850 = vst [vmem:[%s4884_s26 + $0xa8] sm:$0xff] %v2786_v2  ;;  %v2724_v27 = vadd.f32 %v4872_v44, %v2296_v6 }
 0x293   : > { %2849 = vst [vmem:[%s4884_s26 + $0xa0] sm:$0xff] %v2785_v28  ;;  %v2723_v30 = vadd.f32 %v4872_v44, %v2291_v47  ;;  %v3171_v0 = vpop.f32.mrb[152].mxu1 }
 0x294   : > { %v2788_v61 = vmax.f32 %v2724_v27, 0.0  ;;  %v2015_v43 = vpop.f32.mrb[88].mxu0  ;;  %v2306_v58 = vadd.f32 %v4837_v57, %v3171_v0  ;;  %v2300_v53 = vpop.f32.mrb[153].mxu1 }
 0x295   : > { %v2787_v10 = vmax.f32 %v2723_v30, 0.0  ;;  %v4988_v36 = vadd.f32 %v2015_v43, %v4678_v50  ;;  %v2017_v26 = vpop.f32.mrb[89].mxu0  ;;  %v2301_v31 = vadd.f32 %v4832_v19, %v2300_v53 }
 0x296   : > { %2852 = vst [vmem:[%s4884_s26 + $0xb8] sm:$0xff] %v2788_v61  ;;  %v2726_v39 = vadd.f32 %v4872_v44, %v2306_v58 }
 0x297   : > { %2851 = vst [vmem:[%s4884_s26 + $0xb0] sm:$0xff] %v2787_v10  ;;  %v2725_v42 = vadd.f32 %v4872_v44, %v2301_v31  ;;  %v3174_v18 = vpop.f32.mrb[154].mxu1 }
 0x298   : > { %v2790_v14 = vmax.f32 %v2726_v39, 0.0  ;;  %v2020_v40 = vpop.f32.mrb[90].mxu0  ;;  %v2316_v57 = vadd.f32 %v4847_v60, %v3174_v18  ;;  %v2310_v29 = vpop.f32.mrb[155].mxu1 }
 0x299   : > { %v2789_v37 = vmax.f32 %v2725_v42, 0.0  ;;  %v4997_v50 = vadd.f32 %v2020_v40, %v4684_v16  ;;  %v2022_v20 = vpop.f32.mrb[91].mxu0  ;;  %v2311_v19 = vadd.f32 %v4842_v52, %v2310_v29 }
 0x29a   : > { %2854 = vst [vmem:[%s4884_s26 + $0xc8] sm:$0xff] %v2790_v14  ;;  %v2728_v9 = vadd.f32 %v4872_v44, %v2316_v57 }
 0x29b   : > { %2853 = vst [vmem:[%s4884_s26 + $0xc0] sm:$0xff] %v2789_v37  ;;  %v2727_v49 = vadd.f32 %v4872_v44, %v2311_v19  ;;  %v3177_v48 = vpop.f32.mrb[156].mxu1 }
 0x29c   : > { %v2792_v5 = vmax.f32 %v2728_v9, 0.0  ;;  %v2025_v1 = vpop.f32.mrb[92].mxu0  ;;  %v2326_v60 = vadd.f32 %v4857_v22, %v3177_v48  ;;  %v2320_v23 = vpop.f32.mrb[157].mxu1 }
 0x29d   : > { %v2791_v8 = vmax.f32 %v2727_v49, 0.0  ;;  %v5006_v16 = vadd.f32 %v2025_v1, %v4690_v38  ;;  %v2027_v21 = vpop.f32.mrb[93].mxu0  ;;  %v2321_v52 = vadd.f32 %v4852_v62, %v2320_v23 }
 0x29e   : > { %2856 = vst [vmem:[%s4884_s26 + $0xd8] sm:$0xff] %v2792_v5  ;;  %v2730_v41 = vadd.f32 %v4872_v44, %v2326_v60 }
 0x29f   : > { %2855 = vst [vmem:[%s4884_s26 + $0xd0] sm:$0xff] %v2791_v8  ;;  %v2729_v15 = vadd.f32 %v4872_v44, %v2321_v52  ;;  %v3180_v63 = vpop.f32.mrb[158].mxu1 }
 0x2a0   : > { %v2794_v2 = vmax.f32 %v2730_v41, 0.0  ;;  %v2030_v24 = vpop.f32.mrb[94].mxu0  ;;  %v2336_v22 = vadd.f32 %v4867_v34, %v3180_v63  ;;  %v2330_v6 = vpop.f32.mrb[159].mxu1  ;;  %v5166_v41 = vld [vmem:[#allocation4_spill] sm:$0xff] }
 0x2a1   : > { %v2793_v3 = vmax.f32 %v2729_v15, 0.0  ;;  %v5015_v38 = vadd.f32 %v2030_v24, %v4696_v54  ;;  %v2032_v28 = vpop.f32.mrb[95].mxu0  ;;  %v2331_v62 = vadd.f32 %v4862_v51, %v2330_v6 }
 0x2a2   : > { %2858 = vst [vmem:[%s4884_s26 + $0xe8] sm:$0xff] %v2794_v2  ;;  %v2732_v12 = vadd.f32 %v4872_v44, %v2336_v22 }
 0x2a3   : > { %2857 = vst [vmem:[%s4884_s26 + $0xe0] sm:$0xff] %v2793_v3  ;;  %v2731_v47 = vadd.f32 %v4872_v44, %v2331_v62  ;;  %v3183_v27 = vpop.f32.mrb[160].mxu1 }
 0x2a4   : > { %v2796_v30 = vmax.f32 %v2732_v12, 0.0  ;;  %v2035_v0 = vpop.f32.mrb[96].mxu0  ;;  %v2346_v34 = vadd.f32 %v4889_v25, %v3183_v27  ;;  %v2340_v61 = vpop.f32.mrb[161].mxu1  ;;  %v5167_v12 = vld [vmem:[#allocation5_spill] sm:$0xff] }
 0x2a5   : > { %v2795_v43 = vmax.f32 %v2731_v47, 0.0  ;;  %v5024_v54 = vadd.f32 %v2035_v0, %v4789_v7  ;;  %v2037_v58 = vpop.f32.mrb[97].mxu0  ;;  %v2341_v51 = vadd.f32 %v4877_v4, %v2340_v61 }
 0x2a6   : > { %2860 = vst [vmem:[%s4884_s26 + $0xf8] sm:$0xff] %v2796_v30  ;;  %v2734_v53 = vadd.f32 %v4872_v44, %v2346_v34 }
 0x2a7   : > { %2859 = vst [vmem:[%s4884_s26 + $0xf0] sm:$0xff] %v2795_v43  ;;  %v2733_v10 = vadd.f32 %v4872_v44, %v2341_v51  ;;  %v3186_v26 = vpop.f32.mrb[162].mxu1 }
 0x2a8   : > { %v2798_v31 = vmax.f32 %v2734_v53, 0.0  ;;  %v2040_v39 = vpop.f32.mrb[98].mxu0  ;;  %v2356_v25 = vadd.f32 %v4907_v45, %v3186_v26  ;;  %v2350_v42 = vpop.f32.mrb[163].mxu1  ;;  %v5168_v53 = vld [vmem:[#allocation6_spill] sm:$0xff] }
 0x2a9   : > { %v2797_v18 = vmax.f32 %v2733_v10, 0.0  ;;  %v5033_v7 = vadd.f32 %v2040_v39, %v4794_v35  ;;  %v2042_v14 = vpop.f32.mrb[99].mxu0  ;;  %v2351_v4 = vadd.f32 %v4898_v33, %v2350_v42  ;;  %v5165_v35 = vld [vmem:[#allocation3_spill] sm:$0xff] }
 0x2aa   : > { %2862 = vst [vmem:[%s4884_s26 + $0x108] sm:$0xff] %v2798_v31  ;;  %v2736_v40 = vadd.f32 %v4872_v44, %v2356_v25 }
 0x2ab   : > { %2861 = vst [vmem:[%s4884_s26 + $0x100] sm:$0xff] %v2797_v18  ;;  %v2735_v57 = vadd.f32 %v4872_v44, %v2351_v4  ;;  %v3189_v29 = vpop.f32.mrb[164].mxu1 }
 0x2ac   : > { %v2800_v37 = vmax.f32 %v2736_v40, 0.0  ;;  %v2045_v20 = vpop.f32.mrb[100].mxu0  ;;  %v2366_v45 = vadd.f32 %v4925_v56, %v3189_v29  ;;  %v2360_v19 = vpop.f32.mrb[165].mxu1  ;;  %v5169_v40 = vld [vmem:[#allocation7_spill] sm:$0xff] }
 0x2ad   : > { %v2799_v9 = vmax.f32 %v2735_v57, 0.0  ;;  %v5042_v49 = vadd.f32 %v2045_v20, %v5165_v35  ;;  %v2047_v48 = vpop.f32.mrb[101].mxu0  ;;  %v2361_v33 = vadd.f32 %v4916_v55, %v2360_v19 }
 0x2ae   : > { %2864 = vst [vmem:[%s4884_s26 + $0x118] sm:$0xff] %v2800_v37  ;;  %v2738_v5 = vadd.f32 %v4872_v44, %v2366_v45 }
 0x2af   : > { %2863 = vst [vmem:[%s4884_s26 + $0x110] sm:$0xff] %v2799_v9  ;;  %v2737_v1 = vadd.f32 %v4872_v44, %v2361_v33  ;;  %v3192_v60 = vpop.f32.mrb[166].mxu1  ;;  %v5170_v33 = vld [vmem:[#allocation8_spill] sm:$0xff] }
 0x2b0   : > { %v2802_v23 = vmax.f32 %v2738_v5, 0.0  ;;  %v2050_v8 = vpop.f32.mrb[102].mxu0  ;;  %v2376_v56 = vadd.f32 %v4943_v32, %v3192_v60  ;;  %v2370_v21 = vpop.f32.mrb[167].mxu1 }
 0x2b1   : > { %v2801_v52 = vmax.f32 %v2737_v1, 0.0  ;;  %v5051_v15 = vadd.f32 %v2050_v8, %v5166_v41  ;;  %v2052_v63 = vpop.f32.mrb[103].mxu0  ;;  %v2371_v55 = vadd.f32 %v4934_v17, %v2370_v21 }
 0x2b2   : > { %2866 = vst [vmem:[%s4884_s26 + $0x128] sm:$0xff] %v2802_v23  ;;  %v2740_v2 = vadd.f32 %v4872_v44, %v2376_v56  ;;  %v5171_v63 = vld [vmem:[#allocation9_spill] sm:$0xff] }
 0x2b3   : > { %2865 = vst [vmem:[%s4884_s26 + $0x120] sm:$0xff] %v2801_v52  ;;  %v2739_v24 = vadd.f32 %v4872_v44, %v2371_v55  ;;  %v3195_v22 = vpop.f32.mrb[168].mxu1 }
 0x2b4   : > { %v2804_v6 = vmax.f32 %v2740_v2, 0.0  ;;  %v2055_v3 = vpop.f32.mrb[104].mxu0  ;;  %v2386_v32 = vadd.f32 %v4961_v59, %v3195_v22  ;;  %v2380_v28 = vpop.f32.mrb[169].mxu1 }
 0x2b5   : > { %v2803_v62 = vmax.f32 %v2739_v24, 0.0  ;;  %v5060_v47 = vadd.f32 %v2055_v3, %v5167_v12  ;;  %v2057_v27 = vpop.f32.mrb[105].mxu0  ;;  %v2381_v17 = vadd.f32 %v4952_v46, %v2380_v28  ;;  %v5172_v12 = vld [vmem:[#allocation10_spill] sm:$0xff] }
 0x2b6   : > { %2868 = vst [vmem:[%s4884_s26 + $0x138] sm:$0xff] %v2804_v6  ;;  %v2742_v30 = vadd.f32 %v4872_v44, %v2386_v32 }
 0x2b7   : > { %2867 = vst [vmem:[%s4884_s26 + $0x130] sm:$0xff] %v2803_v62  ;;  %v2741_v0 = vadd.f32 %v4872_v44, %v2381_v17  ;;  %v3198_v34 = vpop.f32.mrb[170].mxu1 }
 0x2b8   : > { %v2806_v61 = vmax.f32 %v2742_v30, 0.0  ;;  %v2060_v43 = vpop.f32.mrb[106].mxu0  ;;  %v2396_v59 = vadd.f32 %v4979_v13, %v3198_v34  ;;  %v2390_v58 = vpop.f32.mrb[171].mxu1 }
 0x2b9   : > { %v2805_v51 = vmax.f32 %v2741_v0, 0.0  ;;  %v3490_v10 = vadd.f32 %v2060_v43, %v5168_v53  ;;  %v2062_v26 = vpop.f32.mrb[107].mxu0  ;;  %v2391_v46 = vadd.f32 %v4970_v11, %v2390_v58 }
 0x2ba   : > { %2870 = vst [vmem:[%s4884_s26 + $0x148] sm:$0xff] %v2806_v61  ;;  %v2744_v31 = vadd.f32 %v4872_v44, %v2396_v59 }
 0x2bb   : > { %2869 = vst [vmem:[%s4884_s26 + $0x140] sm:$0xff] %v2805_v51  ;;  %v2743_v39 = vadd.f32 %v4872_v44, %v2391_v46  ;;  %v3201_v25 = vpop.f32.mrb[172].mxu1  ;;  %v5173_v51 = vld [vmem:[#allocation11_spill] sm:$0xff] }
 0x2bc   : > { %v2808_v42 = vmax.f32 %v2744_v31, 0.0  ;;  %v2065_v18 = vpop.f32.mrb[108].mxu0  ;;  %v2406_v13 = vadd.f32 %v4997_v50, %v3201_v25  ;;  %v2400_v14 = vpop.f32.mrb[173].mxu1 }
 0x2bd   : > { %v2807_v4 = vmax.f32 %v2743_v39, 0.0  ;;  %v5076_v57 = vadd.f32 %v2065_v18, %v5169_v40  ;;  %v2067_v29 = vpop.f32.mrb[109].mxu0  ;;  %v2401_v11 = vadd.f32 %v4988_v36, %v2400_v14  ;;  %v5174_v14 = vld [vmem:[#allocation12_spill] sm:$0xff] }
 0x2be   : > { %2872 = vst [vmem:[%s4884_s26 + $0x158] sm:$0xff] %v2808_v42  ;;  %v2746_v37 = vadd.f32 %v4872_v44, %v2406_v13 }
 0x2bf   : > { %2871 = vst [vmem:[%s4884_s26 + $0x150] sm:$0xff] %v2807_v4  ;;  %v2745_v20 = vadd.f32 %v4872_v44, %v2401_v11  ;;  %v3204_v45 = vpop.f32.mrb[174].mxu1 }
 0x2c0   : > { %v2810_v19 = vmax.f32 %v2746_v37, 0.0  ;;  %v2070_v9 = vpop.f32.mrb[110].mxu0  ;;  %v2416_v50 = vadd.f32 %v5015_v38, %v3204_v45  ;;  %v2410_v35 = vpop.f32.mrb[175].mxu1 }
 0x2c1   : > { %v2809_v48 = vmax.f32 %v2745_v20, 0.0  ;;  %v3492_v5 = vadd.f32 %v2070_v9, %v5170_v33  ;;  %v2072_v1 = vpop.f32.mrb[111].mxu0  ;;  %v2411_v36 = vadd.f32 %v5006_v16, %v2410_v35  ;;  %v5175_v35 = vld [vmem:[#allocation13_spill] sm:$0xff] }
 0x2c2   : > { %2874 = vst [vmem:[%s4884_s26 + $0x168] sm:$0xff] %v2810_v19  ;;  %v2748_v60 = vadd.f32 %v4872_v44, %v2416_v50 }
 0x2c3   : > { %2873 = vst [vmem:[%s4884_s26 + $0x160] sm:$0xff] %v2809_v48  ;;  %v2747_v23 = vadd.f32 %v4872_v44, %v2411_v36  ;;  %v3207_v8 = vpop.f32.mrb[176].mxu1 }
 0x2c4   : > { %v2812_v56 = vmax.f32 %v2748_v60, 0.0  ;;  %v2075_v21 = vpop.f32.mrb[112].mxu0  ;;  %v2426_v38 = vadd.f32 %v5033_v7, %v3207_v8  ;;  %v2420_v52 = vpop.f32.mrb[177].mxu1 }
 0x2c5   : > { %v2811_v41 = vmax.f32 %v2747_v23, 0.0  ;;  %v3493_v55 = vadd.f32 %v2075_v21, %v5171_v63  ;;  %v2077_v2 = vpop.f32.mrb[113].mxu0  ;;  %v2421_v16 = vadd.f32 %v5024_v54, %v2420_v52 }
 0x2c6   : > { %2876 = vst [vmem:[%s4884_s26 + $0x178] sm:$0xff] %v2812_v56  ;;  %v2750_v24 = vadd.f32 %v4872_v44, %v2426_v38  ;;  %v5176_v38 = vld [vmem:[#allocation14_spill] sm:$0xff] }
 0x2c7   : > { %2875 = vst [vmem:[%s4884_s26 + $0x170] sm:$0xff] %v2811_v41  ;;  %v2749_v22 = vadd.f32 %v4872_v44, %v2421_v16  ;;  %v3210_v6 = vpop.f32.mrb[178].mxu1 }
 0x2c8   : > { %v2814_v3 = vmax.f32 %v2750_v24, 0.0  ;;  %v2080_v32 = vpop.f32.mrb[114].mxu0  ;;  %v2436_v7 = vadd.f32 %v5051_v15, %v3210_v6  ;;  %v2430_v28 = vpop.f32.mrb[179].mxu1 }
 0x2c9   : > { %v2813_v62 = vmax.f32 %v2749_v22, 0.0  ;;  %v3494_v27 = vadd.f32 %v2080_v32, %v5172_v12  ;;  %v2082_v17 = vpop.f32.mrb[115].mxu0  ;;  %v2431_v54 = vadd.f32 %v5042_v49, %v2430_v28 }
 0x2ca   : > { %2878 = vst [vmem:[%s4884_s26 + $0x188] sm:$0xff] %v2814_v3  ;;  %v2752_v30 = vadd.f32 %v4872_v44, %v2436_v7  ;;  %v5177_v7 = vld [vmem:[#allocation15_spill] sm:$0xff] }
 0x2cb   : > { %2877 = vst [vmem:[%s4884_s26 + $0x180] sm:$0xff] %v2813_v62  ;;  %v2751_v0 = vadd.f32 %v4872_v44, %v2431_v54  ;;  %v3213_v34 = vpop.f32.mrb[180].mxu1 }
 0x2cc   : > { %v2816_v61 = vmax.f32 %v2752_v30, 0.0  ;;  %v2085_v43 = vpop.f32.mrb[116].mxu0  ;;  %v2446_v59 = vadd.f32 %v3490_v10, %v3213_v34  ;;  %v2440_v15 = vpop.f32.mrb[181].mxu1 }
 0x2cd   : > { %v2815_v58 = vmax.f32 %v2751_v0, 0.0  ;;  %v3495_v53 = vadd.f32 %v2085_v43, %v5173_v51  ;;  %v2087_v26 = vpop.f32.mrb[117].mxu0  ;;  %v2441_v46 = vadd.f32 %v5060_v47, %v2440_v15  ;;  %v5178_v43 = vld [vmem:[#allocation16_spill] sm:$0xff] }
 0x2ce   : > { %2880 = vst [vmem:[%s4884_s26 + $0x198] sm:$0xff] %v2816_v61  ;;  %v2754_v49 = vadd.f32 %v4872_v44, %v2446_v59 }
 0x2cf   : > { %2879 = vst [vmem:[%s4884_s26 + $0x190] sm:$0xff] %v2815_v58  ;;  %v2753_v31 = vadd.f32 %v4872_v44, %v2441_v46  ;;  %v3216_v39 = vpop.f32.mrb[182].mxu1 }
 0x2d0   : > { %v2818_v25 = vmax.f32 %v2754_v49, 0.0  ;;  %v2090_v42 = vpop.f32.mrb[118].mxu0  ;;  %v2456_v18 = vadd.f32 %v3492_v5, %v3216_v39  ;;  %v2450_v10 = vpop.f32.mrb[183].mxu1 }
 0x2d1   : > { %v2817_v13 = vmax.f32 %v2753_v31, 0.0  ;;  %v3496_v4 = vadd.f32 %v2090_v42, %v5174_v14  ;;  %v2092_v40 = vpop.f32.mrb[119].mxu0  ;;  %v2451_v29 = vadd.f32 %v5076_v57, %v2450_v10 }
 0x2d2   : > { %2882 = vst [vmem:[%s4884_s26 + $0x1a8] sm:$0xff] %v2818_v25  ;;  %v2756_v47 = vadd.f32 %v4872_v44, %v2456_v18 }
 0x2d3   : > { %2881 = vst [vmem:[%s4884_s26 + $0x1a0] sm:$0xff] %v2817_v13  ;;  %v2755_v11 = vadd.f32 %v4872_v44, %v2451_v29  ;;  %v3219_v37 = vpop.f32.mrb[184].mxu1 }
 0x2d4   : > { %v2820_v20 = vmax.f32 %v2756_v47, 0.0  ;;  %v2095_v45 = vpop.f32.mrb[120].mxu0  ;;  %v2466_v19 = vadd.f32 %v3494_v27, %v3219_v37  ;;  %v2460_v9 = vpop.f32.mrb[185].mxu1 }
 0x2d5   : > { %v2819_v50 = vmax.f32 %v2755_v11, 0.0  ;;  %v3497_v48 = vadd.f32 %v2095_v45, %v5175_v35  ;;  %v2097_v33 = vpop.f32.mrb[121].mxu0  ;;  %v2461_v5 = vadd.f32 %v3493_v55, %v2460_v9 }
 0x2d6   : > { %2884 = vst [vmem:[%s4884_s26 + $0x1b8] sm:$0xff] %v2820_v20  ;;  %v2758_v57 = vadd.f32 %v4872_v44, %v2466_v19 }
 0x2d7   : > { %2883 = vst [vmem:[%s4884_s26 + $0x1b0] sm:$0xff] %v2819_v50  ;;  %v2757_v1 = vadd.f32 %v4872_v44, %v2461_v5  ;;  %v3222_v36 = vpop.f32.mrb[186].mxu1 }
 0x2d8   : > { %v2822_v60 = vmax.f32 %v2758_v57, 0.0  ;;  %v2100_v23 = vpop.f32.mrb[122].mxu0  ;;  %v2476_v8 = vadd.f32 %v3496_v4, %v3222_v36  ;;  %v2470_v56 = vpop.f32.mrb[187].mxu1 }
 0x2d9   : > { %v2821_v21 = vmax.f32 %v2757_v1, 0.0  ;;  %v3498_v52 = vadd.f32 %v2100_v23, %v5176_v38  ;;  %v2102_v41 = vpop.f32.mrb[123].mxu0  ;;  %v2471_v63 = vadd.f32 %v3495_v53, %v2470_v56 }
 0x2da   : > { %2886 = vst [vmem:[%s4884_s26 + $0x1c8] sm:$0xff] %v2822_v60  ;;  %v2760_v55 = vadd.f32 %v4872_v44, %v2476_v8 }
 0x2db   : > { %2885 = vst [vmem:[%s4884_s26 + $0x1c0] sm:$0xff] %v2821_v21  ;;  %v2759_v2 = vadd.f32 %v4872_v44, %v2471_v63  ;;  %v3225_v16 = vpop.f32.mrb[188].mxu1 }
 0x2dc   : > { %v2824_v24 = vmax.f32 %v2760_v55, 0.0  ;;  %v2105_v22 = vpop.f32.mrb[124].mxu0  ;;  %v2486_v6 = vadd.f32 %v3498_v52, %v3225_v16  ;;  %v2480_v3 = vpop.f32.mrb[189].mxu1 }
 0x2dd   : > { %v2823_v32 = vmax.f32 %v2759_v2, 0.0  ;;  %v3499_v28 = vadd.f32 %v2105_v22, %v5177_v7  ;;  %v2107_v62 = vpop.f32.mrb[125].mxu0  ;;  %v2481_v12 = vadd.f32 %v3497_v48, %v2480_v3 }
 0x2de   : > { %2888 = vst [vmem:[%s4884_s26 + $0x1d8] sm:$0xff] %v2824_v24  ;;  %v2762_v27 = vadd.f32 %v4872_v44, %v2486_v6 }
 0x2df   : > { %2887 = vst [vmem:[%s4884_s26 + $0x1d0] sm:$0xff] %v2823_v32  ;;  %v2761_v17 = vadd.f32 %v4872_v44, %v2481_v12  ;;  %v3228_v54 = vpop.f32.mrb[190].mxu1 }
 0x2e0   : > { %v2826_v30 = vmax.f32 %v2762_v27, 0.0  ;;  %v2110_v0 = vpop.f32.mrb[126].mxu0  ;;  %v2490_v34 = vpop.f32.mrb[191].mxu1 }
 0x2e1   : > { %v2825_v61 = vmax.f32 %v2761_v17, 0.0  ;;  %v3500_v59 = vadd.f32 %v2110_v0, %v5178_v43  ;;  %v2112_v15 = vpop.f32.mrb[127].mxu0  ;;  %v2491_v58 = vadd.f32 %v3499_v28, %v2490_v34 }
 0x2e2   : > { %2890 = vst [vmem:[%s4884_s26 + $0x1e8] sm:$0xff] %v2826_v30 }
 0x2e3   : > { %2889 = vst [vmem:[%s4884_s26 + $0x1e0] sm:$0xff] %v2825_v61  ;;  %v2496_v51 = vadd.f32 %v3500_v59, %v3228_v54  ;;  %v2763_v53 = vadd.f32 %v4872_v44, %v2491_v58 }
 0x2e5   : > { %v2764_v26 = vadd.f32 %v4872_v44, %v2496_v51  ;;  %v2827_v46 = vmax.f32 %v2763_v53, 0.0 }
 0x2e7   : > { %v2828_v49 = vmax.f32 %v2764_v26, 0.0  ;;  %2891 = vst [vmem:[%s4884_s26 + $0x1f0] sm:$0xff] %v2827_v46 }
 0x2e9   : > { %2892 = vst [vmem:[%s4884_s26 + $0x1f8] sm:$0xff] %v2828_v49 }
 0x2ea PF: > { %s13_s14 = sadd.s32 1, %s3677_s14   ;;  %s5179_s12 = smov %s3673_s13 }
 0x2eb   : > { %p10_p5 = scmp.ge.s32.totalorder %s13_s14, 16   ;;  %s5180_s13 = smov %s5182_s15 }
 0x2ed   :  { %12 = sbr.rel (!%p10_p5) target bundleno = 2 (0x2), region = 76 }

// kernel: siamese_forward.9
= control target key start
LH: loop header
LB: loop body
LE: loop exit
PB: predicated region body
PF: predicated region fallthrough
CT: control target
= control target key end

     0   :  { %s669_s15 = smov 0   ;;  %s872_s0 = inlined_call_operand.vmem [shape: f32[4,21,1344], index: 0, kind: input, shape index: {}]   ;;  %s873_s1 = inlined_call_operand.vmem [shape: f32[4,21,1344], index: 1, kind: input, shape index: {}]   ;;  %s874_s2 = inlined_call_operand.vmem [shape: f32[4,21,1344], index: 2, kind: input, shape index: {}]   ;;  %s875_s3 = inlined_call_operand.vmem [shape: f32[4,21,1344], index: 3, kind: input, shape index: {}]   ;;  %s876_s4 = inlined_call_operand.vmem [shape: f32[4,21,1344], index: 4, kind: output, shape index: {}]  }
   0x1 LB: > { %s615_s16 = sadd.s32 4294967295, %s642_s15   ;;  %p619_p0 = scmp.ge.s32.totalorder %s642_s15, 1  ;;  %s642_s15 = sphi %s669_s15, %s14_s15  }
   0x2   : > { %p192_p1 = scmp.lt.s32.totalorder %s642_s15, 5 }
   0x4   : > { %p193_p2 = pnand %p619_p0, %p192_p1 }
   0x5   : > { %p233_p3 = scmp.lt.s32.totalorder (!%p193_p2), %s615_s16, 3  ;;  %vm499_vm0 = vcmask (!%p193_p2), 523264   ;;  %vm522_vm1 = vcmask (!%p193_p2), 520192  }
   0x6   : > { %196 = sbr.rel (%p193_p2) target bundleno = 72 (0x48), region = 36 }
   0xd   : > { %s878_s16 = smov (!%p233_p3, %s615_s16), 3 }
   0xe   : > { %s627_s17 = smul.u32 264, %s878_s16 }
  0x10   : > { %s680_s20 = scalar_lea.vmem %s872_s0, %s627_s17  ;;  %s685_s23 = scalar_lea.vmem %s873_s1, %s627_s17 }
  0x11   : > { %s690_s26 = scalar_lea.vmem %s874_s2, %s627_s17  ;;  %s695_s29 = scalar_lea.vmem %s875_s3, %s627_s17  ;;  %v258_v0 = vld [vmem:[%s680_s20] sm:$0xff]  ;;  %v259_v2 = vld [vmem:[%s680_s20 + $0x8] sm:$0xff]  ;;  %v260_v11 = vld [vmem:[%s680_s20 + $0x10] sm:$0xff] }
  0x12   : > { %v291_v1 = vld [vmem:[%s685_s23] sm:$0xff]  ;;  %v292_v6 = vld [vmem:[%s685_s23 + $0x8] sm:$0xff]  ;;  %s709_s6 = scalar_lea.vmem %s876_s4, %s627_s17  ;;  %v293_v13 = vld [vmem:[%s685_s23 + $0x10] sm:$0xff] }
  0x13   : > { %v324_v3 = vmax.f32 %v258_v0, %v291_v1  ;;  %v357_v4 = vld [vmem:[%s690_s26] sm:$0xff]  ;;  %v325_v8 = vmax.f32 %v259_v2, %v292_v6  ;;  %v358_v9 = vld [vmem:[%s690_s26 + $0x8] sm:$0xff]  ;;  %v359_v14 = vld [vmem:[%s690_s26 + $0x10] sm:$0xff]  ;;  %v326_v17 = vmax.f32 %v260_v11, %v293_v13 }
  0x14   : > { %v390_v5 = vld [vmem:[%s695_s29] sm:$0xff]  ;;  %v391_v10 = vld [vmem:[%s695_s29 + $0x8] sm:$0xff]  ;;  %v392_v15 = vld [vmem:[%s695_s29 + $0x10] sm:$0xff] }
  0x15   : > { %v423_v7 = vmax.f32 %v357_v4, %v390_v5  ;;  %v424_v12 = vmax.f32 %v358_v9, %v391_v10  ;;  %v425_v18 = vmax.f32 %v359_v14, %v392_v15  ;;  %v261_v19 = vld [vmem:[%s680_s20 + $0x18] sm:$0xff]  ;;  %v262_v25 = vld [vmem:[%s680_s20 + $0x20] sm:$0xff]  ;;  %v263_v32 = vld [vmem:[%s680_s20 + $0x28] sm:$0xff] }
  0x16   : > { %v294_v20 = vld [vmem:[%s685_s23 + $0x18] sm:$0xff]  ;;  %v295_v26 = vld [vmem:[%s685_s23 + $0x20] sm:$0xff]  ;;  %v296_v34 = vld [vmem:[%s685_s23 + $0x28] sm:$0xff] }
  0x17   : > { %v456_v16 = vmax.f32 %v324_v3, %v423_v7  ;;  %v360_v21 = vld [vmem:[%s690_s26 + $0x18] sm:$0xff]  ;;  %v457_v22 = vmax.f32 %v325_v8, %v424_v12  ;;  %v327_v23 = vmax.f32 %v261_v19, %v294_v20  ;;  %v458_v27 = vmax.f32 %v326_v17, %v425_v18  ;;  %v361_v30 = vld [vmem:[%s690_s26 + $0x20] sm:$0xff]  ;;  %v362_v35 = vld [vmem:[%s690_s26 + $0x28] sm:$0xff] }
  0x18   : > { %v393_v24 = vld [vmem:[%s695_s29 + $0x18] sm:$0xff]  ;;  %v328_v29 = vmax.f32 %v262_v25, %v295_v26  ;;  %v394_v31 = vld [vmem:[%s695_s29 + $0x20] sm:$0xff]  ;;  %v395_v36 = vld [vmem:[%s695_s29 + $0x28] sm:$0xff]  ;;  %v329_v38 = vmax.f32 %v263_v32, %v296_v34 }
  0x19   : > { %489 = vst [vmem:[%s709_s6] sm:$0xff] %v456_v16  ;;  %v426_v28 = vmax.f32 %v360_v21, %v393_v24  ;;  %490 = vst [vmem:[%s709_s6 + $0x8] sm:$0xff] %v457_v22  ;;  %v427_v33 = vmax.f32 %v361_v30, %v394_v31  ;;  %v428_v39 = vmax.f32 %v362_v35, %v395_v36  ;;  %v264_v40 = vld [vmem:[%s680_s20 + $0x30] sm:$0xff]  ;;  %v265_v46 = vld [vmem:[%s680_s20 + $0x38] sm:$0xff] }
  0x1a   : > { %491 = vst [vmem:[%s709_s6 + $0x10] sm:$0xff] %v458_v27  ;;  %v297_v41 = vld [vmem:[%s685_s23 + $0x30] sm:$0xff]  ;;  %v298_v47 = vld [vmem:[%s685_s23 + $0x38] sm:$0xff]  ;;  %v266_v53 = vld [vmem:[%s680_s20 + $0x40] sm:$0xff] }
  0x1b   : > { %v459_v37 = vmax.f32 %v327_v23, %v426_v28  ;;  %v363_v42 = vld [vmem:[%s690_s26 + $0x30] sm:$0xff]  ;;  %v460_v43 = vmax.f32 %v328_v29, %v427_v33  ;;  %v330_v44 = vmax.f32 %v264_v40, %v297_v41  ;;  %v461_v48 = vmax.f32 %v329_v38, %v428_v39  ;;  %v364_v51 = vld [vmem:[%s690_s26 + $0x38] sm:$0xff]  ;;  %v299_v55 = vld [vmem:[%s685_s23 + $0x40] sm:$0xff] }
  0x1c   : > { %v396_v45 = vld [vmem:[%s695_s29 + $0x30] sm:$0xff]  ;;  %v331_v50 = vmax.f32 %v265_v46, %v298_v47  ;;  %v397_v52 = vld [vmem:[%s695_s29 + $0x38] sm:$0xff]  ;;  %v365_v56 = vld [vmem:[%s690_s26 + $0x40] sm:$0xff]  ;;  %v332_v59 = vmax.f32 %v266_v53, %v299_v55 }
  0x1d   : > { %492 = vst [vmem:[%s709_s6 + $0x18] sm:$0xff] %v459_v37  ;;  %v429_v49 = vmax.f32 %v363_v42, %v396_v45  ;;  %493 = vst [vmem:[%s709_s6 + $0x20] sm:$0xff] %v460_v43  ;;  %v430_v54 = vmax.f32 %v364_v51, %v397_v52  ;;  %v398_v57 = vld [vmem:[%s695_s29 + $0x40] sm:$0xff]  ;;  %v267_v61 = vld [vmem:[%s680_s20 + $0x48] sm:$0xff] }
  0x1e   : > { %494 = vst [vmem:[%s709_s6 + $0x28] sm:$0xff] %v461_v48  ;;  %v431_v60 = vmax.f32 %v365_v56, %v398_v57  ;;  %v300_v62 = vld [vmem:[%s685_s23 + $0x48] sm:$0xff]  ;;  %v268_v3 = vld [vmem:[%s680_s20 + $0x50] sm:$0xff]  ;;  %v269_v10 = vld [vmem:[%s680_s20 + $0x58] sm:$0xff] }
  0x1f   : > { %v462_v58 = vmax.f32 %v330_v44, %v429_v49  ;;  %v366_v63 = vld [vmem:[%s690_s26 + $0x48] sm:$0xff]  ;;  %v463_v0 = vmax.f32 %v331_v50, %v430_v54  ;;  %v333_v1 = vmax.f32 %v267_v61, %v300_v62  ;;  %v301_v4 = vld [vmem:[%s685_s23 + $0x50] sm:$0xff]  ;;  %v302_v12 = vld [vmem:[%s685_s23 + $0x58] sm:$0xff] }
  0x20   : > { %v399_v2 = vld [vmem:[%s695_s29 + $0x48] sm:$0xff]  ;;  %v464_v5 = vmax.f32 %v332_v59, %v431_v60  ;;  %v334_v7 = vmax.f32 %v268_v3, %v301_v4  ;;  %v367_v8 = vld [vmem:[%s690_s26 + $0x50] sm:$0xff]  ;;  %v368_v13 = vld [vmem:[%s690_s26 + $0x58] sm:$0xff]  ;;  %v335_v16 = vmax.f32 %v269_v10, %v302_v12 }
  0x21   : > { %495 = vst [vmem:[%s709_s6 + $0x30] sm:$0xff] %v462_v58  ;;  %v432_v6 = vmax.f32 %v366_v63, %v399_v2  ;;  %v400_v9 = vld [vmem:[%s695_s29 + $0x50] sm:$0xff]  ;;  %496 = vst [vmem:[%s709_s6 + $0x38] sm:$0xff] %v463_v0  ;;  %v401_v14 = vld [vmem:[%s695_s29 + $0x58] sm:$0xff] }
  0x22   : > { %v433_v11 = vmax.f32 %v367_v8, %v400_v9  ;;  %497 = vst [vmem:[%s709_s6 + $0x40] sm:$0xff] %v464_v5  ;;  %v434_v17 = vmax.f32 %v368_v13, %v401_v14  ;;  %v270_v18 = vld [vmem:[%s680_s20 + $0x60] sm:$0xff]  ;;  %v271_v24 = vld [vmem:[%s680_s20 + $0x68] sm:$0xff]  ;;  %v272_v31 = vld [vmem:[%s680_s20 + $0x70] sm:$0xff] }
  0x23   : > { %v465_v15 = vmax.f32 %v333_v1, %v432_v6  ;;  %v303_v19 = vld [vmem:[%s685_s23 + $0x60] sm:$0xff]  ;;  %v304_v25 = vld [vmem:[%s685_s23 + $0x68] sm:$0xff]  ;;  %v305_v33 = vld [vmem:[%s685_s23 + $0x70] sm:$0xff] }
  0x24   : > { %v369_v20 = vld [vmem:[%s690_s26 + $0x60] sm:$0xff]  ;;  %v466_v21 = vmax.f32 %v334_v7, %v433_v11  ;;  %v336_v22 = vmax.f32 %v270_v18, %v303_v19  ;;  %v467_v26 = vmax.f32 %v335_v16, %v434_v17  ;;  %v337_v28 = vmax.f32 %v271_v24, %v304_v25  ;;  %v370_v29 = vld [vmem:[%s690_s26 + $0x68] sm:$0xff]  ;;  %v371_v34 = vld [vmem:[%s690_s26 + $0x70] sm:$0xff] }
  0x25   : > { %v402_v23 = vld [vmem:[%s695_s29 + $0x60] sm:$0xff]  ;;  %498 = vst [vmem:[%s709_s6 + $0x48] sm:$0xff] %v465_v15  ;;  %v403_v30 = vld [vmem:[%s695_s29 + $0x68] sm:$0xff]  ;;  %v404_v35 = vld [vmem:[%s695_s29 + $0x70] sm:$0xff]  ;;  %v338_v37 = vmax.f32 %v272_v31, %v305_v33 }
  0x26   : > { %v435_v27 = vmax.f32 %v369_v20, %v402_v23  ;;  %500 = vst.msk [vmem:[%s709_s6 + $0x50] sm:$0xff] %vm499_vm0, %v466_v21  ;;  %v436_v32 = vmax.f32 %v370_v29, %v403_v30  ;;  %501 = vst [vmem:[%s709_s6 + $0x58] sm:$0xff] %v467_v26  ;;  %v437_v38 = vmax.f32 %v371_v34, %v404_v35  ;;  %v273_v39 = vld [vmem:[%s680_s20 + $0x78] sm:$0xff]  ;;  %v274_v45 = vld [vmem:[%s680_s20 + $0x80] sm:$0xff] }
  0x27   : > { %v306_v40 = vld [vmem:[%s685_s23 + $0x78] sm:$0xff]  ;;  %v307_v46 = vld [vmem:[%s685_s23 + $0x80] sm:$0xff]  ;;  %v275_v52 = vld [vmem:[%s680_s20 + $0x88] sm:$0xff] }
  0x28   : > { %v468_v36 = vmax.f32 %v336_v22, %v435_v27  ;;  %v372_v41 = vld [vmem:[%s690_s26 + $0x78] sm:$0xff]  ;;  %v469_v42 = vmax.f32 %v337_v28, %v436_v32  ;;  %v339_v43 = vmax.f32 %v273_v39, %v306_v40  ;;  %v470_v47 = vmax.f32 %v338_v37, %v437_v38  ;;  %v373_v50 = vld [vmem:[%s690_s26 + $0x80] sm:$0xff]  ;;  %v308_v54 = vld [vmem:[%s685_s23 + $0x88] sm:$0xff] }
  0x29   : > { %v405_v44 = vld [vmem:[%s695_s29 + $0x78] sm:$0xff]  ;;  %v340_v49 = vmax.f32 %v274_v45, %v307_v46  ;;  %v406_v51 = vld [vmem:[%s695_s29 + $0x80] sm:$0xff]  ;;  %v374_v55 = vld [vmem:[%s690_s26 + $0x88] sm:$0xff]  ;;  %v341_v58 = vmax.f32 %v275_v52, %v308_v54 }
  0x2a   : > { %502 = vst [vmem:[%s709_s6 + $0x60] sm:$0xff] %v468_v36  ;;  %v438_v48 = vmax.f32 %v372_v41, %v405_v44  ;;  %503 = vst [vmem:[%s709_s6 + $0x68] sm:$0xff] %v469_v42  ;;  %v439_v53 = vmax.f32 %v373_v50, %v406_v51  ;;  %v407_v56 = vld [vmem:[%s695_s29 + $0x88] sm:$0xff]  ;;  %v276_v60 = vld [vmem:[%s680_s20 + $0x90] sm:$0xff] }
  0x2b   : > { %504 = vst [vmem:[%s709_s6 + $0x70] sm:$0xff] %v470_v47  ;;  %v440_v59 = vmax.f32 %v374_v55, %v407_v56  ;;  %v309_v61 = vld [vmem:[%s685_s23 + $0x90] sm:$0xff]  ;;  %v277_v2 = vld [vmem:[%s680_s20 + $0x98] sm:$0xff]  ;;  %v278_v9 = vld [vmem:[%s680_s20 + $0xa0] sm:$0xff] }
  0x2c   : > { %v471_v57 = vmax.f32 %v339_v43, %v438_v48  ;;  %v375_v62 = vld [vmem:[%s690_s26 + $0x90] sm:$0xff]  ;;  %v472_v63 = vmax.f32 %v340_v49, %v439_v53  ;;  %v342_v0 = vmax.f32 %v276_v60, %v309_v61  ;;  %v310_v3 = vld [vmem:[%s685_s23 + $0x98] sm:$0xff]  ;;  %v311_v11 = vld [vmem:[%s685_s23 + $0xa0] sm:$0xff] }
  0x2d   : > { %v408_v1 = vld [vmem:[%s695_s29 + $0x90] sm:$0xff]  ;;  %v473_v4 = vmax.f32 %v341_v58, %v440_v59  ;;  %v343_v6 = vmax.f32 %v277_v2, %v310_v3  ;;  %v376_v7 = vld [vmem:[%s690_s26 + $0x98] sm:$0xff]  ;;  %v377_v12 = vld [vmem:[%s690_s26 + $0xa0] sm:$0xff]  ;;  %v344_v15 = vmax.f32 %v278_v9, %v311_v11 }
  0x2e   : > { %505 = vst [vmem:[%s709_s6 + $0x78] sm:$0xff] %v471_v57  ;;  %v441_v5 = vmax.f32 %v375_v62, %v408_v1  ;;  %v409_v8 = vld [vmem:[%s695_s29 + $0x98] sm:$0xff]  ;;  %506 = vst [vmem:[%s709_s6 + $0x80] sm:$0xff] %v472_v63  ;;  %v410_v13 = vld [vmem:[%s695_s29 + $0xa0] sm:$0xff] }
  0x2f   : > { %v442_v10 = vmax.f32 %v376_v7, %v409_v8  ;;  %507 = vst [vmem:[%s709_s6 + $0x88] sm:$0xff] %v473_v4  ;;  %v443_v16 = vmax.f32 %v377_v12, %v410_v13  ;;  %v279_v17 = vld [vmem:[%s680_s20 + $0xa8] sm:$0xff]  ;;  %v280_v23 = vld [vmem:[%s680_s20 + $0xb0] sm:$0x1f]  ;;  %v281_v30 = vld [vmem:[%s680_s20 + $0xb8] sm:$0x1f] }
  0x30   : > { %v474_v14 = vmax.f32 %v342_v0, %v441_v5  ;;  %v312_v18 = vld [vmem:[%s685_s23 + $0xa8] sm:$0xff]  ;;  %v313_v24 = vld [vmem:[%s685_s23 + $0xb0] sm:$0x1f]  ;;  %v314_v32 = vld [vmem:[%s685_s23 + $0xb8] sm:$0x1f] }
  0x31   : > { %v378_v19 = vld [vmem:[%s690_s26 + $0xa8] sm:$0xff]  ;;  %v475_v20 = vmax.f32 %v343_v6, %v442_v10  ;;  %v345_v21 = vmax.f32 %v279_v17, %v312_v18  ;;  %v476_v25 = vmax.f32 %v344_v15, %v443_v16  ;;  %v346_v27 = vmax.f32 %v280_v23, %v313_v24  ;;  %v379_v28 = vld [vmem:[%s690_s26 + $0xb0] sm:$0x1f]  ;;  %v380_v33 = vld [vmem:[%s690_s26 + $0xb8] sm:$0x1f] }
  0x32   : > { %v411_v22 = vld [vmem:[%s695_s29 + $0xa8] sm:$0xff]  ;;  %508 = vst [vmem:[%s709_s6 + $0x90] sm:$0xff] %v474_v14  ;;  %v412_v29 = vld [vmem:[%s695_s29 + $0xb0] sm:$0x1f]  ;;  %v413_v34 = vld [vmem:[%s695_s29 + $0xb8] sm:$0x1f]  ;;  %v347_v36 = vmax.f32 %v281_v30, %v314_v32 }
  0x33   : > { %v444_v26 = vmax.f32 %v378_v19, %v411_v22  ;;  %509 = vst [vmem:[%s709_s6 + $0x98] sm:$0xff] %v475_v20  ;;  %v445_v31 = vmax.f32 %v379_v28, %v412_v29  ;;  %510 = vst [vmem:[%s709_s6 + $0xa0] sm:$0xff] %v476_v25  ;;  %v446_v37 = vmax.f32 %v380_v33, %v413_v34  ;;  %v282_v38 = vld [vmem:[%s680_s20 + $0xc0] sm:$0x1f]  ;;  %v283_v44 = vld [vmem:[%s680_s20 + $0xc8] sm:$0x1f] }
  0x34   : > { %v315_v39 = vld [vmem:[%s685_s23 + $0xc0] sm:$0x1f]  ;;  %v316_v45 = vld [vmem:[%s685_s23 + $0xc8] sm:$0x1f]  ;;  %v284_v51 = vld [vmem:[%s680_s20 + $0xd0] sm:$0x1f] }
  0x35   : > { %v477_v35 = vmax.f32 %v345_v21, %v444_v26  ;;  %v381_v40 = vld [vmem:[%s690_s26 + $0xc0] sm:$0x1f]  ;;  %v478_v41 = vmax.f32 %v346_v27, %v445_v31  ;;  %v348_v42 = vmax.f32 %v282_v38, %v315_v39  ;;  %v479_v46 = vmax.f32 %v347_v36, %v446_v37  ;;  %v382_v49 = vld [vmem:[%s690_s26 + $0xc8] sm:$0x1f]  ;;  %v317_v53 = vld [vmem:[%s685_s23 + $0xd0] sm:$0x1f] }
  0x36   : > { %v414_v43 = vld [vmem:[%s695_s29 + $0xc0] sm:$0x1f]  ;;  %v349_v48 = vmax.f32 %v283_v44, %v316_v45  ;;  %v415_v50 = vld [vmem:[%s695_s29 + $0xc8] sm:$0x1f]  ;;  %v383_v54 = vld [vmem:[%s690_s26 + $0xd0] sm:$0x1f]  ;;  %v350_v57 = vmax.f32 %v284_v51, %v317_v53 }
  0x37   : > { %511 = vst.msk [vmem:[%s709_s6 + $0xa8] sm:$0xff] %vm499_vm0, %v477_v35  ;;  %v447_v47 = vmax.f32 %v381_v40, %v414_v43  ;;  %512 = vst [vmem:[%s709_s6 + $0xb0] sm:$0x1f] %v478_v41  ;;  %v448_v52 = vmax.f32 %v382_v49, %v415_v50  ;;  %v416_v55 = vld [vmem:[%s695_s29 + $0xd0] sm:$0x1f] }
  0x38   : > { %513 = vst [vmem:[%s709_s6 + $0xb8] sm:$0x1f] %v479_v46  ;;  %v449_v58 = vmax.f32 %v383_v54, %v416_v55  ;;  %v285_v59 = vld [vmem:[%s680_s20 + $0xd8] sm:$0x1f]  ;;  %v286_v1 = vld [vmem:[%s680_s20 + $0xe0] sm:$0x1f] }
  0x39   : > { %v480_v56 = vmax.f32 %v348_v42, %v447_v47  ;;  %v318_v60 = vld [vmem:[%s685_s23 + $0xd8] sm:$0x1f]  ;;  %v481_v62 = vmax.f32 %v349_v48, %v448_v52  ;;  %v319_v2 = vld [vmem:[%s685_s23 + $0xe0] sm:$0x1f]  ;;  %v287_v8 = vld [vmem:[%s680_s20 + $0xe8] sm:$0x1f] }
  0x3a   : > { %v384_v61 = vld [vmem:[%s690_s26 + $0xd8] sm:$0x1f]  ;;  %v351_v63 = vmax.f32 %v285_v59, %v318_v60  ;;  %v482_v3 = vmax.f32 %v350_v57, %v449_v58  ;;  %v352_v5 = vmax.f32 %v286_v1, %v319_v2  ;;  %v385_v6 = vld [vmem:[%s690_s26 + $0xe0] sm:$0x1f]  ;;  %v320_v10 = vld [vmem:[%s685_s23 + $0xe8] sm:$0x1f] }
  0x3b   : > { %v417_v0 = vld [vmem:[%s695_s29 + $0xd8] sm:$0x1f]  ;;  %514 = vst [vmem:[%s709_s6 + $0xc0] sm:$0x1f] %v480_v56  ;;  %v418_v7 = vld [vmem:[%s695_s29 + $0xe0] sm:$0x1f]  ;;  %v353_v14 = vmax.f32 %v287_v8, %v320_v10 }
  0x3c   : > { %v450_v4 = vmax.f32 %v384_v61, %v417_v0  ;;  %515 = vst [vmem:[%s709_s6 + $0xc8] sm:$0x1f] %v481_v62  ;;  %v451_v9 = vmax.f32 %v385_v6, %v418_v7  ;;  %v386_v11 = vld [vmem:[%s690_s26 + $0xe8] sm:$0x1f]  ;;  %516 = vst [vmem:[%s709_s6 + $0xd0] sm:$0x1f] %v482_v3 }
  0x3d   : > { %v419_v12 = vld [vmem:[%s695_s29 + $0xe8] sm:$0x1f]  ;;  %v288_v16 = vld [vmem:[%s680_s20 + $0xf0] sm:$0x1f]  ;;  %v289_v22 = vld [vmem:[%s680_s20 + $0xf8] sm:$0x1f] }
  0x3e   : > { %v483_v13 = vmax.f32 %v351_v63, %v450_v4  ;;  %v452_v15 = vmax.f32 %v386_v11, %v419_v12  ;;  %v321_v17 = vld [vmem:[%s685_s23 + $0xf0] sm:$0x1f]  ;;  %v484_v19 = vmax.f32 %v352_v5, %v451_v9  ;;  %v322_v23 = vld [vmem:[%s685_s23 + $0xf8] sm:$0x1f]  ;;  %v290_v29 = vld [vmem:[%s680_s20 + $0x100] sm:$0x1f] }
  0x3f   : > { %v387_v18 = vld [vmem:[%s690_s26 + $0xf0] sm:$0x1f]  ;;  %v354_v20 = vmax.f32 %v288_v16, %v321_v17  ;;  %v355_v26 = vmax.f32 %v289_v22, %v322_v23  ;;  %v388_v27 = vld [vmem:[%s690_s26 + $0xf8] sm:$0x1f]  ;;  %v323_v31 = vld [vmem:[%s685_s23 + $0x100] sm:$0x1f] }
  0x40   : > { %v420_v21 = vld [vmem:[%s695_s29 + $0xf0] sm:$0x1f]  ;;  %517 = vst [vmem:[%s709_s6 + $0xd8] sm:$0x1f] %v483_v13  ;;  %v485_v24 = vmax.f32 %v353_v14, %v452_v15  ;;  %v421_v28 = vld [vmem:[%s695_s29 + $0xf8] sm:$0x1f]  ;;  %v356_v35 = vmax.f32 %v290_v29, %v323_v31 }
  0x41   : > { %v453_v25 = vmax.f32 %v387_v18, %v420_v21  ;;  %518 = vst [vmem:[%s709_s6 + $0xe0] sm:$0x1f] %v484_v19  ;;  %v454_v30 = vmax.f32 %v388_v27, %v421_v28  ;;  %v389_v32 = vld [vmem:[%s690_s26 + $0x100] sm:$0x1f] }
  0x42   : > { %v422_v33 = vld [vmem:[%s695_s29 + $0x100] sm:$0x1f]  ;;  %519 = vst [vmem:[%s709_s6 + $0xe8] sm:$0x1f] %v485_v24 }
  0x43   : > { %v486_v34 = vmax.f32 %v354_v20, %v453_v25  ;;  %v455_v36 = vmax.f32 %v389_v32, %v422_v33  ;;  %v487_v37 = vmax.f32 %v355_v26, %v454_v30 }
  0x45   : > { %520 = vst [vmem:[%s709_s6 + $0xf0] sm:$0x1f] %v486_v34  ;;  %v488_v38 = vmax.f32 %v356_v35, %v455_v36  ;;  %521 = vst [vmem:[%s709_s6 + $0xf8] sm:$0x1f] %v487_v37 }
  0x47   : > { %523 = vst.msk [vmem:[%s709_s6 + $0x100] sm:$0x1f] %vm522_vm1, %v488_v38 }
  0x48 PF: > { %s14_s15 = sadd.s32 1, %s642_s15  }
  0x49   : > { %p11_p4 = scmp.ge.s32.totalorder %s14_s15, 6  }
  0x4b   :  { %13 = sbr.rel (!%p11_p4) target bundleno = 1 (0x1), region = 75 }

// kernel: siamese_forward.10
= control target key start
LH: loop header
LB: loop body
LE: loop exit
PB: predicated region body
PF: predicated region fallthrough
CT: control target
= control target key end

     0   :  { %8 = vsyncpa [#allocation4], 0  ;;  %s4093_s0 = inlined_call_operand.vmem [shape: f32[8,28672], index: 0, kind: input, shape index: {}]   ;;  %s4094_s1 = inlined_call_operand.hbm [shape: f32[28672,256], index: 1, kind: input, shape index: {}]   ;;  %s4095_s2 = inlined_call_operand.vmem [shape: f32[1,256], index: 2, kind: input, shape index: {}]   ;;  %s4096_s3 = inlined_call_operand.vmem [shape: f32[8,256], index: 3, kind: output, shape index: {}]  }
   0x1   :  { %10 = vsyncpa [#allocation4 + $0x1], 0  ;;  %s3373_s12 = smov 0   ;;  %s3375_s13 = smov 0  }
   0x2   :  { %s3377_s14 = smov 0   ;;  %s3379_s15 = smov 0  }
   0x3   :  { %s3381_s16 = smov 0   ;;  %s3383_s17 = smov 0  }
   0x4   :  { %s3385_s18 = smov 0   ;;  %s3387_s19 = smov 0  }
   0x5 LB: > { %s2084_s20 = sadd.s32 4294967295, %s3346_s19   ;;  %s28_s21 = sadd.s32 1, %s3338_s17  ;;  %s3346_s19 = sphi %s3387_s19, %s16_s19   ;;  %s3342_s18 = sphi %s3385_s18, %s4107_s18   ;;  %s3338_s17 = sphi %s3383_s17, %s4106_s17   ;;  %s3334_s16 = sphi %s3381_s16, %s4105_s16   ;;  %s3330_s15 = sphi %s3379_s15, %s4104_s15   ;;  %s3326_s14 = sphi %s3377_s14, %s4103_s14   ;;  %s3322_s13 = sphi %s3375_s13, %s4102_s13   ;;  %s3318_s12 = sphi %s3373_s12, %s4101_s12  }
   0x6   : > { %p29_p0 = scmp.ge.s32.totalorder %s28_s21, 7  ;;  %s31_s22 = sadd.s32 1, %s3342_s18 }
   0x7   : > { %s72_s23 = sadd.s32 1, %s3326_s14  ;;  %p79_p1 = scmp.ne.s32.totalorder %s3326_s14, %s3322_s13 }
   0x8   : > { %s4109_s21 = smov (%p29_p0, %s28_s21), 0  ;;  %s4111_s22 = smov (!%p29_p0, %s31_s22), %s3342_s18 }
   0x9   : > { %s67_s24 = ssub.s32 %s3338_s17, %s4109_s21  ;;  %p80_p2 = scmp.eq.s32.totalorder %s3346_s19, 0 }
   0xa   : > { %p33_p3 = scmp.ge.s32.totalorder %s4111_s22, 2  ;;  %p85_p4 = scmp.ne.s32.totalorder %s3322_s13, %s3318_s12 }
   0xb   : > { %p3424_p5 = por %p80_p2, %p79_p1  ;;  %p86_p6 = scmp.eq.s32.totalorder %s2084_s20, 0 }
   0xc   : > { %s4113_s22 = smov (%p33_p3, %s4111_s22), 0  ;;  %p3181_p8 = scmp.lt.s32.totalorder %s3346_s19, 14 }
   0xd   : > { %p3430_p7 = por %p86_p6, %p85_p4  ;;  %s68_s27 = ssub.s32 %s3342_s18, %s4113_s22 }
   0xe   : > { %s69_s28 = sor.u32 %s68_s27, %s67_s24  ;;  %s176_s29 = sand.u32 1, %s3326_s14  }
   0xf   : > { %p70_p9 = scmp.eq.s32.totalorder %s69_s28, 0  ;;  %s2088_s30 = sshll.u32 %s176_s29, 12 }
  0x10   : > { %s2102_s4 = sshll.u32 %s3338_s17, 10  ;;  %s180_s8 = scalar_lea.vmem [#allocation3], %s2088_s30 }
  0x11   : > { %s3440_s5 = scalar_select %p70_p9, %s3326_s14, %s72_s23  }
  0x12   : > { %s186_s6 = sadd.s32 %s3342_s18, %s2102_s4  ;;  %s189_s9 = sshll.u32 %s180_s8, 4  ;;  %s3448_s9 = int_to_ptr.vmem [resolvable:$true] %s189_s9 }
  0x13   : > { %s2091_s7 = sshll.u32 %s186_s6, 7  ;;  %p3454_p10 = pnand %p3181_p8, %p3424_p5 }
  0x14   : > { %s3446_s12 = scalar_lea.hbm %s4094_s1, %s2091_s7  ;;  %s3459_s23 = scalar_lea.sflag [#allocation4], %s176_s29 }
  0x15   : > { %s3250_s24 = scalar_lea.hbm %s3446_s12, 65536  ;;  %p3252_p13 = pneg %p3454_p10 }
  0x16   : > { %p3251_p12 = scmp.ne.s32.totalorder %s3446_s12, %s3250_s24  ;;  %s3255_s28 = scalar_lea.hbm %s4094_s1, 917504 }
  0x17   : > { %p3256_p2 = scmp.lt.u32.totalorder %s3446_s12, %s4094_s1  ;;  %p3257_p3 = scmp.lt.u32.totalorder %s3255_s28, %s3250_s24 }
  0x18   : > { %p3253_p0 = pnand %p3252_p13, %p3251_p12  ;;  %p3259_p5 = scmp.lt.u32.totalorder %s3250_s24, %s3446_s12 }
  0x19   : > { %p3258_p4 = por %p3257_p3, %p3256_p2 }
  0x1a   : > { %p3254_p1 = pneg %p3253_p0 }
  0x1b   : > { %p3260_p6 = por %p3259_p5, %p3258_p4 }
  0x1d   : > { %p3261_p8 = pnand %p3260_p6, %p3254_p1 }
  0x1f   : > { %3264 = shalt.err (!%p3261_p8)
}
  0x20   : > { %s3265_s29 = scalar_lea.vmem %s3448_s9, 65536  ;;  %s3348_s6 = smov [#allocation3]  }
  0x21   : > { %p3266_p9 = scmp.ne.s32.totalorder %s3448_s9, %s3265_s29  ;;  %s3270_s7 = sshll.u32 %s3348_s6, 4  ;;  %s3271_s7 = int_to_ptr.vmem [resolvable:$false] %s3270_s7 }
  0x22   : > { %s3272_s8 = scalar_lea.vmem %s3271_s7, 131072  ;;  %p3273_p11 = scmp.lt.s32.totalorder %s3448_s9, %s3271_s7 }
  0x23   : > { %p3268_p12 = pnand %p3266_p9, %p3252_p13  ;;  %p3274_p2 = scmp.lt.s32.totalorder %s3272_s8, %s3265_s29 }
  0x25   : > { %p3269_p0 = pneg %p3268_p12  ;;  %p3275_p3 = por %p3274_p2, %p3273_p11 }
  0x27   : > { %p3276_p4 = pnand %p3275_p3, %p3269_p0 }
  0x29   : > { %3279 = shalt.err (!%p3276_p4)
}
  0x2a   : > { %s3349_s10 = smov 256   ;;  %s3350_s11 = smov 128  }
  0x2b   : > { %s3351_s24 = smov 8   ;;  %p203_p13 = scmp.lt.s32.totalorder %s3346_s19, 15 }
  0x2c   : > { %3180 = dma.hbm_to_vmem [thread:$0]  (!%p3454_p10), %s3446_s12, 65536, %s3448_s9, %s3459_s23, %s3349_s10, %s3350_s11, %s3351_s24  }
  0x2d   : > { %p4100_p1 = scmp.ge.s32.totalorder %s3346_s19, 1 }
  0x2f   : > { %p204_p5 = pnand %p4100_p1, %p203_p13 }
  0x30   : > { %s209_s27 = sand.u32 (!%p204_p5), 1, %s3322_s13  }
  0x31   : > { %207 = sbr.rel (%p204_p5) target bundleno = 564 (0x234), region = 32  ;;  %s2093_s25 = sshll.u32 (!%p204_p5), %s209_s27, 12 }
  0x32   : > { %s210_s28 = scalar_lea.sflag (!%p204_p5), [#allocation4], %s209_s27  ;;  %s3491_s30 = scalar_lea.vmem (!%p204_p5), [#allocation3], %s2093_s25 }
  0x38   : > { %3313 = dma.done.wait (%p3430_p7), %s210_s28, 65536  }
  0x39   : > { %3315 = vsyncadd (%p3430_p7), %s210_s28, 4294901760  ;;  %s2094_s9 = sshll.u32 %s3330_s15, 5  ;;  %p262_p10 = scmp.lt.s32.totalorder %s3334_s16, 1 }
  0x3a   : > { %p254_p11 = scmp.lt.s32.totalorder %s2094_s9, 223  ;;  %p2097_p7 = scmp.ne.s32.totalorder %s3330_s15, 0 }
  0x3b   : > { %s4115_s16 = smov (!%p262_p10, %s3334_s16), 1  ;;  %v3352_v0 = vmov (!%p2097_p7), 0.0  }
  0x3c   : > { %s4117_s9 = smov (!%p254_p11, %s2094_s9), 223  ;;  %s264_s23 = scalar_lea.vmem %s4095_s2, %s4115_s16  ;;  %277 = vst [vmem:[#allocation2] sm:$0xff] (!%p2097_p7), %v3352_v0 }
  0x3d   : > { %s2096_s4 = sshll.u32 %s4115_s16, 3  ;;  %s2095_s29 = sshll.u32 %s4117_s9, 3 }
  0x3e   : > { %s3510_s7 = scalar_lea.vmem %s4096_s3, %s2096_s4  ;;  %s3515_s11 = scalar_lea.vmem %s4093_s0, %s2095_s29 }
  0x3f   : > { %276 = sbr.rel (%p2097_p7) target bundleno = 70 (0x46), region = 40 }
  0x46 PF: > { %v327_v1 = vld [vmem:[%s3491_s30 + $0x80] sm:$0xff]  ;;  %v328_v2 = vld [vmem:[%s3491_s30 + $0x88] sm:$0xff]  ;;  %v329_v12 = vld [vmem:[%s3491_s30 + $0x90] sm:$0xff]  ;;  %p2098_p6 = scmp.ne.s32.totalorder %s3330_s15, 6 }
  0x47   : > { %v359_v3 = vld [vmem:[%s3491_s30 + $0x180] sm:$0xff]  ;;  %v2663_v4 = vpack.c.bf16 %v328_v2, %v327_v1  ;;  %v360_v5 = vld [vmem:[%s3491_s30 + $0x188] sm:$0xff]  ;;  %v330_v14 = vld [vmem:[%s3491_s30 + $0x98] sm:$0xff] }
  0x48   : > { %v311_v6 = vld [vmem:[%s3491_s30] sm:$0xff]  ;;  %v312_v7 = vld [vmem:[%s3491_s30 + $0x8] sm:$0xff]  ;;  %v2695_v8 = vpack.c.bf16 %v360_v5, %v359_v3  ;;  %v361_v15 = vld [vmem:[%s3491_s30 + $0x190] sm:$0xff]  ;;  %v2667_v17 = vpack.c.bf16 %v330_v14, %v329_v12 }
  0x49   : > { %v2665_v9 = vpack.c.bf16 %v312_v7, %v311_v6  ;;  %v343_v10 = vld [vmem:[%s3491_s30 + $0x100] sm:$0xff]  ;;  %v344_v11 = vld [vmem:[%s3491_s30 + $0x108] sm:$0xff]  ;;  %2664 = vmatprep.subr.bf16.mxu0 %v2663_v4  ;;  %v362_v16 = vld [vmem:[%s3491_s30 + $0x198] sm:$0xff] }
  0x4a   : > { %v2697_v13 = vpack.c.bf16 %v344_v11, %v343_v10  ;;  %2696 = vmatprep.subr.bf16.mxu1 %v2695_v8  ;;  %v2699_v18 = vpack.c.bf16 %v362_v16, %v361_v15  ;;  %v313_v19 = vld [vmem:[%s3491_s30 + $0x10] sm:$0xff]  ;;  %v314_v20 = vld [vmem:[%s3491_s30 + $0x18] sm:$0xff]  ;;  %v331_v24 = vld [vmem:[%s3491_s30 + $0xa0] sm:$0xff] }
  0x4b   : > { %2666 = vmatpush3.bf16.msra.mxu0 %v2665_v9  ;;  %v345_v21 = vld [vmem:[%s3491_s30 + $0x110] sm:$0xff]  ;;  %v2669_v22 = vpack.c.bf16 %v314_v20, %v313_v19  ;;  %v346_v23 = vld [vmem:[%s3491_s30 + $0x118] sm:$0xff]  ;;  %v332_v25 = vld [vmem:[%s3491_s30 + $0xa8] sm:$0xff] }
  0x4c   : > { %2698 = vmatpush3.bf16.msra.mxu1 %v2697_v13  ;;  %2668 = vmatprep.subr.bf16.mxu0 %v2667_v17  ;;  %v2701_v26 = vpack.c.bf16 %v346_v23, %v345_v21  ;;  %v2671_v27 = vpack.c.bf16 %v332_v25, %v331_v24  ;;  %v363_v28 = vld [vmem:[%s3491_s30 + $0x1a0] sm:$0xff]  ;;  %v364_v29 = vld [vmem:[%s3491_s30 + $0x1a8] sm:$0xff]  ;;  %v333_v36 = vld [vmem:[%s3491_s30 + $0xb0] sm:$0xff] }
  0x4d   : > { %2700 = vmatprep.subr.bf16.mxu1 %v2699_v18  ;;  %v315_v30 = vld [vmem:[%s3491_s30 + $0x20] sm:$0xff]  ;;  %v2703_v31 = vpack.c.bf16 %v364_v29, %v363_v28  ;;  %v316_v32 = vld [vmem:[%s3491_s30 + $0x28] sm:$0xff]  ;;  %v334_v37 = vld [vmem:[%s3491_s30 + $0xb8] sm:$0xff] }
  0x4e   : > { %v347_v33 = vld [vmem:[%s3491_s30 + $0x120] sm:$0xff]  ;;  %v348_v34 = vld [vmem:[%s3491_s30 + $0x128] sm:$0xff]  ;;  %v2673_v35 = vpack.c.bf16 %v316_v32, %v315_v30  ;;  %v365_v38 = vld [vmem:[%s3491_s30 + $0x1b0] sm:$0xff]  ;;  %v2675_v40 = vpack.c.bf16 %v334_v37, %v333_v36 }
  0x4f   : > { %2670 = vmatpush3.bf16.msra.mxu0 %v2669_v22  ;;  %v2705_v39 = vpack.c.bf16 %v348_v34, %v347_v33  ;;  %v366_v41 = vld [vmem:[%s3491_s30 + $0x1b8] sm:$0xff]  ;;  %v317_v42 = vld [vmem:[%s3491_s30 + $0x30] sm:$0xff]  ;;  %v335_v47 = vld [vmem:[%s3491_s30 + $0xc0] sm:$0xff] }
  0x50   : > { %2702 = vmatpush3.bf16.msra.mxu1 %v2701_v26  ;;  %2672 = vmatprep.subr.bf16.mxu0 %v2671_v27  ;;  %v318_v43 = vld [vmem:[%s3491_s30 + $0x38] sm:$0xff]  ;;  %v2707_v44 = vpack.c.bf16 %v366_v41, %v365_v38  ;;  %v349_v45 = vld [vmem:[%s3491_s30 + $0x130] sm:$0xff]  ;;  %v336_v48 = vld [vmem:[%s3491_s30 + $0xc8] sm:$0xff] }
  0x51   : > { %2704 = vmatprep.subr.bf16.mxu1 %v2703_v31  ;;  %v350_v46 = vld [vmem:[%s3491_s30 + $0x138] sm:$0xff]  ;;  %v367_v49 = vld [vmem:[%s3491_s30 + $0x1c0] sm:$0xff]  ;;  %v368_v50 = vld [vmem:[%s3491_s30 + $0x1c8] sm:$0xff]  ;;  %v2677_v51 = vpack.c.bf16 %v318_v43, %v317_v42  ;;  %v2679_v53 = vpack.c.bf16 %v336_v48, %v335_v47 }
  0x52   : > { %v2709_v52 = vpack.c.bf16 %v350_v46, %v349_v45  ;;  %v319_v54 = vld [vmem:[%s3491_s30 + $0x40] sm:$0xff]  ;;  %v320_v55 = vld [vmem:[%s3491_s30 + $0x48] sm:$0xff]  ;;  %v2711_v57 = vpack.c.bf16 %v368_v50, %v367_v49  ;;  %v337_v59 = vld [vmem:[%s3491_s30 + $0xd0] sm:$0xff] }
  0x53   : > { %2674 = vmatpush3.bf16.msra.mxu0 %v2673_v35  ;;  %v351_v56 = vld [vmem:[%s3491_s30 + $0x140] sm:$0xff]  ;;  %v352_v58 = vld [vmem:[%s3491_s30 + $0x148] sm:$0xff]  ;;  %v338_v60 = vld [vmem:[%s3491_s30 + $0xd8] sm:$0xff]  ;;  %v2681_v63 = vpack.c.bf16 %v320_v55, %v319_v54 }
  0x54   : > { %2706 = vmatpush3.bf16.msra.mxu1 %v2705_v39  ;;  %2676 = vmatprep.subr.bf16.mxu0 %v2675_v40  ;;  %v369_v61 = vld [vmem:[%s3491_s30 + $0x1d0] sm:$0xff]  ;;  %v370_v62 = vld [vmem:[%s3491_s30 + $0x1d8] sm:$0xff]  ;;  %v2713_v0 = vpack.c.bf16 %v352_v58, %v351_v56  ;;  %v2683_v1 = vpack.c.bf16 %v338_v60, %v337_v59  ;;  %v339_v7 = vld [vmem:[%s3491_s30 + $0xe0] sm:$0xff] }
  0x55   : > { %2708 = vmatprep.subr.bf16.mxu1 %v2707_v44  ;;  %v321_v2 = vld [vmem:[%s3491_s30 + $0x50] sm:$0xff]  ;;  %v322_v3 = vld [vmem:[%s3491_s30 + $0x58] sm:$0xff]  ;;  %v2715_v5 = vpack.c.bf16 %v370_v62, %v369_v61  ;;  %v340_v8 = vld [vmem:[%s3491_s30 + $0xe8] sm:$0xff] }
  0x56   : > { %v353_v4 = vld [vmem:[%s3491_s30 + $0x150] sm:$0xff]  ;;  %v354_v6 = vld [vmem:[%s3491_s30 + $0x158] sm:$0xff]  ;;  %v371_v9 = vld [vmem:[%s3491_s30 + $0x1e0] sm:$0xff]  ;;  %v2685_v11 = vpack.c.bf16 %v322_v3, %v321_v2  ;;  %v2687_v15 = vpack.c.bf16 %v340_v8, %v339_v7 }
  0x57   : > { %2678 = vmatpush3.bf16.msra.mxu0 %v2677_v51  ;;  %v372_v10 = vld [vmem:[%s3491_s30 + $0x1e8] sm:$0xff]  ;;  %v323_v12 = vld [vmem:[%s3491_s30 + $0x60] sm:$0xff]  ;;  %v2717_v14 = vpack.c.bf16 %v354_v6, %v353_v4  ;;  %v282_v18 = vld [vmem:[%s3515_s11 + $0x18] sm:$0xff] }
  0x58   : > { %2710 = vmatpush3.bf16.msra.mxu1 %v2709_v52  ;;  %2680 = vmatprep.subr.bf16.mxu0 %v2679_v53  ;;  %v324_v13 = vld [vmem:[%s3491_s30 + $0x68] sm:$0xff]  ;;  %v355_v16 = vld [vmem:[%s3491_s30 + $0x160] sm:$0xff]  ;;  %v2719_v19 = vpack.c.bf16 %v372_v10, %v371_v9  ;;  %v341_v21 = vld [vmem:[%s3491_s30 + $0xf0] sm:$0xff] }
  0x59   : > { %2712 = vmatprep.subr.bf16.mxu1 %v2711_v57  ;;  %v280_v17 = vld [vmem:[%s3515_s11 + $0x8] sm:$0xff]  ;;  %v356_v20 = vld [vmem:[%s3491_s30 + $0x168] sm:$0xff]  ;;  %v342_v22 = vld [vmem:[%s3491_s30 + $0xf8] sm:$0xff]  ;;  %957 = vmatprep.mubr.f32.mxu1 %v282_v18  ;;  %v2689_v25 = vpack.c.bf16 %v324_v13, %v323_v12 }
  0x5a   : > { %887 = vmatprep.mubr.f32.mxu0 %v280_v17  ;;  %v373_v23 = vld [vmem:[%s3491_s30 + $0x1f0] sm:$0xff]  ;;  %v374_v24 = vld [vmem:[%s3491_s30 + $0x1f8] sm:$0xff]  ;;  %v2721_v26 = vpack.c.bf16 %v356_v20, %v355_v16  ;;  %v2691_v27 = vpack.c.bf16 %v342_v22, %v341_v21  ;;  %v391_v33 = vld [vmem:[%s3491_s30 + $0x280] sm:$0xff] }
  0x5b   : > { %2682 = vmatpush3.bf16.msra.mxu0 %v2681_v63  ;;  %v325_v28 = vld [vmem:[%s3491_s30 + $0x70] sm:$0xff]  ;;  %v326_v29 = vld [vmem:[%s3491_s30 + $0x78] sm:$0xff]  ;;  %v2723_v31 = vpack.c.bf16 %v374_v24, %v373_v23  ;;  %v392_v34 = vld [vmem:[%s3491_s30 + $0x288] sm:$0xff] }
  0x5c   : > { %2714 = vmatpush3.bf16.msra.mxu1 %v2713_v0  ;;  %2684 = vmatprep.subr.bf16.mxu0 %v2683_v1  ;;  %v357_v30 = vld [vmem:[%s3491_s30 + $0x170] sm:$0xff]  ;;  %v358_v32 = vld [vmem:[%s3491_s30 + $0x178] sm:$0xff]  ;;  %v423_v35 = vld [vmem:[%s3491_s30 + $0x380] sm:$0xff]  ;;  %v2693_v37 = vpack.c.bf16 %v326_v29, %v325_v28  ;;  %v2727_v39 = vpack.c.bf16 %v392_v34, %v391_v33 }
  0x5d   : > { %2716 = vmatprep.subr.bf16.mxu1 %v2715_v5  ;;  %v424_v36 = vld [vmem:[%s3491_s30 + $0x388] sm:$0xff]  ;;  %v2725_v38 = vpack.c.bf16 %v358_v32, %v357_v30  ;;  %v375_v40 = vld [vmem:[%s3491_s30 + $0x200] sm:$0xff]  ;;  %v393_v45 = vld [vmem:[%s3491_s30 + $0x290] sm:$0xff] }
  0x5e   : > { %v376_v41 = vld [vmem:[%s3491_s30 + $0x208] sm:$0xff]  ;;  %v407_v42 = vld [vmem:[%s3491_s30 + $0x300] sm:$0xff]  ;;  %v2759_v43 = vpack.c.bf16 %v424_v36, %v423_v35  ;;  %v394_v46 = vld [vmem:[%s3491_s30 + $0x298] sm:$0xff] }
  0x5f   : > { %2686 = vmatpush3.bf16.msra.mxu0 %v2685_v11  ;;  %v408_v44 = vld [vmem:[%s3491_s30 + $0x308] sm:$0xff]  ;;  %v425_v47 = vld [vmem:[%s3491_s30 + $0x390] sm:$0xff]  ;;  %v426_v48 = vld [vmem:[%s3491_s30 + $0x398] sm:$0xff]  ;;  %v2729_v51 = vpack.c.bf16 %v376_v41, %v375_v40  ;;  %v2731_v53 = vpack.c.bf16 %v394_v46, %v393_v45 }
  0x60   : > { %2718 = vmatpush3.bf16.msra.mxu1 %v2717_v14  ;;  %2688 = vmatprep.subr.bf16.mxu0 %v2687_v15  ;;  %v279_v49 = vld [vmem:[%s3515_s11] sm:$0xff]  ;;  %v281_v50 = vld [vmem:[%s3515_s11 + $0x10] sm:$0xff]  ;;  %v2761_v52 = vpack.c.bf16 %v408_v44, %v407_v42  ;;  %v377_v54 = vld [vmem:[%s3491_s30 + $0x210] sm:$0xff]  ;;  %v2763_v57 = vpack.c.bf16 %v426_v48, %v425_v47 }
  0x61   : > { %2720 = vmatprep.subr.bf16.mxu1 %v2719_v19  ;;  %v378_v55 = vld [vmem:[%s3491_s30 + $0x218] sm:$0xff]  ;;  %v409_v56 = vld [vmem:[%s3491_s30 + $0x310] sm:$0xff]  ;;  %v395_v59 = vld [vmem:[%s3491_s30 + $0x2a0] sm:$0xff] }
  0x62   : > { %v410_v58 = vld [vmem:[%s3491_s30 + $0x318] sm:$0xff]  ;;  %v396_v60 = vld [vmem:[%s3491_s30 + $0x2a8] sm:$0xff]  ;;  %v427_v61 = vld [vmem:[%s3491_s30 + $0x3a0] sm:$0xff]  ;;  %v2733_v63 = vpack.c.bf16 %v378_v55, %v377_v54 }
  0x63   : > { %2690 = vmatpush3.bf16.msra.mxu0 %v2689_v25  ;;  %v428_v62 = vld [vmem:[%s3491_s30 + $0x3a8] sm:$0xff]  ;;  %v2765_v0 = vpack.c.bf16 %v410_v58, %v409_v56  ;;  %v2735_v1 = vpack.c.bf16 %v396_v60, %v395_v59  ;;  %v379_v2 = vld [vmem:[%s3491_s30 + $0x220] sm:$0xff]  ;;  %v397_v7 = vld [vmem:[%s3491_s30 + $0x2b0] sm:$0xff] }
  0x64   : > { %2722 = vmatpush3.bf16.msra.mxu1 %v2721_v26  ;;  %2692 = vmatprep.subr.bf16.mxu0 %v2691_v27  ;;  %v380_v3 = vld [vmem:[%s3491_s30 + $0x228] sm:$0xff]  ;;  %v411_v4 = vld [vmem:[%s3491_s30 + $0x320] sm:$0xff]  ;;  %v2767_v5 = vpack.c.bf16 %v428_v62, %v427_v61  ;;  %v398_v8 = vld [vmem:[%s3491_s30 + $0x2b8] sm:$0xff] }
  0x65   : > { %2724 = vmatprep.subr.bf16.mxu1 %v2723_v31  ;;  %v412_v6 = vld [vmem:[%s3491_s30 + $0x328] sm:$0xff]  ;;  %v429_v9 = vld [vmem:[%s3491_s30 + $0x3b0] sm:$0xff]  ;;  %v430_v10 = vld [vmem:[%s3491_s30 + $0x3b8] sm:$0xff]  ;;  %v2737_v11 = vpack.c.bf16 %v380_v3, %v379_v2  ;;  %v2739_v13 = vpack.c.bf16 %v398_v8, %v397_v7 }
  0x66   : > { %v2769_v12 = vpack.c.bf16 %v412_v6, %v411_v4  ;;  %v381_v14 = vld [vmem:[%s3491_s30 + $0x230] sm:$0xff]  ;;  %v382_v15 = vld [vmem:[%s3491_s30 + $0x238] sm:$0xff]  ;;  %v2771_v17 = vpack.c.bf16 %v430_v10, %v429_v9  ;;  %v399_v19 = vld [vmem:[%s3491_s30 + $0x2c0] sm:$0xff] }
  0x67   : > { %2694 = vmatpush3.bf16.msra.mxu0 %v2693_v37  ;;  %v413_v16 = vld [vmem:[%s3491_s30 + $0x330] sm:$0xff]  ;;  %v414_v18 = vld [vmem:[%s3491_s30 + $0x338] sm:$0xff]  ;;  %v400_v20 = vld [vmem:[%s3491_s30 + $0x2c8] sm:$0xff]  ;;  %v2741_v23 = vpack.c.bf16 %v382_v15, %v381_v14 }
  0x68   : > { %2726 = vmatpush3.bf16.msra.mxu1 %v2725_v38  ;;  %2728 = vmatprep.subr.bf16.mxu0 %v2727_v39  ;;  %v431_v21 = vld [vmem:[%s3491_s30 + $0x3c0] sm:$0xff]  ;;  %v432_v22 = vld [vmem:[%s3491_s30 + $0x3c8] sm:$0xff]  ;;  %v2773_v26 = vpack.c.bf16 %v414_v18, %v413_v16  ;;  %v2743_v27 = vpack.c.bf16 %v400_v20, %v399_v19  ;;  %v286_v30 = vld [vmem:[%s3515_s11 + $0x38] sm:$0xff] }
  0x69   : > { %2760 = vmatprep.subr.bf16.mxu1 %v2759_v43  ;;  %v383_v24 = vld [vmem:[%s3491_s30 + $0x240] sm:$0xff]  ;;  %v384_v28 = vld [vmem:[%s3491_s30 + $0x248] sm:$0xff]  ;;  %v2775_v31 = vpack.c.bf16 %v432_v22, %v431_v21  ;;  %v401_v33 = vld [vmem:[%s3491_s30 + $0x2d0] sm:$0xff] }
  0x6a   : > { %888 = vmatmul.mubr.f32.vlgmr.msra.gmra.mrb[0].mxu0 %v279_v49  ;;  %v284_v25 = vld [vmem:[%s3515_s11 + $0x28] sm:$0xff]  ;;  %v416_v32 = vld [vmem:[%s3491_s30 + $0x348] sm:$0xff]  ;;  %v402_v34 = vld [vmem:[%s3491_s30 + $0x2d8] sm:$0xff]  ;;  %v2745_v37 = vpack.c.bf16 %v384_v28, %v383_v24 }
  0x6b   : > { %958 = vmatmul.mubr.f32.vlgmr.msra.gmra.mrb[0].mxu1 %v281_v50  ;;  %2730 = vmatpush3.bf16.msra.mxu0 %v2729_v51  ;;  %v415_v29 = vld [vmem:[%s3491_s30 + $0x340] sm:$0xff]  ;;  %v433_v35 = vld [vmem:[%s3491_s30 + $0x3d0] sm:$0xff]  ;;  %v434_v36 = vld [vmem:[%s3491_s30 + $0x3d8] sm:$0xff]  ;;  %v2747_v39 = vpack.c.bf16 %v402_v34, %v401_v33 }
  0x6c   : > { %2762 = vmatpush3.bf16.msra.mxu1 %v2761_v52  ;;  %2732 = vmatprep.subr.bf16.mxu0 %v2731_v53  ;;  %v2777_v38 = vpack.c.bf16 %v416_v32, %v415_v29  ;;  %v385_v40 = vld [vmem:[%s3491_s30 + $0x250] sm:$0xff]  ;;  %v386_v41 = vld [vmem:[%s3491_s30 + $0x258] sm:$0xff]  ;;  %v2779_v43 = vpack.c.bf16 %v434_v36, %v433_v35  ;;  %v403_v45 = vld [vmem:[%s3491_s30 + $0x2e0] sm:$0xff] }
  0x6d   : > { %2764 = vmatprep.subr.bf16.mxu1 %v2763_v57  ;;  %1027 = vmatprep.mubr.f32.mxu0 %v284_v25  ;;  %v417_v42 = vld [vmem:[%s3491_s30 + $0x350] sm:$0xff]  ;;  %v418_v44 = vld [vmem:[%s3491_s30 + $0x358] sm:$0xff]  ;;  %v404_v46 = vld [vmem:[%s3491_s30 + $0x2e8] sm:$0xff]  ;;  %v2749_v49 = vpack.c.bf16 %v386_v41, %v385_v40 }
  0x6e   : > { %1097 = vmatprep.mubr.f32.mxu1 %v286_v30  ;;  %v435_v47 = vld [vmem:[%s3491_s30 + $0x3e0] sm:$0xff]  ;;  %v436_v48 = vld [vmem:[%s3491_s30 + $0x3e8] sm:$0xff]  ;;  %v2781_v50 = vpack.c.bf16 %v418_v44, %v417_v42  ;;  %v2751_v51 = vpack.c.bf16 %v404_v46, %v403_v45  ;;  %v405_v57 = vld [vmem:[%s3491_s30 + $0x2f0] sm:$0xff] }
  0x6f   : > { %2734 = vmatpush3.bf16.msra.mxu0 %v2733_v63  ;;  %v387_v52 = vld [vmem:[%s3491_s30 + $0x260] sm:$0xff]  ;;  %v388_v53 = vld [vmem:[%s3491_s30 + $0x268] sm:$0xff]  ;;  %v2783_v55 = vpack.c.bf16 %v436_v48, %v435_v47  ;;  %v406_v58 = vld [vmem:[%s3491_s30 + $0x2f8] sm:$0xff] }
  0x70   : > { %2766 = vmatpush3.bf16.msra.mxu1 %v2765_v0  ;;  %2736 = vmatprep.subr.bf16.mxu0 %v2735_v1  ;;  %v419_v54 = vld [vmem:[%s3491_s30 + $0x360] sm:$0xff]  ;;  %v420_v56 = vld [vmem:[%s3491_s30 + $0x368] sm:$0xff]  ;;  %v437_v59 = vld [vmem:[%s3491_s30 + $0x3f0] sm:$0xff]  ;;  %v2753_v61 = vpack.c.bf16 %v388_v53, %v387_v52  ;;  %v2755_v63 = vpack.c.bf16 %v406_v58, %v405_v57 }
  0x71   : > { %2768 = vmatprep.subr.bf16.mxu1 %v2767_v5  ;;  %v438_v60 = vld [vmem:[%s3491_s30 + $0x3f8] sm:$0xff]  ;;  %v2785_v62 = vpack.c.bf16 %v420_v56, %v419_v54  ;;  %v389_v0 = vld [vmem:[%s3491_s30 + $0x270] sm:$0xff]  ;;  %v455_v5 = vld [vmem:[%s3491_s30 + $0x480] sm:$0xff] }
  0x72   : > { %v390_v1 = vld [vmem:[%s3491_s30 + $0x278] sm:$0xff]  ;;  %v421_v2 = vld [vmem:[%s3491_s30 + $0x370] sm:$0xff]  ;;  %v2787_v3 = vpack.c.bf16 %v438_v60, %v437_v59  ;;  %v456_v6 = vld [vmem:[%s3491_s30 + $0x488] sm:$0xff] }
  0x73   : > { %2738 = vmatpush3.bf16.msra.mxu0 %v2737_v11  ;;  %v422_v4 = vld [vmem:[%s3491_s30 + $0x378] sm:$0xff]  ;;  %v487_v7 = vld [vmem:[%s3491_s30 + $0x580] sm:$0xff]  ;;  %v488_v8 = vld [vmem:[%s3491_s30 + $0x588] sm:$0xff]  ;;  %v2757_v9 = vpack.c.bf16 %v390_v1, %v389_v0  ;;  %v2791_v11 = vpack.c.bf16 %v456_v6, %v455_v5 }
  0x74   : > { %2770 = vmatpush3.bf16.msra.mxu1 %v2769_v12  ;;  %2740 = vmatprep.subr.bf16.mxu0 %v2739_v13  ;;  %v2789_v10 = vpack.c.bf16 %v422_v4, %v421_v2  ;;  %v439_v12 = vld [vmem:[%s3491_s30 + $0x400] sm:$0xff]  ;;  %v440_v13 = vld [vmem:[%s3491_s30 + $0x408] sm:$0xff]  ;;  %v2823_v15 = vpack.c.bf16 %v488_v8, %v487_v7  ;;  %v458_v18 = vld [vmem:[%s3491_s30 + $0x498] sm:$0xff] }
  0x75   : > { %2772 = vmatprep.subr.bf16.mxu1 %v2771_v17  ;;  %v471_v14 = vld [vmem:[%s3491_s30 + $0x500] sm:$0xff]  ;;  %v472_v16 = vld [vmem:[%s3491_s30 + $0x508] sm:$0xff]  ;;  %v457_v17 = vld [vmem:[%s3491_s30 + $0x490] sm:$0xff]  ;;  %v2793_v22 = vpack.c.bf16 %v440_v13, %v439_v12 }
  0x76   : > { %v489_v19 = vld [vmem:[%s3491_s30 + $0x590] sm:$0xff]  ;;  %v490_v20 = vld [vmem:[%s3491_s30 + $0x598] sm:$0xff]  ;;  %v2825_v24 = vpack.c.bf16 %v472_v16, %v471_v14  ;;  %v2795_v25 = vpack.c.bf16 %v458_v18, %v457_v17  ;;  %v460_v32 = vld [vmem:[%s3491_s30 + $0x4a8] sm:$0xff] }
  0x77   : > { %2742 = vmatpush3.bf16.msra.mxu0 %v2741_v23  ;;  %v283_v21 = vld [vmem:[%s3515_s11 + $0x20] sm:$0xff]  ;;  %v285_v23 = vld [vmem:[%s3515_s11 + $0x30] sm:$0xff]  ;;  %v473_v28 = vld [vmem:[%s3491_s30 + $0x510] sm:$0xff]  ;;  %v2827_v29 = vpack.c.bf16 %v490_v20, %v489_v19 }
  0x78   : > { %2774 = vmatpush3.bf16.msra.mxu1 %v2773_v26  ;;  %2744 = vmatprep.subr.bf16.mxu0 %v2743_v27  ;;  %v441_v26 = vld [vmem:[%s3491_s30 + $0x410] sm:$0xff]  ;;  %v442_v27 = vld [vmem:[%s3491_s30 + $0x418] sm:$0xff]  ;;  %v491_v33 = vld [vmem:[%s3491_s30 + $0x5a0] sm:$0xff] }
  0x79   : > { %2776 = vmatprep.subr.bf16.mxu1 %v2775_v31  ;;  %v474_v30 = vld [vmem:[%s3491_s30 + $0x518] sm:$0xff]  ;;  %v459_v31 = vld [vmem:[%s3491_s30 + $0x4a0] sm:$0xff]  ;;  %v492_v34 = vld [vmem:[%s3491_s30 + $0x5a8] sm:$0xff]  ;;  %v2797_v36 = vpack.c.bf16 %v442_v27, %v441_v26 }
  0x7a   : > { %v288_v35 = vld [vmem:[%s3515_s11 + $0x48] sm:$0xff]  ;;  %v444_v41 = vld [vmem:[%s3491_s30 + $0x428] sm:$0xff]  ;;  %v461_v45 = vld [vmem:[%s3491_s30 + $0x4b0] sm:$0xff] }
  0x7b   : > { %2746 = vmatpush3.bf16.msra.mxu0 %v2745_v37  ;;  %v290_v37 = vld [vmem:[%s3515_s11 + $0x58] sm:$0xff]  ;;  %v443_v40 = vld [vmem:[%s3491_s30 + $0x420] sm:$0xff]  ;;  %v476_v44 = vld [vmem:[%s3491_s30 + $0x528] sm:$0xff] }
  0x7c   : > { %2778 = vmatpush3.bf16.msra.mxu1 %v2777_v38  ;;  %2748 = vmatprep.subr.bf16.mxu0 %v2747_v39  ;;  %v2829_v38 = vpack.c.bf16 %v474_v30, %v473_v28  ;;  %v2799_v39 = vpack.c.bf16 %v460_v32, %v459_v31  ;;  %v475_v42 = vld [vmem:[%s3491_s30 + $0x520] sm:$0xff]  ;;  %v462_v46 = vld [vmem:[%s3491_s30 + $0x4b8] sm:$0xff]  ;;  %v493_v47 = vld [vmem:[%s3491_s30 + $0x5b0] sm:$0xff] }
  0x7d   : > { %2780 = vmatprep.subr.bf16.mxu1 %v2779_v43  ;;  %v2831_v43 = vpack.c.bf16 %v492_v34, %v491_v33  ;;  %v494_v48 = vld [vmem:[%s3491_s30 + $0x5b8] sm:$0xff]  ;;  %v445_v52 = vld [vmem:[%s3491_s30 + $0x430] sm:$0xff]  ;;  %v463_v57 = vld [vmem:[%s3491_s30 + $0x4c0] sm:$0xff] }
  0x7e   : > { %v446_v53 = vld [vmem:[%s3491_s30 + $0x438] sm:$0xff]  ;;  %v477_v54 = vld [vmem:[%s3491_s30 + $0x530] sm:$0xff]  ;;  %v464_v58 = vld [vmem:[%s3491_s30 + $0x4c8] sm:$0xff] }
  0x7f   : > { %2750 = vmatpush3.bf16.msra.mxu0 %v2749_v49  ;;  %v2801_v49 = vpack.c.bf16 %v444_v41, %v443_v40  ;;  %v478_v56 = vld [vmem:[%s3491_s30 + $0x538] sm:$0xff]  ;;  %v495_v59 = vld [vmem:[%s3491_s30 + $0x5c0] sm:$0xff]  ;;  %v496_v60 = vld [vmem:[%s3491_s30 + $0x5c8] sm:$0xff] }
  0x80   : > { %2782 = vmatpush3.bf16.msra.mxu1 %v2781_v50  ;;  %2752 = vmatprep.subr.bf16.mxu0 %v2751_v51  ;;  %v2833_v50 = vpack.c.bf16 %v476_v44, %v475_v42  ;;  %v2803_v51 = vpack.c.bf16 %v462_v46, %v461_v45  ;;  %v447_v0 = vld [vmem:[%s3491_s30 + $0x440] sm:$0xff]  ;;  %v448_v1 = vld [vmem:[%s3491_s30 + $0x448] sm:$0xff]  ;;  %v465_v5 = vld [vmem:[%s3491_s30 + $0x4d0] sm:$0xff] }
  0x81   : > { %2784 = vmatprep.subr.bf16.mxu1 %v2783_v55  ;;  %v2835_v55 = vpack.c.bf16 %v494_v48, %v493_v47  ;;  %v479_v2 = vld [vmem:[%s3491_s30 + $0x540] sm:$0xff]  ;;  %v480_v4 = vld [vmem:[%s3491_s30 + $0x548] sm:$0xff]  ;;  %v466_v6 = vld [vmem:[%s3491_s30 + $0x4d8] sm:$0xff] }
  0x82   : > { %v497_v7 = vld [vmem:[%s3491_s30 + $0x5d0] sm:$0xff]  ;;  %v498_v8 = vld [vmem:[%s3491_s30 + $0x5d8] sm:$0xff]  ;;  %v467_v17 = vld [vmem:[%s3491_s30 + $0x4e0] sm:$0xff] }
  0x83   : > { %2754 = vmatpush3.bf16.msra.mxu0 %v2753_v61  ;;  %v2805_v61 = vpack.c.bf16 %v446_v53, %v445_v52  ;;  %v449_v12 = vld [vmem:[%s3491_s30 + $0x450] sm:$0xff]  ;;  %v450_v13 = vld [vmem:[%s3491_s30 + $0x458] sm:$0xff]  ;;  %v468_v18 = vld [vmem:[%s3491_s30 + $0x4e8] sm:$0xff] }
  0x84   : > { %2786 = vmatpush3.bf16.msra.mxu1 %v2785_v62  ;;  %2756 = vmatprep.subr.bf16.mxu0 %v2755_v63  ;;  %v2837_v62 = vpack.c.bf16 %v478_v56, %v477_v54  ;;  %v2807_v63 = vpack.c.bf16 %v464_v58, %v463_v57  ;;  %v481_v14 = vld [vmem:[%s3491_s30 + $0x550] sm:$0xff]  ;;  %v482_v16 = vld [vmem:[%s3491_s30 + $0x558] sm:$0xff]  ;;  %v499_v19 = vld [vmem:[%s3491_s30 + $0x5e0] sm:$0xff] }
  0x85   : > { %2788 = vmatprep.subr.bf16.mxu1 %v2787_v3  ;;  %v2839_v3 = vpack.c.bf16 %v496_v60, %v495_v59  ;;  %v500_v20 = vld [vmem:[%s3491_s30 + $0x5e8] sm:$0xff]  ;;  %v483_v26 = vld [vmem:[%s3491_s30 + $0x560] sm:$0xff]  ;;  %v470_v30 = vld [vmem:[%s3491_s30 + $0x4f8] sm:$0xff] }
  0x86   : > { %v2847_v27 = vpack.c.bf16 %v500_v20, %v499_v19  ;;  %v484_v28 = vld [vmem:[%s3491_s30 + $0x568] sm:$0xff]  ;;  %v501_v31 = vld [vmem:[%s3491_s30 + $0x5f0] sm:$0xff]  ;;  %v502_v32 = vld [vmem:[%s3491_s30 + $0x5f8] sm:$0xff] }
  0x87   : > { %2758 = vmatpush3.bf16.msra.mxu0 %v2757_v9  ;;  %v2809_v9 = vpack.c.bf16 %v448_v1, %v447_v0  ;;  %v2849_v34 = vpack.c.bf16 %v484_v28, %v483_v26  ;;  %v486_v40 = vld [vmem:[%s3491_s30 + $0x578] sm:$0xff]  ;;  %v519_v41 = vld [vmem:[%s3491_s30 + $0x680] sm:$0xff]  ;;  %v520_v42 = vld [vmem:[%s3491_s30 + $0x688] sm:$0xff] }
  0x88   : > { %2790 = vmatpush3.bf16.msra.mxu1 %v2789_v10  ;;  %2792 = vmatprep.subr.bf16.mxu0 %v2791_v11  ;;  %v2841_v10 = vpack.c.bf16 %v480_v4, %v479_v2  ;;  %v2811_v11 = vpack.c.bf16 %v466_v6, %v465_v5  ;;  %v552_v44 = vld [vmem:[%s3491_s30 + $0x788] sm:$0xff]  ;;  %v2855_v47 = vpack.c.bf16 %v520_v42, %v519_v41  ;;  %v503_v48 = vld [vmem:[%s3491_s30 + $0x600] sm:$0xff]  ;;  %v521_v53 = vld [vmem:[%s3491_s30 + $0x690] sm:$0xff] }
  0x89   : > { %2824 = vmatprep.subr.bf16.mxu1 %v2823_v15  ;;  %v2843_v15 = vpack.c.bf16 %v498_v8, %v497_v7  ;;  %v536_v52 = vld [vmem:[%s3491_s30 + $0x708] sm:$0xff]  ;;  %v522_v54 = vld [vmem:[%s3491_s30 + $0x698] sm:$0xff]  ;;  %v537_v0 = vld [vmem:[%s3491_s30 + $0x710] sm:$0xff] }
  0x8a   : > { %1028 = vmatmul.mubr.f32.vlgmr.msra.gmra.mrb[2].mxu0 %v283_v21  ;;  %v2813_v21 = vpack.c.bf16 %v450_v13, %v449_v12  ;;  %v554_v56 = vld [vmem:[%s3491_s30 + $0x798] sm:$0xff]  ;;  %v289_v59 = vld [vmem:[%s3515_s11 + $0x50] sm:$0xff]  ;;  %v555_v5 = vld [vmem:[%s3491_s30 + $0x7a0] sm:$0xff] }
  0x8b   : > { %2794 = vmatpush3.bf16.msra.mxu0 %v2793_v22  ;;  %1098 = vmatmul.mubr.f32.vlgmr.msra.gmra.mrb[2].mxu1 %v285_v23  ;;  %v2845_v22 = vpack.c.bf16 %v482_v16, %v481_v14  ;;  %v2815_v23 = vpack.c.bf16 %v468_v18, %v467_v17  ;;  %v287_v57 = vld [vmem:[%s3515_s11 + $0x40] sm:$0xff]  ;;  %v524_v4 = vld [vmem:[%s3491_s30 + $0x6a8] sm:$0xff]  ;;  %v292_v7 = vld [vmem:[%s3515_s11 + $0x68] sm:$0xff] }
  0x8c   : > { %2826 = vmatpush3.bf16.msra.mxu1 %v2825_v24  ;;  %2796 = vmatprep.subr.bf16.mxu0 %v2795_v25  ;;  %v451_v24 = vld [vmem:[%s3491_s30 + $0x460] sm:$0xff]  ;;  %v452_v25 = vld [vmem:[%s3491_s30 + $0x468] sm:$0xff]  ;;  %v538_v2 = vld [vmem:[%s3491_s30 + $0x718] sm:$0xff] }
  0x8d   : > { %2828 = vmatprep.subr.bf16.mxu1 %v2827_v29  ;;  %1167 = vmatprep.mubr.f32.mxu0 %v288_v35  ;;  %v469_v29 = vld [vmem:[%s3491_s30 + $0x4f0] sm:$0xff]  ;;  %v2817_v33 = vpack.c.bf16 %v452_v25, %v451_v24  ;;  %v556_v6 = vld [vmem:[%s3491_s30 + $0x7a8] sm:$0xff]  ;;  %v507_v12 = vld [vmem:[%s3491_s30 + $0x620] sm:$0xff] }
  0x8e   : > { %1237 = vmatprep.mubr.f32.mxu1 %v290_v37  ;;  %v2819_v35 = vpack.c.bf16 %v470_v30, %v469_v29  ;;  %v454_v37 = vld [vmem:[%s3491_s30 + $0x478] sm:$0xff]  ;;  %v508_v13 = vld [vmem:[%s3491_s30 + $0x628] sm:$0xff]  ;;  %v539_v14 = vld [vmem:[%s3491_s30 + $0x720] sm:$0xff] }
  0x8f   : > { %2798 = vmatpush3.bf16.msra.mxu0 %v2797_v36  ;;  %v453_v36 = vld [vmem:[%s3491_s30 + $0x470] sm:$0xff]  ;;  %v540_v16 = vld [vmem:[%s3491_s30 + $0x728] sm:$0xff]  ;;  %v526_v18 = vld [vmem:[%s3491_s30 + $0x6b8] sm:$0xff] }
  0x90   : > { %2830 = vmatpush3.bf16.msra.mxu1 %v2829_v38  ;;  %2800 = vmatprep.subr.bf16.mxu0 %v2799_v39  ;;  %v485_v38 = vld [vmem:[%s3491_s30 + $0x570] sm:$0xff]  ;;  %v2851_v39 = vpack.c.bf16 %v502_v32, %v501_v31  ;;  %v2821_v45 = vpack.c.bf16 %v454_v37, %v453_v36  ;;  %v558_v20 = vld [vmem:[%s3491_s30 + $0x7b8] sm:$0xff]  ;;  %v527_v29 = vld [vmem:[%s3491_s30 + $0x6c0] sm:$0xff] }
  0x91   : > { %2832 = vmatprep.subr.bf16.mxu1 %v2831_v43  ;;  %v551_v43 = vld [vmem:[%s3491_s30 + $0x780] sm:$0xff]  ;;  %v2853_v46 = vpack.c.bf16 %v486_v40, %v485_v38  ;;  %v525_v17 = vld [vmem:[%s3491_s30 + $0x6b0] sm:$0xff]  ;;  %v510_v25 = vld [vmem:[%s3491_s30 + $0x638] sm:$0xff] }
  0x92   : > { %v557_v19 = vld [vmem:[%s3491_s30 + $0x7b0] sm:$0xff]  ;;  %v542_v28 = vld [vmem:[%s3491_s30 + $0x738] sm:$0xff]  ;;  %v528_v30 = vld [vmem:[%s3491_s30 + $0x6c8] sm:$0xff] }
  0x93   : > { %2802 = vmatpush3.bf16.msra.mxu0 %v2801_v49  ;;  %v504_v49 = vld [vmem:[%s3491_s30 + $0x608] sm:$0xff]  ;;  %v509_v24 = vld [vmem:[%s3491_s30 + $0x630] sm:$0xff]  ;;  %v559_v31 = vld [vmem:[%s3491_s30 + $0x7c0] sm:$0xff] }
  0x94   : > { %2834 = vmatpush3.bf16.msra.mxu1 %v2833_v50  ;;  %2804 = vmatprep.subr.bf16.mxu0 %v2803_v51  ;;  %v535_v50 = vld [vmem:[%s3491_s30 + $0x700] sm:$0xff]  ;;  %v2887_v51 = vpack.c.bf16 %v552_v44, %v551_v43  ;;  %v2857_v58 = vpack.c.bf16 %v504_v49, %v503_v48  ;;  %v541_v26 = vld [vmem:[%s3491_s30 + $0x730] sm:$0xff]  ;;  %v560_v32 = vld [vmem:[%s3491_s30 + $0x7c8] sm:$0xff] }
  0x95   : > { %2836 = vmatprep.subr.bf16.mxu1 %v2835_v55  ;;  %v553_v55 = vld [vmem:[%s3491_s30 + $0x790] sm:$0xff]  ;;  %v2889_v60 = vpack.c.bf16 %v536_v52, %v535_v50  ;;  %v511_v36 = vld [vmem:[%s3491_s30 + $0x640] sm:$0xff]  ;;  %v512_v37 = vld [vmem:[%s3491_s30 + $0x648] sm:$0xff] }
  0x96   : > { %v2891_v1 = vpack.c.bf16 %v554_v56, %v553_v55  ;;  %v543_v38 = vld [vmem:[%s3491_s30 + $0x740] sm:$0xff]  ;;  %v544_v40 = vld [vmem:[%s3491_s30 + $0x748] sm:$0xff]  ;;  %v529_v41 = vld [vmem:[%s3491_s30 + $0x6d0] sm:$0xff] }
  0x97   : > { %2806 = vmatpush3.bf16.msra.mxu0 %v2805_v61  ;;  %v2859_v61 = vpack.c.bf16 %v522_v54, %v521_v53  ;;  %v530_v42 = vld [vmem:[%s3491_s30 + $0x6d8] sm:$0xff]  ;;  %v561_v43 = vld [vmem:[%s3491_s30 + $0x7d0] sm:$0xff]  ;;  %v531_v53 = vld [vmem:[%s3491_s30 + $0x6e0] sm:$0xff] }
  0x98   : > { %2838 = vmatpush3.bf16.msra.mxu1 %v2837_v62  ;;  %2808 = vmatprep.subr.bf16.mxu0 %v2807_v63  ;;  %v505_v62 = vld [vmem:[%s3491_s30 + $0x610] sm:$0xff]  ;;  %v506_v63 = vld [vmem:[%s3491_s30 + $0x618] sm:$0xff]  ;;  %v532_v54 = vld [vmem:[%s3491_s30 + $0x6e8] sm:$0xff] }
  0x99   : > { %2840 = vmatprep.subr.bf16.mxu1 %v2839_v3  ;;  %v523_v3 = vld [vmem:[%s3491_s30 + $0x6a0] sm:$0xff]  ;;  %v2861_v8 = vpack.c.bf16 %v506_v63, %v505_v62  ;;  %v562_v44 = vld [vmem:[%s3491_s30 + $0x7d8] sm:$0xff]  ;;  %v513_v48 = vld [vmem:[%s3491_s30 + $0x650] sm:$0xff] }
  0x9a   : > { %v514_v49 = vld [vmem:[%s3491_s30 + $0x658] sm:$0xff]  ;;  %v545_v50 = vld [vmem:[%s3491_s30 + $0x750] sm:$0xff]  ;;  %v563_v55 = vld [vmem:[%s3491_s30 + $0x7e0] sm:$0xff] }
  0x9b   : > { %2810 = vmatpush3.bf16.msra.mxu0 %v2809_v9  ;;  %v294_v9 = vld [vmem:[%s3515_s11 + $0x78] sm:$0xff]  ;;  %v546_v52 = vld [vmem:[%s3491_s30 + $0x758] sm:$0xff]  ;;  %v564_v56 = vld [vmem:[%s3491_s30 + $0x7e8] sm:$0xff] }
  0x9c   : > { %2842 = vmatpush3.bf16.msra.mxu1 %v2841_v10  ;;  %2812 = vmatprep.subr.bf16.mxu0 %v2811_v11  ;;  %v2893_v10 = vpack.c.bf16 %v538_v2, %v537_v0  ;;  %v2863_v11 = vpack.c.bf16 %v524_v4, %v523_v3  ;;  %v547_v62 = vld [vmem:[%s3491_s30 + $0x760] sm:$0xff]  ;;  %v2911_v63 = vpack.c.bf16 %v564_v56, %v563_v55  ;;  %v548_v0 = vld [vmem:[%s3491_s30 + $0x768] sm:$0xff]  ;;  %v534_v2 = vld [vmem:[%s3491_s30 + $0x6f8] sm:$0xff] }
  0x9d   : > { %2844 = vmatprep.subr.bf16.mxu1 %v2843_v15  ;;  %v2895_v15 = vpack.c.bf16 %v556_v6, %v555_v5  ;;  %v565_v3 = vld [vmem:[%s3491_s30 + $0x7f0] sm:$0xff]  ;;  %v566_v4 = vld [vmem:[%s3491_s30 + $0x7f8] sm:$0xff]  ;;  %v2913_v6 = vpack.c.bf16 %v548_v0, %v547_v62 }
  0x9e   : > { %v621_v55 = vld [vmem:[%s3491_s30 + $0x9b0] sm:$0xff]  ;;  %v622_v56 = vld [vmem:[%s3491_s30 + $0x9b8] sm:$0xff] }
  0x9f   : > { %2814 = vmatpush3.bf16.msra.mxu0 %v2813_v21  ;;  %v2865_v21 = vpack.c.bf16 %v508_v13, %v507_v12  ;;  %v550_v12 = vld [vmem:[%s3491_s30 + $0x778] sm:$0xff]  ;;  %v583_v13 = vld [vmem:[%s3491_s30 + $0x880] sm:$0xff]  ;;  %v605_v62 = vld [vmem:[%s3491_s30 + $0x930] sm:$0xff] }
  0xa0   : > { %2846 = vmatpush3.bf16.msra.mxu1 %v2845_v22  ;;  %2816 = vmatprep.subr.bf16.mxu0 %v2815_v23  ;;  %v2897_v22 = vpack.c.bf16 %v540_v16, %v539_v14  ;;  %v2867_v23 = vpack.c.bf16 %v526_v18, %v525_v17  ;;  %v584_v14 = vld [vmem:[%s3491_s30 + $0x888] sm:$0xff]  ;;  %v606_v0 = vld [vmem:[%s3491_s30 + $0x938] sm:$0xff] }
  0xa1   : > { %2848 = vmatprep.subr.bf16.mxu1 %v2847_v27  ;;  %v2899_v27 = vpack.c.bf16 %v558_v20, %v557_v19  ;;  %v616_v16 = vld [vmem:[%s3491_s30 + $0x988] sm:$0xff]  ;;  %v2919_v19 = vpack.c.bf16 %v584_v14, %v583_v13  ;;  %v567_v20 = vld [vmem:[%s3491_s30 + $0x800] sm:$0xff]  ;;  %v593_v13 = vld [vmem:[%s3491_s30 + $0x8d0] sm:$0xff] }
  0xa2   : > { %v594_v14 = vld [vmem:[%s3491_s30 + $0x8d8] sm:$0xff] }
  0xa3   : > { %2818 = vmatpush3.bf16.msra.mxu0 %v2817_v33  ;;  %v2869_v33 = vpack.c.bf16 %v510_v25, %v509_v24  ;;  %v600_v24 = vld [vmem:[%s3491_s30 + $0x908] sm:$0xff]  ;;  %v585_v25 = vld [vmem:[%s3491_s30 + $0x890] sm:$0xff] }
  0xa4   : > { %2850 = vmatpush3.bf16.msra.mxu1 %v2849_v34  ;;  %2820 = vmatprep.subr.bf16.mxu0 %v2819_v35  ;;  %v2901_v34 = vpack.c.bf16 %v542_v28, %v541_v26  ;;  %v2871_v35 = vpack.c.bf16 %v528_v30, %v527_v29  ;;  %v586_v26 = vld [vmem:[%s3491_s30 + $0x898] sm:$0xff] }
  0xa5   : > { %2852 = vmatprep.subr.bf16.mxu1 %v2851_v39  ;;  %v2903_v39 = vpack.c.bf16 %v560_v32, %v559_v31  ;;  %v618_v28 = vld [vmem:[%s3491_s30 + $0x998] sm:$0xff]  ;;  %v293_v31 = vld [vmem:[%s3515_s11 + $0x70] sm:$0xff] }
  0xa6   : > { %v291_v29 = vld [vmem:[%s3515_s11 + $0x60] sm:$0xff] }
  0xa7   : > { %2822 = vmatpush3.bf16.msra.mxu0 %v2821_v45  ;;  %v2873_v45 = vpack.c.bf16 %v512_v37, %v511_v36  ;;  %v601_v36 = vld [vmem:[%s3491_s30 + $0x910] sm:$0xff] }
  0xa8   : > { %2854 = vmatpush3.bf16.msra.mxu1 %v2853_v46  ;;  %2856 = vmatprep.subr.bf16.mxu0 %v2855_v47  ;;  %v2905_v46 = vpack.c.bf16 %v544_v40, %v543_v38  ;;  %v2875_v47 = vpack.c.bf16 %v530_v42, %v529_v41  ;;  %v602_v38 = vld [vmem:[%s3491_s30 + $0x918] sm:$0xff]  ;;  %v588_v40 = vld [vmem:[%s3491_s30 + $0x8a8] sm:$0xff]  ;;  %v619_v41 = vld [vmem:[%s3491_s30 + $0x9a0] sm:$0xff] }
  0xa9   : > { %2888 = vmatprep.subr.bf16.mxu1 %v2887_v51  ;;  %v2907_v51 = vpack.c.bf16 %v562_v44, %v561_v43  ;;  %v620_v42 = vld [vmem:[%s3491_s30 + $0x9a8] sm:$0xff]  ;;  %v296_v43 = vld [vmem:[%s3515_s11 + $0x88] sm:$0xff] }
  0xaa   : > { %1168 = vmatmul.mubr.f32.vlgmr.msra.gmra.mrb[4].mxu0 %v287_v57  ;;  %v2877_v57 = vpack.c.bf16 %v514_v49, %v513_v48  ;;  %v571_v48 = vld [vmem:[%s3491_s30 + $0x820] sm:$0xff]  ;;  %v572_v49 = vld [vmem:[%s3491_s30 + $0x828] sm:$0xff] }
  0xab   : > { %2858 = vmatpush3.bf16.msra.mxu0 %v2857_v58  ;;  %1238 = vmatmul.mubr.f32.vlgmr.msra.gmra.mrb[4].mxu1 %v289_v59  ;;  %v2909_v58 = vpack.c.bf16 %v546_v52, %v545_v50  ;;  %v2879_v59 = vpack.c.bf16 %v532_v54, %v531_v53  ;;  %v603_v50 = vld [vmem:[%s3491_s30 + $0x920] sm:$0xff]  ;;  %v604_v52 = vld [vmem:[%s3491_s30 + $0x928] sm:$0xff]  ;;  %v589_v53 = vld [vmem:[%s3491_s30 + $0x8b0] sm:$0xff] }
  0xac   : > { %2890 = vmatpush3.bf16.msra.mxu1 %v2889_v60  ;;  %2860 = vmatprep.subr.bf16.mxu0 %v2859_v61  ;;  %v515_v60 = vld [vmem:[%s3491_s30 + $0x660] sm:$0xff]  ;;  %v516_v61 = vld [vmem:[%s3491_s30 + $0x668] sm:$0xff]  ;;  %v590_v54 = vld [vmem:[%s3491_s30 + $0x8b8] sm:$0xff] }
  0xad   : > { %2892 = vmatprep.subr.bf16.mxu1 %v2891_v1  ;;  %1307 = vmatprep.mubr.f32.mxu0 %v292_v7  ;;  %v533_v1 = vld [vmem:[%s3491_s30 + $0x6f0] sm:$0xff]  ;;  %v2881_v5 = vpack.c.bf16 %v516_v61, %v515_v60  ;;  %v574_v61 = vld [vmem:[%s3491_s30 + $0x838] sm:$0xff] }
  0xae   : > { %1377 = vmatprep.mubr.f32.mxu1 %v294_v9  ;;  %v2883_v7 = vpack.c.bf16 %v534_v2, %v533_v1  ;;  %v518_v9 = vld [vmem:[%s3491_s30 + $0x678] sm:$0xff]  ;;  %v573_v60 = vld [vmem:[%s3491_s30 + $0x830] sm:$0xff]  ;;  %v591_v1 = vld [vmem:[%s3491_s30 + $0x8c0] sm:$0xff] }
  0xaf   : > { %2862 = vmatpush3.bf16.msra.mxu0 %v2861_v8  ;;  %v517_v8 = vld [vmem:[%s3491_s30 + $0x670] sm:$0xff]  ;;  %v592_v2 = vld [vmem:[%s3491_s30 + $0x8c8] sm:$0xff] }
  0xb0   : > { %2894 = vmatpush3.bf16.msra.mxu1 %v2893_v10  ;;  %2864 = vmatprep.subr.bf16.mxu0 %v2863_v11  ;;  %v549_v10 = vld [vmem:[%s3491_s30 + $0x770] sm:$0xff]  ;;  %v2915_v11 = vpack.c.bf16 %v566_v4, %v565_v3  ;;  %v2885_v17 = vpack.c.bf16 %v518_v9, %v517_v8  ;;  %v623_v3 = vld [vmem:[%s3491_s30 + $0x9c0] sm:$0xff]  ;;  %v624_v4 = vld [vmem:[%s3491_s30 + $0x9c8] sm:$0xff] }
  0xb1   : > { %2896 = vmatprep.subr.bf16.mxu1 %v2895_v15  ;;  %v615_v15 = vld [vmem:[%s3491_s30 + $0x980] sm:$0xff]  ;;  %v2917_v18 = vpack.c.bf16 %v550_v12, %v549_v10  ;;  %v576_v9 = vld [vmem:[%s3491_s30 + $0x848] sm:$0xff] }
  0xb2   : > { %v575_v8 = vld [vmem:[%s3491_s30 + $0x840] sm:$0xff]  ;;  %v608_v12 = vld [vmem:[%s3491_s30 + $0x948] sm:$0xff] }
  0xb3   : > { %2866 = vmatpush3.bf16.msra.mxu0 %v2865_v21  ;;  %v568_v21 = vld [vmem:[%s3491_s30 + $0x808] sm:$0xff]  ;;  %v607_v10 = vld [vmem:[%s3491_s30 + $0x940] sm:$0xff] }
  0xb4   : > { %2898 = vmatpush3.bf16.msra.mxu1 %v2897_v22  ;;  %2868 = vmatprep.subr.bf16.mxu0 %v2867_v23  ;;  %v599_v22 = vld [vmem:[%s3491_s30 + $0x900] sm:$0xff]  ;;  %v2951_v23 = vpack.c.bf16 %v616_v16, %v615_v15  ;;  %v2921_v30 = vpack.c.bf16 %v568_v21, %v567_v20  ;;  %v625_v15 = vld [vmem:[%s3491_s30 + $0x9d0] sm:$0xff]  ;;  %v626_v16 = vld [vmem:[%s3491_s30 + $0x9d8] sm:$0xff] }
  0xb5   : > { %2900 = vmatprep.subr.bf16.mxu1 %v2899_v27  ;;  %v617_v27 = vld [vmem:[%s3491_s30 + $0x990] sm:$0xff]  ;;  %v2953_v32 = vpack.c.bf16 %v600_v24, %v599_v22  ;;  %v578_v21 = vld [vmem:[%s3491_s30 + $0x858] sm:$0xff] }
  0xb6   : > { %v2955_v37 = vpack.c.bf16 %v618_v28, %v617_v27  ;;  %v577_v20 = vld [vmem:[%s3491_s30 + $0x850] sm:$0xff]  ;;  %v610_v24 = vld [vmem:[%s3491_s30 + $0x958] sm:$0xff]  ;;  %v627_v27 = vld [vmem:[%s3491_s30 + $0x9e0] sm:$0xff] }
  0xb7   : > { %2870 = vmatpush3.bf16.msra.mxu0 %v2869_v33  ;;  %v2923_v33 = vpack.c.bf16 %v586_v26, %v585_v25  ;;  %v609_v22 = vld [vmem:[%s3491_s30 + $0x950] sm:$0xff]  ;;  %v595_v25 = vld [vmem:[%s3491_s30 + $0x8e0] sm:$0xff]  ;;  %v596_v26 = vld [vmem:[%s3491_s30 + $0x8e8] sm:$0xff] }
  0xb8   : > { %2902 = vmatpush3.bf16.msra.mxu1 %v2901_v34  ;;  %2872 = vmatprep.subr.bf16.mxu0 %v2871_v35  ;;  %v569_v34 = vld [vmem:[%s3491_s30 + $0x810] sm:$0xff]  ;;  %v570_v35 = vld [vmem:[%s3491_s30 + $0x818] sm:$0xff]  ;;  %v628_v28 = vld [vmem:[%s3491_s30 + $0x9e8] sm:$0xff] }
  0xb9   : > { %2904 = vmatprep.subr.bf16.mxu1 %v2903_v39  ;;  %v587_v39 = vld [vmem:[%s3491_s30 + $0x8a0] sm:$0xff]  ;;  %v2925_v44 = vpack.c.bf16 %v570_v35, %v569_v34  ;;  %v2975_v35 = vpack.c.bf16 %v628_v28, %v627_v27  ;;  %v685_v27 = vld [vmem:[%s3491_s30 + $0xbb0] sm:$0xff]  ;;  %v686_v28 = vld [vmem:[%s3491_s30 + $0xbb8] sm:$0xff] }
  0xba   : > { %v611_v34 = vld [vmem:[%s3491_s30 + $0x960] sm:$0xff] }
  0xbb   : > { %2874 = vmatpush3.bf16.msra.mxu0 %v2873_v45  ;;  %v298_v45 = vld [vmem:[%s3515_s11 + $0x98] sm:$0xff] }
  0xbc   : > { %2906 = vmatpush3.bf16.msra.mxu1 %v2905_v46  ;;  %2876 = vmatprep.subr.bf16.mxu0 %v2875_v47  ;;  %v2957_v46 = vpack.c.bf16 %v602_v38, %v601_v36  ;;  %v2927_v47 = vpack.c.bf16 %v588_v40, %v587_v39  ;;  %v612_v36 = vld [vmem:[%s3491_s30 + $0x968] sm:$0xff]  ;;  %v598_v38 = vld [vmem:[%s3491_s30 + $0x8f8] sm:$0xff]  ;;  %v629_v39 = vld [vmem:[%s3491_s30 + $0x9f0] sm:$0xff] }
  0xbd   : > { %2908 = vmatprep.subr.bf16.mxu1 %v2907_v51  ;;  %v2959_v51 = vpack.c.bf16 %v620_v42, %v619_v41  ;;  %v630_v40 = vld [vmem:[%s3491_s30 + $0x9f8] sm:$0xff]  ;;  %v2977_v42 = vpack.c.bf16 %v612_v36, %v611_v34  ;;  %v669_v34 = vld [vmem:[%s3491_s30 + $0xb30] sm:$0xff] }
  0xbe   : > { %v670_v36 = vld [vmem:[%s3491_s30 + $0xb38] sm:$0xff] }
  0xbf   : > { %2878 = vmatpush3.bf16.msra.mxu0 %v2877_v57  ;;  %v2929_v57 = vpack.c.bf16 %v572_v49, %v571_v48  ;;  %v614_v48 = vld [vmem:[%s3491_s30 + $0x978] sm:$0xff]  ;;  %v647_v49 = vld [vmem:[%s3491_s30 + $0xa80] sm:$0xff] }
  0xc0   : > { %2910 = vmatpush3.bf16.msra.mxu1 %v2909_v58  ;;  %2880 = vmatprep.subr.bf16.mxu0 %v2879_v59  ;;  %v2961_v58 = vpack.c.bf16 %v604_v52, %v603_v50  ;;  %v2931_v59 = vpack.c.bf16 %v590_v54, %v589_v53  ;;  %v648_v50 = vld [vmem:[%s3491_s30 + $0xa88] sm:$0xff] }
  0xc1   : > { %2912 = vmatprep.subr.bf16.mxu1 %v2911_v63  ;;  %v2963_v63 = vpack.c.bf16 %v622_v56, %v621_v55  ;;  %v680_v52 = vld [vmem:[%s3491_s30 + $0xb88] sm:$0xff]  ;;  %v2983_v55 = vpack.c.bf16 %v648_v50, %v647_v49  ;;  %v631_v56 = vld [vmem:[%s3491_s30 + $0xa00] sm:$0xff]  ;;  %v657_v49 = vld [vmem:[%s3491_s30 + $0xad0] sm:$0xff] }
  0xc2   : > { %v658_v50 = vld [vmem:[%s3491_s30 + $0xad8] sm:$0xff] }
  0xc3   : > { %2882 = vmatpush3.bf16.msra.mxu0 %v2881_v5  ;;  %v2933_v5 = vpack.c.bf16 %v574_v61, %v573_v60  ;;  %v664_v60 = vld [vmem:[%s3491_s30 + $0xb08] sm:$0xff]  ;;  %v649_v61 = vld [vmem:[%s3491_s30 + $0xa90] sm:$0xff] }
  0xc4   : > { %2914 = vmatpush3.bf16.msra.mxu1 %v2913_v6  ;;  %2884 = vmatprep.subr.bf16.mxu0 %v2883_v7  ;;  %v2965_v6 = vpack.c.bf16 %v606_v0, %v605_v62  ;;  %v2935_v7 = vpack.c.bf16 %v592_v2, %v591_v1  ;;  %v650_v62 = vld [vmem:[%s3491_s30 + $0xa98] sm:$0xff] }
  0xc5   : > { %2916 = vmatprep.subr.bf16.mxu1 %v2915_v11  ;;  %v2967_v11 = vpack.c.bf16 %v624_v4, %v623_v3  ;;  %v682_v0 = vld [vmem:[%s3491_s30 + $0xb98] sm:$0xff]  ;;  %v297_v3 = vld [vmem:[%s3515_s11 + $0x90] sm:$0xff] }
  0xc6   : > { %v295_v1 = vld [vmem:[%s3515_s11 + $0x80] sm:$0xff] }
  0xc7   : > { %2886 = vmatpush3.bf16.msra.mxu0 %v2885_v17  ;;  %v2937_v17 = vpack.c.bf16 %v576_v9, %v575_v8  ;;  %v665_v8 = vld [vmem:[%s3491_s30 + $0xb10] sm:$0xff] }
  0xc8   : > { %2918 = vmatpush3.bf16.msra.mxu1 %v2917_v18  ;;  %2920 = vmatprep.subr.bf16.mxu0 %v2919_v19  ;;  %v2969_v18 = vpack.c.bf16 %v608_v12, %v607_v10  ;;  %v2939_v19 = vpack.c.bf16 %v594_v14, %v593_v13  ;;  %v666_v10 = vld [vmem:[%s3491_s30 + $0xb18] sm:$0xff]  ;;  %v652_v12 = vld [vmem:[%s3491_s30 + $0xaa8] sm:$0xff]  ;;  %v683_v13 = vld [vmem:[%s3491_s30 + $0xba0] sm:$0xff] }
  0xc9   : > { %2952 = vmatprep.subr.bf16.mxu1 %v2951_v23  ;;  %v2971_v23 = vpack.c.bf16 %v626_v16, %v625_v15  ;;  %v684_v14 = vld [vmem:[%s3491_s30 + $0xba8] sm:$0xff]  ;;  %v300_v15 = vld [vmem:[%s3515_s11 + $0xa8] sm:$0xff] }
  0xca   : > { %1308 = vmatmul.mubr.f32.vlgmr.msra.gmra.mrb[6].mxu0 %v291_v29  ;;  %v2941_v29 = vpack.c.bf16 %v578_v21, %v577_v20  ;;  %v635_v20 = vld [vmem:[%s3491_s30 + $0xa20] sm:$0xff]  ;;  %v636_v21 = vld [vmem:[%s3491_s30 + $0xa28] sm:$0xff] }
  0xcb   : > { %2922 = vmatpush3.bf16.msra.mxu0 %v2921_v30  ;;  %1378 = vmatmul.mubr.f32.vlgmr.msra.gmra.mrb[6].mxu1 %v293_v31  ;;  %v2973_v30 = vpack.c.bf16 %v610_v24, %v609_v22  ;;  %v2943_v31 = vpack.c.bf16 %v596_v26, %v595_v25  ;;  %v667_v22 = vld [vmem:[%s3491_s30 + $0xb20] sm:$0xff]  ;;  %v668_v24 = vld [vmem:[%s3491_s30 + $0xb28] sm:$0xff]  ;;  %v653_v25 = vld [vmem:[%s3491_s30 + $0xab0] sm:$0xff] }
  0xcc   : > { %2954 = vmatpush3.bf16.msra.mxu1 %v2953_v32  ;;  %2924 = vmatprep.subr.bf16.mxu0 %v2923_v33  ;;  %v579_v32 = vld [vmem:[%s3491_s30 + $0x860] sm:$0xff]  ;;  %v580_v33 = vld [vmem:[%s3491_s30 + $0x868] sm:$0xff]  ;;  %v654_v26 = vld [vmem:[%s3491_s30 + $0xab8] sm:$0xff] }
  0xcd   : > { %2956 = vmatprep.subr.bf16.mxu1 %v2955_v37  ;;  %1447 = vmatprep.mubr.f32.mxu0 %v296_v43  ;;  %v597_v37 = vld [vmem:[%s3491_s30 + $0x8f0] sm:$0xff]  ;;  %v2945_v41 = vpack.c.bf16 %v580_v33, %v579_v32  ;;  %v638_v33 = vld [vmem:[%s3491_s30 + $0xa38] sm:$0xff] }
  0xce   : > { %1517 = vmatprep.mubr.f32.mxu1 %v298_v45  ;;  %v2947_v43 = vpack.c.bf16 %v598_v38, %v597_v37  ;;  %v582_v45 = vld [vmem:[%s3491_s30 + $0x878] sm:$0xff]  ;;  %v637_v32 = vld [vmem:[%s3491_s30 + $0xa30] sm:$0xff]  ;;  %v655_v37 = vld [vmem:[%s3491_s30 + $0xac0] sm:$0xff] }
  0xcf   : > { %2926 = vmatpush3.bf16.msra.mxu0 %v2925_v44  ;;  %v581_v44 = vld [vmem:[%s3491_s30 + $0x870] sm:$0xff]  ;;  %v656_v38 = vld [vmem:[%s3491_s30 + $0xac8] sm:$0xff] }
  0xd0   : > { %2958 = vmatpush3.bf16.msra.mxu1 %v2957_v46  ;;  %2928 = vmatprep.subr.bf16.mxu0 %v2927_v47  ;;  %v613_v46 = vld [vmem:[%s3491_s30 + $0x970] sm:$0xff]  ;;  %v2979_v47 = vpack.c.bf16 %v630_v40, %v629_v39  ;;  %v2949_v53 = vpack.c.bf16 %v582_v45, %v581_v44  ;;  %v687_v39 = vld [vmem:[%s3491_s30 + $0xbc0] sm:$0xff]  ;;  %v688_v40 = vld [vmem:[%s3491_s30 + $0xbc8] sm:$0xff] }
  0xd1   : > { %2960 = vmatprep.subr.bf16.mxu1 %v2959_v51  ;;  %v679_v51 = vld [vmem:[%s3491_s30 + $0xb80] sm:$0xff]  ;;  %v2981_v54 = vpack.c.bf16 %v614_v48, %v613_v46  ;;  %v640_v45 = vld [vmem:[%s3491_s30 + $0xa48] sm:$0xff] }
  0xd2   : > { %v639_v44 = vld [vmem:[%s3491_s30 + $0xa40] sm:$0xff]  ;;  %v672_v48 = vld [vmem:[%s3491_s30 + $0xb48] sm:$0xff] }
  0xd3   : > { %2930 = vmatpush3.bf16.msra.mxu0 %v2929_v57  ;;  %v632_v57 = vld [vmem:[%s3491_s30 + $0xa08] sm:$0xff]  ;;  %v671_v46 = vld [vmem:[%s3491_s30 + $0xb40] sm:$0xff] }
  0xd4   : > { %2962 = vmatpush3.bf16.msra.mxu1 %v2961_v58  ;;  %2932 = vmatprep.subr.bf16.mxu0 %v2931_v59  ;;  %v663_v58 = vld [vmem:[%s3491_s30 + $0xb00] sm:$0xff]  ;;  %v3015_v59 = vpack.c.bf16 %v680_v52, %v679_v51  ;;  %v2985_v2 = vpack.c.bf16 %v632_v57, %v631_v56  ;;  %v689_v51 = vld [vmem:[%s3491_s30 + $0xbd0] sm:$0xff]  ;;  %v690_v52 = vld [vmem:[%s3491_s30 + $0xbd8] sm:$0xff] }
  0xd5   : > { %2964 = vmatprep.subr.bf16.mxu1 %v2963_v63  ;;  %v681_v63 = vld [vmem:[%s3491_s30 + $0xb90] sm:$0xff]  ;;  %v3017_v4 = vpack.c.bf16 %v664_v60, %v663_v58  ;;  %v642_v57 = vld [vmem:[%s3491_s30 + $0xa58] sm:$0xff] }
  0xd6   : > { %v3019_v9 = vpack.c.bf16 %v682_v0, %v681_v63  ;;  %v641_v56 = vld [vmem:[%s3491_s30 + $0xa50] sm:$0xff]  ;;  %v674_v60 = vld [vmem:[%s3491_s30 + $0xb58] sm:$0xff]  ;;  %v691_v63 = vld [vmem:[%s3491_s30 + $0xbe0] sm:$0xff] }
  0xd7   : > { %2934 = vmatpush3.bf16.msra.mxu0 %v2933_v5  ;;  %v2987_v5 = vpack.c.bf16 %v650_v62, %v649_v61  ;;  %v673_v58 = vld [vmem:[%s3491_s30 + $0xb50] sm:$0xff]  ;;  %v659_v61 = vld [vmem:[%s3491_s30 + $0xae0] sm:$0xff]  ;;  %v660_v62 = vld [vmem:[%s3491_s30 + $0xae8] sm:$0xff] }
  0xd8   : > { %2966 = vmatpush3.bf16.msra.mxu1 %v2965_v6  ;;  %2936 = vmatprep.subr.bf16.mxu0 %v2935_v7  ;;  %v633_v6 = vld [vmem:[%s3491_s30 + $0xa10] sm:$0xff]  ;;  %v634_v7 = vld [vmem:[%s3491_s30 + $0xa18] sm:$0xff]  ;;  %v692_v0 = vld [vmem:[%s3491_s30 + $0xbe8] sm:$0xff] }
  0xd9   : > { %2968 = vmatprep.subr.bf16.mxu1 %v2967_v11  ;;  %v651_v11 = vld [vmem:[%s3491_s30 + $0xaa0] sm:$0xff]  ;;  %v2989_v16 = vpack.c.bf16 %v634_v7, %v633_v6  ;;  %v3039_v7 = vpack.c.bf16 %v692_v0, %v691_v63  ;;  %v749_v63 = vld [vmem:[%s3491_s30 + $0xdb0] sm:$0xff]  ;;  %v750_v0 = vld [vmem:[%s3491_s30 + $0xdb8] sm:$0xff] }
  0xda   : > { %v675_v6 = vld [vmem:[%s3491_s30 + $0xb60] sm:$0xff] }
  0xdb   : > { %2938 = vmatpush3.bf16.msra.mxu0 %v2937_v17  ;;  %v302_v17 = vld [vmem:[%s3515_s11 + $0xb8] sm:$0xff] }
  0xdc   : > { %2970 = vmatpush3.bf16.msra.mxu1 %v2969_v18  ;;  %2940 = vmatprep.subr.bf16.mxu0 %v2939_v19  ;;  %v3021_v18 = vpack.c.bf16 %v666_v10, %v665_v8  ;;  %v2991_v19 = vpack.c.bf16 %v652_v12, %v651_v11  ;;  %v676_v8 = vld [vmem:[%s3491_s30 + $0xb68] sm:$0xff]  ;;  %v662_v10 = vld [vmem:[%s3491_s30 + $0xaf8] sm:$0xff]  ;;  %v693_v11 = vld [vmem:[%s3491_s30 + $0xbf0] sm:$0xff] }
  0xdd   : > { %2972 = vmatprep.subr.bf16.mxu1 %v2971_v23  ;;  %v3023_v23 = vpack.c.bf16 %v684_v14, %v683_v13  ;;  %v694_v12 = vld [vmem:[%s3491_s30 + $0xbf8] sm:$0xff]  ;;  %v3041_v14 = vpack.c.bf16 %v676_v8, %v675_v6  ;;  %v733_v6 = vld [vmem:[%s3491_s30 + $0xd30] sm:$0xff] }
  0xde   : > { %v734_v8 = vld [vmem:[%s3491_s30 + $0xd38] sm:$0xff] }
  0xdf   : > { %2942 = vmatpush3.bf16.msra.mxu0 %v2941_v29  ;;  %v2993_v29 = vpack.c.bf16 %v636_v21, %v635_v20  ;;  %v678_v20 = vld [vmem:[%s3491_s30 + $0xb78] sm:$0xff]  ;;  %v711_v21 = vld [vmem:[%s3491_s30 + $0xc80] sm:$0xff] }
  0xe0   : > { %2974 = vmatpush3.bf16.msra.mxu1 %v2973_v30  ;;  %2944 = vmatprep.subr.bf16.mxu0 %v2943_v31  ;;  %v3025_v30 = vpack.c.bf16 %v668_v24, %v667_v22  ;;  %v2995_v31 = vpack.c.bf16 %v654_v26, %v653_v25  ;;  %v712_v22 = vld [vmem:[%s3491_s30 + $0xc88] sm:$0xff] }
  0xe1   : > { %2976 = vmatprep.subr.bf16.mxu1 %v2975_v35  ;;  %v3027_v35 = vpack.c.bf16 %v686_v28, %v685_v27  ;;  %v744_v24 = vld [vmem:[%s3491_s30 + $0xd88] sm:$0xff]  ;;  %v3047_v27 = vpack.c.bf16 %v712_v22, %v711_v21  ;;  %v695_v28 = vld [vmem:[%s3491_s30 + $0xc00] sm:$0xff]  ;;  %v721_v21 = vld [vmem:[%s3491_s30 + $0xcd0] sm:$0xff] }
  0xe2   : > { %v722_v22 = vld [vmem:[%s3491_s30 + $0xcd8] sm:$0xff] }
  0xe3   : > { %2946 = vmatpush3.bf16.msra.mxu0 %v2945_v41  ;;  %v2997_v41 = vpack.c.bf16 %v638_v33, %v637_v32  ;;  %v728_v32 = vld [vmem:[%s3491_s30 + $0xd08] sm:$0xff]  ;;  %v713_v33 = vld [vmem:[%s3491_s30 + $0xc90] sm:$0xff] }
  0xe4   : > { %2978 = vmatpush3.bf16.msra.mxu1 %v2977_v42  ;;  %2948 = vmatprep.subr.bf16.mxu0 %v2947_v43  ;;  %v3029_v42 = vpack.c.bf16 %v670_v36, %v669_v34  ;;  %v2999_v43 = vpack.c.bf16 %v656_v38, %v655_v37  ;;  %v714_v34 = vld [vmem:[%s3491_s30 + $0xc98] sm:$0xff] }
  0xe5   : > { %2980 = vmatprep.subr.bf16.mxu1 %v2979_v47  ;;  %v3031_v47 = vpack.c.bf16 %v688_v40, %v687_v39  ;;  %v746_v36 = vld [vmem:[%s3491_s30 + $0xd98] sm:$0xff]  ;;  %v301_v39 = vld [vmem:[%s3515_s11 + $0xb0] sm:$0xff] }
  0xe6   : > { %v299_v37 = vld [vmem:[%s3515_s11 + $0xa0] sm:$0xff] }
  0xe7   : > { %2950 = vmatpush3.bf16.msra.mxu0 %v2949_v53  ;;  %v3001_v53 = vpack.c.bf16 %v640_v45, %v639_v44  ;;  %v729_v44 = vld [vmem:[%s3491_s30 + $0xd10] sm:$0xff] }
  0xe8   : > { %2982 = vmatpush3.bf16.msra.mxu1 %v2981_v54  ;;  %2984 = vmatprep.subr.bf16.mxu0 %v2983_v55  ;;  %v3033_v54 = vpack.c.bf16 %v672_v48, %v671_v46  ;;  %v3003_v55 = vpack.c.bf16 %v658_v50, %v657_v49  ;;  %v730_v46 = vld [vmem:[%s3491_s30 + $0xd18] sm:$0xff]  ;;  %v716_v48 = vld [vmem:[%s3491_s30 + $0xca8] sm:$0xff]  ;;  %v747_v49 = vld [vmem:[%s3491_s30 + $0xda0] sm:$0xff] }
  0xe9   : > { %3016 = vmatprep.subr.bf16.mxu1 %v3015_v59  ;;  %v3035_v59 = vpack.c.bf16 %v690_v52, %v689_v51  ;;  %v748_v50 = vld [vmem:[%s3491_s30 + $0xda8] sm:$0xff]  ;;  %v304_v51 = vld [vmem:[%s3515_s11 + $0xc8] sm:$0xff] }
  0xea   : > { %1448 = vmatmul.mubr.f32.vlgmr.msra.gmra.mrb[8].mxu0 %v295_v1  ;;  %v3005_v1 = vpack.c.bf16 %v642_v57, %v641_v56  ;;  %v699_v56 = vld [vmem:[%s3491_s30 + $0xc20] sm:$0xff]  ;;  %v700_v57 = vld [vmem:[%s3491_s30 + $0xc28] sm:$0xff] }
  0xeb   : > { %2986 = vmatpush3.bf16.msra.mxu0 %v2985_v2  ;;  %1518 = vmatmul.mubr.f32.vlgmr.msra.gmra.mrb[8].mxu1 %v297_v3  ;;  %v3037_v2 = vpack.c.bf16 %v674_v60, %v673_v58  ;;  %v3007_v3 = vpack.c.bf16 %v660_v62, %v659_v61  ;;  %v731_v58 = vld [vmem:[%s3491_s30 + $0xd20] sm:$0xff]  ;;  %v732_v60 = vld [vmem:[%s3491_s30 + $0xd28] sm:$0xff]  ;;  %v717_v61 = vld [vmem:[%s3491_s30 + $0xcb0] sm:$0xff] }
  0xec   : > { %3018 = vmatpush3.bf16.msra.mxu1 %v3017_v4  ;;  %2988 = vmatprep.subr.bf16.mxu0 %v2987_v5  ;;  %v643_v4 = vld [vmem:[%s3491_s30 + $0xa60] sm:$0xff]  ;;  %v644_v5 = vld [vmem:[%s3491_s30 + $0xa68] sm:$0xff]  ;;  %v718_v62 = vld [vmem:[%s3491_s30 + $0xcb8] sm:$0xff] }
  0xed   : > { %3020 = vmatprep.subr.bf16.mxu1 %v3019_v9  ;;  %1587 = vmatprep.mubr.f32.mxu0 %v300_v15  ;;  %v661_v9 = vld [vmem:[%s3491_s30 + $0xaf0] sm:$0xff]  ;;  %v3009_v13 = vpack.c.bf16 %v644_v5, %v643_v4  ;;  %v702_v5 = vld [vmem:[%s3491_s30 + $0xc38] sm:$0xff] }
  0xee   : > { %1657 = vmatprep.mubr.f32.mxu1 %v302_v17  ;;  %v3011_v15 = vpack.c.bf16 %v662_v10, %v661_v9  ;;  %v646_v17 = vld [vmem:[%s3491_s30 + $0xa78] sm:$0xff]  ;;  %v701_v4 = vld [vmem:[%s3491_s30 + $0xc30] sm:$0xff]  ;;  %v719_v9 = vld [vmem:[%s3491_s30 + $0xcc0] sm:$0xff] }
  0xef   : > { %2990 = vmatpush3.bf16.msra.mxu0 %v2989_v16  ;;  %v645_v16 = vld [vmem:[%s3491_s30 + $0xa70] sm:$0xff]  ;;  %v720_v10 = vld [vmem:[%s3491_s30 + $0xcc8] sm:$0xff] }
  0xf0   : > { %3022 = vmatpush3.bf16.msra.mxu1 %v3021_v18  ;;  %2992 = vmatprep.subr.bf16.mxu0 %v2991_v19  ;;  %v677_v18 = vld [vmem:[%s3491_s30 + $0xb70] sm:$0xff]  ;;  %v3043_v19 = vpack.c.bf16 %v694_v12, %v693_v11  ;;  %v3013_v25 = vpack.c.bf16 %v646_v17, %v645_v16  ;;  %v751_v11 = vld [vmem:[%s3491_s30 + $0xdc0] sm:$0xff]  ;;  %v752_v12 = vld [vmem:[%s3491_s30 + $0xdc8] sm:$0xff] }
  0xf1   : > { %3024 = vmatprep.subr.bf16.mxu1 %v3023_v23  ;;  %v743_v23 = vld [vmem:[%s3491_s30 + $0xd80] sm:$0xff]  ;;  %v3045_v26 = vpack.c.bf16 %v678_v20, %v677_v18  ;;  %v704_v17 = vld [vmem:[%s3491_s30 + $0xc48] sm:$0xff] }
  0xf2   : > { %v703_v16 = vld [vmem:[%s3491_s30 + $0xc40] sm:$0xff]  ;;  %v736_v20 = vld [vmem:[%s3491_s30 + $0xd48] sm:$0xff] }
  0xf3   : > { %2994 = vmatpush3.bf16.msra.mxu0 %v2993_v29  ;;  %v696_v29 = vld [vmem:[%s3491_s30 + $0xc08] sm:$0xff]  ;;  %v735_v18 = vld [vmem:[%s3491_s30 + $0xd40] sm:$0xff] }
  0xf4   : > { %3026 = vmatpush3.bf16.msra.mxu1 %v3025_v30  ;;  %2996 = vmatprep.subr.bf16.mxu0 %v2995_v31  ;;  %v727_v30 = vld [vmem:[%s3491_s30 + $0xd00] sm:$0xff]  ;;  %v3079_v31 = vpack.c.bf16 %v744_v24, %v743_v23  ;;  %v3049_v38 = vpack.c.bf16 %v696_v29, %v695_v28  ;;  %v753_v23 = vld [vmem:[%s3491_s30 + $0xdd0] sm:$0xff]  ;;  %v754_v24 = vld [vmem:[%s3491_s30 + $0xdd8] sm:$0xff] }
  0xf5   : > { %3028 = vmatprep.subr.bf16.mxu1 %v3027_v35  ;;  %v745_v35 = vld [vmem:[%s3491_s30 + $0xd90] sm:$0xff]  ;;  %v3081_v40 = vpack.c.bf16 %v728_v32, %v727_v30  ;;  %v706_v29 = vld [vmem:[%s3491_s30 + $0xc58] sm:$0xff] }
  0xf6   : > { %v3083_v45 = vpack.c.bf16 %v746_v36, %v745_v35  ;;  %v705_v28 = vld [vmem:[%s3491_s30 + $0xc50] sm:$0xff]  ;;  %v738_v32 = vld [vmem:[%s3491_s30 + $0xd58] sm:$0xff]  ;;  %v755_v35 = vld [vmem:[%s3491_s30 + $0xde0] sm:$0xff] }
  0xf7   : > { %2998 = vmatpush3.bf16.msra.mxu0 %v2997_v41  ;;  %v3051_v41 = vpack.c.bf16 %v714_v34, %v713_v33  ;;  %v737_v30 = vld [vmem:[%s3491_s30 + $0xd50] sm:$0xff]  ;;  %v723_v33 = vld [vmem:[%s3491_s30 + $0xce0] sm:$0xff]  ;;  %v724_v34 = vld [vmem:[%s3491_s30 + $0xce8] sm:$0xff] }
  0xf8   : > { %3030 = vmatpush3.bf16.msra.mxu1 %v3029_v42  ;;  %3000 = vmatprep.subr.bf16.mxu0 %v2999_v43  ;;  %v697_v42 = vld [vmem:[%s3491_s30 + $0xc10] sm:$0xff]  ;;  %v698_v43 = vld [vmem:[%s3491_s30 + $0xc18] sm:$0xff]  ;;  %v756_v36 = vld [vmem:[%s3491_s30 + $0xde8] sm:$0xff] }
  0xf9   : > { %3032 = vmatprep.subr.bf16.mxu1 %v3031_v47  ;;  %v715_v47 = vld [vmem:[%s3491_s30 + $0xca0] sm:$0xff]  ;;  %v3053_v52 = vpack.c.bf16 %v698_v43, %v697_v42  ;;  %v3103_v43 = vpack.c.bf16 %v756_v36, %v755_v35  ;;  %v813_v35 = vld [vmem:[%s3491_s30 + $0xfb0] sm:$0xff]  ;;  %v814_v36 = vld [vmem:[%s3491_s30 + $0xfb8] sm:$0xff] }
  0xfa   : > { %v739_v42 = vld [vmem:[%s3491_s30 + $0xd60] sm:$0xff] }
  0xfb   : > { %3002 = vmatpush3.bf16.msra.mxu0 %v3001_v53  ;;  %v306_v53 = vld [vmem:[%s3515_s11 + $0xd8] sm:$0xff] }
  0xfc   : > { %3034 = vmatpush3.bf16.msra.mxu1 %v3033_v54  ;;  %3004 = vmatprep.subr.bf16.mxu0 %v3003_v55  ;;  %v3085_v54 = vpack.c.bf16 %v730_v46, %v729_v44  ;;  %v3055_v55 = vpack.c.bf16 %v716_v48, %v715_v47  ;;  %v740_v44 = vld [vmem:[%s3491_s30 + $0xd68] sm:$0xff]  ;;  %v726_v46 = vld [vmem:[%s3491_s30 + $0xcf8] sm:$0xff]  ;;  %v757_v47 = vld [vmem:[%s3491_s30 + $0xdf0] sm:$0xff] }
  0xfd   : > { %3036 = vmatprep.subr.bf16.mxu1 %v3035_v59  ;;  %v3087_v59 = vpack.c.bf16 %v748_v50, %v747_v49  ;;  %v758_v48 = vld [vmem:[%s3491_s30 + $0xdf8] sm:$0xff]  ;;  %v3105_v50 = vpack.c.bf16 %v740_v44, %v739_v42  ;;  %v797_v42 = vld [vmem:[%s3491_s30 + $0xf30] sm:$0xff] }
  0xfe   : > { %v798_v44 = vld [vmem:[%s3491_s30 + $0xf38] sm:$0xff] }
  0xff   : > { %3006 = vmatpush3.bf16.msra.mxu0 %v3005_v1  ;;  %v3057_v1 = vpack.c.bf16 %v700_v57, %v699_v56  ;;  %v742_v56 = vld [vmem:[%s3491_s30 + $0xd78] sm:$0xff]  ;;  %v775_v57 = vld [vmem:[%s3491_s30 + $0xe80] sm:$0xff] }
 0x100   : > { %3038 = vmatpush3.bf16.msra.mxu1 %v3037_v2  ;;  %3008 = vmatprep.subr.bf16.mxu0 %v3007_v3  ;;  %v3089_v2 = vpack.c.bf16 %v732_v60, %v731_v58  ;;  %v3059_v3 = vpack.c.bf16 %v718_v62, %v717_v61  ;;  %v776_v58 = vld [vmem:[%s3491_s30 + $0xe88] sm:$0xff] }
 0x101   : > { %3040 = vmatprep.subr.bf16.mxu1 %v3039_v7  ;;  %v3091_v7 = vpack.c.bf16 %v750_v0, %v749_v63  ;;  %v808_v60 = vld [vmem:[%s3491_s30 + $0xf88] sm:$0xff]  ;;  %v3111_v63 = vpack.c.bf16 %v776_v58, %v775_v57  ;;  %v759_v0 = vld [vmem:[%s3491_s30 + $0xe00] sm:$0xff]  ;;  %v785_v57 = vld [vmem:[%s3491_s30 + $0xed0] sm:$0xff] }
 0x102   : > { %v786_v58 = vld [vmem:[%s3491_s30 + $0xed8] sm:$0xff] }
 0x103   : > { %3010 = vmatpush3.bf16.msra.mxu0 %v3009_v13  ;;  %v3061_v13 = vpack.c.bf16 %v702_v5, %v701_v4  ;;  %v792_v4 = vld [vmem:[%s3491_s30 + $0xf08] sm:$0xff]  ;;  %v777_v5 = vld [vmem:[%s3491_s30 + $0xe90] sm:$0xff] }
 0x104   : > { %3042 = vmatpush3.bf16.msra.mxu1 %v3041_v14  ;;  %3012 = vmatprep.subr.bf16.mxu0 %v3011_v15  ;;  %v3093_v14 = vpack.c.bf16 %v734_v8, %v733_v6  ;;  %v3063_v15 = vpack.c.bf16 %v720_v10, %v719_v9  ;;  %v778_v6 = vld [vmem:[%s3491_s30 + $0xe98] sm:$0xff] }
 0x105   : > { %3044 = vmatprep.subr.bf16.mxu1 %v3043_v19  ;;  %v3095_v19 = vpack.c.bf16 %v752_v12, %v751_v11  ;;  %v810_v8 = vld [vmem:[%s3491_s30 + $0xf98] sm:$0xff]  ;;  %v305_v11 = vld [vmem:[%s3515_s11 + $0xd0] sm:$0xff] }
 0x106   : > { %v303_v9 = vld [vmem:[%s3515_s11 + $0xc0] sm:$0xff] }
 0x107   : > { %3014 = vmatpush3.bf16.msra.mxu0 %v3013_v25  ;;  %v3065_v25 = vpack.c.bf16 %v704_v17, %v703_v16  ;;  %v793_v16 = vld [vmem:[%s3491_s30 + $0xf10] sm:$0xff] }
 0x108   : > { %3046 = vmatpush3.bf16.msra.mxu1 %v3045_v26  ;;  %3048 = vmatprep.subr.bf16.mxu0 %v3047_v27  ;;  %v3097_v26 = vpack.c.bf16 %v736_v20, %v735_v18  ;;  %v3067_v27 = vpack.c.bf16 %v722_v22, %v721_v21  ;;  %v794_v18 = vld [vmem:[%s3491_s30 + $0xf18] sm:$0xff]  ;;  %v780_v20 = vld [vmem:[%s3491_s30 + $0xea8] sm:$0xff]  ;;  %v811_v21 = vld [vmem:[%s3491_s30 + $0xfa0] sm:$0xff] }
 0x109   : > { %3080 = vmatprep.subr.bf16.mxu1 %v3079_v31  ;;  %v3099_v31 = vpack.c.bf16 %v754_v24, %v753_v23  ;;  %v812_v22 = vld [vmem:[%s3491_s30 + $0xfa8] sm:$0xff]  ;;  %v308_v23 = vld [vmem:[%s3515_s11 + $0xe8] sm:$0xff] }
 0x10a   : > { %1588 = vmatmul.mubr.f32.vlgmr.msra.gmra.mrb[10].mxu0 %v299_v37  ;;  %v3069_v37 = vpack.c.bf16 %v706_v29, %v705_v28  ;;  %v763_v28 = vld [vmem:[%s3491_s30 + $0xe20] sm:$0xff]  ;;  %v764_v29 = vld [vmem:[%s3491_s30 + $0xe28] sm:$0xff] }
 0x10b   : > { %3050 = vmatpush3.bf16.msra.mxu0 %v3049_v38  ;;  %1658 = vmatmul.mubr.f32.vlgmr.msra.gmra.mrb[10].mxu1 %v301_v39  ;;  %v3101_v38 = vpack.c.bf16 %v738_v32, %v737_v30  ;;  %v3071_v39 = vpack.c.bf16 %v724_v34, %v723_v33  ;;  %v795_v30 = vld [vmem:[%s3491_s30 + $0xf20] sm:$0xff]  ;;  %v796_v32 = vld [vmem:[%s3491_s30 + $0xf28] sm:$0xff]  ;;  %v781_v33 = vld [vmem:[%s3491_s30 + $0xeb0] sm:$0xff] }
 0x10c   : > { %3082 = vmatpush3.bf16.msra.mxu1 %v3081_v40  ;;  %3052 = vmatprep.subr.bf16.mxu0 %v3051_v41  ;;  %v707_v40 = vld [vmem:[%s3491_s30 + $0xc60] sm:$0xff]  ;;  %v708_v41 = vld [vmem:[%s3491_s30 + $0xc68] sm:$0xff]  ;;  %v782_v34 = vld [vmem:[%s3491_s30 + $0xeb8] sm:$0xff] }
 0x10d   : > { %3084 = vmatprep.subr.bf16.mxu1 %v3083_v45  ;;  %1727 = vmatprep.mubr.f32.mxu0 %v304_v51  ;;  %v725_v45 = vld [vmem:[%s3491_s30 + $0xcf0] sm:$0xff]  ;;  %v3073_v49 = vpack.c.bf16 %v708_v41, %v707_v40  ;;  %v766_v41 = vld [vmem:[%s3491_s30 + $0xe38] sm:$0xff] }
 0x10e   : > { %1797 = vmatprep.mubr.f32.mxu1 %v306_v53  ;;  %v3075_v51 = vpack.c.bf16 %v726_v46, %v725_v45  ;;  %v710_v53 = vld [vmem:[%s3491_s30 + $0xc78] sm:$0xff]  ;;  %v765_v40 = vld [vmem:[%s3491_s30 + $0xe30] sm:$0xff]  ;;  %v783_v45 = vld [vmem:[%s3491_s30 + $0xec0] sm:$0xff] }
 0x10f   : > { %3054 = vmatpush3.bf16.msra.mxu0 %v3053_v52  ;;  %v709_v52 = vld [vmem:[%s3491_s30 + $0xc70] sm:$0xff]  ;;  %v784_v46 = vld [vmem:[%s3491_s30 + $0xec8] sm:$0xff] }
 0x110   : > { %3086 = vmatpush3.bf16.msra.mxu1 %v3085_v54  ;;  %3056 = vmatprep.subr.bf16.mxu0 %v3055_v55  ;;  %v741_v54 = vld [vmem:[%s3491_s30 + $0xd70] sm:$0xff]  ;;  %v3107_v55 = vpack.c.bf16 %v758_v48, %v757_v47  ;;  %v3077_v61 = vpack.c.bf16 %v710_v53, %v709_v52  ;;  %v815_v47 = vld [vmem:[%s3491_s30 + $0xfc0] sm:$0xff]  ;;  %v816_v48 = vld [vmem:[%s3491_s30 + $0xfc8] sm:$0xff] }
 0x111   : > { %3088 = vmatprep.subr.bf16.mxu1 %v3087_v59  ;;  %v807_v59 = vld [vmem:[%s3491_s30 + $0xf80] sm:$0xff]  ;;  %v3109_v62 = vpack.c.bf16 %v742_v56, %v741_v54  ;;  %v768_v53 = vld [vmem:[%s3491_s30 + $0xe48] sm:$0xff] }
 0x112   : > { %v767_v52 = vld [vmem:[%s3491_s30 + $0xe40] sm:$0xff]  ;;  %v800_v56 = vld [vmem:[%s3491_s30 + $0xf48] sm:$0xff] }
 0x113   : > { %3058 = vmatpush3.bf16.msra.mxu0 %v3057_v1  ;;  %v760_v1 = vld [vmem:[%s3491_s30 + $0xe08] sm:$0xff]  ;;  %v799_v54 = vld [vmem:[%s3491_s30 + $0xf40] sm:$0xff] }
 0x114   : > { %3090 = vmatpush3.bf16.msra.mxu1 %v3089_v2  ;;  %3060 = vmatprep.subr.bf16.mxu0 %v3059_v3  ;;  %v791_v2 = vld [vmem:[%s3491_s30 + $0xf00] sm:$0xff]  ;;  %v3143_v3 = vpack.c.bf16 %v808_v60, %v807_v59  ;;  %v3113_v10 = vpack.c.bf16 %v760_v1, %v759_v0  ;;  %v817_v59 = vld [vmem:[%s3491_s30 + $0xfd0] sm:$0xff]  ;;  %v818_v60 = vld [vmem:[%s3491_s30 + $0xfd8] sm:$0xff] }
 0x115   : > { %3092 = vmatprep.subr.bf16.mxu1 %v3091_v7  ;;  %v809_v7 = vld [vmem:[%s3491_s30 + $0xf90] sm:$0xff]  ;;  %v3145_v12 = vpack.c.bf16 %v792_v4, %v791_v2  ;;  %v770_v1 = vld [vmem:[%s3491_s30 + $0xe58] sm:$0xff] }
 0x116   : > { %v3147_v17 = vpack.c.bf16 %v810_v8, %v809_v7  ;;  %v769_v0 = vld [vmem:[%s3491_s30 + $0xe50] sm:$0xff]  ;;  %v802_v4 = vld [vmem:[%s3491_s30 + $0xf58] sm:$0xff]  ;;  %v819_v7 = vld [vmem:[%s3491_s30 + $0xfe0] sm:$0xff] }
 0x117   : > { %3062 = vmatpush3.bf16.msra.mxu0 %v3061_v13  ;;  %v3115_v13 = vpack.c.bf16 %v778_v6, %v777_v5  ;;  %v801_v2 = vld [vmem:[%s3491_s30 + $0xf50] sm:$0xff]  ;;  %v787_v5 = vld [vmem:[%s3491_s30 + $0xee0] sm:$0xff]  ;;  %v788_v6 = vld [vmem:[%s3491_s30 + $0xee8] sm:$0xff] }
 0x118   : > { %3094 = vmatpush3.bf16.msra.mxu1 %v3093_v14  ;;  %3064 = vmatprep.subr.bf16.mxu0 %v3063_v15  ;;  %v761_v14 = vld [vmem:[%s3491_s30 + $0xe10] sm:$0xff]  ;;  %v762_v15 = vld [vmem:[%s3491_s30 + $0xe18] sm:$0xff]  ;;  %v820_v8 = vld [vmem:[%s3491_s30 + $0xfe8] sm:$0xff] }
 0x119   : > { %3096 = vmatprep.subr.bf16.mxu1 %v3095_v19  ;;  %v779_v19 = vld [vmem:[%s3491_s30 + $0xea0] sm:$0xff]  ;;  %v3117_v24 = vpack.c.bf16 %v762_v15, %v761_v14 }
 0x11a   : > { %v803_v14 = vld [vmem:[%s3491_s30 + $0xf60] sm:$0xff] }
 0x11b   : > { %3066 = vmatpush3.bf16.msra.mxu0 %v3065_v25  ;;  %v310_v25 = vld [vmem:[%s3515_s11 + $0xf8] sm:$0xff] }
 0x11c   : > { %3098 = vmatpush3.bf16.msra.mxu1 %v3097_v26  ;;  %3068 = vmatprep.subr.bf16.mxu0 %v3067_v27  ;;  %v3149_v26 = vpack.c.bf16 %v794_v18, %v793_v16  ;;  %v3119_v27 = vpack.c.bf16 %v780_v20, %v779_v19  ;;  %v3167_v16 = vpack.c.bf16 %v820_v8, %v819_v7  ;;  %v789_v18 = vld [vmem:[%s3491_s30 + $0xef0] sm:$0xff]  ;;  %v790_v19 = vld [vmem:[%s3491_s30 + $0xef8] sm:$0xff] }
 0x11d   : > { %3100 = vmatprep.subr.bf16.mxu1 %v3099_v31  ;;  %v3151_v31 = vpack.c.bf16 %v812_v22, %v811_v21  ;;  %v821_v22 = vld [vmem:[%s3491_s30 + $0xff0] sm:$0xff] }
 0x11f   : > { %3070 = vmatpush3.bf16.msra.mxu0 %v3069_v37  ;;  %v3121_v37 = vpack.c.bf16 %v764_v29, %v763_v28  ;;  %v3139_v29 = vpack.c.bf16 %v790_v19, %v789_v18 }
 0x120   : > { %3102 = vmatpush3.bf16.msra.mxu1 %v3101_v38  ;;  %3072 = vmatprep.subr.bf16.mxu0 %v3071_v39  ;;  %v3153_v38 = vpack.c.bf16 %v796_v32, %v795_v30  ;;  %v3123_v39 = vpack.c.bf16 %v782_v34, %v781_v33  ;;  %v773_v30 = vld [vmem:[%s3491_s30 + $0xe70] sm:$0xff]  ;;  %v806_v34 = vld [vmem:[%s3491_s30 + $0xf78] sm:$0xff] }
 0x121   : > { %3104 = vmatprep.subr.bf16.mxu1 %v3103_v43  ;;  %v3155_v43 = vpack.c.bf16 %v814_v36, %v813_v35  ;;  %v805_v33 = vld [vmem:[%s3491_s30 + $0xf70] sm:$0xff] }
 0x123   : > { %3074 = vmatpush3.bf16.msra.mxu0 %v3073_v49  ;;  %v3125_v49 = vpack.c.bf16 %v766_v41, %v765_v40 }
 0x124   : > { %3106 = vmatpush3.bf16.msra.mxu1 %v3105_v50  ;;  %3076 = vmatprep.subr.bf16.mxu0 %v3075_v51  ;;  %v3157_v50 = vpack.c.bf16 %v798_v44, %v797_v42  ;;  %v3127_v51 = vpack.c.bf16 %v784_v46, %v783_v45 }
 0x125   : > { %3108 = vmatprep.subr.bf16.mxu1 %v3107_v55  ;;  %v3159_v55 = vpack.c.bf16 %v816_v48, %v815_v47 }
 0x127   : > { %3078 = vmatpush3.bf16.msra.mxu0 %v3077_v61  ;;  %v3129_v61 = vpack.c.bf16 %v768_v53, %v767_v52 }
 0x128   : > { %3110 = vmatpush3.bf16.msra.mxu1 %v3109_v62  ;;  %3112 = vmatprep.subr.bf16.mxu0 %v3111_v63  ;;  %v3161_v62 = vpack.c.bf16 %v800_v56, %v799_v54  ;;  %v3131_v63 = vpack.c.bf16 %v786_v58, %v785_v57 }
 0x129   : > { %3144 = vmatprep.subr.bf16.mxu1 %v3143_v3  ;;  %v3163_v3 = vpack.c.bf16 %v818_v60, %v817_v59 }
 0x12a   : > { %1728 = vmatmul.mubr.f32.vlgmr.msra.gmra.mrb[12].mxu0 %v303_v9  ;;  %v3133_v9 = vpack.c.bf16 %v770_v1, %v769_v0 }
 0x12b   : > { %3114 = vmatpush3.bf16.msra.mxu0 %v3113_v10  ;;  %1798 = vmatmul.mubr.f32.vlgmr.msra.gmra.mrb[12].mxu1 %v305_v11  ;;  %v3165_v10 = vpack.c.bf16 %v802_v4, %v801_v2  ;;  %v3135_v11 = vpack.c.bf16 %v788_v6, %v787_v5 }
 0x12c   : > { %3146 = vmatpush3.bf16.msra.mxu1 %v3145_v12  ;;  %3116 = vmatprep.subr.bf16.mxu0 %v3115_v13  ;;  %v771_v12 = vld [vmem:[%s3491_s30 + $0xe60] sm:$0xff]  ;;  %v772_v13 = vld [vmem:[%s3491_s30 + $0xe68] sm:$0xff] }
 0x12d   : > { %3148 = vmatprep.subr.bf16.mxu1 %v3147_v17  ;;  %1867 = vmatprep.mubr.f32.mxu0 %v308_v23  ;;  %v804_v17 = vld [vmem:[%s3491_s30 + $0xf68] sm:$0xff]  ;;  %v822_v23 = vld [vmem:[%s3491_s30 + $0xff8] sm:$0xff] }
 0x12e   : > { %1937 = vmatprep.mubr.f32.mxu1 %v310_v25  ;;  %v3169_v28 = vpack.c.bf16 %v804_v17, %v803_v14  ;;  %v3171_v32 = vpack.c.bf16 %v822_v23, %v821_v22 }
 0x12f   : > { %3118 = vmatpush3.bf16.msra.mxu0 %v3117_v24 }
 0x130   : > { %3150 = vmatpush3.bf16.msra.mxu1 %v3149_v26  ;;  %3120 = vmatprep.subr.bf16.mxu0 %v3119_v27  ;;  %v3137_v26 = vpack.c.bf16 %v772_v13, %v771_v12 }
 0x131   : > { %3152 = vmatprep.subr.bf16.mxu1 %v3151_v31  ;;  %v774_v31 = vld [vmem:[%s3491_s30 + $0xe78] sm:$0xff] }
 0x132   : > { %v3141_v36 = vpack.c.bf16 %v774_v31, %v773_v30  ;;  %v278_v31 = vld [vmem:[#allocation2] sm:$0xff] }
 0x133   : > { %3122 = vmatpush3.bf16.msra.mxu0 %v3121_v37  ;;  %v3173_v37 = vpack.c.bf16 %v806_v34, %v805_v33 }
 0x134   : > { %3154 = vmatpush3.bf16.msra.mxu1 %v3153_v38  ;;  %3124 = vmatprep.subr.bf16.mxu0 %v3123_v39  ;;  %v307_v38 = vld [vmem:[%s3515_s11 + $0xe0] sm:$0xff]  ;;  %v309_v39 = vld [vmem:[%s3515_s11 + $0xf0] sm:$0xff] }
 0x135   : > { %3156 = vmatprep.subr.bf16.mxu1 %v3155_v43 }
 0x137   : > { %3126 = vmatpush3.bf16.msra.mxu0 %v3125_v49 }
 0x138   : > { %3158 = vmatpush3.bf16.msra.mxu1 %v3157_v50  ;;  %3128 = vmatprep.subr.bf16.mxu0 %v3127_v51 }
 0x139   : > { %3160 = vmatprep.subr.bf16.mxu1 %v3159_v55 }
 0x13b   : > { %3130 = vmatpush3.bf16.msra.mxu0 %v3129_v61 }
 0x13c   : > { %3162 = vmatpush3.bf16.msra.mxu1 %v3161_v62  ;;  %3132 = vmatprep.subr.bf16.mxu0 %v3131_v63 }
 0x13d   : > { %v2135_v15 = vpop.f32.mrb[0].mxu0  ;;  %3164 = vmatprep.subr.bf16.mxu1 %v3163_v3 }
 0x13e   : > { %v2170_v20 = vpop.f32.mrb[0].mxu1  ;;  %v2136_v21 = vpop.f32.mrb[1].mxu0 }
 0x13f   : > { %v2137_v24 = vadd.f32 %v2136_v21, %v2135_v15  ;;  %v2171_v25 = vpop.f32.mrb[1].mxu1  ;;  %3134 = vmatpush3.bf16.msra.mxu0 %v3133_v9 }
 0x140   : > { %v2172_v27 = vadd.f32 %v2171_v25, %v2170_v20  ;;  %3166 = vmatpush3.bf16.msra.mxu1 %v3165_v10  ;;  %3136 = vmatprep.subr.bf16.mxu0 %v3135_v11 }
 0x141   : > { %3168 = vmatprep.subr.bf16.mxu1 %v3167_v16 }
 0x142   : > { %v960_v35 = vadd.f32 %v2172_v27, %v2137_v24 }
 0x143   : > { %3138 = vmatpush3.bf16.msra.mxu0 %v3137_v26 }
 0x144   : > { %3170 = vmatpush3.bf16.msra.mxu1 %v3169_v28  ;;  %3140 = vmatprep.subr.bf16.mxu0 %v3139_v29 }
 0x145   : > { %3172 = vmatprep.subr.bf16.mxu1 %v3171_v32 }
 0x147   : > { %3142 = vmatpush3.bf16.msra.mxu0 %v3141_v36 }
 0x148   : > { %3174 = vmatpush3.bf16.msra.mxu1 %v3173_v37 }
 0x14a   : > { %1868 = vmatmul.mubr.f32.vlgmr.msra.gmra.mrb[14].mxu0 %v307_v38 }
 0x14b   : > { %1938 = vmatmul.mubr.f32.vlgmr.msra.gmra.mrb[14].mxu1 %v309_v39 }
 0x15d   : > { %v2205_v40 = vpop.f32.mrb[2].mxu0 }
 0x15e   : > { %v2206_v41 = vpop.f32.mrb[3].mxu0  ;;  %v2240_v42 = vpop.f32.mrb[2].mxu1 }
 0x15f   : > { %v2207_v43 = vadd.f32 %v2206_v41, %v2205_v40  ;;  %v2241_v44 = vpop.f32.mrb[3].mxu1 }
 0x160   : > { %v2242_v45 = vadd.f32 %v2241_v44, %v2240_v42 }
 0x161   : > { %v1030_v46 = vadd.f32 %v2207_v43, %v960_v35  ;;  %v2099_v35 = vld [vmem:[%s264_s23] ss:$0 sm:$0xff] (!%p2098_p6) }
 0x163   : > { %v1100_v47 = vadd.f32 %v2242_v45, %v1030_v46 }
 0x17d   : > { %v2275_v48 = vpop.f32.mrb[4].mxu0 }
 0x17e   : > { %v2276_v49 = vpop.f32.mrb[5].mxu0  ;;  %v2310_v50 = vpop.f32.mrb[4].mxu1 }
 0x17f   : > { %v2277_v51 = vadd.f32 %v2276_v49, %v2275_v48  ;;  %v2311_v52 = vpop.f32.mrb[5].mxu1 }
 0x180   : > { %v2312_v53 = vadd.f32 %v2311_v52, %v2310_v50 }
 0x181   : > { %v1170_v54 = vadd.f32 %v2277_v51, %v1100_v47 }
 0x183   : > { %v1240_v55 = vadd.f32 %v2312_v53, %v1170_v54 }
 0x19d   : > { %v2345_v56 = vpop.f32.mrb[6].mxu0 }
 0x19e   : > { %v2346_v57 = vpop.f32.mrb[7].mxu0  ;;  %v2380_v58 = vpop.f32.mrb[6].mxu1 }
 0x19f   : > { %v2347_v59 = vadd.f32 %v2346_v57, %v2345_v56  ;;  %v2381_v60 = vpop.f32.mrb[7].mxu1 }
 0x1a0   : > { %v2382_v61 = vadd.f32 %v2381_v60, %v2380_v58 }
 0x1a1   : > { %v1310_v62 = vadd.f32 %v2347_v59, %v1240_v55 }
 0x1a3   : > { %v1380_v63 = vadd.f32 %v2382_v61, %v1310_v62 }
 0x1bd   : > { %v2415_v0 = vpop.f32.mrb[8].mxu0 }
 0x1be   : > { %v2416_v1 = vpop.f32.mrb[9].mxu0  ;;  %v2450_v2 = vpop.f32.mrb[8].mxu1 }
 0x1bf   : > { %v2417_v3 = vadd.f32 %v2416_v1, %v2415_v0  ;;  %v2451_v4 = vpop.f32.mrb[9].mxu1 }
 0x1c0   : > { %v2452_v5 = vadd.f32 %v2451_v4, %v2450_v2 }
 0x1c1   : > { %v1450_v6 = vadd.f32 %v2417_v3, %v1380_v63 }
 0x1c3   : > { %v1520_v7 = vadd.f32 %v2452_v5, %v1450_v6 }
 0x1dd   : > { %v2485_v8 = vpop.f32.mrb[10].mxu0 }
 0x1de   : > { %v2486_v9 = vpop.f32.mrb[11].mxu0  ;;  %v2520_v10 = vpop.f32.mrb[10].mxu1 }
 0x1df   : > { %v2487_v11 = vadd.f32 %v2486_v9, %v2485_v8  ;;  %v2521_v12 = vpop.f32.mrb[11].mxu1 }
 0x1e0   : > { %v2522_v13 = vadd.f32 %v2521_v12, %v2520_v10 }
 0x1e1   : > { %v1590_v14 = vadd.f32 %v2487_v11, %v1520_v7 }
 0x1e3   : > { %v1660_v15 = vadd.f32 %v2522_v13, %v1590_v14 }
 0x1fd   : > { %v2555_v16 = vpop.f32.mrb[12].mxu0 }
 0x1fe   : > { %v2556_v17 = vpop.f32.mrb[13].mxu0  ;;  %v2590_v18 = vpop.f32.mrb[12].mxu1 }
 0x1ff   : > { %v2557_v19 = vadd.f32 %v2556_v17, %v2555_v16  ;;  %v2591_v20 = vpop.f32.mrb[13].mxu1 }
 0x200   : > { %v2592_v21 = vadd.f32 %v2591_v20, %v2590_v18 }
 0x201   : > { %v1730_v22 = vadd.f32 %v2557_v19, %v1660_v15 }
 0x203   : > { %v1800_v23 = vadd.f32 %v2592_v21, %v1730_v22 }
 0x21d   : > { %v2625_v24 = vpop.f32.mrb[14].mxu0 }
 0x21e   : > { %v2626_v25 = vpop.f32.mrb[15].mxu0  ;;  %v2660_v26 = vpop.f32.mrb[14].mxu1 }
 0x21f   : > { %v2627_v27 = vadd.f32 %v2626_v25, %v2625_v24  ;;  %v2661_v28 = vpop.f32.mrb[15].mxu1 }
 0x220   : > { %v2662_v29 = vadd.f32 %v2661_v28, %v2660_v26 }
 0x221   : > { %v1870_v30 = vadd.f32 %v2627_v27, %v1800_v23  ;;  %1948 = sbr.rel (%p2098_p6) target bundleno = 564 (0x234), region = 44 }
 0x223   : > { %v1940_v32 = vadd.f32 %v2662_v29, %v1870_v30 }
 0x225   : > { %v1943_v33 = vadd.f32 %v1940_v32, %v278_v31 }
 0x227   : > { %1944 = vst [vmem:[#allocation2] sm:$0xff] %v1943_v33 }
 0x22e   : > { %v1949_v34 = vld [vmem:[#allocation2] sm:$0xff] }
 0x22f   : > { %v1957_v36 = vadd.f32 %v2099_v35, %v1949_v34 }
 0x231   : > { %v1958_v37 = vmax.f32 %v1957_v36, 0.0 }
 0x233   : > { %1959 = vst [vmem:[%s3510_s7] sm:$0xff] %v1958_v37 }
 0x234 PF: > { %s16_s19 = sadd.s32 1, %s3346_s19   ;;  %s4101_s12 = smov %s3322_s13 }
 0x235   : > { %p13_p8 = scmp.ge.s32.totalorder %s16_s19, 16   ;;  %s4102_s13 = smov %s3326_s14 }
 0x236   : > { %s4103_s14 = smov %s3440_s5  ;;  %s4104_s15 = smov %s3338_s17 }
 0x237   : > { %s4105_s16 = smov %s3342_s18  ;;  %s4106_s17 = smov %s4109_s21 }
 0x238   : > { %s4107_s18 = smov %s4113_s22  ;;  %15 = sbr.rel (!%p13_p8) target bundleno = 5 (0x5), region = 86 }
 0x23f   :  { %1987 = vsyncpa [#allocation4], 1 }
 0x240   :  { %1989 = vsyncpa [#allocation4 + $0x1], 1 }

// kernel: siamese_forward.11
= control target key start
LH: loop header
LB: loop body
LE: loop exit
PB: predicated region body
PF: predicated region fallthrough
CT: control target
= control target key end

     0   :  { %s326_s1 = inlined_call_operand.vmem [shape: f32[256,128], index: 1, kind: input, shape index: {}]   ;;  %s327_s0 = inlined_call_operand.vmem [shape: f32[8,256], index: 0, kind: input, shape index: {}]   ;;  %s328_s2 = inlined_call_operand.vmem [shape: f32[1,128], index: 2, kind: input, shape index: {}]   ;;  %s329_s3 = inlined_call_operand.vmem [shape: f32[8,128], index: 3, kind: output, shape index: {}]  }
   0x1   :  { %v32_v0 = vld [vmem:[%s326_s1 + $0x80] sm:$0xff]  ;;  %v33_v1 = vld [vmem:[%s326_s1 + $0x88] sm:$0xff]  ;;  %v34_v5 = vld [vmem:[%s326_s1 + $0x90] sm:$0xff] }
   0x2   :  { %v16_v2 = vld [vmem:[%s326_s1] sm:$0xff]  ;;  %v166_v3 = vpack.c.bf16 %v33_v1, %v32_v0  ;;  %v17_v4 = vld [vmem:[%s326_s1 + $0x8] sm:$0xff]  ;;  %v35_v6 = vld [vmem:[%s326_s1 + $0x98] sm:$0xff] }
   0x3   :  { %v168_v7 = vpack.c.bf16 %v17_v4, %v16_v2  ;;  %v170_v8 = vpack.c.bf16 %v35_v6, %v34_v5  ;;  %v18_v9 = vld [vmem:[%s326_s1 + $0x10] sm:$0xff]  ;;  %v19_v10 = vld [vmem:[%s326_s1 + $0x18] sm:$0xff]  ;;  %v36_v11 = vld [vmem:[%s326_s1 + $0xa0] sm:$0xff] }
   0x4   :  { %167 = vmatprep.subr.bf16.mxu0 %v166_v3  ;;  %v37_v12 = vld [vmem:[%s326_s1 + $0xa8] sm:$0xff]  ;;  %v172_v13 = vpack.c.bf16 %v19_v10, %v18_v9  ;;  %v20_v15 = vld [vmem:[%s326_s1 + $0x20] sm:$0xff]  ;;  %v38_v17 = vld [vmem:[%s326_s1 + $0xb0] sm:$0xff] }
   0x5   :  { %169 = vmatpush3.bf16.msra.mxu0 %v168_v7  ;;  %v174_v14 = vpack.c.bf16 %v37_v12, %v36_v11  ;;  %v21_v16 = vld [vmem:[%s326_s1 + $0x28] sm:$0xff]  ;;  %v39_v18 = vld [vmem:[%s326_s1 + $0xb8] sm:$0xff]  ;;  %v22_v21 = vld [vmem:[%s326_s1 + $0x30] sm:$0xff] }
   0x6   :  { %171 = vmatprep.subr.bf16.mxu0 %v170_v8  ;;  %v176_v19 = vpack.c.bf16 %v21_v16, %v20_v15  ;;  %v178_v20 = vpack.c.bf16 %v39_v18, %v38_v17  ;;  %v23_v22 = vld [vmem:[%s326_s1 + $0x38] sm:$0xff]  ;;  %v40_v23 = vld [vmem:[%s326_s1 + $0xc0] sm:$0xff]  ;;  %v41_v24 = vld [vmem:[%s326_s1 + $0xc8] sm:$0xff] }
   0x7   :  { %v15_v25 = vld [vmem:[%s327_s0 + $0x8] sm:$0xff]  ;;  %v180_v26 = vpack.c.bf16 %v23_v22, %v22_v21  ;;  %v182_v27 = vpack.c.bf16 %v41_v24, %v40_v23  ;;  %v24_v28 = vld [vmem:[%s326_s1 + $0x40] sm:$0xff]  ;;  %v42_v30 = vld [vmem:[%s326_s1 + $0xd0] sm:$0xff] }
   0x8   :  { %119 = vmatprep.mubr.f32.mxu0 %v15_v25  ;;  %v25_v29 = vld [vmem:[%s326_s1 + $0x48] sm:$0xff]  ;;  %v43_v31 = vld [vmem:[%s326_s1 + $0xd8] sm:$0xff]  ;;  %v26_v34 = vld [vmem:[%s326_s1 + $0x50] sm:$0xff] }
   0x9   :  { %173 = vmatpush3.bf16.msra.mxu0 %v172_v13  ;;  %v184_v32 = vpack.c.bf16 %v25_v29, %v24_v28  ;;  %v186_v33 = vpack.c.bf16 %v43_v31, %v42_v30  ;;  %v27_v35 = vld [vmem:[%s326_s1 + $0x58] sm:$0xff]  ;;  %v44_v36 = vld [vmem:[%s326_s1 + $0xe0] sm:$0xff]  ;;  %v45_v37 = vld [vmem:[%s326_s1 + $0xe8] sm:$0xff] }
   0xa   :  { %175 = vmatprep.subr.bf16.mxu0 %v174_v14  ;;  %v188_v38 = vpack.c.bf16 %v27_v35, %v26_v34  ;;  %v190_v39 = vpack.c.bf16 %v45_v37, %v44_v36  ;;  %v28_v40 = vld [vmem:[%s326_s1 + $0x60] sm:$0xff]  ;;  %v29_v41 = vld [vmem:[%s326_s1 + $0x68] sm:$0xff]  ;;  %v46_v42 = vld [vmem:[%s326_s1 + $0xf0] sm:$0xff] }
   0xb   :  { %v47_v43 = vld [vmem:[%s326_s1 + $0xf8] sm:$0xff]  ;;  %v192_v44 = vpack.c.bf16 %v29_v41, %v28_v40  ;;  %v30_v46 = vld [vmem:[%s326_s1 + $0x70] sm:$0xff]  ;;  %v14_v49 = vld [vmem:[%s327_s0] sm:$0xff] }
   0xc   :  { %v194_v45 = vpack.c.bf16 %v47_v43, %v46_v42  ;;  %v31_v47 = vld [vmem:[%s326_s1 + $0x78] sm:$0xff]  ;;  %v130_v51 = vld [vmem:[%s328_s2] ss:$0 sm:$0xff] }
   0xd   :  { %177 = vmatpush3.bf16.msra.mxu0 %v176_v19  ;;  %v196_v48 = vpack.c.bf16 %v31_v47, %v30_v46 }
   0xe   :  { %179 = vmatprep.subr.bf16.mxu0 %v178_v20 }
  0x11   :  { %181 = vmatpush3.bf16.msra.mxu0 %v180_v26 }
  0x12   :  { %183 = vmatprep.subr.bf16.mxu0 %v182_v27 }
  0x15   :  { %185 = vmatpush3.bf16.msra.mxu0 %v184_v32 }
  0x16   :  { %187 = vmatprep.subr.bf16.mxu0 %v186_v33 }
  0x19   :  { %189 = vmatpush3.bf16.msra.mxu0 %v188_v38 }
  0x1a   :  { %191 = vmatprep.subr.bf16.mxu0 %v190_v39 }
  0x1d   :  { %193 = vmatpush3.bf16.msra.mxu0 %v192_v44 }
  0x1e   :  { %195 = vmatprep.subr.bf16.mxu0 %v194_v45 }
  0x21   :  { %197 = vmatpush3.bf16.msra.mxu0 %v196_v48 }
  0x24   :  { %120 = vmatmul.mubr.f32.vlgmr.msra.gmra.mrb[0].mxu0 %v14_v49 }
  0xf7   :  { %v163_v50 = vpop.f32.mrb[0].mxu0 }
  0xf8   :  { %v164_v52 = vpop.f32.mrb[1].mxu0 }
  0xf9   :  { %v165_v53 = vadd.f32 %v164_v52, %v163_v50 }
  0xfb   :  { %v122_v54 = vadd.f32 %v165_v53, %v130_v51 }
  0xfd   :  { %125 = vst [vmem:[%s329_s3] sm:$0xff] %v122_v54 }

</bundles_post_ra>
